<compile_context>
chip_gen: v7x
topology: tpu7x:2x2x1
jax: 0.10.0
libtpu: 0.0.40
codegen_flags: <defaults>
</compile_context>

<pallas_src>
import jax
import jax.numpy as jnp
from jax import lax
from jax.experimental import pallas as pl
from jax.experimental.pallas import tpu as pltpu

# Small, module-consistent hyperparameters (E divisible by NUM_HEADS).
E = 128            # text_embedding_size
A = 32             # audio_embedding_size
V = 64             # video_embedding_size
NUM_HEADS = 4
DH = E // NUM_HEADS
N_COMPLAINT = 2
N_ASPECT = 5
HEAD_PAD = 128     # lane-dense padded width for the fused classifier heads
NEG = -1e30        # additive-mask constant (representable in bf16 too)

S = 8                                    # sequence length seen by each MHA call
GROUPS_PER_BLOCK = 16                    # independent batches per grid step
ROWS_PER_BLOCK = GROUPS_PER_BLOCK * S    # 128 rows per block -> full MXU row fill
NUM_BLOCKS = 4                           # >=2 grid steps per TC on v7x megacore
TOTAL_ROWS = NUM_BLOCKS * ROWS_PER_BLOCK

# Column offsets inside the fused text-side weight wtp (E, 16E):
#   [K_audio head-masked x4 | K_video head-masked x4 | VWO_audio x4 | VWO_video x4]
KA_OFF = 0
KV_OFF = 4 * E
VWOA_OFF = 8 * E
VWOV_OFF = 12 * E


def _softmax_exp_dtype():
    """bf16 exp on chips with a bf16 EUP (v6e/v7x); f32 on v5e and older."""
    try:
        kind = jax.devices()[0].device_kind.lower()
    except Exception:
        return jnp.bfloat16
    if any(t in kind for t in ("v2", "v3", "v4", "v5")):
        return jnp.float32
    return jnp.bfloat16


EXP_DTYPE = _softmax_exp_dtype()


def _forward_block(text_in, av_in, w, recip, exp_dtype):
    """Shared math.  `w` holds either Pallas refs (kernel) or arrays (reference);
    only `[...]` and static slices are used, so both work.  Weights are read at
    their point of use (per-head slabs of wtp/btp are 128-lane-aligned slices)."""
    f32, bf16 = jnp.float32, jnp.bfloat16

    # text_fc (text is reused for K/VWO slabs and the fusion matmul).
    text = (jnp.dot(text_in, w["wt"][...], preferred_element_type=f32)
            + w["bt"][...]).astype(bf16)

    # audio_fc+Q and video_fc+Q fused into one block-diagonal matmul -> [q_a | q_v].
    q = (jnp.dot(av_in, w["wq"][...], preferred_element_type=f32)
         + w["bq"][...]).astype(bf16)

    def attention(q_h, k_off, vwo_off):
        # Per-head scores over the block rows with a full K=128 contraction against
        # a head-masked K slab (no 32-lane slices).  out_proj folded into the VWO
        # slabs; per-head slabs computed lazily from the resident wtp weight.
        o = jnp.zeros((q_h.shape[0], E), f32)
        for h in range(NUM_HEADS):
            kc = slice(k_off + h * E, k_off + (h + 1) * E)
            vc = slice(vwo_off + h * E, vwo_off + (h + 1) * E)
            k_h = (jnp.dot(text, w["wtp"][:, kc], preferred_element_type=f32)
                   + w["btp"][:, kc]).astype(bf16)
            s = lax.dot_general(q_h, k_h, (((1,), (1,)), ((), ())),
                                preferred_element_type=f32)
            s = s + w["attn_bias"][...]           # block-diagonal additive mask
            m = jnp.max(s, axis=-1, keepdims=True)
            p = jnp.exp((s - m).astype(exp_dtype))
            denom = jnp.sum(p, axis=-1, keepdims=True).astype(f32)
            p = p * recip(denom).astype(exp_dtype)
            vwo_h = (jnp.dot(text, w["wtp"][:, vc], preferred_element_type=f32)
                     + w["btp"][:, vc]).astype(bf16)
            o = o + jnp.dot(p.astype(bf16), vwo_h, preferred_element_type=f32)
        return o.astype(bf16)

    audio_o = attention(q[:, 0:E], KA_OFF, VWOA_OFF)
    video_o = attention(q[:, E:2 * E], KV_OFF, VWOV_OFF)

    # fusion_fc as three partial matmuls (out_proj biases pre-folded into w["bf"]).
    fusion = (jnp.dot(text, w["wft"][...], preferred_element_type=f32)
              + jnp.dot(audio_o, w["wfa"][...], preferred_element_type=f32)
              + jnp.dot(video_o, w["wfv"][...], preferred_element_type=f32)
              + w["bf"][...]).astype(bf16)

    # Fused, lane-padded classifier heads: ONE exp pass shared by both softmaxes.
    logits = jnp.dot(fusion, w["wh"][...], preferred_element_type=f32) + w["bh"][...]
    hm = w["head_masks"]
    add_c, add_a, add_v = hm[0:1, :], hm[1:2, :], hm[2:3, :]   # additive lane masks
    ind_c, ind_a = hm[3:4, :], hm[4:5, :]                      # 0/1 lane indicators
    m_c = jnp.max(logits + add_c, axis=-1, keepdims=True)
    m_a = jnp.max(logits + add_a, axis=-1, keepdims=True)
    e = jnp.exp(logits + add_v - (m_c * ind_c + m_a * ind_a))
    s_c = jnp.sum(e * ind_c, axis=-1, keepdims=True)
    s_a = jnp.sum(e * ind_a, axis=-1, keepdims=True)
    return e * (ind_c * recip(s_c) + ind_a * recip(s_a))


def complaint_kernel(text_ref, av_ref, attn_bias_ref, head_masks_ref,
                     wt_ref, bt_ref, wq_ref, bq_ref, wtp_ref, btp_ref,
                     wft_ref, wfa_ref, wfv_ref, bf_ref, wh_ref, bh_ref, out_ref):
    # Refs (not values) are handed to the shared math -> point-of-use weight reads.
    w = dict(attn_bias=attn_bias_ref, head_masks=head_masks_ref,
             wt=wt_ref, bt=bt_ref, wq=wq_ref, bq=bq_ref,
             wtp=wtp_ref, btp=btp_ref,
             wft=wft_ref, wfa=wfa_ref, wfv=wfv_ref, bf=bf_ref,
             wh=wh_ref, bh=bh_ref)
    out_ref[...] = _forward_block(
        text_ref[...], av_ref[...], w,
        lambda x: pl.reciprocal(x, approx=True), EXP_DTYPE)


def make_params(key):
    """Parameters in PyTorch-module structure, stored transposed as (in, out)."""
    ks = jax.random.split(key, 10)
    f32 = jnp.float32

    def lin(k, n_in, n_out, scale=0.05):
        kw, kb = jax.random.split(k)
        return (jax.random.normal(kw, (n_in, n_out), f32) * scale,
                jax.random.normal(kb, (1, n_out), f32) * scale)

    p = {}
    p["wt"], p["bt"] = lin(ks[0], E, E)                 # text_fc
    p["wa"], p["ba"] = lin(ks[1], A, E)                 # audio_fc
    p["wv"], p["bv"] = lin(ks[2], V, E)                 # video_fc
    p["wqkv_a"], p["bqkv_a"] = lin(ks[3], E, 3 * E)     # audio_cross_attention in_proj
    p["wo_a"], p["bo_a"] = lin(ks[4], E, E)             # audio_cross_attention out_proj
    p["wqkv_v"], p["bqkv_v"] = lin(ks[5], E, 3 * E)     # video_cross_attention in_proj
    p["wo_v"], p["bo_v"] = lin(ks[6], E, E)             # video_cross_attention out_proj
    p["wf"], p["bf"] = lin(ks[7], 3 * E, E)             # fusion_fc
    p["wc"], p["bc"] = lin(ks[8], E, N_COMPLAINT)       # output_complaint
    p["wasp"], p["basp"] = lin(ks[9], E, N_ASPECT)      # output_aspect
    return p


def prepare_weights(p):
    """Fuse / fold / pad module weights into the kernel's resident bf16 slabs."""
    f32, bf16 = jnp.float32, jnp.bfloat16
    scale = 1.0 / float(DH) ** 0.5

    # audio_fc/video_fc fused with the scale-folded Q projections, block-diagonal
    # over the concatenated [audio | video] input -> one matmul yields [q_a | q_v].
    wq_a = p["wqkv_a"][:, :E] * scale
    bq_a = p["bqkv_a"][:, :E] * scale
    wq_v = p["wqkv_v"][:, :E] * scale
    bq_v = p["bqkv_v"][:, :E] * scale
    wqa = jnp.dot(p["wa"], wq_a)
    bqa = jnp.dot(p["ba"], wq_a) + bq_a
    wqv = jnp.dot(p["wv"], wq_v)
    bqv = jnp.dot(p["bv"], wq_v) + bq_v
    wq = jnp.zeros((A + V, 2 * E), f32)
    wq = wq.at[:A, :E].set(wqa).at[A:, E:].set(wqv)
    bq = jnp.concatenate([bqa, bqv], axis=1)

    # Head-masked full-width K copies (zero the other heads' columns) -> the kernel
    # never takes a 32-lane slice of Q or K.
    def masked_k(wk, bk):
        ws, bs = [], []
        for h in range(NUM_HEADS):
            m = jnp.zeros((1, E), f32).at[0, h * DH:(h + 1) * DH].set(1.0)
            ws.append(wk * m)
            bs.append(bk * m)
        return jnp.concatenate(ws, axis=1), jnp.concatenate(bs, axis=1)

    wk_a, bk_a = masked_k(p["wqkv_a"][:, E:2 * E], p["bqkv_a"][:, E:2 * E])
    wk_v, bk_v = masked_k(p["wqkv_v"][:, E:2 * E], p["bqkv_v"][:, E:2 * E])

    # Per-head value*out_proj fusion: vwo_h = text @ (Wv_h @ Wo_h) + bv_h @ Wo_h.
    def vwo(wqkv, bqkv, wo):
        wv_ = wqkv[:, 2 * E:3 * E]
        bv_ = bqkv[:, 2 * E:3 * E]
        wb, bb = [], []
        for h in range(NUM_HEADS):
            hs = slice(h * DH, (h + 1) * DH)
            wb.append(jnp.dot(wv_[:, hs], wo[hs, :]))
            bb.append(jnp.dot(bv_[:, hs], wo[hs, :]))
        return jnp.concatenate(wb, axis=1), jnp.concatenate(bb, axis=1)

    wvo_a, bvo_a = vwo(p["wqkv_a"], p["bqkv_a"], p["wo_a"])
    wvo_v, bvo_v = vwo(p["wqkv_v"], p["bqkv_v"], p["wo_v"])

    # One fused text-side projection weight: (E, 16E).
    wtp = jnp.concatenate([wk_a, wk_v, wvo_a, wvo_v], axis=1)
    btp = jnp.concatenate([bk_a, bk_v, bvo_a, bvo_v], axis=1)

    # fusion_fc split; attention out_proj biases folded into the fusion bias.
    wft = p["wf"][0:E, :]
    wfa = p["wf"][E:2 * E, :]
    wfv = p["wf"][2 * E:3 * E, :]
    bf_fused = p["bf"] + jnp.dot(p["bo_a"], wfa) + jnp.dot(p["bo_v"], wfv)

    # Fused, lane-padded classifier heads.
    wh = jnp.zeros((E, HEAD_PAD), f32)
    wh = wh.at[:, :N_COMPLAINT].set(p["wc"])
    wh = wh.at[:, N_COMPLAINT:N_COMPLAINT + N_ASPECT].set(p["wasp"])
    bh = jnp.zeros((1, HEAD_PAD), f32)
    bh = bh.at[:, :N_COMPLAINT].set(p["bc"])
    bh = bh.at[:, N_COMPLAINT:N_COMPLAINT + N_ASPECT].set(p["basp"])

    # Hoisted constants: block-diagonal additive attention bias (per 128-row block)
    # and per-lane classifier masks (rows: add_c, add_a, add_valid, ind_c, ind_a).
    rg = jnp.arange(ROWS_PER_BLOCK) // S
    attn_bias = jnp.where(rg[:, None] == rg[None, :], 0.0, NEG).astype(f32)

    lane = jnp.arange(HEAD_PAD)
    is_c = lane < N_COMPLAINT
    is_a = (lane >= N_COMPLAINT) & (lane < N_COMPLAINT + N_ASPECT)
    hm = jnp.zeros((8, HEAD_PAD), f32)
    hm = hm.at[0].set(jnp.where(is_c, 0.0, NEG))
    hm = hm.at[1].set(jnp.where(is_a, 0.0, NEG))
    hm = hm.at[2].set(jnp.where(is_c | is_a, 0.0, NEG))
    hm = hm.at[3].set(is_c.astype(f32))
    hm = hm.at[4].set(is_a.astype(f32))

    return dict(
        attn_bias=attn_bias, head_masks=hm,
        wt=p["wt"].astype(bf16), bt=p["bt"].astype(f32),
        wq=wq.astype(bf16), bq=bq.astype(f32),
        wtp=wtp.astype(bf16), btp=btp.astype(f32),
        wft=wft.astype(bf16), wfa=wfa.astype(bf16), wfv=wfv.astype(bf16),
        bf=bf_fused.astype(f32),
        wh=wh.astype(bf16), bh=bh.astype(f32),
    )


def complaint_identification(text_emb, audio_emb, video_emb, w):
    bf16 = jnp.bfloat16
    text = text_emb.astype(bf16)
    av = jnp.concatenate([audio_emb, video_emb], axis=1).astype(bf16)

    args = (text, av,
            w["attn_bias"], w["head_masks"],
            w["wt"], w["bt"], w["wq"], w["bq"], w["wtp"], w["btp"],
            w["wft"], w["wfa"], w["wfv"], w["bf"], w["wh"], w["bh"])

    total_rows = text_emb.shape[0]
    n_blocks = total_rows // ROWS_PER_BLOCK

    def act_spec(ncols):
        return pl.BlockSpec((ROWS_PER_BLOCK, ncols), lambda g: (g, 0))

    def resident_spec(arr):
        # Constant block index -> stays resident in VMEM across the grid.
        return pl.BlockSpec(arr.shape, lambda g: (0, 0))

    in_specs = [act_spec(text.shape[1]), act_spec(av.shape[1])]
    in_specs += [resident_spec(a) for a in args[2:]]

    out = pl.pallas_call(
        complaint_kernel,
        out_shape=jax.ShapeDtypeStruct((total_rows, HEAD_PAD), jnp.float32),
        grid=(n_blocks,),
        in_specs=in_specs,
        out_specs=pl.BlockSpec((ROWS_PER_BLOCK, HEAD_PAD), lambda g: (g, 0)),
        compiler_params=pltpu.CompilerParams(dimension_semantics=("parallel",)),
    )(*args)

    return out[:, :N_COMPLAINT], out[:, N_COMPLAINT:N_COMPLAINT + N_ASPECT]


def reference_forward(text_emb, audio_emb, video_emb, w):
    """Plain-JAX replica of the kernel math (exact reciprocal) for validation."""
    bf16, f32 = jnp.bfloat16, jnp.float32
    n = text_emb.shape[0]
    rg = jnp.arange(n) // S
    wr = dict(w)
    wr["attn_bias"] = jnp.where(rg[:, None] == rg[None, :], 0.0, NEG).astype(f32)
    av = jnp.concatenate([audio_emb, video_emb], axis=1).astype(bf16)
    out = _forward_block(text_emb.astype(bf16), av, wr, lambda x: 1.0 / x, EXP_DTYPE)
    return out[:, :N_COMPLAINT], out[:, N_COMPLAINT:N_COMPLAINT + N_ASPECT]


if __name__ == "__main__":
    key = jax.random.PRNGKey(0)
    k_param, k_text, k_audio, k_video = jax.random.split(key, 4)

    params = make_params(k_param)
    weights = prepare_weights(params)

    # text_emb stands in for sbert_output['sentence_embedding'] (see TODO above).
    # Rows are NUM_BLOCKS * GROUPS_PER_BLOCK groups of S samples each; every S-row
    # group is one independent forward pass of the original module.
    text_emb = jax.random.normal(k_text, (TOTAL_ROWS, E), jnp.float32)
    audio_emb = jax.random.normal(k_audio, (TOTAL_ROWS, A), jnp.float32)
    video_emb = jax.random.normal(k_video, (TOTAL_ROWS, V), jnp.float32)

    complaint_out, aspect_out = jax.jit(complaint_identification)(
        text_emb, audio_emb, video_emb, weights)
    jax.block_until_ready((complaint_out, aspect_out))

    assert complaint_out.shape == (TOTAL_ROWS, N_COMPLAINT)
    assert aspect_out.shape == (TOTAL_ROWS, N_ASPECT)
    # softmax rows sum to ~1 (approx reciprocal -> loose tolerance)
    assert jnp.allclose(jnp.sum(complaint_out, axis=1), 1.0, atol=1e-2)
    assert jnp.allclose(jnp.sum(aspect_out, axis=1), 1.0, atol=1e-2)
    # match the pure-JAX reference of the same (bf16) math
    c_ref, a_ref = reference_forward(text_emb, audio_emb, video_emb, weights)
    assert jnp.allclose(complaint_out, c_ref, atol=2e-2)
    assert jnp.allclose(aspect_out, a_ref, atol=2e-2)
    print("KERNEL_OK")
</pallas_src>

<mosaic_0001>
module attributes {stable_mosaic.version = 11 : i64} {
  func.func @complaint_kernel(%arg0: i32, %arg1: memref<128x128xbf16, #tpu.memory_space<vmem>>, %arg2: memref<128x96xbf16, #tpu.memory_space<vmem>>, %arg3: memref<128x128xf32, #tpu.memory_space<vmem>>, %arg4: memref<8x128xf32, #tpu.memory_space<vmem>>, %arg5: memref<128x128xbf16, #tpu.memory_space<vmem>>, %arg6: memref<1x128xf32, #tpu.memory_space<vmem>>, %arg7: memref<96x256xbf16, #tpu.memory_space<vmem>>, %arg8: memref<1x256xf32, #tpu.memory_space<vmem>>, %arg9: memref<128x2048xbf16, #tpu.memory_space<vmem>>, %arg10: memref<1x2048xf32, #tpu.memory_space<vmem>>, %arg11: memref<128x128xbf16, #tpu.memory_space<vmem>>, %arg12: memref<128x128xbf16, #tpu.memory_space<vmem>>, %arg13: memref<128x128xbf16, #tpu.memory_space<vmem>>, %arg14: memref<1x128xf32, #tpu.memory_space<vmem>>, %arg15: memref<128x128xbf16, #tpu.memory_space<vmem>>, %arg16: memref<1x128xf32, #tpu.memory_space<vmem>>, %arg17: memref<128x128xf32, #tpu.memory_space<vmem>>) attributes {dimension_semantics = [#tpu.dimension_semantics<parallel>], iteration_bounds = array<i64: 4>, scalar_prefetch = 0 : i64, scratch_operands = 0 : i64, tpu.core_type = #tpu.core_type<tc>, window_params = [{transform_indices = @transform_0, window_bounds = array<i64: 128, 128>}, {transform_indices = @transform_1, window_bounds = array<i64: 128, 96>}, {pipeline_mode = #tpu.pipeline_mode<synchronous>, transform_indices = @transform_2, window_bounds = array<i64: 128, 128>}, {pipeline_mode = #tpu.pipeline_mode<synchronous>, transform_indices = @transform_3, window_bounds = array<i64: 8, 128>}, {pipeline_mode = #tpu.pipeline_mode<synchronous>, transform_indices = @transform_4, window_bounds = array<i64: 128, 128>}, {pipeline_mode = #tpu.pipeline_mode<synchronous>, transform_indices = @transform_5, window_bounds = array<i64: 1, 128>}, {pipeline_mode = #tpu.pipeline_mode<synchronous>, transform_indices = @transform_6, window_bounds = array<i64: 96, 256>}, {pipeline_mode = #tpu.pipeline_mode<synchronous>, transform_indices = @transform_7, window_bounds = array<i64: 1, 256>}, {pipeline_mode = #tpu.pipeline_mode<synchronous>, transform_indices = @transform_8, window_bounds = array<i64: 128, 2048>}, {pipeline_mode = #tpu.pipeline_mode<synchronous>, transform_indices = @transform_9, window_bounds = array<i64: 1, 2048>}, {pipeline_mode = #tpu.pipeline_mode<synchronous>, transform_indices = @transform_10, window_bounds = array<i64: 128, 128>}, {pipeline_mode = #tpu.pipeline_mode<synchronous>, transform_indices = @transform_11, window_bounds = array<i64: 128, 128>}, {pipeline_mode = #tpu.pipeline_mode<synchronous>, transform_indices = @transform_12, window_bounds = array<i64: 128, 128>}, {pipeline_mode = #tpu.pipeline_mode<synchronous>, transform_indices = @transform_13, window_bounds = array<i64: 1, 128>}, {pipeline_mode = #tpu.pipeline_mode<synchronous>, transform_indices = @transform_14, window_bounds = array<i64: 128, 128>}, {pipeline_mode = #tpu.pipeline_mode<synchronous>, transform_indices = @transform_15, window_bounds = array<i64: 1, 128>}, {transform_indices = @transform_16, window_bounds = array<i64: 128, 128>}]} {
    %c0 = arith.constant 0 : index
    %c0_0 = arith.constant 0 : index
    %0 = vector.load %arg1[%c0, %c0_0] : memref<128x128xbf16, #tpu.memory_space<vmem>>, vector<128x128xbf16>
    %c0_1 = arith.constant 0 : index
    %c0_2 = arith.constant 0 : index
    %1 = vector.load %arg2[%c0_1, %c0_2] : memref<128x96xbf16, #tpu.memory_space<vmem>>, vector<128x96xbf16>
    %c0_3 = arith.constant 0 : index
    %c0_4 = arith.constant 0 : index
    %2 = vector.load %arg5[%c0_3, %c0_4] : memref<128x128xbf16, #tpu.memory_space<vmem>>, vector<128x128xbf16>
    %cst = arith.constant dense<0.000000e+00> : vector<128x128xf32>
    %3 = tpu.matmul %0, %2, %cst {dimension_numbers = #tpu.dot_dimension_numbers<[1], [0], [0], [1], [0, 0, 1, 1], [], []>} : vector<128x128xbf16>, vector<128x128xbf16>, vector<128x128xf32> -> vector<128x128xf32>
    %c0_5 = arith.constant 0 : index
    %c0_6 = arith.constant 0 : index
    %4 = vector.load %arg6[%c0_5, %c0_6] : memref<1x128xf32, #tpu.memory_space<vmem>>, vector<1x128xf32>
    %5 = vector.broadcast %4 : vector<1x128xf32> to vector<128x128xf32>
    %6 = arith.addf %3, %5 : vector<128x128xf32>
    %7 = arith.truncf %6 : vector<128x128xf32> to vector<128x128xbf16>
    %c0_7 = arith.constant 0 : index
    %c0_8 = arith.constant 0 : index
    %8 = vector.load %arg7[%c0_7, %c0_8] : memref<96x256xbf16, #tpu.memory_space<vmem>>, vector<96x256xbf16>
    %cst_9 = arith.constant dense<0.000000e+00> : vector<128x256xf32>
    %9 = tpu.matmul %1, %8, %cst_9 {dimension_numbers = #tpu.dot_dimension_numbers<[1], [0], [0], [1], [0, 0, 1, 1], [], []>} : vector<128x96xbf16>, vector<96x256xbf16>, vector<128x256xf32> -> vector<128x256xf32>
    %c0_10 = arith.constant 0 : index
    %c0_11 = arith.constant 0 : index
    %10 = vector.load %arg8[%c0_10, %c0_11] : memref<1x256xf32, #tpu.memory_space<vmem>>, vector<1x256xf32>
    %11 = vector.broadcast %10 : vector<1x256xf32> to vector<128x256xf32>
    %12 = arith.addf %9, %11 : vector<128x256xf32>
    %13 = arith.truncf %12 : vector<128x256xf32> to vector<128x256xbf16>
    %14 = vector.extract_strided_slice %13 {offsets = [0, 0], sizes = [128, 128], strides = [1, 1]} : vector<128x256xbf16> to vector<128x128xbf16>
    %cst_12 = arith.constant 0.000000e+00 : f32
    %15 = vector.broadcast %cst_12 : f32 to vector<128x128xf32>
    %c0_13 = arith.constant 0 : index
    %c0_14 = arith.constant 0 : index
    %16 = vector.load %arg9[%c0_13, %c0_14] : memref<128x2048xbf16, #tpu.memory_space<vmem>>, vector<128x128xbf16>
    %cst_15 = arith.constant dense<0.000000e+00> : vector<128x128xf32>
    %17 = tpu.matmul %7, %16, %cst_15 {dimension_numbers = #tpu.dot_dimension_numbers<[1], [0], [0], [1], [0, 0, 1, 1], [], []>} : vector<128x128xbf16>, vector<128x128xbf16>, vector<128x128xf32> -> vector<128x128xf32>
    %c0_16 = arith.constant 0 : index
    %c0_17 = arith.constant 0 : index
    %18 = vector.load %arg10[%c0_16, %c0_17] : memref<1x2048xf32, #tpu.memory_space<vmem>>, vector<1x128xf32>
    %19 = vector.broadcast %18 : vector<1x128xf32> to vector<128x128xf32>
    %20 = arith.addf %17, %19 : vector<128x128xf32>
    %21 = arith.truncf %20 : vector<128x128xf32> to vector<128x128xbf16>
    %cst_18 = arith.constant dense<0.000000e+00> : vector<128x128xf32>
    %22 = tpu.matmul %14, %21, %cst_18 {dimension_numbers = #tpu.dot_dimension_numbers<[1], [1], [0], [0], [0, 0, 1, 0], [], []>} : vector<128x128xbf16>, vector<128x128xbf16>, vector<128x128xf32> -> vector<128x128xf32>
    %c0_19 = arith.constant 0 : index
    %c0_20 = arith.constant 0 : index
    %23 = vector.load %arg3[%c0_19, %c0_20] : memref<128x128xf32, #tpu.memory_space<vmem>>, vector<128x128xf32>
    %24 = arith.addf %22, %23 : vector<128x128xf32>
    %cst_21 = arith.constant dense<0xFF800000> : vector<128xf32>
    %25 = vector.multi_reduction <maximumf>, %24, %cst_21 [1] : vector<128x128xf32> to vector<128xf32>
    %26 = vector.shape_cast %25 : vector<128xf32> to vector<128x1xf32>
    %27 = vector.broadcast %26 : vector<128x1xf32> to vector<128x128xf32>
    %28 = arith.subf %24, %27 : vector<128x128xf32>
    %29 = arith.truncf %28 : vector<128x128xf32> to vector<128x128xbf16>
    %30 = math.exp %29 : vector<128x128xbf16>
    %31 = arith.extf %30 : vector<128x128xbf16> to vector<128x128xf32>
    %cst_22 = arith.constant dense<0.000000e+00> : vector<128xf32>
    %32 = vector.multi_reduction <add>, %31, %cst_22 [1] : vector<128x128xf32> to vector<128xf32>
    %33 = vector.shape_cast %32 : vector<128xf32> to vector<128x1xf32>
    %34 = arith.truncf %33 : vector<128x1xf32> to vector<128x1xbf16>
    %35 = arith.extf %34 : vector<128x1xbf16> to vector<128x1xf32>
    %36 = tpu.reciprocal %35 {approx = true} : vector<128x1xf32> -> vector<128x1xf32>
    %37 = arith.truncf %36 : vector<128x1xf32> to vector<128x1xbf16>
    %38 = vector.broadcast %37 : vector<128x1xbf16> to vector<128x128xbf16>
    %39 = arith.mulf %30, %38 : vector<128x128xbf16>
    %c0_23 = arith.constant 0 : index
    %c1024 = arith.constant 1024 : index
    %40 = vector.load %arg9[%c0_23, %c1024] : memref<128x2048xbf16, #tpu.memory_space<vmem>>, vector<128x128xbf16>
    %cst_24 = arith.constant dense<0.000000e+00> : vector<128x128xf32>
    %41 = tpu.matmul %7, %40, %cst_24 {dimension_numbers = #tpu.dot_dimension_numbers<[1], [0], [0], [1], [0, 0, 1, 1], [], []>} : vector<128x128xbf16>, vector<128x128xbf16>, vector<128x128xf32> -> vector<128x128xf32>
    %c0_25 = arith.constant 0 : index
    %c1024_26 = arith.constant 1024 : index
    %42 = vector.load %arg10[%c0_25, %c1024_26] : memref<1x2048xf32, #tpu.memory_space<vmem>>, vector<1x128xf32>
    %43 = vector.broadcast %42 : vector<1x128xf32> to vector<128x128xf32>
    %44 = arith.addf %41, %43 : vector<128x128xf32>
    %45 = arith.truncf %44 : vector<128x128xf32> to vector<128x128xbf16>
    %cst_27 = arith.constant dense<0.000000e+00> : vector<128x128xf32>
    %46 = tpu.matmul %39, %45, %cst_27 {dimension_numbers = #tpu.dot_dimension_numbers<[1], [0], [0], [1], [0, 0, 1, 1], [], []>} : vector<128x128xbf16>, vector<128x128xbf16>, vector<128x128xf32> -> vector<128x128xf32>
    %47 = arith.addf %15, %46 : vector<128x128xf32>
    %c0_28 = arith.constant 0 : index
    %c128 = arith.constant 128 : index
    %48 = vector.load %arg9[%c0_28, %c128] : memref<128x2048xbf16, #tpu.memory_space<vmem>>, vector<128x128xbf16>
    %cst_29 = arith.constant dense<0.000000e+00> : vector<128x128xf32>
    %49 = tpu.matmul %7, %48, %cst_29 {dimension_numbers = #tpu.dot_dimension_numbers<[1], [0], [0], [1], [0, 0, 1, 1], [], []>} : vector<128x128xbf16>, vector<128x128xbf16>, vector<128x128xf32> -> vector<128x128xf32>
    %c0_30 = arith.constant 0 : index
    %c128_31 = arith.constant 128 : index
    %50 = vector.load %arg10[%c0_30, %c128_31] : memref<1x2048xf32, #tpu.memory_space<vmem>>, vector<1x128xf32>
    %51 = vector.broadcast %50 : vector<1x128xf32> to vector<128x128xf32>
    %52 = arith.addf %49, %51 : vector<128x128xf32>
    %53 = arith.truncf %52 : vector<128x128xf32> to vector<128x128xbf16>
    %cst_32 = arith.constant dense<0.000000e+00> : vector<128x128xf32>
    %54 = tpu.matmul %14, %53, %cst_32 {dimension_numbers = #tpu.dot_dimension_numbers<[1], [1], [0], [0], [0, 0, 1, 0], [], []>} : vector<128x128xbf16>, vector<128x128xbf16>, vector<128x128xf32> -> vector<128x128xf32>
    %c0_33 = arith.constant 0 : index
    %c0_34 = arith.constant 0 : index
    %55 = vector.load %arg3[%c0_33, %c0_34] : memref<128x128xf32, #tpu.memory_space<vmem>>, vector<128x128xf32>
    %56 = arith.addf %54, %55 : vector<128x128xf32>
    %cst_35 = arith.constant dense<0xFF800000> : vector<128xf32>
    %57 = vector.multi_reduction <maximumf>, %56, %cst_35 [1] : vector<128x128xf32> to vector<128xf32>
    %58 = vector.shape_cast %57 : vector<128xf32> to vector<128x1xf32>
    %59 = vector.broadcast %58 : vector<128x1xf32> to vector<128x128xf32>
    %60 = arith.subf %56, %59 : vector<128x128xf32>
    %61 = arith.truncf %60 : vector<128x128xf32> to vector<128x128xbf16>
    %62 = math.exp %61 : vector<128x128xbf16>
    %63 = arith.extf %62 : vector<128x128xbf16> to vector<128x128xf32>
    %cst_36 = arith.constant dense<0.000000e+00> : vector<128xf32>
    %64 = vector.multi_reduction <add>, %63, %cst_36 [1] : vector<128x128xf32> to vector<128xf32>
    %65 = vector.shape_cast %64 : vector<128xf32> to vector<128x1xf32>
    %66 = arith.truncf %65 : vector<128x1xf32> to vector<128x1xbf16>
    %67 = arith.extf %66 : vector<128x1xbf16> to vector<128x1xf32>
    %68 = tpu.reciprocal %67 {approx = true} : vector<128x1xf32> -> vector<128x1xf32>
    %69 = arith.truncf %68 : vector<128x1xf32> to vector<128x1xbf16>
    %70 = vector.broadcast %69 : vector<128x1xbf16> to vector<128x128xbf16>
    %71 = arith.mulf %62, %70 : vector<128x128xbf16>
    %c0_37 = arith.constant 0 : index
    %c1152 = arith.constant 1152 : index
    %72 = vector.load %arg9[%c0_37, %c1152] : memref<128x2048xbf16, #tpu.memory_space<vmem>>, vector<128x128xbf16>
    %cst_38 = arith.constant dense<0.000000e+00> : vector<128x128xf32>
    %73 = tpu.matmul %7, %72, %cst_38 {dimension_numbers = #tpu.dot_dimension_numbers<[1], [0], [0], [1], [0, 0, 1, 1], [], []>} : vector<128x128xbf16>, vector<128x128xbf16>, vector<128x128xf32> -> vector<128x128xf32>
    %c0_39 = arith.constant 0 : index
    %c1152_40 = arith.constant 1152 : index
    %74 = vector.load %arg10[%c0_39, %c1152_40] : memref<1x2048xf32, #tpu.memory_space<vmem>>, vector<1x128xf32>
    %75 = vector.broadcast %74 : vector<1x128xf32> to vector<128x128xf32>
    %76 = arith.addf %73, %75 : vector<128x128xf32>
    %77 = arith.truncf %76 : vector<128x128xf32> to vector<128x128xbf16>
    %cst_41 = arith.constant dense<0.000000e+00> : vector<128x128xf32>
    %78 = tpu.matmul %71, %77, %cst_41 {dimension_numbers = #tpu.dot_dimension_numbers<[1], [0], [0], [1], [0, 0, 1, 1], [], []>} : vector<128x128xbf16>, vector<128x128xbf16>, vector<128x128xf32> -> vector<128x128xf32>
    %79 = arith.addf %47, %78 : vector<128x128xf32>
    %c0_42 = arith.constant 0 : index
    %c256 = arith.constant 256 : index
    %80 = vector.load %arg9[%c0_42, %c256] : memref<128x2048xbf16, #tpu.memory_space<vmem>>, vector<128x128xbf16>
    %cst_43 = arith.constant dense<0.000000e+00> : vector<128x128xf32>
    %81 = tpu.matmul %7, %80, %cst_43 {dimension_numbers = #tpu.dot_dimension_numbers<[1], [0], [0], [1], [0, 0, 1, 1], [], []>} : vector<128x128xbf16>, vector<128x128xbf16>, vector<128x128xf32> -> vector<128x128xf32>
    %c0_44 = arith.constant 0 : index
    %c256_45 = arith.constant 256 : index
    %82 = vector.load %arg10[%c0_44, %c256_45] : memref<1x2048xf32, #tpu.memory_space<vmem>>, vector<1x128xf32>
    %83 = vector.broadcast %82 : vector<1x128xf32> to vector<128x128xf32>
    %84 = arith.addf %81, %83 : vector<128x128xf32>
    %85 = arith.truncf %84 : vector<128x128xf32> to vector<128x128xbf16>
    %cst_46 = arith.constant dense<0.000000e+00> : vector<128x128xf32>
    %86 = tpu.matmul %14, %85, %cst_46 {dimension_numbers = #tpu.dot_dimension_numbers<[1], [1], [0], [0], [0, 0, 1, 0], [], []>} : vector<128x128xbf16>, vector<128x128xbf16>, vector<128x128xf32> -> vector<128x128xf32>
    %c0_47 = arith.constant 0 : index
    %c0_48 = arith.constant 0 : index
    %87 = vector.load %arg3[%c0_47, %c0_48] : memref<128x128xf32, #tpu.memory_space<vmem>>, vector<128x128xf32>
    %88 = arith.addf %86, %87 : vector<128x128xf32>
    %cst_49 = arith.constant dense<0xFF800000> : vector<128xf32>
    %89 = vector.multi_reduction <maximumf>, %88, %cst_49 [1] : vector<128x128xf32> to vector<128xf32>
    %90 = vector.shape_cast %89 : vector<128xf32> to vector<128x1xf32>
    %91 = vector.broadcast %90 : vector<128x1xf32> to vector<128x128xf32>
    %92 = arith.subf %88, %91 : vector<128x128xf32>
    %93 = arith.truncf %92 : vector<128x128xf32> to vector<128x128xbf16>
    %94 = math.exp %93 : vector<128x128xbf16>
    %95 = arith.extf %94 : vector<128x128xbf16> to vector<128x128xf32>
    %cst_50 = arith.constant dense<0.000000e+00> : vector<128xf32>
    %96 = vector.multi_reduction <add>, %95, %cst_50 [1] : vector<128x128xf32> to vector<128xf32>
    %97 = vector.shape_cast %96 : vector<128xf32> to vector<128x1xf32>
    %98 = arith.truncf %97 : vector<128x1xf32> to vector<128x1xbf16>
    %99 = arith.extf %98 : vector<128x1xbf16> to vector<128x1xf32>
    %100 = tpu.reciprocal %99 {approx = true} : vector<128x1xf32> -> vector<128x1xf32>
    %101 = arith.truncf %100 : vector<128x1xf32> to vector<128x1xbf16>
    %102 = vector.broadcast %101 : vector<128x1xbf16> to vector<128x128xbf16>
    %103 = arith.mulf %94, %102 : vector<128x128xbf16>
    %c0_51 = arith.constant 0 : index
    %c1280 = arith.constant 1280 : index
    %104 = vector.load %arg9[%c0_51, %c1280] : memref<128x2048xbf16, #tpu.memory_space<vmem>>, vector<128x128xbf16>
    %cst_52 = arith.constant dense<0.000000e+00> : vector<128x128xf32>
    %105 = tpu.matmul %7, %104, %cst_52 {dimension_numbers = #tpu.dot_dimension_numbers<[1], [0], [0], [1], [0, 0, 1, 1], [], []>} : vector<128x128xbf16>, vector<128x128xbf16>, vector<128x128xf32> -> vector<128x128xf32>
    %c0_53 = arith.constant 0 : index
    %c1280_54 = arith.constant 1280 : index
    %106 = vector.load %arg10[%c0_53, %c1280_54] : memref<1x2048xf32, #tpu.memory_space<vmem>>, vector<1x128xf32>
    %107 = vector.broadcast %106 : vector<1x128xf32> to vector<128x128xf32>
    %108 = arith.addf %105, %107 : vector<128x128xf32>
    %109 = arith.truncf %108 : vector<128x128xf32> to vector<128x128xbf16>
    %cst_55 = arith.constant dense<0.000000e+00> : vector<128x128xf32>
    %110 = tpu.matmul %103, %109, %cst_55 {dimension_numbers = #tpu.dot_dimension_numbers<[1], [0], [0], [1], [0, 0, 1, 1], [], []>} : vector<128x128xbf16>, vector<128x128xbf16>, vector<128x128xf32> -> vector<128x128xf32>
    %111 = arith.addf %79, %110 : vector<128x128xf32>
    %c0_56 = arith.constant 0 : index
    %c384 = arith.constant 384 : index
    %112 = vector.load %arg9[%c0_56, %c384] : memref<128x2048xbf16, #tpu.memory_space<vmem>>, vector<128x128xbf16>
    %cst_57 = arith.constant dense<0.000000e+00> : vector<128x128xf32>
    %113 = tpu.matmul %7, %112, %cst_57 {dimension_numbers = #tpu.dot_dimension_numbers<[1], [0], [0], [1], [0, 0, 1, 1], [], []>} : vector<128x128xbf16>, vector<128x128xbf16>, vector<128x128xf32> -> vector<128x128xf32>
    %c0_58 = arith.constant 0 : index
    %c384_59 = arith.constant 384 : index
    %114 = vector.load %arg10[%c0_58, %c384_59] : memref<1x2048xf32, #tpu.memory_space<vmem>>, vector<1x128xf32>
    %115 = vector.broadcast %114 : vector<1x128xf32> to vector<128x128xf32>
    %116 = arith.addf %113, %115 : vector<128x128xf32>
    %117 = arith.truncf %116 : vector<128x128xf32> to vector<128x128xbf16>
    %cst_60 = arith.constant dense<0.000000e+00> : vector<128x128xf32>
    %118 = tpu.matmul %14, %117, %cst_60 {dimension_numbers = #tpu.dot_dimension_numbers<[1], [1], [0], [0], [0, 0, 1, 0], [], []>} : vector<128x128xbf16>, vector<128x128xbf16>, vector<128x128xf32> -> vector<128x128xf32>
    %c0_61 = arith.constant 0 : index
    %c0_62 = arith.constant 0 : index
    %119 = vector.load %arg3[%c0_61, %c0_62] : memref<128x128xf32, #tpu.memory_space<vmem>>, vector<128x128xf32>
    %120 = arith.addf %118, %119 : vector<128x128xf32>
    %cst_63 = arith.constant dense<0xFF800000> : vector<128xf32>
    %121 = vector.multi_reduction <maximumf>, %120, %cst_63 [1] : vector<128x128xf32> to vector<128xf32>
    %122 = vector.shape_cast %121 : vector<128xf32> to vector<128x1xf32>
    %123 = vector.broadcast %122 : vector<128x1xf32> to vector<128x128xf32>
    %124 = arith.subf %120, %123 : vector<128x128xf32>
    %125 = arith.truncf %124 : vector<128x128xf32> to vector<128x128xbf16>
    %126 = math.exp %125 : vector<128x128xbf16>
    %127 = arith.extf %126 : vector<128x128xbf16> to vector<128x128xf32>
    %cst_64 = arith.constant dense<0.000000e+00> : vector<128xf32>
    %128 = vector.multi_reduction <add>, %127, %cst_64 [1] : vector<128x128xf32> to vector<128xf32>
    %129 = vector.shape_cast %128 : vector<128xf32> to vector<128x1xf32>
    %130 = arith.truncf %129 : vector<128x1xf32> to vector<128x1xbf16>
    %131 = arith.extf %130 : vector<128x1xbf16> to vector<128x1xf32>
    %132 = tpu.reciprocal %131 {approx = true} : vector<128x1xf32> -> vector<128x1xf32>
    %133 = arith.truncf %132 : vector<128x1xf32> to vector<128x1xbf16>
    %134 = vector.broadcast %133 : vector<128x1xbf16> to vector<128x128xbf16>
    %135 = arith.mulf %126, %134 : vector<128x128xbf16>
    %c0_65 = arith.constant 0 : index
    %c1408 = arith.constant 1408 : index
    %136 = vector.load %arg9[%c0_65, %c1408] : memref<128x2048xbf16, #tpu.memory_space<vmem>>, vector<128x128xbf16>
    %cst_66 = arith.constant dense<0.000000e+00> : vector<128x128xf32>
    %137 = tpu.matmul %7, %136, %cst_66 {dimension_numbers = #tpu.dot_dimension_numbers<[1], [0], [0], [1], [0, 0, 1, 1], [], []>} : vector<128x128xbf16>, vector<128x128xbf16>, vector<128x128xf32> -> vector<128x128xf32>
    %c0_67 = arith.constant 0 : index
    %c1408_68 = arith.constant 1408 : index
    %138 = vector.load %arg10[%c0_67, %c1408_68] : memref<1x2048xf32, #tpu.memory_space<vmem>>, vector<1x128xf32>
    %139 = vector.broadcast %138 : vector<1x128xf32> to vector<128x128xf32>
    %140 = arith.addf %137, %139 : vector<128x128xf32>
    %141 = arith.truncf %140 : vector<128x128xf32> to vector<128x128xbf16>
    %cst_69 = arith.constant dense<0.000000e+00> : vector<128x128xf32>
    %142 = tpu.matmul %135, %141, %cst_69 {dimension_numbers = #tpu.dot_dimension_numbers<[1], [0], [0], [1], [0, 0, 1, 1], [], []>} : vector<128x128xbf16>, vector<128x128xbf16>, vector<128x128xf32> -> vector<128x128xf32>
    %143 = arith.addf %111, %142 : vector<128x128xf32>
    %144 = arith.truncf %143 : vector<128x128xf32> to vector<128x128xbf16>
    %145 = vector.extract_strided_slice %13 {offsets = [0, 128], sizes = [128, 128], strides = [1, 1]} : vector<128x256xbf16> to vector<128x128xbf16>
    %cst_70 = arith.constant 0.000000e+00 : f32
    %146 = vector.broadcast %cst_70 : f32 to vector<128x128xf32>
    %c0_71 = arith.constant 0 : index
    %c512 = arith.constant 512 : index
    %147 = vector.load %arg9[%c0_71, %c512] : memref<128x2048xbf16, #tpu.memory_space<vmem>>, vector<128x128xbf16>
    %cst_72 = arith.constant dense<0.000000e+00> : vector<128x128xf32>
    %148 = tpu.matmul %7, %147, %cst_72 {dimension_numbers = #tpu.dot_dimension_numbers<[1], [0], [0], [1], [0, 0, 1, 1], [], []>} : vector<128x128xbf16>, vector<128x128xbf16>, vector<128x128xf32> -> vector<128x128xf32>
    %c0_73 = arith.constant 0 : index
    %c512_74 = arith.constant 512 : index
    %149 = vector.load %arg10[%c0_73, %c512_74] : memref<1x2048xf32, #tpu.memory_space<vmem>>, vector<1x128xf32>
    %150 = vector.broadcast %149 : vector<1x128xf32> to vector<128x128xf32>
    %151 = arith.addf %148, %150 : vector<128x128xf32>
    %152 = arith.truncf %151 : vector<128x128xf32> to vector<128x128xbf16>
    %cst_75 = arith.constant dense<0.000000e+00> : vector<128x128xf32>
    %153 = tpu.matmul %145, %152, %cst_75 {dimension_numbers = #tpu.dot_dimension_numbers<[1], [1], [0], [0], [0, 0, 1, 0], [], []>} : vector<128x128xbf16>, vector<128x128xbf16>, vector<128x128xf32> -> vector<128x128xf32>
    %c0_76 = arith.constant 0 : index
    %c0_77 = arith.constant 0 : index
    %154 = vector.load %arg3[%c0_76, %c0_77] : memref<128x128xf32, #tpu.memory_space<vmem>>, vector<128x128xf32>
    %155 = arith.addf %153, %154 : vector<128x128xf32>
    %cst_78 = arith.constant dense<0xFF800000> : vector<128xf32>
    %156 = vector.multi_reduction <maximumf>, %155, %cst_78 [1] : vector<128x128xf32> to vector<128xf32>
    %157 = vector.shape_cast %156 : vector<128xf32> to vector<128x1xf32>
    %158 = vector.broadcast %157 : vector<128x1xf32> to vector<128x128xf32>
    %159 = arith.subf %155, %158 : vector<128x128xf32>
    %160 = arith.truncf %159 : vector<128x128xf32> to vector<128x128xbf16>
    %161 = math.exp %160 : vector<128x128xbf16>
    %162 = arith.extf %161 : vector<128x128xbf16> to vector<128x128xf32>
    %cst_79 = arith.constant dense<0.000000e+00> : vector<128xf32>
    %163 = vector.multi_reduction <add>, %162, %cst_79 [1] : vector<128x128xf32> to vector<128xf32>
    %164 = vector.shape_cast %163 : vector<128xf32> to vector<128x1xf32>
    %165 = arith.truncf %164 : vector<128x1xf32> to vector<128x1xbf16>
    %166 = arith.extf %165 : vector<128x1xbf16> to vector<128x1xf32>
    %167 = tpu.reciprocal %166 {approx = true} : vector<128x1xf32> -> vector<128x1xf32>
    %168 = arith.truncf %167 : vector<128x1xf32> to vector<128x1xbf16>
    %169 = vector.broadcast %168 : vector<128x1xbf16> to vector<128x128xbf16>
    %170 = arith.mulf %161, %169 : vector<128x128xbf16>
    %c0_80 = arith.constant 0 : index
    %c1536 = arith.constant 1536 : index
    %171 = vector.load %arg9[%c0_80, %c1536] : memref<128x2048xbf16, #tpu.memory_space<vmem>>, vector<128x128xbf16>
    %cst_81 = arith.constant dense<0.000000e+00> : vector<128x128xf32>
    %172 = tpu.matmul %7, %171, %cst_81 {dimension_numbers = #tpu.dot_dimension_numbers<[1], [0], [0], [1], [0, 0, 1, 1], [], []>} : vector<128x128xbf16>, vector<128x128xbf16>, vector<128x128xf32> -> vector<128x128xf32>
    %c0_82 = arith.constant 0 : index
    %c1536_83 = arith.constant 1536 : index
    %173 = vector.load %arg10[%c0_82, %c1536_83] : memref<1x2048xf32, #tpu.memory_space<vmem>>, vector<1x128xf32>
    %174 = vector.broadcast %173 : vector<1x128xf32> to vector<128x128xf32>
    %175 = arith.addf %172, %174 : vector<128x128xf32>
    %176 = arith.truncf %175 : vector<128x128xf32> to vector<128x128xbf16>
    %cst_84 = arith.constant dense<0.000000e+00> : vector<128x128xf32>
    %177 = tpu.matmul %170, %176, %cst_84 {dimension_numbers = #tpu.dot_dimension_numbers<[1], [0], [0], [1], [0, 0, 1, 1], [], []>} : vector<128x128xbf16>, vector<128x128xbf16>, vector<128x128xf32> -> vector<128x128xf32>
    %178 = arith.addf %146, %177 : vector<128x128xf32>
    %c0_85 = arith.constant 0 : index
    %c640 = arith.constant 640 : index
    %179 = vector.load %arg9[%c0_85, %c640] : memref<128x2048xbf16, #tpu.memory_space<vmem>>, vector<128x128xbf16>
    %cst_86 = arith.constant dense<0.000000e+00> : vector<128x128xf32>
    %180 = tpu.matmul %7, %179, %cst_86 {dimension_numbers = #tpu.dot_dimension_numbers<[1], [0], [0], [1], [0, 0, 1, 1], [], []>} : vector<128x128xbf16>, vector<128x128xbf16>, vector<128x128xf32> -> vector<128x128xf32>
    %c0_87 = arith.constant 0 : index
    %c640_88 = arith.constant 640 : index
    %181 = vector.load %arg10[%c0_87, %c640_88] : memref<1x2048xf32, #tpu.memory_space<vmem>>, vector<1x128xf32>
    %182 = vector.broadcast %181 : vector<1x128xf32> to vector<128x128xf32>
    %183 = arith.addf %180, %182 : vector<128x128xf32>
    %184 = arith.truncf %183 : vector<128x128xf32> to vector<128x128xbf16>
    %cst_89 = arith.constant dense<0.000000e+00> : vector<128x128xf32>
    %185 = tpu.matmul %145, %184, %cst_89 {dimension_numbers = #tpu.dot_dimension_numbers<[1], [1], [0], [0], [0, 0, 1, 0], [], []>} : vector<128x128xbf16>, vector<128x128xbf16>, vector<128x128xf32> -> vector<128x128xf32>
    %c0_90 = arith.constant 0 : index
    %c0_91 = arith.constant 0 : index
    %186 = vector.load %arg3[%c0_90, %c0_91] : memref<128x128xf32, #tpu.memory_space<vmem>>, vector<128x128xf32>
    %187 = arith.addf %185, %186 : vector<128x128xf32>
    %cst_92 = arith.constant dense<0xFF800000> : vector<128xf32>
    %188 = vector.multi_reduction <maximumf>, %187, %cst_92 [1] : vector<128x128xf32> to vector<128xf32>
    %189 = vector.shape_cast %188 : vector<128xf32> to vector<128x1xf32>
    %190 = vector.broadcast %189 : vector<128x1xf32> to vector<128x128xf32>
    %191 = arith.subf %187, %190 : vector<128x128xf32>
    %192 = arith.truncf %191 : vector<128x128xf32> to vector<128x128xbf16>
    %193 = math.exp %192 : vector<128x128xbf16>
    %194 = arith.extf %193 : vector<128x128xbf16> to vector<128x128xf32>
    %cst_93 = arith.constant dense<0.000000e+00> : vector<128xf32>
    %195 = vector.multi_reduction <add>, %194, %cst_93 [1] : vector<128x128xf32> to vector<128xf32>
    %196 = vector.shape_cast %195 : vector<128xf32> to vector<128x1xf32>
    %197 = arith.truncf %196 : vector<128x1xf32> to vector<128x1xbf16>
    %198 = arith.extf %197 : vector<128x1xbf16> to vector<128x1xf32>
    %199 = tpu.reciprocal %198 {approx = true} : vector<128x1xf32> -> vector<128x1xf32>
    %200 = arith.truncf %199 : vector<128x1xf32> to vector<128x1xbf16>
    %201 = vector.broadcast %200 : vector<128x1xbf16> to vector<128x128xbf16>
    %202 = arith.mulf %193, %201 : vector<128x128xbf16>
    %c0_94 = arith.constant 0 : index
    %c1664 = arith.constant 1664 : index
    %203 = vector.load %arg9[%c0_94, %c1664] : memref<128x2048xbf16, #tpu.memory_space<vmem>>, vector<128x128xbf16>
    %cst_95 = arith.constant dense<0.000000e+00> : vector<128x128xf32>
    %204 = tpu.matmul %7, %203, %cst_95 {dimension_numbers = #tpu.dot_dimension_numbers<[1], [0], [0], [1], [0, 0, 1, 1], [], []>} : vector<128x128xbf16>, vector<128x128xbf16>, vector<128x128xf32> -> vector<128x128xf32>
    %c0_96 = arith.constant 0 : index
    %c1664_97 = arith.constant 1664 : index
    %205 = vector.load %arg10[%c0_96, %c1664_97] : memref<1x2048xf32, #tpu.memory_space<vmem>>, vector<1x128xf32>
    %206 = vector.broadcast %205 : vector<1x128xf32> to vector<128x128xf32>
    %207 = arith.addf %204, %206 : vector<128x128xf32>
    %208 = arith.truncf %207 : vector<128x128xf32> to vector<128x128xbf16>
    %cst_98 = arith.constant dense<0.000000e+00> : vector<128x128xf32>
    %209 = tpu.matmul %202, %208, %cst_98 {dimension_numbers = #tpu.dot_dimension_numbers<[1], [0], [0], [1], [0, 0, 1, 1], [], []>} : vector<128x128xbf16>, vector<128x128xbf16>, vector<128x128xf32> -> vector<128x128xf32>
    %210 = arith.addf %178, %209 : vector<128x128xf32>
    %c0_99 = arith.constant 0 : index
    %c768 = arith.constant 768 : index
    %211 = vector.load %arg9[%c0_99, %c768] : memref<128x2048xbf16, #tpu.memory_space<vmem>>, vector<128x128xbf16>
    %cst_100 = arith.constant dense<0.000000e+00> : vector<128x128xf32>
    %212 = tpu.matmul %7, %211, %cst_100 {dimension_numbers = #tpu.dot_dimension_numbers<[1], [0], [0], [1], [0, 0, 1, 1], [], []>} : vector<128x128xbf16>, vector<128x128xbf16>, vector<128x128xf32> -> vector<128x128xf32>
    %c0_101 = arith.constant 0 : index
    %c768_102 = arith.constant 768 : index
    %213 = vector.load %arg10[%c0_101, %c768_102] : memref<1x2048xf32, #tpu.memory_space<vmem>>, vector<1x128xf32>
    %214 = vector.broadcast %213 : vector<1x128xf32> to vector<128x128xf32>
    %215 = arith.addf %212, %214 : vector<128x128xf32>
    %216 = arith.truncf %215 : vector<128x128xf32> to vector<128x128xbf16>
    %cst_103 = arith.constant dense<0.000000e+00> : vector<128x128xf32>
    %217 = tpu.matmul %145, %216, %cst_103 {dimension_numbers = #tpu.dot_dimension_numbers<[1], [1], [0], [0], [0, 0, 1, 0], [], []>} : vector<128x128xbf16>, vector<128x128xbf16>, vector<128x128xf32> -> vector<128x128xf32>
    %c0_104 = arith.constant 0 : index
    %c0_105 = arith.constant 0 : index
    %218 = vector.load %arg3[%c0_104, %c0_105] : memref<128x128xf32, #tpu.memory_space<vmem>>, vector<128x128xf32>
    %219 = arith.addf %217, %218 : vector<128x128xf32>
    %cst_106 = arith.constant dense<0xFF800000> : vector<128xf32>
    %220 = vector.multi_reduction <maximumf>, %219, %cst_106 [1] : vector<128x128xf32> to vector<128xf32>
    %221 = vector.shape_cast %220 : vector<128xf32> to vector<128x1xf32>
    %222 = vector.broadcast %221 : vector<128x1xf32> to vector<128x128xf32>
    %223 = arith.subf %219, %222 : vector<128x128xf32>
    %224 = arith.truncf %223 : vector<128x128xf32> to vector<128x128xbf16>
    %225 = math.exp %224 : vector<128x128xbf16>
    %226 = arith.extf %225 : vector<128x128xbf16> to vector<128x128xf32>
    %cst_107 = arith.constant dense<0.000000e+00> : vector<128xf32>
    %227 = vector.multi_reduction <add>, %226, %cst_107 [1] : vector<128x128xf32> to vector<128xf32>
    %228 = vector.shape_cast %227 : vector<128xf32> to vector<128x1xf32>
    %229 = arith.truncf %228 : vector<128x1xf32> to vector<128x1xbf16>
    %230 = arith.extf %229 : vector<128x1xbf16> to vector<128x1xf32>
    %231 = tpu.reciprocal %230 {approx = true} : vector<128x1xf32> -> vector<128x1xf32>
    %232 = arith.truncf %231 : vector<128x1xf32> to vector<128x1xbf16>
    %233 = vector.broadcast %232 : vector<128x1xbf16> to vector<128x128xbf16>
    %234 = arith.mulf %225, %233 : vector<128x128xbf16>
    %c0_108 = arith.constant 0 : index
    %c1792 = arith.constant 1792 : index
    %235 = vector.load %arg9[%c0_108, %c1792] : memref<128x2048xbf16, #tpu.memory_space<vmem>>, vector<128x128xbf16>
    %cst_109 = arith.constant dense<0.000000e+00> : vector<128x128xf32>
    %236 = tpu.matmul %7, %235, %cst_109 {dimension_numbers = #tpu.dot_dimension_numbers<[1], [0], [0], [1], [0, 0, 1, 1], [], []>} : vector<128x128xbf16>, vector<128x128xbf16>, vector<128x128xf32> -> vector<128x128xf32>
    %c0_110 = arith.constant 0 : index
    %c1792_111 = arith.constant 1792 : index
    %237 = vector.load %arg10[%c0_110, %c1792_111] : memref<1x2048xf32, #tpu.memory_space<vmem>>, vector<1x128xf32>
    %238 = vector.broadcast %237 : vector<1x128xf32> to vector<128x128xf32>
    %239 = arith.addf %236, %238 : vector<128x128xf32>
    %240 = arith.truncf %239 : vector<128x128xf32> to vector<128x128xbf16>
    %cst_112 = arith.constant dense<0.000000e+00> : vector<128x128xf32>
    %241 = tpu.matmul %234, %240, %cst_112 {dimension_numbers = #tpu.dot_dimension_numbers<[1], [0], [0], [1], [0, 0, 1, 1], [], []>} : vector<128x128xbf16>, vector<128x128xbf16>, vector<128x128xf32> -> vector<128x128xf32>
    %242 = arith.addf %210, %241 : vector<128x128xf32>
    %c0_113 = arith.constant 0 : index
    %c896 = arith.constant 896 : index
    %243 = vector.load %arg9[%c0_113, %c896] : memref<128x2048xbf16, #tpu.memory_space<vmem>>, vector<128x128xbf16>
    %cst_114 = arith.constant dense<0.000000e+00> : vector<128x128xf32>
    %244 = tpu.matmul %7, %243, %cst_114 {dimension_numbers = #tpu.dot_dimension_numbers<[1], [0], [0], [1], [0, 0, 1, 1], [], []>} : vector<128x128xbf16>, vector<128x128xbf16>, vector<128x128xf32> -> vector<128x128xf32>
    %c0_115 = arith.constant 0 : index
    %c896_116 = arith.constant 896 : index
    %245 = vector.load %arg10[%c0_115, %c896_116] : memref<1x2048xf32, #tpu.memory_space<vmem>>, vector<1x128xf32>
    %246 = vector.broadcast %245 : vector<1x128xf32> to vector<128x128xf32>
    %247 = arith.addf %244, %246 : vector<128x128xf32>
    %248 = arith.truncf %247 : vector<128x128xf32> to vector<128x128xbf16>
    %cst_117 = arith.constant dense<0.000000e+00> : vector<128x128xf32>
    %249 = tpu.matmul %145, %248, %cst_117 {dimension_numbers = #tpu.dot_dimension_numbers<[1], [1], [0], [0], [0, 0, 1, 0], [], []>} : vector<128x128xbf16>, vector<128x128xbf16>, vector<128x128xf32> -> vector<128x128xf32>
    %c0_118 = arith.constant 0 : index
    %c0_119 = arith.constant 0 : index
    %250 = vector.load %arg3[%c0_118, %c0_119] : memref<128x128xf32, #tpu.memory_space<vmem>>, vector<128x128xf32>
    %251 = arith.addf %249, %250 : vector<128x128xf32>
    %cst_120 = arith.constant dense<0xFF800000> : vector<128xf32>
    %252 = vector.multi_reduction <maximumf>, %251, %cst_120 [1] : vector<128x128xf32> to vector<128xf32>
    %253 = vector.shape_cast %252 : vector<128xf32> to vector<128x1xf32>
    %254 = vector.broadcast %253 : vector<128x1xf32> to vector<128x128xf32>
    %255 = arith.subf %251, %254 : vector<128x128xf32>
    %256 = arith.truncf %255 : vector<128x128xf32> to vector<128x128xbf16>
    %257 = math.exp %256 : vector<128x128xbf16>
    %258 = arith.extf %257 : vector<128x128xbf16> to vector<128x128xf32>
    %cst_121 = arith.constant dense<0.000000e+00> : vector<128xf32>
    %259 = vector.multi_reduction <add>, %258, %cst_121 [1] : vector<128x128xf32> to vector<128xf32>
    %260 = vector.shape_cast %259 : vector<128xf32> to vector<128x1xf32>
    %261 = arith.truncf %260 : vector<128x1xf32> to vector<128x1xbf16>
    %262 = arith.extf %261 : vector<128x1xbf16> to vector<128x1xf32>
    %263 = tpu.reciprocal %262 {approx = true} : vector<128x1xf32> -> vector<128x1xf32>
    %264 = arith.truncf %263 : vector<128x1xf32> to vector<128x1xbf16>
    %265 = vector.broadcast %264 : vector<128x1xbf16> to vector<128x128xbf16>
    %266 = arith.mulf %257, %265 : vector<128x128xbf16>
    %c0_122 = arith.constant 0 : index
    %c1920 = arith.constant 1920 : index
    %267 = vector.load %arg9[%c0_122, %c1920] : memref<128x2048xbf16, #tpu.memory_space<vmem>>, vector<128x128xbf16>
    %cst_123 = arith.constant dense<0.000000e+00> : vector<128x128xf32>
    %268 = tpu.matmul %7, %267, %cst_123 {dimension_numbers = #tpu.dot_dimension_numbers<[1], [0], [0], [1], [0, 0, 1, 1], [], []>} : vector<128x128xbf16>, vector<128x128xbf16>, vector<128x128xf32> -> vector<128x128xf32>
    %c0_124 = arith.constant 0 : index
    %c1920_125 = arith.constant 1920 : index
    %269 = vector.load %arg10[%c0_124, %c1920_125] : memref<1x2048xf32, #tpu.memory_space<vmem>>, vector<1x128xf32>
    %270 = vector.broadcast %269 : vector<1x128xf32> to vector<128x128xf32>
    %271 = arith.addf %268, %270 : vector<128x128xf32>
    %272 = arith.truncf %271 : vector<128x128xf32> to vector<128x128xbf16>
    %cst_126 = arith.constant dense<0.000000e+00> : vector<128x128xf32>
    %273 = tpu.matmul %266, %272, %cst_126 {dimension_numbers = #tpu.dot_dimension_numbers<[1], [0], [0], [1], [0, 0, 1, 1], [], []>} : vector<128x128xbf16>, vector<128x128xbf16>, vector<128x128xf32> -> vector<128x128xf32>
    %274 = arith.addf %242, %273 : vector<128x128xf32>
    %275 = arith.truncf %274 : vector<128x128xf32> to vector<128x128xbf16>
    %c0_127 = arith.constant 0 : index
    %c0_128 = arith.constant 0 : index
    %276 = vector.load %arg11[%c0_127, %c0_128] : memref<128x128xbf16, #tpu.memory_space<vmem>>, vector<128x128xbf16>
    %cst_129 = arith.constant dense<0.000000e+00> : vector<128x128xf32>
    %277 = tpu.matmul %7, %276, %cst_129 {dimension_numbers = #tpu.dot_dimension_numbers<[1], [0], [0], [1], [0, 0, 1, 1], [], []>} : vector<128x128xbf16>, vector<128x128xbf16>, vector<128x128xf32> -> vector<128x128xf32>
    %c0_130 = arith.constant 0 : index
    %c0_131 = arith.constant 0 : index
    %278 = vector.load %arg12[%c0_130, %c0_131] : memref<128x128xbf16, #tpu.memory_space<vmem>>, vector<128x128xbf16>
    %cst_132 = arith.constant dense<0.000000e+00> : vector<128x128xf32>
    %279 = tpu.matmul %144, %278, %cst_132 {dimension_numbers = #tpu.dot_dimension_numbers<[1], [0], [0], [1], [0, 0, 1, 1], [], []>} : vector<128x128xbf16>, vector<128x128xbf16>, vector<128x128xf32> -> vector<128x128xf32>
    %280 = arith.addf %277, %279 : vector<128x128xf32>
    %c0_133 = arith.constant 0 : index
    %c0_134 = arith.constant 0 : index
    %281 = vector.load %arg13[%c0_133, %c0_134] : memref<128x128xbf16, #tpu.memory_space<vmem>>, vector<128x128xbf16>
    %cst_135 = arith.constant dense<0.000000e+00> : vector<128x128xf32>
    %282 = tpu.matmul %275, %281, %cst_135 {dimension_numbers = #tpu.dot_dimension_numbers<[1], [0], [0], [1], [0, 0, 1, 1], [], []>} : vector<128x128xbf16>, vector<128x128xbf16>, vector<128x128xf32> -> vector<128x128xf32>
    %283 = arith.addf %280, %282 : vector<128x128xf32>
    %c0_136 = arith.constant 0 : index
    %c0_137 = arith.constant 0 : index
    %284 = vector.load %arg14[%c0_136, %c0_137] : memref<1x128xf32, #tpu.memory_space<vmem>>, vector<1x128xf32>
    %285 = vector.broadcast %284 : vector<1x128xf32> to vector<128x128xf32>
    %286 = arith.addf %283, %285 : vector<128x128xf32>
    %287 = arith.truncf %286 : vector<128x128xf32> to vector<128x128xbf16>
    %c0_138 = arith.constant 0 : index
    %c0_139 = arith.constant 0 : index
    %288 = vector.load %arg15[%c0_138, %c0_139] : memref<128x128xbf16, #tpu.memory_space<vmem>>, vector<128x128xbf16>
    %cst_140 = arith.constant dense<0.000000e+00> : vector<128x128xf32>
    %289 = tpu.matmul %287, %288, %cst_140 {dimension_numbers = #tpu.dot_dimension_numbers<[1], [0], [0], [1], [0, 0, 1, 1], [], []>} : vector<128x128xbf16>, vector<128x128xbf16>, vector<128x128xf32> -> vector<128x128xf32>
    %c0_141 = arith.constant 0 : index
    %c0_142 = arith.constant 0 : index
    %290 = vector.load %arg16[%c0_141, %c0_142] : memref<1x128xf32, #tpu.memory_space<vmem>>, vector<1x128xf32>
    %291 = vector.broadcast %290 : vector<1x128xf32> to vector<128x128xf32>
    %292 = arith.addf %289, %291 : vector<128x128xf32>
    %c0_143 = arith.constant 0 : index
    %c0_144 = arith.constant 0 : index
    %293 = vector.load %arg4[%c0_143, %c0_144] : memref<8x128xf32, #tpu.memory_space<vmem>>, vector<1x128xf32>
    %c1 = arith.constant 1 : index
    %c0_145 = arith.constant 0 : index
    %294 = vector.load %arg4[%c1, %c0_145] : memref<8x128xf32, #tpu.memory_space<vmem>>, vector<1x128xf32>
    %c2 = arith.constant 2 : index
    %c0_146 = arith.constant 0 : index
    %295 = vector.load %arg4[%c2, %c0_146] : memref<8x128xf32, #tpu.memory_space<vmem>>, vector<1x128xf32>
    %c3 = arith.constant 3 : index
    %c0_147 = arith.constant 0 : index
    %296 = vector.load %arg4[%c3, %c0_147] : memref<8x128xf32, #tpu.memory_space<vmem>>, vector<1x128xf32>
    %c4 = arith.constant 4 : index
    %c0_148 = arith.constant 0 : index
    %297 = vector.load %arg4[%c4, %c0_148] : memref<8x128xf32, #tpu.memory_space<vmem>>, vector<1x128xf32>
    %298 = vector.broadcast %293 : vector<1x128xf32> to vector<128x128xf32>
    %299 = arith.addf %292, %298 : vector<128x128xf32>
    %cst_149 = arith.constant dense<0xFF800000> : vector<128xf32>
    %300 = vector.multi_reduction <maximumf>, %299, %cst_149 [1] : vector<128x128xf32> to vector<128xf32>
    %301 = vector.shape_cast %300 : vector<128xf32> to vector<128x1xf32>
    %302 = vector.broadcast %294 : vector<1x128xf32> to vector<128x128xf32>
    %303 = arith.addf %292, %302 : vector<128x128xf32>
    %cst_150 = arith.constant dense<0xFF800000> : vector<128xf32>
    %304 = vector.multi_reduction <maximumf>, %303, %cst_150 [1] : vector<128x128xf32> to vector<128xf32>
    %305 = vector.shape_cast %304 : vector<128xf32> to vector<128x1xf32>
    %306 = vector.broadcast %295 : vector<1x128xf32> to vector<128x128xf32>
    %307 = arith.addf %292, %306 : vector<128x128xf32>
    %308 = vector.broadcast %301 : vector<128x1xf32> to vector<128x128xf32>
    %309 = vector.broadcast %296 : vector<1x128xf32> to vector<128x128xf32>
    %310 = arith.mulf %308, %309 : vector<128x128xf32>
    %311 = vector.broadcast %305 : vector<128x1xf32> to vector<128x128xf32>
    %312 = vector.broadcast %297 : vector<1x128xf32> to vector<128x128xf32>
    %313 = arith.mulf %311, %312 : vector<128x128xf32>
    %314 = arith.addf %310, %313 : vector<128x128xf32>
    %315 = arith.subf %307, %314 : vector<128x128xf32>
    %316 = math.exp %315 : vector<128x128xf32>
    %317 = vector.broadcast %296 : vector<1x128xf32> to vector<128x128xf32>
    %318 = arith.mulf %316, %317 : vector<128x128xf32>
    %cst_151 = arith.constant dense<0.000000e+00> : vector<128xf32>
    %319 = vector.multi_reduction <add>, %318, %cst_151 [1] : vector<128x128xf32> to vector<128xf32>
    %320 = vector.shape_cast %319 : vector<128xf32> to vector<128x1xf32>
    %321 = vector.broadcast %297 : vector<1x128xf32> to vector<128x128xf32>
    %322 = arith.mulf %316, %321 : vector<128x128xf32>
    %cst_152 = arith.constant dense<0.000000e+00> : vector<128xf32>
    %323 = vector.multi_reduction <add>, %322, %cst_152 [1] : vector<128x128xf32> to vector<128xf32>
    %324 = vector.shape_cast %323 : vector<128xf32> to vector<128x1xf32>
    %325 = tpu.reciprocal %320 {approx = true} : vector<128x1xf32> -> vector<128x1xf32>
    %326 = vector.broadcast %296 : vector<1x128xf32> to vector<128x128xf32>
    %327 = vector.broadcast %325 : vector<128x1xf32> to vector<128x128xf32>
    %328 = arith.mulf %326, %327 : vector<128x128xf32>
    %329 = tpu.reciprocal %324 {approx = true} : vector<128x1xf32> -> vector<128x1xf32>
    %330 = vector.broadcast %297 : vector<1x128xf32> to vector<128x128xf32>
    %331 = vector.broadcast %329 : vector<128x1xf32> to vector<128x128xf32>
    %332 = arith.mulf %330, %331 : vector<128x128xf32>
    %333 = arith.addf %328, %332 : vector<128x128xf32>
    %334 = arith.mulf %316, %333 : vector<128x128xf32>
    %c0_153 = arith.constant 0 : index
    %c0_154 = arith.constant 0 : index
    %335 = vector.load %arg17[%c0_153, %c0_154] : memref<128x128xf32, #tpu.memory_space<vmem>>, vector<128x128xf32>
    tpu.vector_store %arg17[%c0_153, %c0_154], %334 {strides = array<i32>} : memref<128x128xf32, #tpu.memory_space<vmem>>, vector<128x128xf32>,
    return
  }
  func.func @transform_0(%arg0: i32) -> (i32, i32) {
    %c0_i32 = arith.constant 0 : i32
    %c0_i32_0 = arith.constant 0 : i32
    return %arg0, %c0_i32 : i32, i32
  }
  func.func @transform_1(%arg0: i32) -> (i32, i32) {
    %c0_i32 = arith.constant 0 : i32
    %c0_i32_0 = arith.constant 0 : i32
    return %arg0, %c0_i32 : i32, i32
  }
  func.func @transform_2(%arg0: i32) -> (i32, i32) {
    %c0_i32 = arith.constant 0 : i32
    %c0_i32_0 = arith.constant 0 : i32
    %c0_i32_1 = arith.constant 0 : i32
    return %c0_i32, %c0_i32_0 : i32, i32
  }
  func.func @transform_3(%arg0: i32) -> (i32, i32) {
    %c0_i32 = arith.constant 0 : i32
    %c0_i32_0 = arith.constant 0 : i32
    %c0_i32_1 = arith.constant 0 : i32
    return %c0_i32, %c0_i32_0 : i32, i32
  }
  func.func @transform_4(%arg0: i32) -> (i32, i32) {
    %c0_i32 = arith.constant 0 : i32
    %c0_i32_0 = arith.constant 0 : i32
    %c0_i32_1 = arith.constant 0 : i32
    return %c0_i32, %c0_i32_0 : i32, i32
  }
  func.func @transform_5(%arg0: i32) -> (i32, i32) {
    %c0_i32 = arith.constant 0 : i32
    %c0_i32_0 = arith.constant 0 : i32
    %c0_i32_1 = arith.constant 0 : i32
    return %c0_i32, %c0_i32_0 : i32, i32
  }
  func.func @transform_6(%arg0: i32) -> (i32, i32) {
    %c0_i32 = arith.constant 0 : i32
    %c0_i32_0 = arith.constant 0 : i32
    %c0_i32_1 = arith.constant 0 : i32
    return %c0_i32, %c0_i32_0 : i32, i32
  }
  func.func @transform_7(%arg0: i32) -> (i32, i32) {
    %c0_i32 = arith.constant 0 : i32
    %c0_i32_0 = arith.constant 0 : i32
    %c0_i32_1 = arith.constant 0 : i32
    return %c0_i32, %c0_i32_0 : i32, i32
  }
  func.func @transform_8(%arg0: i32) -> (i32, i32) {
    %c0_i32 = arith.constant 0 : i32
    %c0_i32_0 = arith.constant 0 : i32
    %c0_i32_1 = arith.constant 0 : i32
    return %c0_i32, %c0_i32_0 : i32, i32
  }
  func.func @transform_9(%arg0: i32) -> (i32, i32) {
    %c0_i32 = arith.constant 0 : i32
    %c0_i32_0 = arith.constant 0 : i32
    %c0_i32_1 = arith.constant 0 : i32
    return %c0_i32, %c0_i32_0 : i32, i32
  }
  func.func @transform_10(%arg0: i32) -> (i32, i32) {
    %c0_i32 = arith.constant 0 : i32
    %c0_i32_0 = arith.constant 0 : i32
    %c0_i32_1 = arith.constant 0 : i32
    return %c0_i32, %c0_i32_0 : i32, i32
  }
  func.func @transform_11(%arg0: i32) -> (i32, i32) {
    %c0_i32 = arith.constant 0 : i32
    %c0_i32_0 = arith.constant 0 : i32
    %c0_i32_1 = arith.constant 0 : i32
    return %c0_i32, %c0_i32_0 : i32, i32
  }
  func.func @transform_12(%arg0: i32) -> (i32, i32) {
    %c0_i32 = arith.constant 0 : i32
    %c0_i32_0 = arith.constant 0 : i32
    %c0_i32_1 = arith.constant 0 : i32
    return %c0_i32, %c0_i32_0 : i32, i32
  }
  func.func @transform_13(%arg0: i32) -> (i32, i32) {
    %c0_i32 = arith.constant 0 : i32
    %c0_i32_0 = arith.constant 0 : i32
    %c0_i32_1 = arith.constant 0 : i32
    return %c0_i32, %c0_i32_0 : i32, i32
  }
  func.func @transform_14(%arg0: i32) -> (i32, i32) {
    %c0_i32 = arith.constant 0 : i32
    %c0_i32_0 = arith.constant 0 : i32
    %c0_i32_1 = arith.constant 0 : i32
    return %c0_i32, %c0_i32_0 : i32, i32
  }
  func.func @transform_15(%arg0: i32) -> (i32, i32) {
    %c0_i32 = arith.constant 0 : i32
    %c0_i32_0 = arith.constant 0 : i32
    %c0_i32_1 = arith.constant 0 : i32
    return %c0_i32, %c0_i32_0 : i32, i32
  }
  func.func @transform_16(%arg0: i32) -> (i32, i32) {
    %c0_i32 = arith.constant 0 : i32
    %c0_i32_0 = arith.constant 0 : i32
    return %arg0, %c0_i32 : i32, i32
  }
}

</mosaic_0001>

<bundles_post_ra>
// kernel: complaint_identification.1
= control target key start
LH: loop header
LB: loop body
LE: loop exit
PB: predicated region body
PF: predicated region fallthrough
CT: control target
= control target key end

     0   :  { %s11104_s21 = smov 0   ;;  %s14545_s0 = inlined_call_operand.vmem [shape: bf16[512,128], index: 0, kind: input, shape index: {}]   ;;  %s14546_s1 = inlined_call_operand.vmem [shape: bf16[512,96], index: 1, kind: input, shape index: {}]   ;;  %s14547_s2 = inlined_call_operand.vmem [shape: f32[128,128], index: 2, kind: input, shape index: {}]   ;;  %s14548_s3 = inlined_call_operand.vmem [shape: f32[8,128], index: 3, kind: input, shape index: {}]   ;;  %s14549_s4 = inlined_call_operand.vmem [shape: bf16[128,128], index: 4, kind: input, shape index: {}]   ;;  %s14550_s5 = inlined_call_operand.vmem [shape: f32[1,128], index: 5, kind: input, shape index: {}]   ;;  %s14551_s6 = inlined_call_operand.vmem [shape: bf16[96,256], index: 6, kind: input, shape index: {}]   ;;  %s14552_s7 = inlined_call_operand.vmem [shape: f32[1,256], index: 7, kind: input, shape index: {}]   ;;  %s14553_s8 = inlined_call_operand.vmem [shape: bf16[128,2048], index: 8, kind: input, shape index: {}]   ;;  %s14554_s9 = inlined_call_operand.vmem [shape: f32[1,2048], index: 9, kind: input, shape index: {}]   ;;  %s14555_s10 = inlined_call_operand.vmem [shape: bf16[128,128], index: 10, kind: input, shape index: {}]   ;;  %s14556_s11 = inlined_call_operand.vmem [shape: bf16[128,128], index: 11, kind: input, shape index: {}]   ;;  %s14557_s12 = inlined_call_operand.vmem [shape: bf16[128,128], index: 12, kind: input, shape index: {}]   ;;  %s14558_s13 = inlined_call_operand.vmem [shape: f32[1,128], index: 13, kind: input, shape index: {}]   ;;  %s14559_s14 = inlined_call_operand.vmem [shape: bf16[128,128], index: 14, kind: input, shape index: {}]   ;;  %s14560_s15 = inlined_call_operand.vmem [shape: f32[1,128], index: 15, kind: input, shape index: {}]   ;;  %s14561_s16 = inlined_call_operand.vmem [shape: f32[512,128], index: 16, kind: output, shape index: {}]  }
   0x1   :  { %14641 = sst [smem:[#allocation43_spill]] %s14545_s0 }
   0x2 LB: > { %s8225_s22 = sadd.s32 4294967295, %s11016_s21   ;;  %p8229_p0 = scmp.ge.s32.totalorder %s11016_s21, 1  ;;  %s11016_s21 = sphi %s11104_s21, %s26_s21  }
   0x3   : > { %p474_p1 = scmp.lt.s32.totalorder %s11016_s21, 5 }
   0x5   : > { %p475_p2 = pnand %p8229_p0, %p474_p1 }
   0x7   : > { %478 = sbr.rel (%p475_p2) target bundleno = 5220 (0x1464), region = 84 }
   0xe   : > { %v10379_v0 = vld [vmem:[%s14549_s4] sm:$0xff]   ;;  %s8230_s25 = sshll.u32 %s8225_s22, 4  ;;  %v10380_v1 = vld [vmem:[%s14549_s4 + $0x8] sm:$0xff]   ;;  %v10381_v2 = vld [vmem:[%s14549_s4 + $0x10] sm:$0xff]   ;;  %s14642_s18 = sld [smem:[#allocation43_spill]]  ;;  %v11018_v56 = vmov 0  }
   0xf   : > { %p530_p3 = scmp.lt.s32.totalorder %s8230_s25, 63  ;;  %9058 = vmatprep.subr.bf16.mxu0 %v10379_v0  ;;  %v10382_v3 = vld [vmem:[%s14549_s4 + $0x18] sm:$0xff]   ;;  %v10383_v5 = vld [vmem:[%s14549_s4 + $0x20] sm:$0xff]   ;;  %v10384_v6 = vld [vmem:[%s14549_s4 + $0x28] sm:$0xff]   ;;  %985 = vmatprep.mubr.bf16.mxu1 %v11018_v56  ;;  %vm928_vm0 = vcmask 785408  }
  0x10   : > { %9059 = vmatpush3.bf16.msra.mxu0 %v10379_v0  ;;  %v10385_v7 = vld [vmem:[%s14549_s4 + $0x30] sm:$0xff]   ;;  %v10386_v8 = vld [vmem:[%s14549_s4 + $0x38] sm:$0xff]   ;;  %v1082_v9 = vld [vmem:[%s14553_s8] sm:$0xf] }
  0x11   : > { %s14799_s25 = smov (!%p530_p3, %s8230_s25), 63  ;;  %9060 = vmatprep.subr.bf16.mxu0 %v10380_v1  ;;  %v1083_v10 = vld [vmem:[%s14553_s8 + $0x40] sm:$0xf]  ;;  %v10395_v43 = vld [vmem:[%s14551_s6 + $0x4] ss:$8 sps:$4 sm:$0xff]  }
  0x12   : > { %s8231_s30 = sshll.u32 %s14799_s25, 2  ;;  %v1084_v11 = vld [vmem:[%s14553_s8 + $0x80] sm:$0xf]  ;;  %v8282_v14 = vcombine.low %v1082_v9, %v1083_v10  ;;  %953 = vmatprep.subr.bf16.mxu1 %v10395_v43  ;;  %v10398_v45 = vld [vmem:[%s14551_s6 + $0x14] ss:$8 sps:$4 sm:$0xff]  }
  0x13   : > { %s11148_s22 = scalar_lea.vmem %s14546_s1, %s8231_s30  ;;  %v1085_v12 = vld [vmem:[%s14553_s8 + $0xc0] sm:$0xf]  ;;  %v10400_v46 = vld [vmem:[%s14551_s6 + $0x10] ss:$8 sps:$4 sm:$0xff]   ;;  %v10401_v47 = vld [vmem:[%s14551_s6 + $0x24] ss:$8 sps:$4 sm:$0xff]  }
  0x14   : > { %s11127_s19 = scalar_lea.vmem %s14642_s18, %s8231_s30  ;;  %9061 = vmatpush3.bf16.msra.mxu0 %v10380_v1  ;;  %v1086_v16 = vld [vmem:[%s14553_s8 + $0x100] sm:$0xf]  ;;  %v8283_v18 = vcombine.low %v1084_v11, %v1085_v12  ;;  %v10404_v49 = vld [vmem:[%s14551_s6 + $0x34] ss:$8 sps:$4 sm:$0xff]   ;;  %v10406_v50 = vld [vmem:[%s14551_s6 + $0x30] ss:$8 sps:$4 sm:$0xff]  }
  0x15   : > { %9062 = vmatprep.subr.bf16.mxu0 %v10381_v2  ;;  %v10387_v4 = vld [vmem:[%s11127_s19] sm:$0xff]   ;;  %v10388_v13 = vld [vmem:[%s11127_s19 + $0x8] sm:$0xff]   ;;  %v10389_v15 = vld [vmem:[%s11127_s19 + $0x10] sm:$0xff]  }
  0x16   : > { %9074 = vmatprep.mubr.bf16.mxu0 %v10387_v4  ;;  %v1087_v17 = vld [vmem:[%s14553_s8 + $0x140] sm:$0xf]  ;;  %v10390_v21 = vld [vmem:[%s11127_s19 + $0x18] sm:$0xff]   ;;  %v10392_v29 = vld [vmem:[%s11127_s19 + $0x28] sm:$0xff]  }
  0x17   : > { %v1088_v19 = vld [vmem:[%s14553_s8 + $0x180] sm:$0xf]  ;;  %v8284_v22 = vcombine.low %v1086_v16, %v1087_v17  ;;  %v10393_v31 = vld [vmem:[%s11127_s19 + $0x30] sm:$0xff]   ;;  %v10394_v33 = vld [vmem:[%s11127_s19 + $0x38] sm:$0xff]  }
  0x18   : > { %9063 = vmatpush3.bf16.msra.mxu0 %v10381_v2  ;;  %v1089_v20 = vld [vmem:[%s14553_s8 + $0x1c0] sm:$0xf]  ;;  %v10407_v51 = vld [vmem:[%s14551_s6 + $0x44] ss:$8 sps:$4 sm:$0xff]   ;;  %v10410_v53 = vld [vmem:[%s14551_s6 + $0x54] ss:$8 sps:$4 sm:$0xff]  }
  0x19   : > { %9064 = vmatprep.subr.bf16.mxu0 %v10382_v3  ;;  %v10391_v23 = vld [vmem:[%s11127_s19 + $0x20] sm:$0xff]   ;;  %v8285_v26 = vcombine.low %v1088_v19, %v1089_v20  ;;  %v10412_v54 = vld [vmem:[%s14551_s6 + $0x50] ss:$8 sps:$4 sm:$0xff]   ;;  %v10414_v57 = vld [vmem:[%s11148_s22 + $0x8] sm:$0xff]   ;;  %s8235_s19 = sshll.u32 %s14799_s25, 3 }
  0x1a   : > { %v1090_v24 = vld [vmem:[%s14553_s8 + $0x200] sm:$0xf]  ;;  %v10415_v58 = vld [vmem:[%s11148_s22 + $0x10] sm:$0xff]   ;;  %v10416_v59 = vld [vmem:[%s11148_s22 + $0x18] sm:$0xff]   ;;  %s14480_s24 = scalar_lea.vmem %s14561_s16, %s8235_s19 }
  0x1b   : > { %v1091_v25 = vld [vmem:[%s14553_s8 + $0x240] sm:$0xf]  ;;  %v10418_v61 = vld [vmem:[%s11148_s22 + $0x28] sm:$0xff]   ;;  %v10419_v62 = vld [vmem:[%s11148_s22 + $0x30] sm:$0xff]  }
  0x1c   : > { %9065 = vmatpush3.bf16.msra.mxu0 %v10382_v3  ;;  %v1092_v27 = vld [vmem:[%s14553_s8 + $0x280] sm:$0xf]  ;;  %v8286_v30 = vcombine.low %v1090_v24, %v1091_v25  ;;  %v10420_v63 = vld [vmem:[%s11148_s22 + $0x38] sm:$0xff]  }
  0x1d   : > { %9066 = vmatprep.subr.bf16.mxu0 %v10383_v5  ;;  %v1093_v28 = vld [vmem:[%s14553_s8 + $0x2c0] sm:$0xf] }
  0x1e   : > { %v8287_v32 = vcombine.low %v1092_v27, %v1093_v28  ;;  %v1094_v34 = vld [vmem:[%s14553_s8 + $0x300] sm:$0xf] }
  0x1f   : > { %v1095_v35 = vld [vmem:[%s14553_s8 + $0x340] sm:$0xf] }
  0x20   : > { %9067 = vmatpush3.bf16.msra.mxu0 %v10383_v5  ;;  %v8288_v36 = vcombine.low %v1094_v34, %v1095_v35  ;;  %v1096_v37 = vld [vmem:[%s14553_s8 + $0x380] sm:$0xf] }
  0x21   : > { %9068 = vmatprep.subr.bf16.mxu0 %v10384_v6  ;;  %v1097_v38 = vld [vmem:[%s14553_s8 + $0x3c0] sm:$0xf] }
  0x22   : > { %v8289_v39 = vcombine.low %v1096_v37, %v1097_v38  ;;  %v1555_v40 = vld [vmem:[%s14553_s8 + $0x20] sm:$0xf] }
  0x23   : > { %v1556_v41 = vld [vmem:[%s14553_s8 + $0x60] sm:$0xf] }
  0x24   : > { %9069 = vmatpush3.bf16.msra.mxu0 %v10384_v6  ;;  %v11211_v42 = vcombine.low %v1555_v40, %v1556_v41  ;;  %v10397_v44 = vld [vmem:[%s14551_s6] ss:$8 sps:$4 sm:$0xff]  }
  0x25   : > { %9070 = vmatprep.subr.bf16.mxu0 %v10385_v7  ;;  %954 = vmatpush1.bf16.msra.mxu1 %v10397_v44  ;;  %v10403_v48 = vld [vmem:[%s14551_s6 + $0x20] ss:$8 sps:$4 sm:$0xff]  }
  0x26   : > { %955 = vmatprep.subr.bf16.mxu1 %v10398_v45  ;;  %v10409_v52 = vld [vmem:[%s14551_s6 + $0x40] ss:$8 sps:$4 sm:$0xff]  }
  0x27   : > { %v10413_v55 = vld [vmem:[%s11148_s22] sm:$0xff]  }
  0x28   : > { %9071 = vmatpush3.bf16.msra.mxu0 %v10385_v7  ;;  %v10417_v60 = vld [vmem:[%s11148_s22 + $0x20] sm:$0xff]  }
  0x29   : > { %9072 = vmatprep.subr.bf16.mxu0 %v10386_v8  ;;  %956 = vmatpush1.bf16.msra.mxu1 %v10400_v46  ;;  %v11269_v1 = vld [vmem:[%s14550_s5] ss:$0 sm:$0xff] }
  0x2a   : > { %957 = vmatprep.subr.bf16.mxu1 %v10401_v47  ;;  %v1557_v9 = vld [vmem:[%s14553_s8 + $0xa0] sm:$0xf] }
  0x2b   : > { %v1558_v10 = vld [vmem:[%s14553_s8 + $0xe0] sm:$0xf] }
  0x2c   : > { %9073 = vmatpush3.bf16.msra.mxu0 %v10386_v8  ;;  %v1560_v16 = vld [vmem:[%s14553_s8 + $0x160] sm:$0xf] }
  0x2d   : > { %9090 = vmatprep.subr.bf16.mxu0 %v8282_v14  ;;  %958 = vmatpush1.bf16.msra.mxu1 %v10403_v48  ;;  %v1561_v25 = vld [vmem:[%s14553_s8 + $0x1a0] sm:$0xf] }
  0x2e   : > { %959 = vmatprep.subr.bf16.mxu1 %v10404_v49  ;;  %v1565_v41 = vld [vmem:[%s14553_s8 + $0x2a0] sm:$0xf] }
  0x2f   : > { %9075 = vmatmul.mubr.bf16.vlgmr.msra.gmra.mrb[0].mxu0 %v10388_v13  ;;  %v8292_v13 = vcombine.low %v1557_v9, %v1558_v10  ;;  %v1567_v47 = vld [vmem:[%s14553_s8 + $0x320] sm:$0xf] }
  0x30   : > { %9078 = vmatprep.mubr.bf16.mxu0 %v10389_v15  ;;  %9091 = vmatpush3.bf16.msra.mxu0 %v8282_v14  ;;  %v1559_v15 = vld [vmem:[%s14553_s8 + $0x120] sm:$0xf] }
  0x31   : > { %9092 = vmatprep.subr.bf16.mxu0 %v8283_v18  ;;  %960 = vmatpush1.bf16.msra.mxu1 %v10406_v50  ;;  %v1568_v48 = vld [vmem:[%s14553_s8 + $0x360] sm:$0xf] }
  0x32   : > { %961 = vmatprep.subr.bf16.mxu1 %v10407_v51 }
  0x34   : > { %9093 = vmatpush3.bf16.msra.mxu0 %v8283_v18 }
  0x35   : > { %9094 = vmatprep.subr.bf16.mxu0 %v8284_v22  ;;  %962 = vmatpush1.bf16.msra.mxu1 %v10409_v52 }
  0x36   : > { %963 = vmatprep.subr.bf16.mxu1 %v10410_v53 }
  0x37   : > { %9079 = vmatmul.mubr.bf16.gmra.mrb[4].mxu0 %v10390_v21 }
  0x38   : > { %9082 = vmatprep.mubr.bf16.mxu0 %v10391_v23  ;;  %9095 = vmatpush3.bf16.msra.mxu0 %v8284_v22  ;;  %v8293_v23 = vcombine.low %v1559_v15, %v1560_v16 }
  0x39   : > { %9096 = vmatprep.subr.bf16.mxu0 %v8285_v26  ;;  %964 = vmatpush1.bf16.msra.mxu1 %v10412_v54 }
  0x3c   : > { %9097 = vmatpush3.bf16.msra.mxu0 %v8285_v26  ;;  %8273 = vmatmul.mubr.msk.bf16.vlgmr.msra.gmra.mrb[0].mxu1 %vm928_vm0, %v10413_v55  ;;  %v1562_v26 = vld [vmem:[%s14553_s8 + $0x1e0] sm:$0xf]  ;;  %v8297_v55 = vcombine.low %v1567_v47, %v1568_v48 }
  0x3d   : > { %9098 = vmatprep.subr.bf16.mxu0 %v8286_v30  ;;  %995 = vmatprep.mubr.bf16.mxu1 %v11018_v56 }
  0x3f   : > { %9083 = vmatmul.mubr.bf16.gmra.mrb[8].mxu0 %v10392_v29  ;;  %v8294_v29 = vcombine.low %v1561_v25, %v1562_v26 }
  0x40   : > { %9086 = vmatprep.mubr.bf16.mxu0 %v10393_v31  ;;  %9099 = vmatpush3.bf16.msra.mxu0 %v8286_v30  ;;  %v1563_v31 = vld [vmem:[%s14553_s8 + $0x220] sm:$0xf] }
  0x41   : > { %9100 = vmatprep.subr.bf16.mxu0 %v8287_v32 }
  0x44   : > { %9101 = vmatpush3.bf16.msra.mxu0 %v8287_v32  ;;  %8274 = vmatmul.mubr.msk.bf16.gmra.mrb[4].mxu1 %vm928_vm0, %v10414_v57  ;;  %v1564_v32 = vld [vmem:[%s14553_s8 + $0x260] sm:$0xf] }
  0x45   : > { %9102 = vmatprep.subr.bf16.mxu0 %v8288_v36  ;;  %1005 = vmatprep.mubr.bf16.mxu1 %v11018_v56  ;;  %v1569_v57 = vld [vmem:[%s14553_s8 + $0x3a0] sm:$0xf] }
  0x47   : > { %9087 = vmatmul.mubr.bf16.gmra.mrb[12].mxu0 %v10394_v33 }
  0x48   : > { %9103 = vmatpush3.bf16.msra.mxu0 %v8288_v36 }
  0x49   : > { %9104 = vmatprep.subr.bf16.mxu0 %v8289_v39 }
  0x4c   : > { %9105 = vmatpush3.bf16.msra.mxu0 %v8289_v39  ;;  %8275 = vmatmul.mubr.msk.bf16.gmra.mrb[8].mxu1 %vm928_vm0, %v10415_v58  ;;  %v8295_v39 = vcombine.low %v1563_v31, %v1564_v32  ;;  %v1570_v58 = vld [vmem:[%s14553_s8 + $0x3e0] sm:$0xf] }
  0x4d   : > { %9154 = vmatprep.subr.bf16.mxu0 %v11211_v42  ;;  %1015 = vmatprep.mubr.bf16.mxu1 %v11018_v56 }
  0x54   : > { %8276 = vmatmul.mubr.msk.bf16.gmra.mrb[12].mxu1 %vm928_vm0, %v10416_v59 }
  0x55   : > { %1025 = vmatprep.mubr.bf16.mxu1 %v11018_v56 }
  0x5c   : > { %8277 = vmatmul.mubr.msk.bf16.gmra.mrb[16].mxu1 %vm928_vm0, %v10417_v60 }
  0x5d   : > { %1035 = vmatprep.mubr.bf16.mxu1 %v11018_v56 }
  0x64   : > { %8278 = vmatmul.mubr.msk.bf16.gmra.mrb[20].mxu1 %vm928_vm0, %v10418_v61  ;;  %v8298_v61 = vcombine.low %v1569_v57, %v1570_v58 }
  0x65   : > { %1045 = vmatprep.mubr.bf16.mxu1 %v11018_v56 }
  0x6c   : > { %8279 = vmatmul.mubr.msk.bf16.gmra.mrb[24].mxu1 %vm928_vm0, %v10419_v62  ;;  %v818_v62 = vlaneseq }
  0x6d   : > { %1055 = vmatprep.mubr.bf16.mxu1 %v11018_v56 }
  0x74   : > { %8280 = vmatmul.mubr.msk.bf16.gmra.mrb[28].mxu1 %vm928_vm0, %v10420_v63  ;;  %v819_v63 = vshrl.u32 %v818_v62, 7 }
 0x102   : > { %v9076_v0 = vpop.f32.mrb[0].mxu0 }
 0x103   : > { %v733_v2 = vpop.f32.mrb[1].mxu0  ;;  %v742_v4 = vadd.f32 %v9076_v0, %v11269_v1  ;;  %v816_v0 = vld [vmem:[%s14552_s7] sm:$0x3] }
 0x104   : > { %v9077_v3 = vpop.f32.mrb[2].mxu0  ;;  %v734_v7 = vadd.f32 %v11269_v1, %v733_v2 }
 0x105   : > { %v745_v5 = vadd.f32 %v9077_v3, %v11269_v1  ;;  %v736_v6 = vpop.f32.mrb[3].mxu0  ;;  %v824_v3 = vsub.s32 1, %v819_v63 }
 0x106   : > { %v737_v8 = vadd.f32 %v11269_v1, %v736_v6 }
 0x107   : > { %v11281_v11 = vpack.c.bf16 %v745_v5, %v742_v4  ;;  %v11367_v6 = vrot.slane %v816_v0, %v824_v3 }
 0x108   : > { %v11283_v12 = vpack.c.bf16 %v737_v8, %v734_v7 }
 0x10a   : > { %v9080_v14 = vpop.f32.mrb[4].mxu0  ;;  %9106 = vmatprep.mubr.bf16.mxu0 %v11283_v12 }
 0x10b   : > { %v758_v17 = vadd.f32 %v9080_v14, %v11269_v1  ;;  %v749_v18 = vpop.f32.mrb[5].mxu0  ;;  %9107 = vmatmul.mubr.bf16.vlgmr.msra.gmra.mrb[16].mxu0 %v11281_v11 }
 0x10c   : > { %v750_v19 = vadd.f32 %v11269_v1, %v749_v18  ;;  %v9081_v20 = vpop.f32.mrb[6].mxu0  ;;  %9155 = vmatpush3.bf16.msra.mxu0 %v11211_v42  ;;  %v1566_v42 = vld [vmem:[%s14553_s8 + $0x2e0] sm:$0xf] }
 0x10d   : > { %v761_v21 = vadd.f32 %v9081_v20, %v11269_v1  ;;  %v752_v22 = vpop.f32.mrb[7].mxu0  ;;  %9156 = vmatprep.subr.bf16.mxu0 %v8292_v13  ;;  %v8296_v45 = vcombine.low %v1565_v41, %v1566_v42 }
 0x10e   : > { %v753_v24 = vadd.f32 %v11269_v1, %v752_v22 }
 0x10f   : > { %v11304_v27 = vpack.c.bf16 %v761_v21, %v758_v17  ;;  %v987_v2 = vpop.f32.mrb[0].mxu1 }
 0x110   : > { %v11306_v28 = vpack.c.bf16 %v753_v24, %v750_v19  ;;  %9157 = vmatpush3.bf16.msra.mxu0 %v8292_v13  ;;  %v989_v4 = vpop.f32.mrb[1].mxu1 }
 0x111   : > { %9158 = vmatprep.subr.bf16.mxu0 %v8293_v23  ;;  %v991_v7 = vpop.f32.mrb[2].mxu1  ;;  %v990_v10 = vadd.f32 %v989_v4, %v11367_v6 }
 0x112   : > { %v9084_v30 = vpop.f32.mrb[8].mxu0  ;;  %9110 = vmatprep.mubr.bf16.mxu0 %v11306_v28  ;;  %v993_v8 = vpop.f32.mrb[3].mxu1 }
 0x113   : > { %v774_v33 = vadd.f32 %v9084_v30, %v11269_v1  ;;  %v765_v34 = vpop.f32.mrb[9].mxu0  ;;  %9111 = vmatmul.mubr.bf16.gmra.mrb[20].mxu0 %v11304_v27  ;;  %v994_v14 = vadd.f32 %v993_v8, %v11367_v6 }
 0x114   : > { %v766_v35 = vadd.f32 %v11269_v1, %v765_v34  ;;  %v9085_v36 = vpop.f32.mrb[10].mxu0  ;;  %9159 = vmatpush3.bf16.msra.mxu0 %v8293_v23 }
 0x115   : > { %v777_v37 = vadd.f32 %v9085_v36, %v11269_v1  ;;  %v768_v38 = vpop.f32.mrb[11].mxu0  ;;  %9160 = vmatprep.subr.bf16.mxu0 %v8294_v29  ;;  %v11375_v16 = vpack.c.bf16 %v994_v14, %v990_v10 }
 0x116   : > { %v769_v40 = vadd.f32 %v11269_v1, %v768_v38 }
 0x117   : > { %v11326_v43 = vpack.c.bf16 %v777_v37, %v774_v33  ;;  %14646 = vst [vmem:[#allocation5_spill] sm:$0xff] %v11375_v16  ;;  %v997_v17 = vpop.f32.mrb[4].mxu1  ;;  %v11811_v16 = vld [vmem:[%s14547_s2 + $0x70] sm:$0xff] }
 0x118   : > { %v11328_v44 = vpack.c.bf16 %v769_v40, %v766_v35  ;;  %9161 = vmatpush3.bf16.msra.mxu0 %v8294_v29  ;;  %v999_v19 = vpop.f32.mrb[5].mxu1 }
 0x119   : > { %9162 = vmatprep.subr.bf16.mxu0 %v8295_v39  ;;  %v1000_v20 = vadd.f32 %v999_v19, %v11367_v6  ;;  %v1001_v21 = vpop.f32.mrb[6].mxu1 }
 0x11a   : > { %v9088_v46 = vpop.f32.mrb[12].mxu0  ;;  %9114 = vmatprep.mubr.bf16.mxu0 %v11328_v44  ;;  %v1003_v23 = vpop.f32.mrb[7].mxu1 }
 0x11b   : > { %v790_v49 = vadd.f32 %v9088_v46, %v11269_v1  ;;  %v781_v50 = vpop.f32.mrb[13].mxu0  ;;  %9115 = vmatmul.mubr.bf16.gmra.mrb[24].mxu0 %v11326_v43  ;;  %v1004_v24 = vadd.f32 %v1003_v23, %v11367_v6 }
 0x11c   : > { %v782_v51 = vadd.f32 %v11269_v1, %v781_v50  ;;  %v9089_v52 = vpop.f32.mrb[14].mxu0  ;;  %9163 = vmatpush3.bf16.msra.mxu0 %v8295_v39 }
 0x11d   : > { %v793_v53 = vadd.f32 %v9089_v52, %v11269_v1  ;;  %v784_v54 = vpop.f32.mrb[15].mxu0  ;;  %9164 = vmatprep.subr.bf16.mxu0 %v8296_v45  ;;  %v11385_v26 = vpack.c.bf16 %v1004_v24, %v1000_v20 }
 0x11e   : > { %v785_v56 = vadd.f32 %v11269_v1, %v784_v54  ;;  %v820_v1 = vsub.s32 0, %v819_v63 }
 0x11f   : > { %v11348_v59 = vpack.c.bf16 %v793_v53, %v790_v49  ;;  %14647 = vst [vmem:[#allocation6_spill] sm:$0xff] %v11385_v26  ;;  %v1007_v29 = vpop.f32.mrb[8].mxu1 }
 0x120   : > { %v11350_v60 = vpack.c.bf16 %v785_v56, %v782_v51  ;;  %9165 = vmatpush3.bf16.msra.mxu0 %v8296_v45  ;;  %v11365_v5 = vrot.slane %v816_v0, %v820_v1  ;;  %v1009_v31 = vpop.f32.mrb[9].mxu1 }
 0x121   : > { %14643 = vst [vmem:[#allocation2_spill] sm:$0xff] %v11348_v59  ;;  %9166 = vmatprep.subr.bf16.mxu0 %v8297_v55  ;;  %v1010_v32 = vadd.f32 %v1009_v31, %v11367_v6  ;;  %v1011_v33 = vpop.f32.mrb[10].mxu1 }
 0x122   : > { %14644 = vst [vmem:[#allocation3_spill] sm:$0xff] %v11350_v60  ;;  %9118 = vmatprep.mubr.bf16.mxu0 %v11350_v60  ;;  %v988_v9 = vadd.f32 %v987_v2, %v11365_v5  ;;  %v992_v13 = vadd.f32 %v991_v7, %v11365_v5  ;;  %v998_v18 = vadd.f32 %v997_v17, %v11365_v5  ;;  %v1013_v35 = vpop.f32.mrb[11].mxu1 }
 0x123   : > { %9119 = vmatmul.mubr.bf16.gmra.mrb[28].mxu0 %v11348_v59  ;;  %v1002_v22 = vadd.f32 %v1001_v21, %v11365_v5  ;;  %v1008_v30 = vadd.f32 %v1007_v29, %v11365_v5  ;;  %v1012_v34 = vadd.f32 %v1011_v33, %v11365_v5  ;;  %v1014_v36 = vadd.f32 %v1013_v35, %v11367_v6 }
 0x124   : > { %9167 = vmatpush3.bf16.msra.mxu0 %v8297_v55  ;;  %9170 = vmatprep.mubr.bf16.mxu0 %v11283_v12  ;;  %v11373_v15 = vpack.c.bf16 %v992_v13, %v988_v9 }
 0x125   : > { %9168 = vmatprep.subr.bf16.mxu0 %v8298_v61  ;;  %v11383_v25 = vpack.c.bf16 %v1002_v22, %v998_v18  ;;  %v11391_v37 = vpack.c.bf16 %v1012_v34, %v1008_v30  ;;  %v11393_v38 = vpack.c.bf16 %v1014_v36, %v1010_v32 }
 0x126   : > { %14645 = vst [vmem:[#allocation4_spill] sm:$0xff] %v11373_v15  ;;  %9138 = vmatprep.mubr.bf16.mxu1 %v11373_v15 }
 0x127   : > { %14648 = vst [vmem:[#allocation7_spill] sm:$0xff] %v11393_v38  ;;  %v1017_v39 = vpop.f32.mrb[12].mxu1 }
 0x128   : > { %9169 = vmatpush3.bf16.msra.mxu0 %v8298_v61  ;;  %v1018_v40 = vadd.f32 %v1017_v39, %v11365_v5  ;;  %v1019_v41 = vpop.f32.mrb[13].mxu1 }
 0x129   : > { %v1020_v42 = vadd.f32 %v1019_v41, %v11367_v6  ;;  %v1021_v45 = vpop.f32.mrb[14].mxu1 }
 0x12a   : > { %v1022_v46 = vadd.f32 %v1021_v45, %v11365_v5  ;;  %v1023_v47 = vpop.f32.mrb[15].mxu1 }
 0x12b   : > { %9171 = vmatmul.mubr.bf16.vlgmr.msra.gmra.mrb[32].mxu0 %v11281_v11  ;;  %v1024_v48 = vadd.f32 %v1023_v47, %v11367_v6 }
 0x12c   : > { %9174 = vmatprep.mubr.bf16.mxu0 %v11306_v28  ;;  %v11399_v49 = vpack.c.bf16 %v1022_v46, %v1018_v40 }
 0x12d   : > { %v11401_v50 = vpack.c.bf16 %v1024_v48, %v1020_v42  ;;  %v8281_v42 = vld [vmem:[%s14554_s9] ss:$0 sm:$0xff] }
 0x12e   : > { %14649 = vst [vmem:[#allocation8_spill] sm:$0xff] %v11399_v49 }
 0x12f   : > { %14650 = vst [vmem:[#allocation9_spill] sm:$0xff] %v11401_v50  ;;  %v1027_v51 = vpop.f32.mrb[16].mxu1 }
 0x130   : > { %v1028_v52 = vadd.f32 %v1027_v51, %v11365_v5  ;;  %v1029_v53 = vpop.f32.mrb[17].mxu1 }
 0x131   : > { %v1030_v54 = vadd.f32 %v1029_v53, %v11367_v6  ;;  %v1031_v55 = vpop.f32.mrb[18].mxu1 }
 0x132   : > { %v1032_v56 = vadd.f32 %v1031_v55, %v11365_v5  ;;  %v1033_v57 = vpop.f32.mrb[19].mxu1 }
 0x133   : > { %9175 = vmatmul.mubr.bf16.gmra.mrb[36].mxu0 %v11304_v27  ;;  %v1034_v58 = vadd.f32 %v1033_v57, %v11367_v6 }
 0x134   : > { %9178 = vmatprep.mubr.bf16.mxu0 %v11328_v44  ;;  %v11407_v61 = vpack.c.bf16 %v1032_v56, %v1028_v52 }
 0x135   : > { %v11409_v62 = vpack.c.bf16 %v1034_v58, %v1030_v54 }
 0x136   : > { %14651 = vst [vmem:[#allocation10_spill] sm:$0xff] %v11407_v61 }
 0x137   : > { %14652 = vst [vmem:[#allocation11_spill] sm:$0xff] %v11409_v62  ;;  %v1037_v63 = vpop.f32.mrb[20].mxu1 }
 0x138   : > { %v1038_v0 = vadd.f32 %v1037_v63, %v11365_v5  ;;  %v1039_v1 = vpop.f32.mrb[21].mxu1 }
 0x139   : > { %v1040_v2 = vadd.f32 %v1039_v1, %v11367_v6  ;;  %v1041_v3 = vpop.f32.mrb[22].mxu1 }
 0x13a   : > { %v1042_v4 = vadd.f32 %v1041_v3, %v11365_v5  ;;  %v1043_v7 = vpop.f32.mrb[23].mxu1 }
 0x13b   : > { %9179 = vmatmul.mubr.bf16.gmra.mrb[40].mxu0 %v11326_v43  ;;  %v1044_v8 = vadd.f32 %v1043_v7, %v11367_v6 }
 0x13c   : > { %9182 = vmatprep.mubr.bf16.mxu0 %v11350_v60  ;;  %v11415_v9 = vpack.c.bf16 %v1042_v4, %v1038_v0 }
 0x13d   : > { %v11417_v10 = vpack.c.bf16 %v1044_v8, %v1040_v2 }
 0x13e   : > { %14653 = vst [vmem:[#allocation12_spill] sm:$0xff] %v11415_v9 }
 0x13f   : > { %14654 = vst [vmem:[#allocation13_spill] sm:$0xff] %v11417_v10  ;;  %v1047_v13 = vpop.f32.mrb[24].mxu1 }
 0x140   : > { %v1048_v14 = vadd.f32 %v1047_v13, %v11365_v5  ;;  %v1049_v17 = vpop.f32.mrb[25].mxu1 }
 0x141   : > { %v1050_v18 = vadd.f32 %v1049_v17, %v11367_v6  ;;  %v1051_v19 = vpop.f32.mrb[26].mxu1 }
 0x142   : > { %v1052_v20 = vadd.f32 %v1051_v19, %v11365_v5  ;;  %v1053_v21 = vpop.f32.mrb[27].mxu1 }
 0x143   : > { %9183 = vmatmul.mubr.bf16.gmra.mrb[44].mxu0 %v11348_v59  ;;  %v1054_v22 = vadd.f32 %v1053_v21, %v11367_v6 }
 0x144   : > { %9234 = vmatprep.mubr.bf16.mxu0 %v11373_v15  ;;  %v11423_v23 = vpack.c.bf16 %v1052_v20, %v1048_v14 }
 0x145   : > { %v11425_v24 = vpack.c.bf16 %v1054_v22, %v1050_v18 }
 0x146   : > { %14655 = vst [vmem:[#allocation14_spill] sm:$0xff] %v11423_v23 }
 0x147   : > { %14656 = vst [vmem:[#allocation15_spill] sm:$0xff] %v11425_v24  ;;  %v1057_v29 = vpop.f32.mrb[28].mxu1 }
 0x148   : > { %v1058_v30 = vadd.f32 %v1057_v29, %v11365_v5  ;;  %v1059_v31 = vpop.f32.mrb[29].mxu1 }
 0x149   : > { %v1060_v32 = vadd.f32 %v1059_v31, %v11367_v6  ;;  %v1061_v33 = vpop.f32.mrb[30].mxu1 }
 0x14a   : > { %v1062_v34 = vadd.f32 %v1061_v33, %v11365_v5  ;;  %v1063_v35 = vpop.f32.mrb[31].mxu1 }
 0x14b   : > { %v1064_v36 = vadd.f32 %v1063_v35, %v11367_v6 }
 0x14c   : > { %v11431_v39 = vpack.c.bf16 %v1062_v34, %v1058_v30 }
 0x14d   : > { %v11433_v40 = vpack.c.bf16 %v1064_v36, %v1060_v32 }
 0x14e   : > { %14657 = vst [vmem:[#allocation16_spill] sm:$0xff] %v11431_v39 }
 0x14f   : > { %14658 = vst [vmem:[#allocation17_spill] sm:$0xff] %v11433_v40 }
 0x1de   : > { %v9108_v41 = vpop.f32.mrb[16].mxu0 }
 0x1df   : > { %v1187_v45 = vpop.f32.mrb[17].mxu0  ;;  %v1196_v47 = vadd.f32 %v9108_v41, %v8281_v42 }
 0x1e0   : > { %v9109_v46 = vpop.f32.mrb[18].mxu0  ;;  %v1188_v52 = vadd.f32 %v8281_v42, %v1187_v45  ;;  %v8290_v45 = vld [vmem:[%s14554_s9 + $0x8] ss:$0 sm:$0xff] }
 0x1e1   : > { %v1199_v48 = vadd.f32 %v9109_v46, %v8281_v42  ;;  %v1190_v51 = vpop.f32.mrb[19].mxu0 }
 0x1e2   : > { %v1191_v53 = vadd.f32 %v8281_v42, %v1190_v51 }
 0x1e3   : > { %v1251_v5 = vpack.c.bf16 %v1199_v48, %v1196_v47 }
 0x1e4   : > { %v1250_v54 = vpack.c.bf16 %v1191_v53, %v1188_v52 }
 0x1e6   : > { %9122 = vmatprep.subr.bf16.mxu1 %v1250_v54  ;;  %v9112_v6 = vpop.f32.mrb[20].mxu0 }
 0x1e7   : > { %v1212_v55 = vadd.f32 %v9112_v6, %v8281_v42  ;;  %9123 = vmatpush3.bf16.xpose.msra.mxu1 %v1250_v54  ;;  %v1203_v56 = vpop.f32.mrb[21].mxu0 }
 0x1e8   : > { %v1204_v57 = vadd.f32 %v8281_v42, %v1203_v56  ;;  %9124 = vmatprep.subr.bf16.mxu1 %v1251_v5  ;;  %v9113_v58 = vpop.f32.mrb[22].mxu0 }
 0x1e9   : > { %v1215_v63 = vadd.f32 %v9113_v58, %v8281_v42  ;;  %v1206_v0 = vpop.f32.mrb[23].mxu0 }
 0x1ea   : > { %v1207_v1 = vadd.f32 %v8281_v42, %v1206_v0 }
 0x1eb   : > { %v1253_v2 = vpack.c.bf16 %v1215_v63, %v1212_v55 }
 0x1ec   : > { %v1252_v3 = vpack.c.bf16 %v1207_v1, %v1204_v57 }
 0x1ee   : > { %v9116_v4 = vpop.f32.mrb[24].mxu0 }
 0x1ef   : > { %9125 = vmatpush3.bf16.xpose.msra.mxu1 %v1251_v5  ;;  %v1228_v7 = vadd.f32 %v9116_v4, %v8281_v42  ;;  %v1219_v8 = vpop.f32.mrb[25].mxu0 }
 0x1f0   : > { %9126 = vmatprep.subr.bf16.mxu1 %v1252_v3  ;;  %v1220_v13 = vadd.f32 %v8281_v42, %v1219_v8  ;;  %v9117_v14 = vpop.f32.mrb[26].mxu0 }
 0x1f1   : > { %v1231_v17 = vadd.f32 %v9117_v14, %v8281_v42  ;;  %v1222_v18 = vpop.f32.mrb[27].mxu0 }
 0x1f2   : > { %v1223_v19 = vadd.f32 %v8281_v42, %v1222_v18 }
 0x1f3   : > { %v1255_v20 = vpack.c.bf16 %v1231_v17, %v1228_v7 }
 0x1f4   : > { %v1254_v21 = vpack.c.bf16 %v1223_v19, %v1220_v13 }
 0x1f6   : > { %v9120_v22 = vpop.f32.mrb[28].mxu0 }
 0x1f7   : > { %9127 = vmatpush3.bf16.xpose.msra.mxu1 %v1252_v3  ;;  %v1244_v29 = vadd.f32 %v9120_v22, %v8281_v42  ;;  %v1235_v30 = vpop.f32.mrb[29].mxu0 }
 0x1f8   : > { %9128 = vmatprep.subr.bf16.mxu1 %v1253_v2  ;;  %v1236_v31 = vadd.f32 %v8281_v42, %v1235_v30  ;;  %v9121_v32 = vpop.f32.mrb[30].mxu0 }
 0x1f9   : > { %v1247_v33 = vadd.f32 %v9121_v32, %v8281_v42  ;;  %v1238_v34 = vpop.f32.mrb[31].mxu0 }
 0x1fa   : > { %v1239_v35 = vadd.f32 %v8281_v42, %v1238_v34 }
 0x1fb   : > { %v1257_v36 = vpack.c.bf16 %v1247_v33, %v1244_v29 }
 0x1fc   : > { %v1256_v41 = vpack.c.bf16 %v1239_v35, %v1236_v31 }
 0x1fe   : > { %v9172_v46 = vpop.f32.mrb[32].mxu0 }
 0x1ff   : > { %v1669_v47 = vadd.f32 %v9172_v46, %v8290_v45  ;;  %9129 = vmatpush3.bf16.xpose.msra.mxu1 %v1253_v2  ;;  %v1660_v48 = vpop.f32.mrb[33].mxu0  ;;  %v1731_v46 = vld [vmem:[%s14553_s8 + $0x4] sm:$0xf] }
 0x200   : > { %9130 = vmatprep.subr.bf16.mxu1 %v1254_v21  ;;  %v9173_v51 = vpop.f32.mrb[34].mxu0  ;;  %v1661_v5 = vadd.f32 %v8290_v45, %v1660_v48 }
 0x201   : > { %v1672_v52 = vadd.f32 %v9173_v51, %v8290_v45  ;;  %v1663_v53 = vpop.f32.mrb[35].mxu0 }
 0x202   : > { %v1664_v54 = vadd.f32 %v8290_v45, %v1663_v53  ;;  %v1733_v53 = vld [vmem:[%s14553_s8 + $0x84] sm:$0xf] }
 0x203   : > { %v11441_v6 = vpack.c.bf16 %v1672_v52, %v1669_v47  ;;  %v1732_v47 = vld [vmem:[%s14553_s8 + $0x44] sm:$0xf] }
 0x204   : > { %v11443_v55 = vpack.c.bf16 %v1664_v54, %v1661_v5  ;;  %v1734_v5 = vld [vmem:[%s14553_s8 + $0xc4] sm:$0xf] }
 0x205   : > { %14659 = vst [vmem:[#allocation18_spill] sm:$0xff] %v11441_v6  ;;  %v8301_v54 = vcombine.low %v1733_v53, %v1734_v5  ;;  %v2196_v5 = vld [vmem:[%s14553_s8 + $0x224] sm:$0xf] }
 0x206   : > { %14660 = vst [vmem:[#allocation19_spill] sm:$0xff] %v11443_v55  ;;  %v9176_v42 = vpop.f32.mrb[36].mxu0 }
 0x207   : > { %v1685_v56 = vadd.f32 %v9176_v42, %v8290_v45  ;;  %9131 = vmatpush3.bf16.xpose.msra.mxu1 %v1254_v21  ;;  %v1676_v57 = vpop.f32.mrb[37].mxu0  ;;  %v1736_v42 = vld [vmem:[%s14553_s8 + $0x144] sm:$0xf] }
 0x208   : > { %v1677_v58 = vadd.f32 %v8290_v45, %v1676_v57  ;;  %9132 = vmatprep.subr.bf16.mxu1 %v1255_v20  ;;  %v9177_v63 = vpop.f32.mrb[38].mxu0  ;;  %v1738_v57 = vld [vmem:[%s14553_s8 + $0x1c4] sm:$0xf] }
 0x209   : > { %v1688_v0 = vadd.f32 %v9177_v63, %v8290_v45  ;;  %v1679_v1 = vpop.f32.mrb[39].mxu0  ;;  %v1739_v63 = vld [vmem:[%s14553_s8 + $0x204] sm:$0xf] }
 0x20a   : > { %v1680_v2 = vadd.f32 %v8290_v45, %v1679_v1 }
 0x20b   : > { %v11445_v3 = vpack.c.bf16 %v1688_v0, %v1685_v56  ;;  %v1737_v56 = vld [vmem:[%s14553_s8 + $0x184] sm:$0xf] }
 0x20c   : > { %v11447_v4 = vpack.c.bf16 %v1680_v2, %v1677_v58  ;;  %v8303_v58 = vcombine.low %v1737_v56, %v1738_v57  ;;  %v1740_v0 = vld [vmem:[%s14553_s8 + $0x244] sm:$0xf] }
 0x20d   : > { %14661 = vst [vmem:[#allocation20_spill] sm:$0xff] %v11445_v3  ;;  %v8304_v1 = vcombine.low %v1739_v63, %v1740_v0  ;;  %v1741_v2 = vld [vmem:[%s14553_s8 + $0x284] sm:$0xf] }
 0x20e   : > { %14662 = vst [vmem:[#allocation21_spill] sm:$0xff] %v11447_v4  ;;  %v9180_v7 = vpop.f32.mrb[40].mxu0  ;;  %v2200_v57 = vld [vmem:[%s14553_s8 + $0x324] sm:$0xf] }
 0x20f   : > { %v1701_v8 = vadd.f32 %v9180_v7, %v8290_v45  ;;  %9133 = vmatpush3.bf16.xpose.msra.mxu1 %v1255_v20  ;;  %v1692_v13 = vpop.f32.mrb[41].mxu0  ;;  %v1742_v7 = vld [vmem:[%s14553_s8 + $0x2c4] sm:$0xf] }
 0x210   : > { %v1693_v14 = vadd.f32 %v8290_v45, %v1692_v13  ;;  %9134 = vmatprep.subr.bf16.mxu1 %v1256_v41  ;;  %v9181_v17 = vpop.f32.mrb[42].mxu0  ;;  %v1743_v13 = vld [vmem:[%s14553_s8 + $0x304] sm:$0xf] }
 0x211   : > { %v1704_v18 = vadd.f32 %v9181_v17, %v8290_v45  ;;  %v1695_v19 = vpop.f32.mrb[43].mxu0  ;;  %v2202_v0 = vld [vmem:[%s14553_s8 + $0x3a4] sm:$0xf] }
 0x212   : > { %v1696_v21 = vadd.f32 %v8290_v45, %v1695_v19  ;;  %v1746_v19 = vld [vmem:[%s14553_s8 + $0x3c4] sm:$0xf] }
 0x213   : > { %v11449_v22 = vpack.c.bf16 %v1704_v18, %v1701_v8  ;;  %v8305_v8 = vcombine.low %v1741_v2, %v1742_v7  ;;  %v1745_v18 = vld [vmem:[%s14553_s8 + $0x384] sm:$0xf] }
 0x214   : > { %v11451_v29 = vpack.c.bf16 %v1696_v21, %v1693_v14  ;;  %v1744_v14 = vld [vmem:[%s14553_s8 + $0x344] sm:$0xf]  ;;  %v8307_v21 = vcombine.low %v1745_v18, %v1746_v19 }
 0x215   : > { %14663 = vst [vmem:[#allocation22_spill] sm:$0xff] %v11449_v22  ;;  %v8306_v17 = vcombine.low %v1743_v13, %v1744_v14 }
 0x216   : > { %14664 = vst [vmem:[#allocation23_spill] sm:$0xff] %v11451_v29  ;;  %v9184_v30 = vpop.f32.mrb[44].mxu0  ;;  %v11793_v29 = vld [vmem:[%s14547_s2 + $0x60] sm:$0xff] }
 0x217   : > { %v1717_v31 = vadd.f32 %v9184_v30, %v8290_v45  ;;  %9135 = vmatpush3.bf16.xpose.msra.mxu1 %v1256_v41  ;;  %v1708_v32 = vpop.f32.mrb[45].mxu0  ;;  %v8300_v41 = vcombine.low %v1731_v46, %v1732_v47  ;;  %v2188_v30 = vld [vmem:[%s14553_s8 + $0x24] sm:$0xf] }
 0x218   : > { %v1709_v33 = vadd.f32 %v8290_v45, %v1708_v32  ;;  %9136 = vmatprep.subr.bf16.mxu1 %v1257_v36  ;;  %v9185_v34 = vpop.f32.mrb[46].mxu0  ;;  %v2193_v46 = vld [vmem:[%s14553_s8 + $0x164] sm:$0xf] }
 0x219   : > { %v1720_v35 = vadd.f32 %v9185_v34, %v8290_v45  ;;  %v1711_v20 = vpop.f32.mrb[47].mxu0  ;;  %v2191_v34 = vld [vmem:[%s14553_s8 + $0xe4] sm:$0xf] }
 0x21a   : > { %v1712_v48 = vadd.f32 %v8290_v45, %v1711_v20  ;;  %v1735_v45 = vld [vmem:[%s14553_s8 + $0x104] sm:$0xf] }
 0x21b   : > { %v11459_v51 = vpack.c.bf16 %v1720_v35, %v1717_v31  ;;  %v2189_v31 = vld [vmem:[%s14553_s8 + $0x64] sm:$0xf] }
 0x21c   : > { %v11461_v52 = vpack.c.bf16 %v1712_v48, %v1709_v33  ;;  %v8309_v32 = vcombine.low %v2188_v30, %v2189_v31  ;;  %v2190_v33 = vld [vmem:[%s14553_s8 + $0xa4] sm:$0xf] }
 0x21d   : > { %14665 = vst [vmem:[#allocation24_spill] sm:$0xff] %v11459_v51  ;;  %v8310_v35 = vcombine.low %v2190_v33, %v2191_v34  ;;  %v2192_v20 = vld [vmem:[%s14553_s8 + $0x124] sm:$0xf]  ;;  %v11775_v51 = vld [vmem:[%s14547_s2 + $0x50] sm:$0xff] }
 0x21e   : > { %14666 = vst [vmem:[#allocation25_spill] sm:$0xff] %v11461_v52  ;;  %v8311_v47 = vcombine.low %v2192_v20, %v2193_v46  ;;  %v2194_v48 = vld [vmem:[%s14553_s8 + $0x1a4] sm:$0xf]  ;;  %v11784_v52 = vld [vmem:[%s14547_s2 + $0x58] sm:$0xff] }
 0x21f   : > { %9137 = vmatpush3.bf16.xpose.msra.mxu1 %v1257_v36  ;;  %v8302_v36 = vcombine.low %v1735_v45, %v1736_v42  ;;  %v2198_v42 = vld [vmem:[%s14553_s8 + $0x2a4] sm:$0xf] }
 0x220   : > { %9186 = vmatprep.subr.bf16.mxu1 %v8300_v41 }
 0x226   : > { %9139 = vmatmul.mubr.bf16.vlgmr.msra.gmra.mrb[32].mxu1 %v11383_v25 }
 0x227   : > { %9142 = vmatprep.mubr.bf16.mxu1 %v11391_v37  ;;  %9187 = vmatpush3.bf16.msra.mxu1 %v8300_v41  ;;  %v2195_v41 = vld [vmem:[%s14553_s8 + $0x1e4] sm:$0xf] }
 0x228   : > { %9188 = vmatprep.subr.bf16.mxu1 %v8301_v54  ;;  %v8312_v53 = vcombine.low %v2194_v48, %v2195_v41  ;;  %v8299_v48 = vld [vmem:[%s14554_s9 + $0x1] ss:$0 sm:$0xff] }
 0x22b   : > { %9189 = vmatpush3.bf16.msra.mxu1 %v8301_v54  ;;  %v2197_v54 = vld [vmem:[%s14553_s8 + $0x264] sm:$0xf] }
 0x22c   : > { %9190 = vmatprep.subr.bf16.mxu1 %v8302_v36  ;;  %v8313_v45 = vcombine.low %v2196_v5, %v2197_v54 }
 0x22e   : > { %9143 = vmatmul.mubr.bf16.gmra.mrb[36].mxu1 %v11399_v49 }
 0x22f   : > { %9146 = vmatprep.mubr.bf16.mxu1 %v11407_v61  ;;  %9191 = vmatpush3.bf16.msra.mxu1 %v8302_v36  ;;  %v2199_v36 = vld [vmem:[%s14553_s8 + $0x2e4] sm:$0xf] }
 0x230   : > { %9192 = vmatprep.subr.bf16.mxu1 %v8303_v58  ;;  %v8314_v56 = vcombine.low %v2198_v42, %v2199_v36 }
 0x233   : > { %9193 = vmatpush3.bf16.msra.mxu1 %v8303_v58  ;;  %v2201_v58 = vld [vmem:[%s14553_s8 + $0x364] sm:$0xf] }
 0x234   : > { %9194 = vmatprep.subr.bf16.mxu1 %v8304_v1  ;;  %v8315_v63 = vcombine.low %v2200_v57, %v2201_v58 }
 0x236   : > { %9147 = vmatmul.mubr.bf16.gmra.mrb[40].mxu1 %v11415_v9 }
 0x237   : > { %9150 = vmatprep.mubr.bf16.mxu1 %v11423_v23  ;;  %9195 = vmatpush3.bf16.msra.mxu1 %v8304_v1  ;;  %v2203_v1 = vld [vmem:[%s14553_s8 + $0x3e4] sm:$0xf] }
 0x238   : > { %9196 = vmatprep.subr.bf16.mxu1 %v8305_v8  ;;  %v8316_v2 = vcombine.low %v2202_v0, %v2203_v1 }
 0x23b   : > { %9197 = vmatpush3.bf16.msra.mxu1 %v8305_v8 }
 0x23c   : > { %9198 = vmatprep.subr.bf16.mxu1 %v8306_v17 }
 0x23e   : > { %9151 = vmatmul.mubr.bf16.gmra.mrb[44].mxu1 %v11431_v39 }
 0x23f   : > { %9199 = vmatpush3.bf16.msra.mxu1 %v8306_v17  ;;  %9202 = vmatprep.mubr.bf16.mxu1 %v11283_v12 }
 0x240   : > { %9200 = vmatprep.subr.bf16.mxu1 %v8307_v21 }
 0x243   : > { %9201 = vmatpush3.bf16.msra.mxu1 %v8307_v21 }
 0x244   : > { %9250 = vmatprep.subr.bf16.mxu1 %v8309_v32 }
 0x246   : > { %9203 = vmatmul.mubr.bf16.vlgmr.msra.gmra.mrb[48].mxu1 %v11281_v11 }
 0x247   : > { %9206 = vmatprep.mubr.bf16.mxu1 %v11306_v28  ;;  %9251 = vmatpush3.bf16.msra.mxu1 %v8309_v32 }
 0x248   : > { %9252 = vmatprep.subr.bf16.mxu1 %v8310_v35 }
 0x24b   : > { %9253 = vmatpush3.bf16.msra.mxu1 %v8310_v35 }
 0x24c   : > { %9254 = vmatprep.subr.bf16.mxu1 %v8311_v47 }
 0x24e   : > { %9207 = vmatmul.mubr.bf16.gmra.mrb[52].mxu1 %v11304_v27 }
 0x24f   : > { %9210 = vmatprep.mubr.bf16.mxu1 %v11328_v44  ;;  %9255 = vmatpush3.bf16.msra.mxu1 %v8311_v47 }
 0x250   : > { %9256 = vmatprep.subr.bf16.mxu1 %v8312_v53 }
 0x253   : > { %9257 = vmatpush3.bf16.msra.mxu1 %v8312_v53 }
 0x254   : > { %9258 = vmatprep.subr.bf16.mxu1 %v8313_v45 }
 0x256   : > { %9211 = vmatmul.mubr.bf16.gmra.mrb[56].mxu1 %v11326_v43 }
 0x257   : > { %9214 = vmatprep.mubr.bf16.mxu1 %v11350_v60  ;;  %9259 = vmatpush3.bf16.msra.mxu1 %v8313_v45 }
 0x258   : > { %9260 = vmatprep.subr.bf16.mxu1 %v8314_v56 }
 0x25b   : > { %9261 = vmatpush3.bf16.msra.mxu1 %v8314_v56 }
 0x25c   : > { %9262 = vmatprep.subr.bf16.mxu1 %v8315_v63 }
 0x25e   : > { %9215 = vmatmul.mubr.bf16.gmra.mrb[60].mxu1 %v11348_v59 }
 0x25f   : > { %9263 = vmatpush3.bf16.msra.mxu1 %v8315_v63  ;;  %9266 = vmatprep.mubr.bf16.mxu1 %v11283_v12 }
 0x260   : > { %9264 = vmatprep.subr.bf16.mxu1 %v8316_v2 }
 0x263   : > { %9265 = vmatpush3.bf16.msra.mxu1 %v8316_v2 }
 0x266   : > { %9267 = vmatmul.mubr.bf16.vlgmr.msra.gmra.mrb[64].mxu1 %v11281_v11 }
 0x267   : > { %9270 = vmatprep.mubr.bf16.mxu1 %v11306_v28 }
 0x26e   : > { %9271 = vmatmul.mubr.bf16.gmra.mrb[68].mxu1 %v11304_v27 }
 0x26f   : > { %9274 = vmatprep.mubr.bf16.mxu1 %v11328_v44 }
 0x276   : > { %9275 = vmatmul.mubr.bf16.gmra.mrb[72].mxu1 %v11326_v43 }
 0x277   : > { %9278 = vmatprep.mubr.bf16.mxu1 %v11350_v60 }
 0x27e   : > { %9279 = vmatmul.mubr.bf16.gmra.mrb[76].mxu1 %v11348_v59 }
 0x2f9   : > { %v11576_v7 = vpop.f32.mrb[32].mxu1 }
 0x2fa   : > { %v11578_v8 = vpop.f32.mrb[33].mxu1 }
 0x2fb   : > { %v11580_v13 = vpop.f32.mrb[34].mxu1 }
 0x2fc   : > { %v11582_v14 = vpop.f32.mrb[35].mxu1 }
 0x301   : > { %v11584_v17 = vpop.f32.mrb[36].mxu1 }
 0x302   : > { %v11586_v18 = vpop.f32.mrb[37].mxu1 }
 0x303   : > { %v11588_v19 = vpop.f32.mrb[38].mxu1 }
 0x304   : > { %v11590_v21 = vpop.f32.mrb[39].mxu1 }
 0x309   : > { %v11592_v30 = vpop.f32.mrb[40].mxu1 }
 0x30a   : > { %v11594_v31 = vpop.f32.mrb[41].mxu1 }
 0x30b   : > { %v11596_v32 = vpop.f32.mrb[42].mxu1 }
 0x30c   : > { %v11598_v33 = vpop.f32.mrb[43].mxu1 }
 0x311   : > { %v11600_v34 = vpop.f32.mrb[44].mxu1 }
 0x312   : > { %v11602_v35 = vpop.f32.mrb[45].mxu1 }
 0x313   : > { %v11604_v20 = vpop.f32.mrb[46].mxu1 }
 0x314   : > { %v11606_v46 = vpop.f32.mrb[47].mxu1 }
 0x319   : > { %v9204_v47 = vpop.f32.mrb[48].mxu1 }
 0x31a   : > { %v1836_v41 = vpop.f32.mrb[49].mxu1  ;;  %v1845_v5 = vadd.f32 %v9204_v47, %v8299_v48 }
 0x31b   : > { %v9205_v53 = vpop.f32.mrb[50].mxu1  ;;  %v1837_v42 = vadd.f32 %v8299_v48, %v1836_v41 }
 0x31c   : > { %v1848_v54 = vadd.f32 %v9205_v53, %v8299_v48  ;;  %v1839_v45 = vpop.f32.mrb[51].mxu1 }
 0x31d   : > { %v1840_v36 = vadd.f32 %v8299_v48, %v1839_v45 }
 0x31e   : > { %v1900_v56 = vpack.c.bf16 %v1848_v54, %v1845_v5 }
 0x31f   : > { %v1899_v57 = vpack.c.bf16 %v1840_v36, %v1837_v42 }
 0x321   : > { %v9208_v58 = vpop.f32.mrb[52].mxu1  ;;  %9218 = vmatprep.subr.bf16.mxu0 %v1899_v57 }
 0x322   : > { %v1852_v63 = vpop.f32.mrb[53].mxu1  ;;  %9219 = vmatpush3.bf16.xpose.msra.mxu0 %v1899_v57  ;;  %v1861_v1 = vadd.f32 %v9208_v58, %v8299_v48 }
 0x323   : > { %v9209_v0 = vpop.f32.mrb[54].mxu1  ;;  %9220 = vmatprep.subr.bf16.mxu0 %v1900_v56  ;;  %v1853_v24 = vadd.f32 %v8299_v48, %v1852_v63 }
 0x324   : > { %v1864_v2 = vadd.f32 %v9209_v0, %v8299_v48  ;;  %v1855_v40 = vpop.f32.mrb[55].mxu1 }
 0x325   : > { %v1856_v10 = vadd.f32 %v8299_v48, %v1855_v40 }
 0x326   : > { %v1902_v62 = vpack.c.bf16 %v1864_v2, %v1861_v1 }
 0x327   : > { %v1901_v50 = vpack.c.bf16 %v1856_v10, %v1853_v24 }
 0x329   : > { %v9212_v47 = vpop.f32.mrb[56].mxu1 }
 0x32a   : > { %v1868_v53 = vpop.f32.mrb[57].mxu1  ;;  %9221 = vmatpush3.bf16.xpose.msra.mxu0 %v1900_v56  ;;  %v1877_v5 = vadd.f32 %v9212_v47, %v8299_v48 }
 0x32b   : > { %v9213_v41 = vpop.f32.mrb[58].mxu1  ;;  %9222 = vmatprep.subr.bf16.mxu0 %v1901_v50  ;;  %v1869_v42 = vadd.f32 %v8299_v48, %v1868_v53  ;;  %v8308_v53 = vld [vmem:[%s14554_s9 + $0x9] ss:$0 sm:$0xff] }
 0x32c   : > { %v1880_v54 = vadd.f32 %v9213_v41, %v8299_v48  ;;  %v1871_v45 = vpop.f32.mrb[59].mxu1 }
 0x32d   : > { %v1872_v36 = vadd.f32 %v8299_v48, %v1871_v45 }
 0x32e   : > { %v1904_v57 = vpack.c.bf16 %v1880_v54, %v1877_v5 }
 0x32f   : > { %v1903_v38 = vpack.c.bf16 %v1872_v36, %v1869_v42 }
 0x331   : > { %v9216_v26 = vpop.f32.mrb[60].mxu1 }
 0x332   : > { %v1884_v58 = vpop.f32.mrb[61].mxu1  ;;  %9223 = vmatpush3.bf16.xpose.msra.mxu0 %v1901_v50  ;;  %v1893_v40 = vadd.f32 %v9216_v26, %v8299_v48 }
 0x333   : > { %v9217_v0 = vpop.f32.mrb[62].mxu1  ;;  %9224 = vmatprep.subr.bf16.mxu0 %v1902_v62  ;;  %v1885_v24 = vadd.f32 %v8299_v48, %v1884_v58 }
 0x334   : > { %v1896_v63 = vadd.f32 %v9217_v0, %v8299_v48  ;;  %v1887_v10 = vpop.f32.mrb[63].mxu1 }
 0x335   : > { %v1888_v1 = vadd.f32 %v8299_v48, %v1887_v10 }
 0x336   : > { %v11611_v56 = vpack.c.bf16 %v1896_v63, %v1893_v40 }
 0x337   : > { %v1905_v2 = vpack.c.bf16 %v1888_v1, %v1885_v24 }
 0x339   : > { %v9268_v47 = vpop.f32.mrb[64].mxu1 }
 0x33a   : > { %9225 = vmatpush3.bf16.xpose.msra.mxu0 %v1902_v62  ;;  %v2293_v41 = vpop.f32.mrb[65].mxu1  ;;  %v2302_v50 = vadd.f32 %v9268_v47, %v8308_v53 }
 0x33b   : > { %9226 = vmatprep.subr.bf16.mxu0 %v1903_v38  ;;  %v9269_v5 = vpop.f32.mrb[66].mxu1  ;;  %v2294_v26 = vadd.f32 %v8308_v53, %v2293_v41 }
 0x33c   : > { %v2305_v54 = vadd.f32 %v9269_v5, %v8308_v53  ;;  %v2296_v45 = vpop.f32.mrb[67].mxu1 }
 0x33d   : > { %v2297_v42 = vadd.f32 %v8308_v53, %v2296_v45 }
 0x33e   : > { %v2357_v36 = vpack.c.bf16 %v2305_v54, %v2302_v50 }
 0x33f   : > { %v2356_v58 = vpack.c.bf16 %v2297_v42, %v2294_v26 }
 0x341   : > { %v9272_v48 = vpop.f32.mrb[68].mxu1  ;;  %9282 = vmatprep.subr.bf16.mxu1 %v2356_v58 }
 0x342   : > { %9227 = vmatpush3.bf16.xpose.msra.mxu0 %v1903_v38  ;;  %v2309_v0 = vpop.f32.mrb[69].mxu1  ;;  %9283 = vmatpush3.bf16.msra.mxu1 %v2356_v58  ;;  %v2318_v63 = vadd.f32 %v9272_v48, %v8308_v53 }
 0x343   : > { %9228 = vmatprep.subr.bf16.mxu0 %v1904_v57  ;;  %v9273_v40 = vpop.f32.mrb[70].mxu1  ;;  %9284 = vmatprep.subr.bf16.mxu1 %v2357_v36  ;;  %v2310_v24 = vadd.f32 %v8308_v53, %v2309_v0 }
 0x344   : > { %v2321_v62 = vadd.f32 %v9273_v40, %v8308_v53  ;;  %v2312_v10 = vpop.f32.mrb[71].mxu1 }
 0x345   : > { %v2313_v1 = vadd.f32 %v8308_v53, %v2312_v10 }
 0x346   : > { %v2359_v47 = vpack.c.bf16 %v2321_v62, %v2318_v63  ;;  %9285 = vmatpush3.bf16.msra.mxu1 %v2357_v36 }
 0x347   : > { %v2358_v5 = vpack.c.bf16 %v2313_v1, %v2310_v24  ;;  %v2558_v24 = vld [vmem:[%s14553_s8 + $0x8] sm:$0xf] }
 0x348   : > { %v2559_v1 = vld [vmem:[%s14553_s8 + $0x48] sm:$0xf] }
 0x349   : > { %v9276_v41 = vpop.f32.mrb[72].mxu1  ;;  %9286 = vmatprep.subr.bf16.mxu1 %v2358_v5 }
 0x34a   : > { %9229 = vmatpush3.bf16.xpose.msra.mxu0 %v1904_v57  ;;  %v2325_v50 = vpop.f32.mrb[73].mxu1  ;;  %9287 = vmatpush3.bf16.msra.mxu1 %v2358_v5  ;;  %v2334_v54 = vadd.f32 %v9276_v41, %v8308_v53 }
 0x34b   : > { %9230 = vmatprep.subr.bf16.mxu0 %v1905_v2  ;;  %v9277_v38 = vpop.f32.mrb[74].mxu1  ;;  %9288 = vmatprep.subr.bf16.mxu1 %v2359_v47  ;;  %v2326_v42 = vadd.f32 %v8308_v53, %v2325_v50  ;;  %v8318_v50 = vcombine.low %v2558_v24, %v2559_v1  ;;  %v2571_v24 = vld [vmem:[%s14553_s8 + $0x348] sm:$0xf] }
 0x34c   : > { %v2337_v45 = vadd.f32 %v9277_v38, %v8308_v53  ;;  %v2328_v26 = vpop.f32.mrb[75].mxu1  ;;  %v2560_v38 = vld [vmem:[%s14553_s8 + $0x88] sm:$0xf] }
 0x34d   : > { %v2329_v58 = vadd.f32 %v8308_v53, %v2328_v26 }
 0x34e   : > { %v2361_v48 = vpack.c.bf16 %v2337_v45, %v2334_v54  ;;  %9289 = vmatpush3.bf16.msra.mxu1 %v2359_v47  ;;  %v2561_v54 = vld [vmem:[%s14553_s8 + $0xc8] sm:$0xf] }
 0x34f   : > { %v2360_v0 = vpack.c.bf16 %v2329_v58, %v2326_v42  ;;  %v2562_v45 = vld [vmem:[%s14553_s8 + $0x108] sm:$0xf] }
 0x350   : > { %v2564_v42 = vld [vmem:[%s14553_s8 + $0x188] sm:$0xf] }
 0x351   : > { %v9280_v40 = vpop.f32.mrb[76].mxu1  ;;  %9290 = vmatprep.subr.bf16.mxu1 %v2360_v0  ;;  %v2565_v58 = vld [vmem:[%s14553_s8 + $0x1c8] sm:$0xf] }
 0x352   : > { %9231 = vmatpush3.bf16.xpose.msra.mxu0 %v1905_v2  ;;  %v2341_v36 = vpop.f32.mrb[77].mxu1  ;;  %9291 = vmatpush3.bf16.msra.mxu1 %v2360_v0  ;;  %v2350_v63 = vadd.f32 %v9280_v40, %v8308_v53  ;;  %v2566_v0 = vld [vmem:[%s14553_s8 + $0x208] sm:$0xf] }
 0x353   : > { %9232 = vmatprep.subr.bf16.mxu0 %v11611_v56  ;;  %v9281_v57 = vpop.f32.mrb[78].mxu1  ;;  %9292 = vmatprep.subr.bf16.mxu1 %v2361_v48  ;;  %v2342_v47 = vadd.f32 %v8308_v53, %v2341_v36  ;;  %v2567_v40 = vld [vmem:[%s14553_s8 + $0x248] sm:$0xf] }
 0x354   : > { %v2353_v62 = vadd.f32 %v9281_v57, %v8308_v53  ;;  %v2344_v10 = vpop.f32.mrb[79].mxu1  ;;  %v8322_v36 = vcombine.low %v2566_v0, %v2567_v40  ;;  %v2568_v57 = vld [vmem:[%s14553_s8 + $0x288] sm:$0xf] }
 0x355   : > { %v2345_v5 = vadd.f32 %v8308_v53, %v2344_v10  ;;  %v8319_v53 = vcombine.low %v2560_v38, %v2561_v54  ;;  %v2570_v10 = vld [vmem:[%s14553_s8 + $0x308] sm:$0xf]  ;;  %v11691_v38 = vld [vmem:[%s14547_s2] sm:$0xff] }
 0x356   : > { %v2363_v2 = vpack.c.bf16 %v2353_v62, %v2350_v63  ;;  %9293 = vmatpush3.bf16.msra.mxu1 %v2361_v48  ;;  %v8321_v48 = vcombine.low %v2564_v42, %v2565_v58  ;;  %v2569_v63 = vld [vmem:[%s14553_s8 + $0x2c8] sm:$0xf]  ;;  %v8324_v1 = vcombine.low %v2570_v10, %v2571_v24  ;;  %14667 = vst [vmem:[#allocation26_spill] sm:$0xff] %v11691_v38  ;;  %v11703_v42 = vld [vmem:[%s14547_s2 + $0x18] sm:$0xff] }
 0x357   : > { %v2362_v41 = vpack.c.bf16 %v2345_v5, %v2342_v47  ;;  %v8323_v62 = vcombine.low %v2568_v57, %v2569_v63  ;;  %v2572_v47 = vld [vmem:[%s14553_s8 + $0x388] sm:$0xf] }
 0x358   : > { %v2573_v5 = vld [vmem:[%s14553_s8 + $0x3c8] sm:$0xf] }
 0x359   : > { %9294 = vmatprep.subr.bf16.mxu1 %v2362_v41  ;;  %v11709_v58 = vld [vmem:[%s14547_s2 + $0x8] sm:$0xff] }
 0x35a   : > { %9233 = vmatpush3.bf16.xpose.msra.mxu0 %v11611_v56  ;;  %9295 = vmatpush3.bf16.msra.mxu1 %v2362_v41  ;;  %v2563_v56 = vld [vmem:[%s14553_s8 + $0x148] sm:$0xf]  ;;  %v11686_v41 = vld [vmem:[%s14547_s2 + $0x10] sm:$0xff] }
 0x35b   : > { %9296 = vmatprep.subr.bf16.mxu1 %v2363_v2  ;;  %9346 = vmatprep.subr.bf16.mxu0 %v8318_v50  ;;  %v8320_v26 = vcombine.low %v2562_v45, %v2563_v56  ;;  %v11730_v10 = vld [vmem:[%s14547_s2 + $0x28] sm:$0xff] }
 0x35e   : > { %9297 = vmatpush3.bf16.msra.mxu1 %v2363_v2  ;;  %v8325_v2 = vcombine.low %v2572_v47, %v2573_v5  ;;  %v11739_v47 = vld [vmem:[%s14547_s2 + $0x30] sm:$0xff] }
 0x35f   : > { %9314 = vmatprep.subr.bf16.mxu1 %v11443_v55 }
 0x361   : > { %9235 = vmatmul.mubr.bf16.vlgmr.msra.gmra.mrb[48].mxu0 %v11383_v25 }
 0x362   : > { %9238 = vmatprep.mubr.bf16.mxu0 %v11391_v37  ;;  %9347 = vmatpush3.bf16.msra.mxu0 %v8318_v50 }
 0x363   : > { %9348 = vmatprep.subr.bf16.mxu0 %v8319_v53 }
 0x366   : > { %9349 = vmatpush3.bf16.msra.mxu0 %v8319_v53 }
 0x367   : > { %9350 = vmatprep.subr.bf16.mxu0 %v8320_v26 }
 0x369   : > { %9239 = vmatmul.mubr.bf16.gmra.mrb[52].mxu0 %v11399_v49 }
 0x36a   : > { %9242 = vmatprep.mubr.bf16.mxu0 %v11407_v61  ;;  %9351 = vmatpush3.bf16.msra.mxu0 %v8320_v26 }
 0x36b   : > { %9352 = vmatprep.subr.bf16.mxu0 %v8321_v48 }
 0x36e   : > { %9353 = vmatpush3.bf16.msra.mxu0 %v8321_v48 }
 0x36f   : > { %9354 = vmatprep.subr.bf16.mxu0 %v8322_v36 }
 0x371   : > { %9243 = vmatmul.mubr.bf16.gmra.mrb[56].mxu0 %v11415_v9 }
 0x372   : > { %9246 = vmatprep.mubr.bf16.mxu0 %v11423_v23  ;;  %9355 = vmatpush3.bf16.msra.mxu0 %v8322_v36  ;;  %v11722_v36 = vld [vmem:[%s14547_s2 + $0x20] sm:$0xff] }
 0x373   : > { %9356 = vmatprep.subr.bf16.mxu0 %v8323_v62 }
 0x376   : > { %9357 = vmatpush3.bf16.msra.mxu0 %v8323_v62 }
 0x377   : > { %9358 = vmatprep.subr.bf16.mxu0 %v8324_v1 }
 0x379   : > { %9247 = vmatmul.mubr.bf16.gmra.mrb[60].mxu0 %v11431_v39 }
 0x37a   : > { %9359 = vmatpush3.bf16.msra.mxu0 %v8324_v1  ;;  %9362 = vmatprep.mubr.bf16.mxu0 %v11283_v12 }
 0x37b   : > { %9360 = vmatprep.subr.bf16.mxu0 %v8325_v2 }
 0x37e   : > { %9361 = vmatpush3.bf16.msra.mxu0 %v8325_v2  ;;  %v11748_v2 = vld [vmem:[%s14547_s2 + $0x38] sm:$0xff] }
 0x381   : > { %9363 = vmatmul.mubr.bf16.vlgmr.msra.gmra.mrb[64].mxu0 %v11281_v11 }
 0x382   : > { %9366 = vmatprep.mubr.bf16.mxu0 %v11306_v28 }
 0x389   : > { %9367 = vmatmul.mubr.bf16.gmra.mrb[68].mxu0 %v11304_v27 }
 0x38a   : > { %9370 = vmatprep.mubr.bf16.mxu0 %v11328_v44 }
 0x391   : > { %9371 = vmatmul.mubr.bf16.gmra.mrb[72].mxu0 %v11326_v43 }
 0x392   : > { %9374 = vmatprep.mubr.bf16.mxu0 %v11350_v60 }
 0x399   : > { %9375 = vmatmul.mubr.bf16.gmra.mrb[76].mxu0 %v11348_v59 }
 0x39a   : > { %9394 = vmatprep.mubr.bf16.mxu0 %v11373_v15 }
 0x434   : > { %v9236_v50 = vpop.f32.mrb[48].mxu0 }
 0x435   : > { %v11694_v54 = vadd.f32 %v9236_v50, %v11686_v41  ;;  %v1941_v53 = vpop.f32.mrb[49].mxu0 }
 0x436   : > { %v11697_v45 = vadd.f32 %v1941_v53, %v11691_v38  ;;  %v9237_v56 = vpop.f32.mrb[50].mxu0 }
 0x437   : > { %2008 = vmax.xlane.f32.xlu1 %v11694_v54  ;;  %v1944_v26 = vpop.f32.mrb[51].mxu0  ;;  %v11712_v48 = vadd.f32 %v9237_v56, %v11703_v42  ;;  %v11757_v56 = vld [vmem:[%s14547_s2 + $0x40] sm:$0xff] }
 0x438   : > { %2004 = vmax.xlane.f32.xlu0 %v11697_v45  ;;  %v11715_v0 = vadd.f32 %v1944_v26, %v11709_v58 }
 0x43b   : > { %2010 = vmax.xlane.f32.xlu1 %v11712_v48 }
 0x43c   : > { %v9240_v40 = vpop.f32.mrb[52].mxu0  ;;  %2006 = vmax.xlane.f32.xlu0 %v11715_v0 }
 0x43d   : > { %v1957_v57 = vpop.f32.mrb[53].mxu0  ;;  %v11742_v5 = vadd.f32 %v9240_v40, %v11739_v47 }
 0x43e   : > { %v11725_v63 = vadd.f32 %v1957_v57, %v11722_v36  ;;  %v9241_v62 = vpop.f32.mrb[54].mxu0 }
 0x43f   : > { %v1960_v24 = vpop.f32.mrb[55].mxu0  ;;  %14668 = vst [vmem:[#allocation27_spill] sm:$0xff] %v11742_v5  ;;  %v11751_v50 = vadd.f32 %v9241_v62, %v11748_v2  ;;  %v11766_v62 = vld [vmem:[%s14547_s2 + $0x48] sm:$0xff] }
 0x440   : > { %v11733_v1 = vadd.f32 %v1960_v24, %v11730_v10  ;;  %2012 = vmax.xlane.f32.xlu0 %v11725_v63 }
 0x441   : > { %14669 = vst [vmem:[#allocation28_spill] sm:$0xff] %v11751_v50 }
 0x442   : > { %2014 = vmax.xlane.f32.xlu1 %v11733_v1 }
 0x444   : > { %v9244_v53 = vpop.f32.mrb[56].mxu0  ;;  %2016 = vmax.xlane.f32.xlu0 %v11742_v5 }
 0x445   : > { %v1973_v26 = vpop.f32.mrb[57].mxu0 }
 0x446   : > { %v11760_v40 = vadd.f32 %v1973_v26, %v11757_v56  ;;  %v9245_v57 = vpop.f32.mrb[58].mxu0  ;;  %2018 = vmax.xlane.f32.xlu1 %v11751_v50  ;;  %v11778_v26 = vadd.f32 %v9244_v53, %v11775_v51  ;;  %v11840_v50 = vadd.f32 %v11582_v14, %v11709_v58 }
 0x447   : > { %v1976_v24 = vpop.f32.mrb[59].mxu0 }
 0x448   : > { %14670 = vst [vmem:[#allocation29_spill] sm:$0xff] %v11760_v40  ;;  %v11769_v15 = vadd.f32 %v1976_v24, %v11766_v62  ;;  %2020 = vmax.xlane.f32.xlu0 %v11760_v40  ;;  %14672 = vst [vmem:[#allocation31_spill] sm:$0xff] %v11778_v26  ;;  %v11787_v24 = vadd.f32 %v9245_v57, %v11784_v52  ;;  %v11802_v57 = vld [vmem:[%s14547_s2 + $0x68] sm:$0xff] }
 0x44a   : > { %14671 = vst [vmem:[#allocation30_spill] sm:$0xff] %v11769_v15  ;;  %2022 = vmax.xlane.f32.xlu1 %v11769_v15  ;;  %14673 = vst [vmem:[#allocation32_spill] sm:$0xff] %v11787_v24 }
 0x44c   : > { %v9248_v22 = vpop.f32.mrb[60].mxu0  ;;  %2024 = vmax.xlane.f32.xlu0 %v11778_v26 }
 0x44d   : > { %v1989_v53 = vpop.f32.mrb[61].mxu0 }
 0x44e   : > { %v11796_v3 = vadd.f32 %v1989_v53, %v11793_v29  ;;  %v9249_v4 = vpop.f32.mrb[62].mxu0  ;;  %2026 = vmax.xlane.f32.xlu1 %v11787_v24  ;;  %v11814_v53 = vadd.f32 %v9248_v22, %v11811_v16  ;;  %v11820_v24 = vld [vmem:[%s14547_s2 + $0x78] sm:$0xff] }
 0x44f   : > { %v1992_v6 = vpop.f32.mrb[63].mxu0 }
 0x450   : > { %14674 = vst [vmem:[#allocation33_spill] sm:$0xff] %v11796_v3  ;;  %v11805_v55 = vadd.f32 %v1992_v6, %v11802_v57  ;;  %2028 = vmax.xlane.f32.xlu0 %v11796_v3  ;;  %14676 = vst [vmem:[#allocation35_spill] sm:$0xff] %v11814_v53  ;;  %v11823_v6 = vadd.f32 %v9249_v4, %v11820_v24  ;;  %v11828_v3 = vld [vmem:[%s14554_s9 + $0x2] ss:$0 sm:$0xff] }
 0x452   : > { %14675 = vst [vmem:[#allocation34_spill] sm:$0xff] %v11805_v55  ;;  %2030 = vmax.xlane.f32.xlu1 %v11805_v55  ;;  %14677 = vst [vmem:[#allocation36_spill] sm:$0xff] %v11823_v6  ;;  %v11833_v55 = vadd.f32 %v11578_v8, %v11691_v38  ;;  %v11847_v38 = vadd.f32 %v11576_v7, %v11686_v41 }
 0x454   : > { %v9364_v26 = vpop.f32.mrb[64].mxu0  ;;  %2032 = vmax.xlane.f32.xlu0 %v11814_v53 }
 0x455   : > { %v2663_v22 = vpop.f32.mrb[65].mxu0  ;;  %v2672_v40 = vadd.f32 %v9364_v26, %v11828_v3 }
 0x456   : > { %v9365_v15 = vpop.f32.mrb[66].mxu0  ;;  %2034 = vmax.xlane.f32.xlu1 %v11823_v6  ;;  %v2664_v5 = vadd.f32 %v11828_v3, %v2663_v22  ;;  %v11876_v22 = vadd.f32 %v11588_v19, %v11748_v2  ;;  %v11888_v19 = vadd.f32 %v11598_v33, %v11766_v62 }
 0x457   : > { %v2675_v4 = vadd.f32 %v9365_v15, %v11828_v3  ;;  %v2666_v59 = vpop.f32.mrb[67].mxu0  ;;  %v11852_v15 = vadd.f32 %v11580_v13, %v11703_v42  ;;  %v11864_v42 = vadd.f32 %v11590_v21, %v11730_v10 }
 0x458   : > { %v2667_v53 = vadd.f32 %v11828_v3, %v2666_v59  ;;  %1371 = vmax.xlane.f32.xlu0 %v11833_v55  ;;  %v11857_v59 = vadd.f32 %v11586_v18, %v11722_v36  ;;  %v11871_v36 = vadd.f32 %v11584_v17, %v11739_v47 }
 0x459   : > { %v2727_v8 = vpack.c.bf16 %v2675_v4, %v2672_v40  ;;  %v11881_v4 = vadd.f32 %v11594_v31, %v11757_v56  ;;  %v11895_v56 = vadd.f32 %v11592_v30, %v11775_v51 }
 0x45a   : > { %v2726_v6 = vpack.c.bf16 %v2667_v53, %v2664_v5  ;;  %1373 = vmax.xlane.f32.xlu1 %v11840_v50 }
 0x45c   : > { %v9368_v14 = vpop.f32.mrb[68].mxu0  ;;  %9378 = vmatprep.subr.bf16.mxu0 %v2726_v6  ;;  %1375 = vmax.xlane.f32.xlu0 %v11847_v38 }
 0x45d   : > { %v2679_v26 = vpop.f32.mrb[69].mxu0  ;;  %9379 = vmatpush3.bf16.xpose.msra.mxu0 %v2726_v6  ;;  %v2688_v7 = vadd.f32 %v9368_v14, %v11828_v3 }
 0x45e   : > { %v9369_v40 = vpop.f32.mrb[70].mxu0  ;;  %9380 = vmatprep.subr.bf16.mxu0 %v2727_v8  ;;  %1377 = vmax.xlane.f32.xlu1 %v11852_v15  ;;  %v2680_v5 = vadd.f32 %v11828_v3, %v2679_v26 }
 0x45f   : > { %v2691_v41 = vadd.f32 %v9369_v40, %v11828_v3  ;;  %v2682_v13 = vpop.f32.mrb[71].mxu0 }
 0x460   : > { %v2683_v53 = vadd.f32 %v11828_v3, %v2682_v13  ;;  %1379 = vmax.xlane.f32.xlu0 %v11857_v59 }
 0x461   : > { %v2729_v18 = vpack.c.bf16 %v2691_v41, %v2688_v7  ;;  %v11900_v7 = vadd.f32 %v11596_v32, %v11784_v52  ;;  %v11905_v41 = vadd.f32 %v11602_v35, %v11793_v29  ;;  %v11912_v52 = vadd.f32 %v11606_v46, %v11802_v57  ;;  %v3307_v46 = vld [vmem:[%s14553_s8 + $0xcc] sm:$0xf] }
 0x462   : > { %v2728_v6 = vpack.c.bf16 %v2683_v53, %v2680_v5  ;;  %1381 = vmax.xlane.f32.xlu1 %v11864_v42  ;;  %v11919_v35 = vadd.f32 %v11600_v34, %v11811_v16  ;;  %v3304_v16 = vld [vmem:[%s14553_s8 + $0xc] sm:$0xf] }
 0x463   : > { %v3308_v57 = vld [vmem:[%s14553_s8 + $0x10c] sm:$0xf] }
 0x464   : > { %v9372_v21 = vpop.f32.mrb[72].mxu0  ;;  %1383 = vmax.xlane.f32.xlu0 %v11871_v36 }
 0x465   : > { %v2695_v10 = vpop.f32.mrb[73].mxu0  ;;  %9381 = vmatpush3.bf16.xpose.msra.mxu0 %v2727_v8  ;;  %v2704_v17 = vadd.f32 %v9372_v21, %v11828_v3  ;;  %v11924_v21 = vadd.f32 %v11604_v20, %v11820_v24  ;;  %v3306_v20 = vld [vmem:[%s14553_s8 + $0x8c] sm:$0xf] }
 0x466   : > { %v9373_v14 = vpop.f32.mrb[74].mxu0  ;;  %9382 = vmatprep.subr.bf16.mxu0 %v2728_v6  ;;  %1385 = vmax.xlane.f32.xlu1 %v11876_v22  ;;  %v2696_v2 = vadd.f32 %v11828_v3, %v2695_v10  ;;  %v8337_v24 = vcombine.low %v3306_v20, %v3307_v46  ;;  %v3765_v20 = vld [vmem:[%s14553_s8 + $0x12c] sm:$0xf] }
 0x467   : > { %v2707_v47 = vadd.f32 %v9373_v14, %v11828_v3  ;;  %v2698_v26 = vpop.f32.mrb[75].mxu0  ;;  %v3310_v14 = vld [vmem:[%s14553_s8 + $0x18c] sm:$0xf] }
 0x468   : > { %v2699_v8 = vadd.f32 %v11828_v3, %v2698_v26  ;;  %1387 = vmax.xlane.f32.xlu0 %v11881_v4  ;;  %v3312_v26 = vld [vmem:[%s14553_s8 + $0x20c] sm:$0xf] }
 0x469   : > { %v2731_v31 = vpack.c.bf16 %v2707_v47, %v2704_v17  ;;  %v3311_v17 = vld [vmem:[%s14553_s8 + $0x1cc] sm:$0xf] }
 0x46a   : > { %v2730_v40 = vpack.c.bf16 %v2699_v8, %v2696_v2  ;;  %1389 = vmax.xlane.f32.xlu1 %v11888_v19  ;;  %v8339_v47 = vcombine.low %v3310_v14, %v3311_v17  ;;  %v3313_v2 = vld [vmem:[%s14553_s8 + $0x24c] sm:$0xf] }
 0x46b   : > { %v8340_v8 = vcombine.low %v3312_v26, %v3313_v2  ;;  %v3766_v46 = vld [vmem:[%s14553_s8 + $0x16c] sm:$0xf] }
 0x46c   : > { %v9376_v33 = vpop.f32.mrb[76].mxu0  ;;  %1391 = vmax.xlane.f32.xlu0 %v11895_v56  ;;  %v3769_v14 = vld [vmem:[%s14553_s8 + $0x22c] sm:$0xf] }
 0x46d   : > { %v2711_v62 = vpop.f32.mrb[77].mxu0  ;;  %9383 = vmatpush3.bf16.xpose.msra.mxu0 %v2728_v6  ;;  %v2720_v51 = vadd.f32 %v9376_v33, %v11828_v3  ;;  %v3770_v17 = vld [vmem:[%s14553_s8 + $0x26c] sm:$0xf] }
 0x46e   : > { %v9377_v13 = vpop.f32.mrb[78].mxu0  ;;  %9384 = vmatprep.subr.bf16.mxu0 %v2729_v18  ;;  %1393 = vmax.xlane.f32.xlu1 %v11900_v7  ;;  %v2712_v32 = vadd.f32 %v11828_v3, %v2711_v62  ;;  %v3316_v62 = vld [vmem:[%s14553_s8 + $0x30c] sm:$0xf]  ;;  %v8349_v2 = vcombine.low %v3769_v14, %v3770_v17  ;;  %v4058_v14 = vld [vmem:[%s14553_s8 + $0x10] sm:$0xf] }
 0x46f   : > { %v2723_v30 = vadd.f32 %v9377_v13, %v11828_v3  ;;  %v2714_v5 = vpop.f32.mrb[79].mxu0  ;;  %v3317_v13 = vld [vmem:[%s14553_s8 + $0x34c] sm:$0xf]  ;;  %v4059_v17 = vld [vmem:[%s14553_s8 + $0x50] sm:$0xf] }
 0x470   : > { %v2715_v53 = vadd.f32 %v11828_v3, %v2714_v5  ;;  %1395 = vmax.xlane.f32.xlu0 %v11905_v41  ;;  %v3305_v3 = vld [vmem:[%s14553_s8 + $0x4c] sm:$0xf] }
 0x471   : > { %v2733_v29 = vpack.c.bf16 %v2723_v30, %v2720_v51  ;;  %v8336_v34 = vcombine.low %v3304_v16, %v3305_v3  ;;  %v8342_v51 = vcombine.low %v3316_v62, %v3317_v13  ;;  %v3318_v30 = vld [vmem:[%s14553_s8 + $0x38c] sm:$0xf] }
 0x472   : > { %v2732_v6 = vpack.c.bf16 %v2715_v53, %v2712_v32  ;;  %1397 = vmax.xlane.f32.xlu1 %v11912_v52  ;;  %v3319_v5 = vld [vmem:[%s14553_s8 + $0x3cc] sm:$0xf] }
 0x473   : > { %v8343_v32 = vcombine.low %v3318_v30, %v3319_v5  ;;  %v3761_v53 = vld [vmem:[%s14553_s8 + $0x2c] sm:$0xf] }
 0x474   : > { %1399 = vmax.xlane.f32.xlu0 %v11919_v35  ;;  %v3763_v16 = vld [vmem:[%s14553_s8 + $0xac] sm:$0xf] }
 0x475   : > { %9385 = vmatpush3.bf16.xpose.msra.mxu0 %v2729_v18  ;;  %v3309_v18 = vld [vmem:[%s14553_s8 + $0x14c] sm:$0xf] }
 0x476   : > { %9386 = vmatprep.subr.bf16.mxu0 %v2730_v40  ;;  %1401 = vmax.xlane.f32.xlu1 %v11924_v21  ;;  %v8338_v10 = vcombine.low %v3308_v57, %v3309_v18  ;;  %v3764_v3 = vld [vmem:[%s14553_s8 + $0xec] sm:$0xf] }
 0x477   : > { %v3767_v57 = vld [vmem:[%s14553_s8 + $0x1ac] sm:$0xf] }
 0x478   : > { %v3768_v18 = vld [vmem:[%s14553_s8 + $0x1ec] sm:$0xf] }
 0x47d   : > { %9387 = vmatpush3.bf16.xpose.msra.mxu0 %v2730_v40  ;;  %v3315_v40 = vld [vmem:[%s14553_s8 + $0x2cc] sm:$0xf] }
 0x47e   : > { %9388 = vmatprep.subr.bf16.mxu0 %v2731_v31 }
 0x485   : > { %9389 = vmatpush3.bf16.xpose.msra.mxu0 %v2731_v31  ;;  %v3314_v31 = vld [vmem:[%s14553_s8 + $0x28c] sm:$0xf] }
 0x486   : > { %9390 = vmatprep.subr.bf16.mxu0 %v2732_v6  ;;  %v8341_v33 = vcombine.low %v3314_v31, %v3315_v40  ;;  %v3772_v31 = vld [vmem:[%s14553_s8 + $0x2ec] sm:$0xf] }
 0x48d   : > { %9391 = vmatpush3.bf16.xpose.msra.mxu0 %v2732_v6 }
 0x48e   : > { %9392 = vmatprep.subr.bf16.mxu0 %v2733_v29 }
 0x495   : > { %9393 = vmatpush3.bf16.xpose.msra.mxu0 %v2733_v29  ;;  %v3762_v29 = vld [vmem:[%s14553_s8 + $0x6c] sm:$0xf] }
 0x496   : > { %9474 = vmatprep.subr.bf16.mxu0 %v8336_v34  ;;  %v8345_v6 = vcombine.low %v3761_v53, %v3762_v29  ;;  %v3773_v53 = vld [vmem:[%s14553_s8 + $0x32c] sm:$0xf] }
 0x497   : > { %v3774_v29 = vld [vmem:[%s14553_s8 + $0x36c] sm:$0xf] }
 0x49c   : > { %9395 = vmatmul.mubr.bf16.vlgmr.msra.gmra.mrb[80].mxu0 %v11383_v25 }
 0x49d   : > { %9398 = vmatprep.mubr.bf16.mxu0 %v11391_v37  ;;  %9475 = vmatpush3.bf16.msra.mxu0 %v8336_v34  ;;  %v8346_v34 = vcombine.low %v3763_v16, %v3764_v3  ;;  %v3775_v3 = vld [vmem:[%s14553_s8 + $0x3ac] sm:$0xf] }
 0x49e   : > { %9476 = vmatprep.subr.bf16.mxu0 %v8337_v24 }
 0x4a1   : > { %9477 = vmatpush3.bf16.msra.mxu0 %v8337_v24  ;;  %v8347_v24 = vcombine.low %v3765_v20, %v3766_v46 }
 0x4a2   : > { %9478 = vmatprep.subr.bf16.mxu0 %v8338_v10 }
 0x4a4   : > { %9399 = vmatmul.mubr.bf16.gmra.mrb[84].mxu0 %v11399_v49 }
 0x4a5   : > { %9402 = vmatprep.mubr.bf16.mxu0 %v11407_v61  ;;  %9479 = vmatpush3.bf16.msra.mxu0 %v8338_v10  ;;  %v8348_v10 = vcombine.low %v3767_v57, %v3768_v18 }
 0x4a6   : > { %9480 = vmatprep.subr.bf16.mxu0 %v8339_v47 }
 0x4a9   : > { %9481 = vmatpush3.bf16.msra.mxu0 %v8339_v47 }
 0x4aa   : > { %9482 = vmatprep.subr.bf16.mxu0 %v8340_v8 }
 0x4ac   : > { %9403 = vmatmul.mubr.bf16.gmra.mrb[88].mxu0 %v11415_v9 }
 0x4ad   : > { %9406 = vmatprep.mubr.bf16.mxu0 %v11423_v23  ;;  %9483 = vmatpush3.bf16.msra.mxu0 %v8340_v8  ;;  %v3771_v8 = vld [vmem:[%s14553_s8 + $0x2ac] sm:$0xf] }
 0x4ae   : > { %9484 = vmatprep.subr.bf16.mxu0 %v8341_v33  ;;  %v8350_v5 = vcombine.low %v3771_v8, %v3772_v31  ;;  %v14680_v8 = vld [vmem:[#allocation2_spill] sm:$0xff] }
 0x4b1   : > { %9485 = vmatpush3.bf16.msra.mxu0 %v8341_v33 }
 0x4b2   : > { %9486 = vmatprep.subr.bf16.mxu0 %v8342_v51 }
 0x4b4   : > { %9407 = vmatmul.mubr.bf16.gmra.mrb[92].mxu0 %v11431_v39 }
 0x4b5   : > { %9487 = vmatpush3.bf16.msra.mxu0 %v8342_v51  ;;  %9490 = vmatprep.mubr.bf16.mxu0 %v11283_v12 }
 0x4b6   : > { %9488 = vmatprep.subr.bf16.mxu0 %v8343_v32 }
 0x4b9   : > { %9489 = vmatpush3.bf16.msra.mxu0 %v8343_v32 }
 0x4ba   : > { %9538 = vmatprep.subr.bf16.mxu0 %v8345_v6 }
 0x4bc   : > { %9491 = vmatmul.mubr.bf16.vlgmr.msra.gmra.mrb[96].mxu0 %v11281_v11 }
 0x4bd   : > { %9494 = vmatprep.mubr.bf16.mxu0 %v11306_v28  ;;  %9539 = vmatpush3.bf16.msra.mxu0 %v8345_v6  ;;  %v8351_v6 = vcombine.low %v3773_v53, %v3774_v29  ;;  %v4060_v53 = vld [vmem:[%s14553_s8 + $0x90] sm:$0xf] }
 0x4be   : > { %9540 = vmatprep.subr.bf16.mxu0 %v8346_v34  ;;  %v4061_v29 = vld [vmem:[%s14553_s8 + $0xd0] sm:$0xf] }
 0x4c1   : > { %9541 = vmatpush3.bf16.msra.mxu0 %v8346_v34  ;;  %v3776_v34 = vld [vmem:[%s14553_s8 + $0x3ec] sm:$0xf] }
 0x4c2   : > { %9542 = vmatprep.subr.bf16.mxu0 %v8347_v24  ;;  %v8352_v18 = vcombine.low %v3775_v3, %v3776_v34  ;;  %v8355_v3 = vcombine.low %v4060_v53, %v4061_v29  ;;  %v14687_v29 = vld [vmem:[#allocation35_spill] sm:$0xff] }
 0x4c4   : > { %v2009_v47 = vpop.xlane.xlu1 %2008  ;;  %9495 = vmatmul.mubr.bf16.gmra.mrb[100].mxu0 %v11304_v27 }
 0x4c5   : > { %9498 = vmatprep.mubr.bf16.mxu0 %v11328_v44  ;;  %9543 = vmatpush3.bf16.msra.mxu0 %v8347_v24  ;;  %v2005_v26 = vpop.xlane.xlu0 %2004  ;;  %v2038_v33 = vsub.f32 %v11694_v54, %v2009_v47 }
 0x4c6   : > { %9544 = vmatprep.subr.bf16.mxu0 %v8348_v10  ;;  %v2036_v51 = vsub.f32 %v11697_v45, %v2005_v26  ;;  %v14678_v26 = vld [vmem:[#allocation27_spill] sm:$0xff] }
 0x4c8   : > { %v2011_v40 = vpop.xlane.xlu1 %2010 }
 0x4c9   : > { %v2039_v62 = vsub.f32 %v11712_v48, %v2011_v40  ;;  %9545 = vmatpush3.bf16.msra.mxu0 %v8348_v10  ;;  %v2007_v13 = vpop.xlane.xlu0 %2006 }
 0x4ca   : > { %v2037_v30 = vsub.f32 %v11715_v0, %v2007_v13  ;;  %9546 = vmatprep.subr.bf16.mxu0 %v8349_v2 }
 0x4cb   : > { %v2053_v32 = vpack.c.bf16 %v2039_v62, %v2038_v33  ;;  %v8354_v33 = vcombine.low %v4058_v14, %v4059_v17  ;;  %v4063_v14 = vld [vmem:[%s14553_s8 + $0x150] sm:$0xf] }
 0x4cc   : > { %v2052_v54 = vpack.c.bf16 %v2037_v30, %v2036_v51  ;;  %9499 = vmatmul.mubr.bf16.gmra.mrb[104].mxu0 %v11326_v43  ;;  %v14681_v51 = vld [vmem:[#allocation29_spill] sm:$0xff] }
 0x4cd   : > { %v2064_v48 = vmul.bf16 1069105081, %v2053_v32  ;;  %9502 = vmatprep.mubr.bf16.mxu0 %v11350_v60  ;;  %9547 = vmatpush3.bf16.msra.mxu0 %v8349_v2  ;;  %v2013_v45 = vpop.xlane.xlu0 %2012  ;;  %v14679_v2 = vld [vmem:[#allocation28_spill] sm:$0xff] }
 0x4ce   : > { %v2061_v0 = vmul.bf16 1069105081, %v2052_v54  ;;  %9548 = vmatprep.subr.bf16.mxu0 %v8350_v5  ;;  %v2040_v20 = vsub.f32 %v11725_v63, %v2013_v45 }
 0x4cf   : > { %v2015_v16 = vpop.xlane.xlu1 %2014 }
 0x4d0   : > { %10453 = vpow.bf16 %v2061_v0  ;;  %v2041_v46 = vsub.f32 %v11733_v1, %v2015_v16  ;;  %v14683_v0 = vld [vmem:[#allocation31_spill] sm:$0xff] }
 0x4d1   : > { %10455 = vpow.bf16 %v2064_v48  ;;  %9549 = vmatpush3.bf16.msra.mxu0 %v8350_v5  ;;  %v2017_v24 = vpop.xlane.xlu0 %2016  ;;  %v14682_v5 = vld [vmem:[#allocation30_spill] sm:$0xff] }
 0x4d2   : > { %v2054_v57 = vpack.c.bf16 %v2041_v46, %v2040_v20  ;;  %9550 = vmatprep.subr.bf16.mxu0 %v8351_v6  ;;  %v2042_v63 = vsub.f32 %v14678_v26, %v2017_v24  ;;  %v14684_v46 = vld [vmem:[#allocation32_spill] sm:$0xff] }
 0x4d3   : > { %v2019_v10 = vpop.xlane.xlu1 %2018 }
 0x4d4   : > { %v2067_v47 = vmul.bf16 1069105081, %v2054_v57  ;;  %v2043_v1 = vsub.f32 %v14679_v2, %v2019_v10  ;;  %9503 = vmatmul.mubr.bf16.gmra.mrb[108].mxu0 %v14680_v8  ;;  %v4062_v10 = vld [vmem:[%s14553_s8 + $0x110] sm:$0xf] }
 0x4d5   : > { %9551 = vmatpush3.bf16.msra.mxu0 %v8351_v6  ;;  %9554 = vmatprep.mubr.bf16.mxu0 %v11283_v12  ;;  %v2021_v31 = vpop.xlane.xlu0 %2020  ;;  %v8356_v2 = vcombine.low %v4062_v10, %v4063_v14 }
 0x4d6   : > { %10457 = vpow.bf16 %v2067_v47  ;;  %v2055_v40 = vpack.c.bf16 %v2043_v1, %v2042_v63  ;;  %9552 = vmatprep.subr.bf16.mxu0 %v8352_v18  ;;  %v2044_v30 = vsub.f32 %v14681_v51, %v2021_v31  ;;  %v14685_v31 = vld [vmem:[#allocation33_spill] sm:$0xff] }
 0x4d7   : > { %v2023_v62 = vpop.xlane.xlu1 %2022 }
 0x4d8   : > { %v2070_v13 = vmul.bf16 1069105081, %v2055_v40  ;;  %v2045_v32 = vsub.f32 %v14682_v5, %v2023_v62  ;;  %v14686_v62 = vld [vmem:[#allocation34_spill] sm:$0xff] }
 0x4d9   : > { %9553 = vmatpush3.bf16.msra.mxu0 %v8352_v18  ;;  %v2025_v54 = vpop.xlane.xlu0 %2024 }
 0x4da   : > { %10459 = vpow.bf16 %v2070_v13  ;;  %v2056_v48 = vpack.c.bf16 %v2045_v32, %v2044_v30  ;;  %9602 = vmatprep.subr.bf16.mxu0 %v8354_v33  ;;  %v2046_v6 = vsub.f32 %v14683_v0, %v2025_v54  ;;  %v4065_v30 = vld [vmem:[%s14553_s8 + $0x1d0] sm:$0xf] }
 0x4db   : > { %v12062_v45 = vpop.eup %10453  ;;  %v2027_v16 = vpop.xlane.xlu1 %2026 }
 0x4dc   : > { %v12065_v34 = vpop.eup %10455  ;;  %v2073_v20 = vmul.bf16 1069105081, %v2056_v48  ;;  %v2047_v24 = vsub.f32 %v14684_v46, %v2027_v16  ;;  %9555 = vmatmul.mubr.bf16.vlgmr.msra.gmra.mrb[112].mxu0 %v11281_v11  ;;  %v2085_v57 = vunpack.c.h.bf16 %v12062_v45  ;;  %v2084_v18 = vunpack.c.l.bf16 %v12062_v45  ;;  %v14688_v16 = vld [vmem:[#allocation36_spill] sm:$0xff] }
 0x4dd   : > { %9558 = vmatprep.mubr.bf16.mxu0 %v11306_v28  ;;  %9603 = vmatpush3.bf16.msra.mxu0 %v8354_v33  ;;  %v2029_v17 = vpop.xlane.xlu0 %2028  ;;  %v2087_v63 = vunpack.c.h.bf16 %v12065_v34  ;;  %v2086_v51 = vunpack.c.l.bf16 %v12065_v34  ;;  %v4064_v33 = vld [vmem:[%s14553_s8 + $0x190] sm:$0xf] }
 0x4de   : > { %10461 = vpow.bf16 %v2073_v20  ;;  %v2057_v47 = vpack.c.bf16 %v2047_v24, %v2046_v6  ;;  %2102 = vadd.xlane.f32.xlu1 %v2085_v57  ;;  %2100 = vadd.xlane.f32.xlu0 %v2084_v18  ;;  %v2048_v40 = vsub.f32 %v14685_v31, %v2029_v17  ;;  %v8357_v0 = vcombine.low %v4064_v33, %v4065_v30  ;;  %v4067_v57 = vld [vmem:[%s14553_s8 + $0x250] sm:$0xf] }
 0x4df   : > { %v2031_v26 = vpop.xlane.xlu1 %2030  ;;  %9604 = vmatprep.subr.bf16.mxu0 %v8355_v3 }
 0x4e0   : > { %v2076_v1 = vmul.bf16 1069105081, %v2057_v47  ;;  %v2049_v13 = vsub.f32 %v14686_v62, %v2031_v26  ;;  %v4069_v62 = vld [vmem:[%s14553_s8 + $0x2d0] sm:$0xf] }
 0x4e1   : > { %v12088_v5 = vpop.eup %10457  ;;  %9605 = vmatpush3.bf16.msra.mxu0 %v8355_v3  ;;  %v2033_v32 = vpop.xlane.xlu0 %2032  ;;  %v4066_v3 = vld [vmem:[%s14553_s8 + $0x210] sm:$0xf] }
 0x4e2   : > { %10463 = vpow.bf16 %v2076_v1  ;;  %v2058_v53 = vpack.c.bf16 %v2049_v13, %v2048_v40  ;;  %2106 = vadd.xlane.f32.xlu1 %v2087_v63  ;;  %2104 = vadd.xlane.f32.xlu0 %v2086_v51  ;;  %v2050_v54 = vsub.f32 %v14687_v29, %v2033_v32  ;;  %v2089_v46 = vunpack.c.h.bf16 %v12088_v5 }
 0x4e3   : > { %v2035_v48 = vpop.xlane.xlu1 %2034  ;;  %9606 = vmatprep.subr.bf16.mxu0 %v8356_v2  ;;  %v2088_v24 = vunpack.c.l.bf16 %v12088_v5  ;;  %v8358_v26 = vcombine.low %v4066_v3, %v4067_v57 }
 0x4e4   : > { %v2079_v6 = vmul.bf16 1069105081, %v2058_v53  ;;  %v2051_v20 = vsub.f32 %v14688_v16, %v2035_v48  ;;  %9559 = vmatmul.mubr.bf16.gmra.mrb[116].mxu0 %v11304_v27  ;;  %v4070_v48 = vld [vmem:[%s14553_s8 + $0x310] sm:$0xf] }
 0x4e5   : > { %v12101_v18 = vpop.eup %10459  ;;  %9562 = vmatprep.mubr.bf16.mxu0 %v11328_v44  ;;  %9607 = vmatpush3.bf16.msra.mxu0 %v8356_v2  ;;  %v1372_v10 = vpop.xlane.xlu0 %1371  ;;  %v4068_v2 = vld [vmem:[%s14553_s8 + $0x290] sm:$0xf] }
 0x4e6   : > { %10465 = vpow.bf16 %v2079_v6  ;;  %v2059_v14 = vpack.c.bf16 %v2051_v20, %v2050_v54  ;;  %2110 = vadd.xlane.f32.xlu1 %v2089_v46  ;;  %2108 = vadd.xlane.f32.xlu0 %v2088_v24  ;;  %v1403_v17 = vsub.f32 %v11833_v55, %v1372_v10  ;;  %v2091_v31 = vunpack.c.h.bf16 %v12101_v18 }
 0x4e7   : > { %v1374_v47 = vpop.xlane.xlu1 %1373  ;;  %9608 = vmatprep.subr.bf16.mxu0 %v8357_v0  ;;  %v2090_v40 = vunpack.c.l.bf16 %v12101_v18  ;;  %v8359_v30 = vcombine.low %v4068_v2, %v4069_v62 }
 0x4e8   : > { %v2082_v63 = vmul.bf16 1069105081, %v2059_v14  ;;  %v1404_v1 = vsub.f32 %v11840_v50, %v1374_v47  ;;  %v4072_v14 = vld [vmem:[%s14553_s8 + $0x390] sm:$0xf] }
 0x4e9   : > { %v12114_v13 = vpop.eup %10461  ;;  %9609 = vmatpush3.bf16.msra.mxu0 %v8357_v0  ;;  %v1376_v55 = vpop.xlane.xlu0 %1375 }
 0x4ea   : > { %10467 = vpow.bf16 %v2082_v63  ;;  %v1419_v51 = vpack.c.bf16 %v1404_v1, %v1403_v17  ;;  %2114 = vadd.xlane.f32.xlu1 %v2091_v31  ;;  %2112 = vadd.xlane.f32.xlu0 %v2090_v40  ;;  %v1405_v50 = vsub.f32 %v11847_v38, %v1376_v55  ;;  %v2093_v29 = vunpack.c.h.bf16 %v12114_v13  ;;  %v4071_v38 = vld [vmem:[%s14553_s8 + $0x350] sm:$0xf] }
 0x4eb   : > { %v1378_v33 = vpop.xlane.xlu1 %1377  ;;  %9610 = vmatprep.subr.bf16.mxu0 %v8358_v26  ;;  %v2092_v54 = vunpack.c.l.bf16 %v12114_v13  ;;  %v8360_v46 = vcombine.low %v4070_v48, %v4071_v38  ;;  %v4073_v17 = vld [vmem:[%s14553_s8 + $0x3d0] sm:$0xf] }
 0x4ec   : > { %v1428_v32 = vmul.bf16 1069105081, %v1419_v51  ;;  %v1406_v53 = vsub.f32 %v11852_v15, %v1378_v33  ;;  %9563 = vmatmul.mubr.bf16.gmra.mrb[120].mxu0 %v11326_v43  ;;  %v8361_v1 = vcombine.low %v4072_v14, %v4073_v17 }
 0x4ed   : > { %v12127_v0 = vpop.eup %10463  ;;  %9566 = vmatprep.mubr.bf16.mxu0 %v11350_v60  ;;  %9611 = vmatpush3.bf16.msra.mxu0 %v8358_v26  ;;  %v1380_v15 = vpop.xlane.xlu0 %1379 }
 0x4ee   : > { %10469 = vpow.bf16 %v1428_v32  ;;  %v1420_v6 = vpack.c.bf16 %v1406_v53, %v1405_v50  ;;  %2118 = vadd.xlane.f32.xlu1 %v2093_v29  ;;  %2116 = vadd.xlane.f32.xlu0 %v2092_v54  ;;  %v1407_v16 = vsub.f32 %v11857_v59, %v1380_v15  ;;  %v2095_v57 = vunpack.c.h.bf16 %v12127_v0 }
 0x4ef   : > { %v1382_v20 = vpop.xlane.xlu1 %1381  ;;  %9612 = vmatprep.subr.bf16.mxu0 %v8359_v30  ;;  %v2094_v10 = vunpack.c.l.bf16 %v12127_v0 }
 0x4f0   : > { %v1431_v24 = vmul.bf16 1069105081, %v1420_v6  ;;  %v1408_v3 = vsub.f32 %v11864_v42, %v1382_v20 }
 0x4f1   : > { %v12140_v47 = vpop.eup %10465  ;;  %9613 = vmatpush3.bf16.msra.mxu0 %v8359_v30  ;;  %v1384_v59 = vpop.xlane.xlu0 %1383 }
 0x4f2   : > { %10471 = vpow.bf16 %v1431_v24  ;;  %v1421_v26 = vpack.c.bf16 %v1408_v3, %v1407_v16  ;;  %2122 = vadd.xlane.f32.xlu1 %v2095_v57  ;;  %2120 = vadd.xlane.f32.xlu0 %v2094_v10  ;;  %v1409_v42 = vsub.f32 %v11871_v36, %v1384_v59  ;;  %v2097_v2 = vunpack.c.h.bf16 %v12140_v47 }
 0x4f3   : > { %v1386_v63 = vpop.xlane.xlu1 %1385  ;;  %9614 = vmatprep.subr.bf16.mxu0 %v8360_v46  ;;  %v2096_v62 = vunpack.c.l.bf16 %v12140_v47 }
 0x4f4   : > { %v1434_v31 = vmul.bf16 1069105081, %v1421_v26  ;;  %v1410_v40 = vsub.f32 %v11876_v22, %v1386_v63  ;;  %9567 = vmatmul.mubr.bf16.gmra.mrb[124].mxu0 %v14680_v8 }
 0x4f5   : > { %v12147_v55 = vpop.eup %10467  ;;  %9615 = vmatpush3.bf16.msra.mxu0 %v8360_v46  ;;  %9618 = vmatprep.mubr.bf16.mxu0 %v11283_v12  ;;  %v1388_v51 = vpop.xlane.xlu0 %1387 }
 0x4f6   : > { %10473 = vpow.bf16 %v1434_v31  ;;  %v1422_v36 = vpack.c.bf16 %v1410_v40, %v1409_v42  ;;  %2126 = vadd.xlane.f32.xlu1 %v2097_v2  ;;  %2124 = vadd.xlane.f32.xlu0 %v2096_v62  ;;  %v1411_v50 = vsub.f32 %v11881_v4, %v1388_v51  ;;  %v2099_v32 = vunpack.c.h.bf16 %v12147_v55 }
 0x4f7   : > { %v1390_v33 = vpop.xlane.xlu1 %1389  ;;  %9616 = vmatprep.subr.bf16.mxu0 %v8361_v1  ;;  %v2098_v53 = vunpack.c.l.bf16 %v12147_v55 }
 0x4f8   : > { %v1437_v22 = vmul.bf16 1069105081, %v1422_v36  ;;  %v1412_v30 = vsub.f32 %v11888_v19, %v1390_v33 }
 0x4f9   : > { %v12154_v29 = vpop.eup %10469  ;;  %9617 = vmatpush3.bf16.msra.mxu0 %v8361_v1  ;;  %v1392_v54 = vpop.xlane.xlu0 %1391 }
 0x4fa   : > { %10475 = vpow.bf16 %v1437_v22  ;;  %v1423_v48 = vpack.c.bf16 %v1412_v30, %v1411_v50  ;;  %2130 = vadd.xlane.f32.xlu1 %v2099_v32  ;;  %2128 = vadd.xlane.f32.xlu0 %v2098_v53  ;;  %v1413_v38 = vsub.f32 %v11895_v56, %v1392_v54  ;;  %v1452_v19 = vunpack.c.h.bf16 %v12154_v29 }
 0x4fb   : > { %v1394_v4 = vpop.xlane.xlu1 %1393  ;;  %v1451_v16 = vunpack.c.l.bf16 %v12154_v29 }
 0x4fc   : > { %v1440_v15 = vmul.bf16 1069105081, %v1423_v48  ;;  %v1414_v6 = vsub.f32 %v11900_v7, %v1394_v4  ;;  %9619 = vmatmul.mubr.bf16.vlgmr.msra.gmra.mrb[128].mxu0 %v11281_v11 }
 0x4fd   : > { %v12161_v20 = vpop.eup %10471  ;;  %9622 = vmatprep.mubr.bf16.mxu0 %v11306_v28  ;;  %v1396_v46 = vpop.xlane.xlu0 %1395 }
 0x4fe   : > { %10477 = vpow.bf16 %v1440_v15  ;;  %v1424_v24 = vpack.c.bf16 %v1414_v6, %v1413_v38  ;;  %1469 = vadd.xlane.f32.xlu1 %v1452_v19  ;;  %1467 = vadd.xlane.f32.xlu0 %v1451_v16  ;;  %v1415_v56 = vsub.f32 %v11905_v41, %v1396_v46  ;;  %v1454_v10 = vunpack.c.h.bf16 %v12161_v20  ;;  %v14689_v38 = vld [vmem:[#allocation5_spill] sm:$0xff] }
 0x4ff   : > { %v1398_v3 = vpop.xlane.xlu1 %1397  ;;  %v1453_v14 = vunpack.c.l.bf16 %v12161_v20 }
 0x500   : > { %v1443_v57 = vmul.bf16 1069105081, %v1424_v24  ;;  %v1416_v7 = vsub.f32 %v11912_v52, %v1398_v3 }
 0x501   : > { %v12168_v17 = vpop.eup %10473  ;;  %v1400_v59 = vpop.xlane.xlu0 %1399 }
 0x502   : > { %10479 = vpow.bf16 %v1443_v57  ;;  %v1425_v26 = vpack.c.bf16 %v1416_v7, %v1415_v56  ;;  %1473 = vadd.xlane.f32.xlu1 %v1454_v10  ;;  %1471 = vadd.xlane.f32.xlu0 %v1453_v14  ;;  %v1417_v42 = vsub.f32 %v11919_v35, %v1400_v59  ;;  %v1456_v52 = vunpack.c.h.bf16 %v12168_v17  ;;  %v14690_v14 = vld [vmem:[#allocation26_spill] sm:$0xff] }
 0x503   : > { %v1402_v63 = vpop.xlane.xlu1 %1401  ;;  %v1455_v31 = vunpack.c.l.bf16 %v12168_v17 }
 0x504   : > { %v1446_v1 = vmul.bf16 1069105081, %v1425_v26  ;;  %v1418_v41 = vsub.f32 %v11924_v21, %v1402_v63  ;;  %9623 = vmatmul.mubr.bf16.gmra.mrb[132].mxu0 %v11304_v27 }
 0x505   : > { %v12175_v40 = vpop.eup %10475  ;;  %9626 = vmatprep.mubr.bf16.mxu0 %v11328_v44 }
 0x506   : > { %10481 = vpow.bf16 %v1446_v1  ;;  %v1426_v2 = vpack.c.bf16 %v1418_v41, %v1417_v42  ;;  %1477 = vadd.xlane.f32.xlu1 %v1456_v52  ;;  %1475 = vadd.xlane.f32.xlu0 %v1455_v31  ;;  %v1458_v35 = vunpack.c.h.bf16 %v12175_v40  ;;  %v1457_v51 = vunpack.c.l.bf16 %v12175_v40 }
 0x508   : > { %v1449_v62 = vmul.bf16 1069105081, %v1426_v2  ;;  %v10933_v2 = vld [vmem:[%s14547_s2 + $0x10] sm:$0xff] }
 0x509   : > { %v12180_v21 = vpop.eup %10477 }
 0x50a   : > { %10483 = vpow.bf16 %v1449_v62  ;;  %1481 = vadd.xlane.f32.xlu1 %v1458_v35  ;;  %1479 = vadd.xlane.f32.xlu0 %v1457_v51  ;;  %v1460_v36 = vunpack.c.h.bf16 %v12180_v21  ;;  %v1459_v50 = vunpack.c.l.bf16 %v12180_v21 }
 0x50c   : > { %9627 = vmatmul.mubr.bf16.gmra.mrb[136].mxu0 %v11326_v43 }
 0x50d   : > { %v12185_v33 = vpop.eup %10479  ;;  %9630 = vmatprep.mubr.bf16.mxu0 %v11350_v60 }
 0x50e   : > { %1485 = vadd.xlane.f32.xlu1 %v1460_v36  ;;  %1483 = vadd.xlane.f32.xlu0 %v1459_v50  ;;  %v1462_v22 = vunpack.c.h.bf16 %v12185_v33  ;;  %v1461_v30 = vunpack.c.l.bf16 %v12185_v33 }
 0x511   : > { %v12190_v32 = vpop.eup %10481 }
 0x512   : > { %1489 = vadd.xlane.f32.xlu1 %v1462_v22  ;;  %1487 = vadd.xlane.f32.xlu0 %v1461_v30  ;;  %v1464_v53 = vunpack.c.h.bf16 %v12190_v32  ;;  %v1463_v54 = vunpack.c.l.bf16 %v12190_v32 }
 0x514   : > { %9631 = vmatmul.mubr.bf16.gmra.mrb[140].mxu0 %v14680_v8 }
 0x515   : > { %v12195_v48 = vpop.eup %10483  ;;  %9650 = vmatprep.mubr.bf16.mxu0 %v14689_v38 }
 0x516   : > { %1493 = vadd.xlane.f32.xlu1 %v1464_v53  ;;  %1491 = vadd.xlane.f32.xlu0 %v1463_v54  ;;  %v1466_v4 = vunpack.c.h.bf16 %v12195_v48  ;;  %v1465_v15 = vunpack.c.l.bf16 %v12195_v48 }
 0x51a   : > { %1497 = vadd.xlane.f32.xlu1 %v1466_v4  ;;  %1495 = vadd.xlane.f32.xlu0 %v1465_v15  ;;  %v10935_v15 = vld [vmem:[%s14547_s2 + $0x20] sm:$0xff] }
 0x56b   : > { %v2103_v6 = vpop.xlane.xlu1 %2102  ;;  %v2101_v19 = vpop.xlane.xlu0 %2100 }
 0x56c   : > { %v2132_v16 = vpack.c.bf16 %v2103_v6, %v2101_v19 }
 0x56e   : > { %v2140_v46 = vunpack.c.l.bf16 %v2132_v16  ;;  %v2141_v24 = vunpack.c.h.bf16 %v2132_v16 }
 0x56f   : > { %v9396_v56 = vpop.f32.mrb[80].mxu0  ;;  %v2107_v3 = vpop.xlane.xlu1 %2106 }
 0x570   : > { %10485 = vrcp.f32 %v2140_v46  ;;  %v2105_v57 = vpop.xlane.xlu0 %2104  ;;  %v2768_v7 = vpop.f32.mrb[81].mxu0  ;;  %v12210_v62 = vadd.f32 %v10933_v2, %v9396_v56  ;;  %v10938_v2 = vld [vmem:[%s14547_s2 + $0x38] sm:$0xff] }
 0x571   : > { %10487 = vrcp.f32 %v2141_v24  ;;  %v2133_v10 = vpack.c.bf16 %v2107_v3, %v2105_v57  ;;  %v12201_v59 = vadd.f32 %v2768_v7, %v14690_v14  ;;  %v9397_v26 = vpop.f32.mrb[82].mxu0  ;;  %v10936_v57 = vld [vmem:[%s14547_s2 + $0x28] sm:$0xff] }
 0x572   : > { %v2771_v42 = vpop.f32.mrb[83].mxu0 }
 0x573   : > { %v2142_v63 = vunpack.c.l.bf16 %v2133_v10  ;;  %v2143_v1 = vunpack.c.h.bf16 %v2133_v10  ;;  %v12204_v41 = vadd.f32 %v2771_v42, %v11709_v58  ;;  %v2111_v52 = vpop.xlane.xlu1 %2110  ;;  %2831 = vmax.xlane.f32.xlu0 %v12201_v59  ;;  %v10934_v58 = vld [vmem:[%s14547_s2 + $0x18] sm:$0xff]  ;;  %v10937_v42 = vld [vmem:[%s14547_s2 + $0x30] sm:$0xff] }
 0x574   : > { %v2109_v31 = vpop.xlane.xlu0 %2108  ;;  %v12216_v51 = vadd.f32 %v10934_v58, %v9397_v26 }
 0x575   : > { %10489 = vrcp.f32 %v2142_v63  ;;  %v2134_v35 = vpack.c.bf16 %v2111_v52, %v2109_v31  ;;  %2833 = vmax.xlane.f32.xlu1 %v12204_v41 }
 0x576   : > { %10491 = vrcp.f32 %v2143_v1 }
 0x577   : > { %v2144_v36 = vunpack.c.l.bf16 %v2134_v35  ;;  %v2145_v50 = vunpack.c.h.bf16 %v2134_v35  ;;  %v9400_v22 = vpop.f32.mrb[84].mxu0  ;;  %v2115_v30 = vpop.xlane.xlu1 %2114  ;;  %2835 = vmax.xlane.f32.xlu0 %v12210_v62 }
 0x578   : > { %v2113_v53 = vpop.xlane.xlu0 %2112  ;;  %v2784_v54 = vpop.f32.mrb[85].mxu0  ;;  %v12234_v63 = vadd.f32 %v10937_v42, %v9400_v22 }
 0x579   : > { %10493 = vrcp.f32 %v2144_v36  ;;  %v2135_v4 = vpack.c.bf16 %v2115_v30, %v2113_v53  ;;  %v12222_v6 = vadd.f32 %v10935_v15, %v2784_v54  ;;  %v9401_v19 = vpop.f32.mrb[86].mxu0  ;;  %2837 = vmax.xlane.f32.xlu1 %v12216_v51 }
 0x57a   : > { %v10486_v16 = vpop.eup %10485  ;;  %10495 = vrcp.f32 %v2145_v50  ;;  %v2787_v46 = vpop.f32.mrb[87].mxu0  ;;  %v12241_v35 = vadd.f32 %v10938_v2, %v9401_v19 }
 0x57b   : > { %v10488_v24 = vpop.eup %10487  ;;  %v2146_v56 = vunpack.c.l.bf16 %v2135_v4  ;;  %v2147_v3 = vunpack.c.h.bf16 %v2135_v4  ;;  %v12228_v7 = vadd.f32 %v10936_v57, %v2787_v46  ;;  %v2119_v10 = vpop.xlane.xlu1 %2118  ;;  %2839 = vmax.xlane.f32.xlu0 %v12222_v6  ;;  %v10940_v57 = vld [vmem:[%s14547_s2 + $0x48] sm:$0xff] }
 0x57c   : > { %v2117_v14 = vpop.xlane.xlu0 %2116  ;;  %v2172_v26 = vpack.c.bf16 %v10488_v24, %v10486_v16 }
 0x57d   : > { %10497 = vrcp.f32 %v2146_v56  ;;  %v2136_v1 = vpack.c.bf16 %v2119_v10, %v2117_v14  ;;  %2841 = vmax.xlane.f32.xlu1 %v12228_v7 }
 0x57e   : > { %10499 = vrcp.f32 %v2147_v3  ;;  %v2180_v52 = vmul.bf16 %v12062_v45, %v2172_v26  ;;  %v10939_v45 = vld [vmem:[%s14547_s2 + $0x40] sm:$0xff] }
 0x57f   : > { %v10490_v31 = vpop.eup %10489  ;;  %v2148_v58 = vunpack.c.l.bf16 %v2136_v1  ;;  %v2149_v36 = vunpack.c.h.bf16 %v2136_v1  ;;  %v9404_v50 = vpop.f32.mrb[88].mxu0  ;;  %2843 = vmax.xlane.f32.xlu0 %v12234_v63 }
 0x580   : > { %v2123_v30 = vpop.xlane.xlu1 %2122  ;;  %v10492_v22 = vpop.eup %10491  ;;  %9298 = vmatprep.mubr.bf16.mxu1 %v2180_v52  ;;  %v10941_v52 = vld [vmem:[%s14547_s2 + $0x50] sm:$0xff] }
 0x581   : > { %v2121_v53 = vpop.xlane.xlu0 %2120  ;;  %v2800_v54 = vpop.f32.mrb[89].mxu0  ;;  %10501 = vrcp.f32 %v2148_v58  ;;  %2845 = vmax.xlane.f32.xlu1 %v12241_v35  ;;  %v2173_v16 = vpack.c.bf16 %v10492_v22, %v10490_v31  ;;  %v12260_v31 = vadd.f32 %v10941_v52, %v9404_v50  ;;  %v14692_v50 = vld [vmem:[#allocation18_spill] sm:$0xff] }
 0x582   : > { %v2137_v4 = vpack.c.bf16 %v2123_v30, %v2121_v53  ;;  %v12247_v15 = vadd.f32 %v10939_v45, %v2800_v54  ;;  %v9405_v19 = vpop.f32.mrb[90].mxu0  ;;  %10503 = vrcp.f32 %v2149_v36  ;;  %v14691_v36 = vld [vmem:[#allocation19_spill] sm:$0xff] }
 0x583   : > { %v2803_v46 = vpop.f32.mrb[91].mxu0  ;;  %v10494_v24 = vpop.eup %10493  ;;  %v2181_v26 = vmul.bf16 %v12065_v34, %v2173_v16  ;;  %v10942_v34 = vld [vmem:[%s14547_s2 + $0x58] sm:$0xff] }
 0x584   : > { %v2150_v56 = vunpack.c.l.bf16 %v2137_v4  ;;  %v2151_v3 = vunpack.c.h.bf16 %v2137_v4  ;;  %v12253_v10 = vadd.f32 %v10940_v57, %v2803_v46  ;;  %v2127_v14 = vpop.xlane.xlu1 %2126  ;;  %2847 = vmax.xlane.f32.xlu0 %v12247_v15  ;;  %v10496_v42 = vpop.eup %10495  ;;  %v12267_v22 = vadd.f32 %v10942_v34, %v9405_v19  ;;  %v10943_v19 = vld [vmem:[%s14547_s2 + $0x60] sm:$0xff] }
 0x585   : > { %v2125_v1 = vpop.xlane.xlu0 %2124  ;;  %9299 = vmatmul.mubr.bf16.vlgmr.msra.gmra.mrb[80].mxu1 %v2181_v26  ;;  %v2174_v58 = vpack.c.bf16 %v10496_v42, %v10494_v24 }
 0x586   : > { %10505 = vrcp.f32 %v2150_v56  ;;  %v2138_v2 = vpack.c.bf16 %v2127_v14, %v2125_v1  ;;  %2849 = vmax.xlane.f32.xlu1 %v12253_v10  ;;  %9315 = vmatpush3.bf16.msra.mxu1 %v14691_v36 }
 0x587   : > { %10507 = vrcp.f32 %v2151_v3  ;;  %v10498_v30 = vpop.eup %10497  ;;  %9316 = vmatprep.subr.bf16.mxu1 %v14692_v50  ;;  %v9408_v4 = vpop.f32.mrb[92].mxu0  ;;  %v2182_v16 = vmul.bf16 %v12088_v5, %v2174_v58  ;;  %v10944_v58 = vld [vmem:[%s14547_s2 + $0x68] sm:$0xff] }
 0x588   : > { %v2152_v53 = vunpack.c.l.bf16 %v2138_v2  ;;  %v2153_v54 = vunpack.c.h.bf16 %v2138_v2  ;;  %v2131_v45 = vpop.xlane.xlu1 %2130  ;;  %2851 = vmax.xlane.f32.xlu0 %v12260_v31  ;;  %v10500_v46 = vpop.eup %10499  ;;  %v14693_v2 = vld [vmem:[#allocation21_spill] sm:$0xff] }
 0x589   : > { %v2129_v24 = vpop.xlane.xlu0 %2128  ;;  %v2816_v56 = vpop.f32.mrb[93].mxu0  ;;  %9302 = vmatprep.mubr.bf16.mxu1 %v2182_v16  ;;  %v2175_v26 = vpack.c.bf16 %v10500_v46, %v10498_v30 }
 0x58a   : > { %10509 = vrcp.f32 %v2152_v53  ;;  %v2139_v3 = vpack.c.bf16 %v2131_v45, %v2129_v24  ;;  %v12275_v57 = vadd.f32 %v10943_v19, %v2816_v56  ;;  %v9409_v14 = vpop.f32.mrb[94].mxu0  ;;  %2853 = vmax.xlane.f32.xlu1 %v12267_v22  ;;  %9317 = vmatpush3.bf16.msra.mxu1 %v14692_v50  ;;  %v10945_v50 = vld [vmem:[%s14547_s2 + $0x70] sm:$0xff] }
 0x58b   : > { %10511 = vrcp.f32 %v2153_v54  ;;  %v2819_v5 = vpop.f32.mrb[95].mxu0  ;;  %v10502_v42 = vpop.eup %10501  ;;  %9318 = vmatprep.subr.bf16.mxu1 %v14693_v2  ;;  %v2183_v30 = vmul.bf16 %v12101_v18, %v2175_v26  ;;  %v12290_v45 = vadd.f32 %v10945_v50, %v9408_v4  ;;  %v10946_v18 = vld [vmem:[%s14547_s2 + $0x78] sm:$0xff]  ;;  %v14694_v4 = vld [vmem:[#allocation20_spill] sm:$0xff] }
 0x58c   : > { %v2154_v1 = vunpack.c.l.bf16 %v2139_v3  ;;  %v2155_v52 = vunpack.c.h.bf16 %v2139_v3  ;;  %v12283_v36 = vadd.f32 %v10944_v58, %v2819_v5  ;;  %v1470_v34 = vpop.xlane.xlu1 %1469  ;;  %2855 = vmax.xlane.f32.xlu0 %v12275_v57  ;;  %v10504_v53 = vpop.eup %10503  ;;  %v12297_v56 = vadd.f32 %v10946_v18, %v9409_v14  ;;  %v12303_v5 = vld [vmem:[%s14554_s9 + $0x3] ss:$0 sm:$0xff] }
 0x58d   : > { %v1468_v54 = vpop.xlane.xlu0 %1467  ;;  %9303 = vmatmul.mubr.bf16.gmra.mrb[84].mxu1 %v2183_v30  ;;  %v2176_v46 = vpack.c.bf16 %v10504_v53, %v10502_v42 }
 0x58e   : > { %10513 = vrcp.f32 %v2154_v1  ;;  %v1499_v16 = vpack.c.bf16 %v1470_v34, %v1468_v54  ;;  %2857 = vmax.xlane.f32.xlu1 %v12283_v36  ;;  %9319 = vmatpush3.bf16.msra.mxu1 %v14693_v2 }
 0x58f   : > { %10515 = vrcp.f32 %v2155_v52  ;;  %9320 = vmatprep.subr.bf16.mxu1 %v14694_v4  ;;  %v9492_v26 = vpop.f32.mrb[96].mxu0  ;;  %v2184_v1 = vmul.bf16 %v12114_v13, %v2176_v46 }
 0x590   : > { %v10506_v24 = vpop.eup %10505  ;;  %v1507_v3 = vunpack.c.l.bf16 %v1499_v16  ;;  %v1508_v19 = vunpack.c.h.bf16 %v1499_v16  ;;  %v1474_v42 = vpop.xlane.xlu1 %1473  ;;  %2859 = vmax.xlane.f32.xlu0 %v12290_v45  ;;  %v3418_v53 = vadd.f32 %v9492_v26, %v12303_v5 }
 0x591   : > { %v10508_v52 = vpop.eup %10507  ;;  %v1472_v2 = vpop.xlane.xlu0 %1471  ;;  %9306 = vmatprep.mubr.bf16.mxu1 %v2184_v1 }
 0x592   : > { %v3409_v58 = vpop.f32.mrb[97].mxu0  ;;  %10517 = vrcp.f32 %v1507_v3  ;;  %v1500_v14 = vpack.c.bf16 %v1474_v42, %v1472_v2  ;;  %2861 = vmax.xlane.f32.xlu1 %v12297_v56  ;;  %v2177_v30 = vpack.c.bf16 %v10508_v52, %v10506_v24  ;;  %9321 = vmatpush3.bf16.msra.mxu1 %v14694_v4  ;;  %v14695_v3 = vld [vmem:[#allocation23_spill] sm:$0xff] }
 0x593   : > { %v9493_v34 = vpop.f32.mrb[98].mxu0  ;;  %10519 = vrcp.f32 %v1508_v19  ;;  %v3410_v54 = vadd.f32 %v12303_v5, %v3409_v58  ;;  %9322 = vmatprep.subr.bf16.mxu1 %v14695_v3 }
 0x594   : > { %v3421_v50 = vadd.f32 %v9493_v34, %v12303_v5  ;;  %v3412_v13 = vpop.f32.mrb[99].mxu0  ;;  %v10510_v16 = vpop.eup %10509  ;;  %v1509_v46 = vunpack.c.l.bf16 %v1500_v14  ;;  %v1510_v18 = vunpack.c.h.bf16 %v1500_v14  ;;  %v2185_v24 = vmul.bf16 %v12127_v0, %v2177_v30 }
 0x595   : > { %v3413_v42 = vadd.f32 %v12303_v5, %v3412_v13  ;;  %v1478_v1 = vpop.xlane.xlu1 %1477  ;;  %v10512_v19 = vpop.eup %10511  ;;  %v14696_v13 = vld [vmem:[#allocation22_spill] sm:$0xff] }
 0x596   : > { %v12315_v52 = vpack.c.bf16 %v3421_v50, %v3418_v53  ;;  %v1476_v26 = vpop.xlane.xlu0 %1475  ;;  %10521 = vrcp.f32 %v1509_v46  ;;  %9307 = vmatmul.mubr.bf16.gmra.mrb[88].mxu1 %v2185_v24  ;;  %v2178_v58 = vpack.c.bf16 %v10512_v19, %v10510_v16 }
 0x597   : > { %v12317_v4 = vpack.c.bf16 %v3413_v42, %v3410_v54  ;;  %v1501_v2 = vpack.c.bf16 %v1478_v1, %v1476_v26  ;;  %10523 = vrcp.f32 %v1510_v18  ;;  %9323 = vmatpush3.bf16.msra.mxu1 %v14695_v3  ;;  %v9496_v23 = vpop.f32.mrb[100].mxu0 }
 0x598   : > { %v10514_v14 = vpop.eup %10513  ;;  %9324 = vmatprep.subr.bf16.mxu1 %v14696_v13  ;;  %v2186_v30 = vmul.bf16 %v12140_v47, %v2178_v58  ;;  %v3425_v46 = vpop.f32.mrb[101].mxu0  ;;  %v3434_v18 = vadd.f32 %v9496_v23, %v12303_v5 }
 0x599   : > { %v1511_v34 = vunpack.c.l.bf16 %v1501_v2  ;;  %v1512_v39 = vunpack.c.h.bf16 %v1501_v2  ;;  %v1482_v0 = vpop.xlane.xlu1 %1481  ;;  %v10516_v53 = vpop.eup %10515  ;;  %v3426_v3 = vadd.f32 %v12303_v5, %v3425_v46  ;;  %v14697_v2 = vld [vmem:[#allocation25_spill] sm:$0xff] }
 0x59a   : > { %v1480_v50 = vpop.xlane.xlu0 %1479  ;;  %9310 = vmatprep.mubr.bf16.mxu1 %v2186_v30  ;;  %v9497_v42 = vpop.f32.mrb[102].mxu0  ;;  %v2179_v16 = vpack.c.bf16 %v10516_v53, %v10514_v14  ;;  %v3016_v30 = vld [vmem:[%s14553_s8 + $0x68] sm:$0xf] }
 0x59b   : > { %10525 = vrcp.f32 %v1511_v34  ;;  %v1502_v54 = vpack.c.bf16 %v1482_v0, %v1480_v50  ;;  %9325 = vmatpush3.bf16.msra.mxu1 %v14696_v13  ;;  %v3437_v1 = vadd.f32 %v9497_v42, %v12303_v5  ;;  %v3428_v24 = vpop.f32.mrb[103].mxu0  ;;  %v3015_v13 = vld [vmem:[%s14553_s8 + $0x28] sm:$0xf] }
 0x59c   : > { %10527 = vrcp.f32 %v1512_v39  ;;  %v10518_v19 = vpop.eup %10517  ;;  %9326 = vmatprep.subr.bf16.mxu1 %v14697_v2  ;;  %v3429_v58 = vadd.f32 %v12303_v5, %v3428_v24  ;;  %v2187_v14 = vmul.bf16 %v12147_v55, %v2179_v16  ;;  %v3017_v55 = vld [vmem:[%s14553_s8 + $0xa8] sm:$0xf] }
 0x59d   : > { %v1513_v47 = vunpack.c.l.bf16 %v1502_v54  ;;  %v1514_v26 = vunpack.c.h.bf16 %v1502_v54  ;;  %v1486_v34 = vpop.xlane.xlu1 %1485  ;;  %v10520_v39 = vpop.eup %10519  ;;  %v12329_v0 = vpack.c.bf16 %v3437_v1, %v3434_v18  ;;  %v3018_v54 = vld [vmem:[%s14553_s8 + $0xe8] sm:$0xf]  ;;  %v14698_v1 = vld [vmem:[#allocation24_spill] sm:$0xff] }
 0x59e   : > { %v1484_v23 = vpop.xlane.xlu0 %1483  ;;  %v12337_v53 = vpack.c.bf16 %v3429_v58, %v3426_v3  ;;  %9311 = vmatmul.mubr.bf16.gmra.mrb[92].mxu1 %v2187_v14  ;;  %v1539_v46 = vpack.c.bf16 %v10520_v39, %v10518_v19 }
 0x59f   : > { %10529 = vrcp.f32 %v1513_v47  ;;  %v1503_v50 = vpack.c.bf16 %v1486_v34, %v1484_v23  ;;  %9327 = vmatpush3.bf16.msra.mxu1 %v14697_v2  ;;  %v9500_v3 = vpop.f32.mrb[104].mxu0  ;;  %v8327_v47 = vcombine.low %v3015_v13, %v3016_v30  ;;  %v8328_v23 = vcombine.low %v3017_v55, %v3018_v54 }
 0x5a0   : > { %10531 = vrcp.f32 %v1514_v26  ;;  %v10522_v42 = vpop.eup %10521  ;;  %9328 = vmatprep.subr.bf16.mxu1 %v14698_v1  ;;  %v1547_v19 = vmul.bf16 %v12154_v29, %v1539_v46  ;;  %v3441_v58 = vpop.f32.mrb[105].mxu0  ;;  %v3450_v9 = vadd.f32 %v9500_v3, %v12303_v5 }
 0x5a1   : > { %v1515_v16 = vunpack.c.l.bf16 %v1503_v50  ;;  %v1516_v18 = vunpack.c.h.bf16 %v1503_v50  ;;  %v1490_v24 = vpop.xlane.xlu1 %1489  ;;  %v10524_v26 = vpop.eup %10523  ;;  %v3442_v50 = vadd.f32 %v12303_v5, %v3441_v58 }
 0x5a2   : > { %v1488_v2 = vpop.xlane.xlu0 %1487  ;;  %9330 = vmatprep.mubr.bf16.mxu1 %v1547_v19  ;;  %v9501_v14 = vpop.f32.mrb[106].mxu0  ;;  %v1540_v39 = vpack.c.bf16 %v10524_v26, %v10522_v42 }
 0x5a3   : > { %10533 = vrcp.f32 %v1515_v16  ;;  %v1504_v34 = vpack.c.bf16 %v1490_v24, %v1488_v2  ;;  %9329 = vmatpush3.bf16.msra.mxu1 %v14698_v1  ;;  %v3453_v61 = vadd.f32 %v9501_v14, %v12303_v5  ;;  %v3444_v29 = vpop.f32.mrb[107].mxu0  ;;  %v3020_v1 = vld [vmem:[%s14553_s8 + $0x168] sm:$0xf] }
 0x5a4   : > { %10535 = vrcp.f32 %v1516_v18  ;;  %v3445_v16 = vadd.f32 %v12303_v5, %v3444_v29  ;;  %v1548_v24 = vmul.bf16 %v12161_v20, %v1540_v39  ;;  %9410 = vmatprep.subr.bf16.mxu1 %v8327_v47  ;;  %v3019_v18 = vld [vmem:[%s14553_s8 + $0x128] sm:$0xf] }
 0x5a5   : > { %v10526_v13 = vpop.eup %10525  ;;  %v1517_v30 = vunpack.c.l.bf16 %v1504_v34  ;;  %v1518_v46 = vunpack.c.h.bf16 %v1504_v34  ;;  %v1494_v19 = vpop.xlane.xlu1 %1493  ;;  %v12354_v54 = vpack.c.bf16 %v3453_v61, %v3450_v9  ;;  %v3021_v61 = vld [vmem:[%s14553_s8 + $0x1a8] sm:$0xf]  ;;  %v8329_v29 = vcombine.low %v3019_v18, %v3020_v1 }
 0x5a6   : > { %v10528_v55 = vpop.eup %10527  ;;  %v1492_v42 = vpop.xlane.xlu0 %1491  ;;  %v12362_v3 = vpack.c.bf16 %v3445_v16, %v3442_v50  ;;  %9331 = vmatmul.mubr.bf16.vlgmr.msra.gmra.mrb[80].mxu1 %v1548_v24  ;;  %v3022_v9 = vld [vmem:[%s14553_s8 + $0x1e8] sm:$0xf] }
 0x5a7   : > { %10537 = vrcp.f32 %v1517_v30  ;;  %v1505_v26 = vpack.c.bf16 %v1494_v19, %v1492_v42  ;;  %v1541_v2 = vpack.c.bf16 %v10528_v55, %v10526_v13  ;;  %9411 = vmatpush3.bf16.msra.mxu1 %v8327_v47  ;;  %v9504_v14 = vpop.f32.mrb[108].mxu0  ;;  %v8330_v24 = vcombine.low %v3021_v61, %v3022_v9  ;;  %v3024_v61 = vld [vmem:[%s14553_s8 + $0x268] sm:$0xf] }
 0x5a8   : > { %10539 = vrcp.f32 %v1518_v46  ;;  %9412 = vmatprep.subr.bf16.mxu1 %v8328_v23  ;;  %v3457_v47 = vpop.f32.mrb[109].mxu0  ;;  %v3466_v55 = vadd.f32 %v9504_v14, %v12303_v5 }
 0x5a9   : > { %v10530_v20 = vpop.eup %10529  ;;  %v1519_v58 = vunpack.c.l.bf16 %v1505_v26  ;;  %v1520_v34 = vunpack.c.h.bf16 %v1505_v26  ;;  %v1498_v39 = vpop.xlane.xlu1 %1497  ;;  %v1549_v50 = vmul.bf16 %v12168_v17, %v1541_v2  ;;  %v3458_v42 = vadd.f32 %v12303_v5, %v3457_v47 }
 0x5aa   : > { %v10532_v13 = vpop.eup %10531  ;;  %v1496_v30 = vpop.xlane.xlu0 %1495 }
 0x5ab   : > { %10541 = vrcp.f32 %v1519_v58  ;;  %9334 = vmatprep.mubr.bf16.mxu1 %v1549_v50  ;;  %v1506_v46 = vpack.c.bf16 %v1498_v39, %v1496_v30  ;;  %v9505_v16 = vpop.f32.mrb[110].mxu0  ;;  %v1542_v19 = vpack.c.bf16 %v10532_v13, %v10530_v20  ;;  %9413 = vmatpush3.bf16.msra.mxu1 %v8328_v23  ;;  %v3023_v23 = vld [vmem:[%s14553_s8 + $0x228] sm:$0xf] }
 0x5ac   : > { %10543 = vrcp.f32 %v1520_v34  ;;  %v3469_v26 = vadd.f32 %v9505_v16, %v12303_v5  ;;  %v3460_v17 = vpop.f32.mrb[111].mxu0  ;;  %9414 = vmatprep.subr.bf16.mxu1 %v8329_v29  ;;  %v12390_v50 = vld [vmem:[%s14554_s9 + $0xb] ss:$0 sm:$0xff]  ;;  %v8331_v13 = vcombine.low %v3023_v23, %v3024_v61 }
 0x5ad   : > { %v10534_v2 = vpop.eup %10533  ;;  %v1521_v18 = vunpack.c.l.bf16 %v1506_v46  ;;  %v1522_v1 = vunpack.c.h.bf16 %v1506_v46  ;;  %v3461_v49 = vadd.f32 %v12303_v5, %v3460_v17  ;;  %v1550_v58 = vmul.bf16 %v12175_v40, %v1542_v19 }
 0x5ae   : > { %v10536_v39 = vpop.eup %10535  ;;  %v12376_v20 = vpack.c.bf16 %v3469_v26, %v3466_v55 }
 0x5af   : > { %10545 = vrcp.f32 %v1521_v18  ;;  %v12384_v9 = vpack.c.bf16 %v3461_v49, %v3458_v42  ;;  %9335 = vmatmul.mubr.bf16.gmra.mrb[84].mxu1 %v1550_v58  ;;  %v1543_v34 = vpack.c.bf16 %v10536_v39, %v10534_v2  ;;  %v9556_v14 = vpop.f32.mrb[112].mxu0  ;;  %v3025_v49 = vld [vmem:[%s14553_s8 + $0x2a8] sm:$0xf] }
 0x5b0   : > { %10547 = vrcp.f32 %v1522_v1  ;;  %9415 = vmatpush3.bf16.msra.mxu1 %v8329_v29  ;;  %v3866_v47 = vpop.f32.mrb[113].mxu0  ;;  %v3026_v29 = vld [vmem:[%s14553_s8 + $0x2e8] sm:$0xf]  ;;  %v3875_v16 = vadd.f32 %v9556_v14, %v12390_v50 }
 0x5b1   : > { %v10538_v40 = vpop.eup %10537  ;;  %v1551_v5 = vmul.bf16 %v12180_v21, %v1543_v34  ;;  %9416 = vmatprep.subr.bf16.mxu1 %v8330_v24  ;;  %v9557_v21 = vpop.f32.mrb[114].mxu0  ;;  %v3867_v26 = vadd.f32 %v12390_v50, %v3866_v47  ;;  %v8332_v18 = vcombine.low %v3025_v49, %v3026_v29  ;;  %v3027_v39 = vld [vmem:[%s14553_s8 + $0x328] sm:$0xf] }
 0x5b2   : > { %v10540_v30 = vpop.eup %10539  ;;  %v3878_v19 = vadd.f32 %v9557_v21, %v12390_v50  ;;  %v3869_v55 = vpop.f32.mrb[115].mxu0  ;;  %v3029_v47 = vld [vmem:[%s14553_s8 + $0x3a8] sm:$0xf] }
 0x5b3   : > { %9338 = vmatprep.mubr.bf16.mxu1 %v1551_v5  ;;  %v1544_v46 = vpack.c.bf16 %v10540_v30, %v10538_v40  ;;  %v3870_v17 = vadd.f32 %v12390_v50, %v3869_v55  ;;  %v3030_v49 = vld [vmem:[%s14553_s8 + $0x3e8] sm:$0xf] }
 0x5b4   : > { %9417 = vmatpush3.bf16.msra.mxu1 %v8330_v24  ;;  %v12403_v58 = vpack.c.bf16 %v3878_v19, %v3875_v16  ;;  %v3028_v24 = vld [vmem:[%s14553_s8 + $0x368] sm:$0xf] }
 0x5b5   : > { %v10542_v42 = vpop.eup %10541  ;;  %v1552_v2 = vmul.bf16 %v12185_v33, %v1544_v46  ;;  %9418 = vmatprep.subr.bf16.mxu1 %v8331_v13  ;;  %v12411_v23 = vpack.c.bf16 %v3870_v17, %v3867_v26  ;;  %v8333_v5 = vcombine.low %v3027_v39, %v3028_v24 }
 0x5b6   : > { %v10544_v1 = vpop.eup %10543 }
 0x5b7   : > { %9339 = vmatmul.mubr.bf16.gmra.mrb[88].mxu1 %v1552_v2  ;;  %v1545_v61 = vpack.c.bf16 %v10544_v1, %v10542_v42  ;;  %v9560_v40 = vpop.f32.mrb[116].mxu0  ;;  %v8334_v42 = vcombine.low %v3029_v47, %v3030_v49 }
 0x5b8   : > { %9419 = vmatpush3.bf16.msra.mxu1 %v8331_v13  ;;  %v3882_v30 = vpop.f32.mrb[117].mxu0  ;;  %v3891_v13 = vadd.f32 %v9560_v40, %v12390_v50 }
 0x5b9   : > { %v10546_v34 = vpop.eup %10545  ;;  %v1553_v33 = vmul.bf16 %v12190_v32, %v1545_v61  ;;  %9420 = vmatprep.subr.bf16.mxu1 %v8332_v18  ;;  %v9561_v29 = vpop.f32.mrb[118].mxu0  ;;  %v3883_v16 = vadd.f32 %v12390_v50, %v3882_v30 }
 0x5ba   : > { %v10548_v14 = vpop.eup %10547  ;;  %v3894_v32 = vadd.f32 %v9561_v29, %v12390_v50  ;;  %v3885_v46 = vpop.f32.mrb[119].mxu0 }
 0x5bb   : > { %9342 = vmatprep.mubr.bf16.mxu1 %v1553_v33  ;;  %v1546_v21 = vpack.c.bf16 %v10548_v14, %v10546_v34  ;;  %v3886_v19 = vadd.f32 %v12390_v50, %v3885_v46 }
 0x5bc   : > { %9421 = vmatpush3.bf16.msra.mxu1 %v8332_v18  ;;  %v12425_v26 = vpack.c.bf16 %v3894_v32, %v3891_v13 }
 0x5bd   : > { %v1554_v55 = vmul.bf16 %v12195_v48, %v1546_v21  ;;  %9422 = vmatprep.subr.bf16.mxu1 %v8333_v5  ;;  %v12427_v17 = vpack.c.bf16 %v3886_v19, %v3883_v16  ;;  %v8353_v19 = vld [vmem:[%s14554_s9 + $0x4] ss:$0 sm:$0xff] }
 0x5bf   : > { %9343 = vmatmul.mubr.bf16.gmra.mrb[92].mxu1 %v1554_v55  ;;  %v9564_v2 = vpop.f32.mrb[120].mxu0 }
 0x5c0   : > { %9423 = vmatpush3.bf16.msra.mxu1 %v8333_v5  ;;  %9426 = vmatprep.mubr.bf16.mxu1 %v11283_v12  ;;  %v3898_v18 = vpop.f32.mrb[121].mxu0  ;;  %v3907_v39 = vadd.f32 %v9564_v2, %v12390_v50 }
 0x5c1   : > { %9424 = vmatprep.subr.bf16.mxu1 %v8334_v42  ;;  %v9565_v1 = vpop.f32.mrb[122].mxu0  ;;  %v3899_v61 = vadd.f32 %v12390_v50, %v3898_v18 }
 0x5c2   : > { %v3910_v24 = vadd.f32 %v9565_v1, %v12390_v50  ;;  %v3901_v48 = vpop.f32.mrb[123].mxu0 }
 0x5c3   : > { %v3902_v34 = vadd.f32 %v12390_v50, %v3901_v48 }
 0x5c4   : > { %9425 = vmatpush3.bf16.msra.mxu1 %v8334_v42  ;;  %v12434_v33 = vpack.c.bf16 %v3910_v24, %v3907_v39 }
 0x5c5   : > { %v12436_v40 = vpack.c.bf16 %v3902_v34, %v3899_v61 }
 0x5c7   : > { %9427 = vmatmul.mubr.bf16.vlgmr.msra.gmra.mrb[96].mxu1 %v11281_v11  ;;  %v9568_v5 = vpop.f32.mrb[124].mxu0 }
 0x5c8   : > { %9430 = vmatprep.mubr.bf16.mxu1 %v11306_v28  ;;  %v3914_v14 = vpop.f32.mrb[125].mxu0  ;;  %v3923_v47 = vadd.f32 %v9568_v5, %v12390_v50 }
 0x5c9   : > { %v9569_v30 = vpop.f32.mrb[126].mxu0  ;;  %v3915_v21 = vadd.f32 %v12390_v50, %v3914_v14 }
 0x5ca   : > { %v3926_v49 = vadd.f32 %v9569_v30, %v12390_v50  ;;  %v3917_v29 = vpop.f32.mrb[127].mxu0 }
 0x5cb   : > { %v3918_v13 = vadd.f32 %v12390_v50, %v3917_v29 }
 0x5cc   : > { %v12444_v32 = vpack.c.bf16 %v3926_v49, %v3923_v47 }
 0x5cd   : > { %v12446_v46 = vpack.c.bf16 %v3918_v13, %v3915_v21 }
 0x5cf   : > { %9431 = vmatmul.mubr.bf16.gmra.mrb[100].mxu1 %v11304_v27  ;;  %v9620_v16 = vpop.f32.mrb[128].mxu0 }
 0x5d0   : > { %9434 = vmatprep.mubr.bf16.mxu1 %v11328_v44  ;;  %v4163_v55 = vpop.f32.mrb[129].mxu0  ;;  %v4172_v2 = vadd.f32 %v9620_v16, %v8353_v19 }
 0x5d1   : > { %v9621_v42 = vpop.f32.mrb[130].mxu0  ;;  %v4164_v39 = vadd.f32 %v8353_v19, %v4163_v55 }
 0x5d2   : > { %v4175_v18 = vadd.f32 %v9621_v42, %v8353_v19  ;;  %v4166_v1 = vpop.f32.mrb[131].mxu0 }
 0x5d3   : > { %v4167_v50 = vadd.f32 %v8353_v19, %v4166_v1 }
 0x5d4   : > { %v4227_v24 = vpack.c.bf16 %v4175_v18, %v4172_v2 }
 0x5d5   : > { %v4226_v48 = vpack.c.bf16 %v4167_v50, %v4164_v39 }
 0x5d7   : > { %9435 = vmatmul.mubr.bf16.gmra.mrb[104].mxu1 %v11326_v43  ;;  %v9624_v61 = vpop.f32.mrb[132].mxu0  ;;  %9634 = vmatprep.subr.bf16.mxu0 %v4226_v48 }
 0x5d8   : > { %9438 = vmatprep.mubr.bf16.mxu1 %v11350_v60  ;;  %v4179_v34 = vpop.f32.mrb[133].mxu0  ;;  %9635 = vmatpush3.bf16.xpose.msra.mxu0 %v4226_v48  ;;  %v4188_v14 = vadd.f32 %v9624_v61, %v8353_v19 }
 0x5d9   : > { %v9625_v5 = vpop.f32.mrb[134].mxu0  ;;  %9636 = vmatprep.subr.bf16.mxu0 %v4227_v24  ;;  %v4180_v49 = vadd.f32 %v8353_v19, %v4179_v34 }
 0x5da   : > { %v4191_v30 = vadd.f32 %v9625_v5, %v8353_v19  ;;  %v4182_v47 = vpop.f32.mrb[135].mxu0 }
 0x5db   : > { %v4183_v29 = vadd.f32 %v8353_v19, %v4182_v47 }
 0x5dc   : > { %v4229_v21 = vpack.c.bf16 %v4191_v30, %v4188_v14 }
 0x5dd   : > { %v4228_v13 = vpack.c.bf16 %v4183_v29, %v4180_v49 }
 0x5df   : > { %9439 = vmatmul.mubr.bf16.gmra.mrb[108].mxu1 %v14680_v8  ;;  %v9628_v16 = vpop.f32.mrb[136].mxu0 }
 0x5e0   : > { %v4195_v55 = vpop.f32.mrb[137].mxu0  ;;  %9637 = vmatpush3.bf16.xpose.msra.mxu0 %v4227_v24  ;;  %v4204_v2 = vadd.f32 %v9628_v16, %v8353_v19 }
 0x5e1   : > { %v9629_v42 = vpop.f32.mrb[138].mxu0  ;;  %9638 = vmatprep.subr.bf16.mxu0 %v4228_v13  ;;  %v4196_v39 = vadd.f32 %v8353_v19, %v4195_v55 }
 0x5e2   : > { %v4207_v18 = vadd.f32 %v9629_v42, %v8353_v19  ;;  %v4198_v1 = vpop.f32.mrb[139].mxu0 }
 0x5e3   : > { %v4199_v50 = vadd.f32 %v8353_v19, %v4198_v1 }
 0x5e4   : > { %v4231_v48 = vpack.c.bf16 %v4207_v18, %v4204_v2 }
 0x5e5   : > { %v4230_v61 = vpack.c.bf16 %v4199_v50, %v4196_v39 }
 0x5e7   : > { %v9632_v5 = vpop.f32.mrb[140].mxu0 }
 0x5e8   : > { %v4211_v60 = vpop.f32.mrb[141].mxu0  ;;  %9639 = vmatpush3.bf16.xpose.msra.mxu0 %v4228_v13  ;;  %v4220_v14 = vadd.f32 %v9632_v5, %v8353_v19 }
 0x5e9   : > { %v9633_v34 = vpop.f32.mrb[142].mxu0  ;;  %9640 = vmatprep.subr.bf16.mxu0 %v4229_v21  ;;  %v4212_v49 = vadd.f32 %v8353_v19, %v4211_v60 }
 0x5ea   : > { %v4223_v30 = vadd.f32 %v9633_v34, %v8353_v19  ;;  %v4214_v47 = vpop.f32.mrb[143].mxu0 }
 0x5eb   : > { %v4215_v29 = vadd.f32 %v8353_v19, %v4214_v47 }
 0x5ec   : > { %v4233_v24 = vpack.c.bf16 %v4223_v30, %v4220_v14 }
 0x5ed   : > { %v4232_v8 = vpack.c.bf16 %v4215_v29, %v4212_v49 }
 0x5f0   : > { %9641 = vmatpush3.bf16.xpose.msra.mxu0 %v4229_v21 }
 0x5f1   : > { %9642 = vmatprep.subr.bf16.mxu0 %v4230_v61 }
 0x5f8   : > { %9643 = vmatpush3.bf16.xpose.msra.mxu0 %v4230_v61 }
 0x5f9   : > { %9644 = vmatprep.subr.bf16.mxu0 %v4231_v48 }
 0x600   : > { %9645 = vmatpush3.bf16.xpose.msra.mxu0 %v4231_v48  ;;  %v2832_v16 = vpop.xlane.xlu0 %2831 }
 0x601   : > { %9646 = vmatprep.subr.bf16.mxu0 %v4232_v8  ;;  %v2863_v42 = vsub.f32 %v12201_v59, %v2832_v16 }
 0x602   : > { %v2834_v55 = vpop.xlane.xlu1 %2833 }
 0x603   : > { %v2864_v13 = vsub.f32 %v12204_v41, %v2834_v55 }
 0x604   : > { %v2836_v2 = vpop.xlane.xlu0 %2835 }
 0x605   : > { %v2879_v18 = vpack.c.bf16 %v2864_v13, %v2863_v42  ;;  %v2865_v60 = vsub.f32 %v12210_v62, %v2836_v2 }
 0x606   : > { %v2838_v1 = vpop.xlane.xlu1 %2837 }
 0x607   : > { %v2888_v39 = vmul.bf16 1069105081, %v2879_v18  ;;  %v2866_v19 = vsub.f32 %v12216_v51, %v2838_v1  ;;  %v14699_v1 = vld [vmem:[#allocation6_spill] sm:$0xff] }
 0x608   : > { %9647 = vmatpush3.bf16.xpose.msra.mxu0 %v4232_v8  ;;  %v2840_v21 = vpop.xlane.xlu0 %2839 }
 0x609   : > { %10549 = vpow.bf16 %v2888_v39  ;;  %v2880_v50 = vpack.c.bf16 %v2866_v19, %v2865_v60  ;;  %9648 = vmatprep.subr.bf16.mxu0 %v4233_v24  ;;  %v2867_v5 = vsub.f32 %v12222_v6, %v2840_v21 }
 0x60a   : > { %v2842_v48 = vpop.xlane.xlu1 %2841 }
 0x60b   : > { %v2891_v61 = vmul.bf16 1069105081, %v2880_v50  ;;  %v2868_v59 = vsub.f32 %v12228_v7, %v2842_v48 }
 0x60c   : > { %v2844_v41 = vpop.xlane.xlu0 %2843 }
 0x60d   : > { %10551 = vpow.bf16 %v2891_v61  ;;  %v2881_v34 = vpack.c.bf16 %v2868_v59, %v2867_v5  ;;  %v2869_v62 = vsub.f32 %v12234_v63, %v2844_v41 }
 0x60e   : > { %v2846_v14 = vpop.xlane.xlu1 %2845 }
 0x60f   : > { %v2894_v30 = vmul.bf16 1069105081, %v2881_v34  ;;  %v2870_v51 = vsub.f32 %v12241_v35, %v2846_v14 }
 0x610   : > { %9649 = vmatpush3.bf16.xpose.msra.mxu0 %v4233_v24 }
 0x611   : > { %v2848_v8 = vpop.xlane.xlu0 %2847  ;;  %10553 = vpow.bf16 %v2894_v30  ;;  %v2882_v47 = vpack.c.bf16 %v2870_v51, %v2869_v62 }
 0x612   : > { %v2871_v16 = vsub.f32 %v12247_v15, %v2848_v8  ;;  %v14702_v8 = vld [vmem:[#allocation11_spill] sm:$0xff] }
 0x613   : > { %v2850_v49 = vpop.xlane.xlu1 %2849  ;;  %v2897_v29 = vmul.bf16 1069105081, %v2882_v47 }
 0x614   : > { %v2872_v6 = vsub.f32 %v12253_v10, %v2850_v49  ;;  %v12466_v7 = vpop.eup %10549  ;;  %v14700_v10 = vld [vmem:[#allocation7_spill] sm:$0xff] }
 0x615   : > { %v2852_v55 = vpop.xlane.xlu0 %2851  ;;  %10555 = vpow.bf16 %v2897_v29  ;;  %v2912_v13 = vunpack.c.h.bf16 %v12466_v7  ;;  %v2911_v35 = vunpack.c.l.bf16 %v12466_v7 }
 0x616   : > { %v2883_v42 = vpack.c.bf16 %v2872_v6, %v2871_v16  ;;  %v2873_v2 = vsub.f32 %v12260_v31, %v2852_v55  ;;  %v14703_v55 = vld [vmem:[#allocation13_spill] sm:$0xff] }
 0x617   : > { %v2854_v63 = vpop.xlane.xlu1 %2853  ;;  %9651 = vmatmul.mubr.bf16.vlgmr.msra.gmra.mrb[144].mxu0 %v14699_v1  ;;  %2929 = vadd.xlane.f32.xlu1 %v2912_v13  ;;  %v14704_v13 = vld [vmem:[#allocation15_spill] sm:$0xff] }
 0x618   : > { %v2900_v24 = vmul.bf16 1069105081, %v2883_v42  ;;  %v2874_v18 = vsub.f32 %v12267_v22, %v2854_v63  ;;  %v12473_v15 = vpop.eup %10551  ;;  %2927 = vadd.xlane.f32.xlu0 %v2911_v35  ;;  %9654 = vmatprep.mubr.bf16.mxu0 %v14700_v10 }
 0x619   : > { %v2856_v39 = vpop.xlane.xlu0 %2855  ;;  %v2914_v19 = vunpack.c.h.bf16 %v12473_v15  ;;  %v2913_v50 = vunpack.c.l.bf16 %v12473_v15 }
 0x61a   : > { %10557 = vpow.bf16 %v2900_v24  ;;  %v2884_v60 = vpack.c.bf16 %v2874_v18, %v2873_v2  ;;  %v2875_v31 = vsub.f32 %v12275_v57, %v2856_v39  ;;  %v14701_v57 = vld [vmem:[#allocation9_spill] sm:$0xff] }
 0x61b   : > { %v2858_v21 = vpop.xlane.xlu1 %2857  ;;  %2933 = vadd.xlane.f32.xlu1 %v2914_v19  ;;  %v14705_v39 = vld [vmem:[#allocation17_spill] sm:$0xff] }
 0x61c   : > { %v2903_v48 = vmul.bf16 1069105081, %v2884_v60  ;;  %v2876_v22 = vsub.f32 %v12283_v36, %v2858_v21  ;;  %v12480_v61 = vpop.eup %10553  ;;  %2931 = vadd.xlane.f32.xlu0 %v2913_v50 }
 0x61d   : > { %v2860_v5 = vpop.xlane.xlu0 %2859  ;;  %v2916_v41 = vunpack.c.h.bf16 %v12480_v61  ;;  %v2915_v14 = vunpack.c.l.bf16 %v12480_v61 }
 0x61e   : > { %10559 = vpow.bf16 %v2903_v48  ;;  %v2885_v59 = vpack.c.bf16 %v2876_v22, %v2875_v31  ;;  %v2877_v62 = vsub.f32 %v12290_v45, %v2860_v5  ;;  %v12515_v48 = vld [vmem:[%s14554_s9 + $0xa] ss:$0 sm:$0xff] }
 0x61f   : > { %v2862_v34 = vpop.xlane.xlu1 %2861  ;;  %9655 = vmatmul.mubr.bf16.gmra.mrb[148].mxu0 %v14701_v57  ;;  %2937 = vadd.xlane.f32.xlu1 %v2916_v41 }
 0x620   : > { %v2906_v30 = vmul.bf16 1069105081, %v2885_v59  ;;  %v2878_v51 = vsub.f32 %v12297_v56, %v2862_v34  ;;  %v12487_v36 = vpop.eup %10555  ;;  %2935 = vadd.xlane.f32.xlu0 %v2915_v14  ;;  %9658 = vmatprep.mubr.bf16.mxu0 %v14702_v8 }
 0x621   : > { %v2918_v49 = vunpack.c.h.bf16 %v12487_v36  ;;  %v2917_v29 = vunpack.c.l.bf16 %v12487_v36 }
 0x622   : > { %10561 = vpow.bf16 %v2906_v30  ;;  %v2886_v47 = vpack.c.bf16 %v2878_v51, %v2877_v62 }
 0x623   : > { %2941 = vadd.xlane.f32.xlu1 %v2918_v49 }
 0x624   : > { %v2909_v16 = vmul.bf16 1069105081, %v2886_v47  ;;  %2939 = vadd.xlane.f32.xlu0 %v2917_v29 }
 0x625   : > { %v12492_v6 = vpop.eup %10557 }
 0x626   : > { %10563 = vpow.bf16 %v2909_v16  ;;  %v2920_v45 = vunpack.c.h.bf16 %v12492_v6  ;;  %v2919_v56 = vunpack.c.l.bf16 %v12492_v6 }
 0x627   : > { %9659 = vmatmul.mubr.bf16.gmra.mrb[152].mxu0 %v14703_v55 }
 0x628   : > { %2945 = vadd.xlane.f32.xlu1 %v2920_v45  ;;  %2943 = vadd.xlane.f32.xlu0 %v2919_v56 }
 0x629   : > { %v12497_v42 = vpop.eup %10559  ;;  %9662 = vmatprep.mubr.bf16.mxu0 %v14704_v13 }
 0x62a   : > { %v2922_v63 = vunpack.c.h.bf16 %v12497_v42  ;;  %v2921_v35 = vunpack.c.l.bf16 %v12497_v42 }
 0x62c   : > { %2949 = vadd.xlane.f32.xlu1 %v2922_v63  ;;  %2947 = vadd.xlane.f32.xlu0 %v2921_v35 }
 0x62d   : > { %v12502_v24 = vpop.eup %10561 }
 0x62e   : > { %v2924_v2 = vunpack.c.h.bf16 %v12502_v24  ;;  %v2923_v18 = vunpack.c.l.bf16 %v12502_v24 }
 0x62f   : > { %9663 = vmatmul.mubr.bf16.gmra.mrb[156].mxu0 %v14705_v39 }
 0x630   : > { %2953 = vadd.xlane.f32.xlu1 %v2924_v2  ;;  %2951 = vadd.xlane.f32.xlu0 %v2923_v18 }
 0x631   : > { %v12507_v60 = vpop.eup %10563  ;;  %9746 = vmatprep.mubr.bf16.mxu0 %v14689_v38 }
 0x632   : > { %v2926_v19 = vunpack.c.h.bf16 %v12507_v60  ;;  %v2925_v21 = vunpack.c.l.bf16 %v12507_v60 }
 0x634   : > { %2957 = vadd.xlane.f32.xlu1 %v2926_v19  ;;  %2955 = vadd.xlane.f32.xlu0 %v2925_v21 }
 0x69a   : > { %v9428_v50 = vpop.f32.mrb[96].mxu1 }
 0x69b   : > { %v3120_v31 = vpop.f32.mrb[97].mxu1  ;;  %v3129_v5 = vadd.f32 %v9428_v50, %v12515_v48 }
 0x69c   : > { %v9429_v22 = vpop.f32.mrb[98].mxu1  ;;  %v3121_v34 = vadd.f32 %v12515_v48, %v3120_v31 }
 0x69d   : > { %v3132_v59 = vadd.f32 %v9429_v22, %v12515_v48  ;;  %v3123_v41 = vpop.f32.mrb[99].mxu1 }
 0x69e   : > { %v3124_v14 = vadd.f32 %v12515_v48, %v3123_v41 }
 0x69f   : > { %v3184_v30 = vpack.c.bf16 %v3132_v59, %v3129_v5 }
 0x6a0   : > { %v3183_v62 = vpack.c.bf16 %v3124_v14, %v3121_v34 }
 0x6a2   : > { %v9432_v51 = vpop.f32.mrb[100].mxu1  ;;  %9442 = vmatprep.subr.bf16.mxu1 %v3183_v62 }
 0x6a3   : > { %v3136_v47 = vpop.f32.mrb[101].mxu1  ;;  %9443 = vmatpush3.bf16.msra.mxu1 %v3183_v62  ;;  %v3145_v29 = vadd.f32 %v9432_v51, %v12515_v48 }
 0x6a4   : > { %v9433_v49 = vpop.f32.mrb[102].mxu1  ;;  %9444 = vmatprep.subr.bf16.mxu1 %v3184_v30  ;;  %v3137_v56 = vadd.f32 %v12515_v48, %v3136_v47  ;;  %v2930_v35 = vpop.xlane.xlu1 %2929 }
 0x6a5   : > { %v3148_v16 = vadd.f32 %v9433_v49, %v12515_v48  ;;  %v3139_v45 = vpop.f32.mrb[103].mxu1  ;;  %v2928_v18 = vpop.xlane.xlu0 %2927 }
 0x6a6   : > { %v3140_v63 = vadd.f32 %v12515_v48, %v3139_v45  ;;  %v2959_v21 = vpack.c.bf16 %v2930_v35, %v2928_v18 }
 0x6a7   : > { %v3186_v2 = vpack.c.bf16 %v3148_v16, %v3145_v29  ;;  %9445 = vmatpush3.bf16.msra.mxu1 %v3184_v30 }
 0x6a8   : > { %v3185_v19 = vpack.c.bf16 %v3140_v63, %v3137_v56  ;;  %v2967_v50 = vunpack.c.l.bf16 %v2959_v21  ;;  %v2968_v31 = vunpack.c.h.bf16 %v2959_v21  ;;  %v2934_v5 = vpop.xlane.xlu1 %2933 }
 0x6a9   : > { %v2932_v41 = vpop.xlane.xlu0 %2931 }
 0x6aa   : > { %v9436_v22 = vpop.f32.mrb[104].mxu1  ;;  %9446 = vmatprep.subr.bf16.mxu1 %v3185_v19  ;;  %10565 = vrcp.f32 %v2967_v50  ;;  %v2960_v14 = vpack.c.bf16 %v2934_v5, %v2932_v41 }
 0x6ab   : > { %v3152_v59 = vpop.f32.mrb[105].mxu1  ;;  %9447 = vmatpush3.bf16.msra.mxu1 %v3185_v19  ;;  %10567 = vrcp.f32 %v2968_v31  ;;  %v3161_v62 = vadd.f32 %v9436_v22, %v12515_v48 }
 0x6ac   : > { %v9437_v34 = vpop.f32.mrb[106].mxu1  ;;  %9448 = vmatprep.subr.bf16.mxu1 %v3186_v2  ;;  %v3153_v47 = vadd.f32 %v12515_v48, %v3152_v59  ;;  %v2969_v49 = vunpack.c.l.bf16 %v2960_v14  ;;  %v2970_v29 = vunpack.c.h.bf16 %v2960_v14  ;;  %v2938_v45 = vpop.xlane.xlu1 %2937 }
 0x6ad   : > { %v3164_v30 = vadd.f32 %v9437_v34, %v12515_v48  ;;  %v3155_v51 = vpop.f32.mrb[107].mxu1  ;;  %v2936_v63 = vpop.xlane.xlu0 %2935 }
 0x6ae   : > { %v3156_v16 = vadd.f32 %v12515_v48, %v3155_v51  ;;  %10569 = vrcp.f32 %v2969_v49  ;;  %v2961_v18 = vpack.c.bf16 %v2938_v45, %v2936_v63 }
 0x6af   : > { %v3188_v56 = vpack.c.bf16 %v3164_v30, %v3161_v62  ;;  %9449 = vmatpush3.bf16.msra.mxu1 %v3186_v2  ;;  %10571 = vrcp.f32 %v2970_v29 }
 0x6b0   : > { %v3187_v35 = vpack.c.bf16 %v3156_v16, %v3153_v47  ;;  %v2971_v19 = vunpack.c.l.bf16 %v2961_v18  ;;  %v2972_v21 = vunpack.c.h.bf16 %v2961_v18  ;;  %v2942_v31 = vpop.xlane.xlu1 %2941 }
 0x6b1   : > { %v2940_v5 = vpop.xlane.xlu0 %2939 }
 0x6b2   : > { %v9440_v50 = vpop.f32.mrb[108].mxu1  ;;  %9450 = vmatprep.subr.bf16.mxu1 %v3187_v35  ;;  %10573 = vrcp.f32 %v2971_v19  ;;  %v2962_v41 = vpack.c.bf16 %v2942_v31, %v2940_v5 }
 0x6b3   : > { %v3168_v22 = vpop.f32.mrb[109].mxu1  ;;  %9451 = vmatpush3.bf16.msra.mxu1 %v3187_v35  ;;  %10575 = vrcp.f32 %v2972_v21  ;;  %v3177_v2 = vadd.f32 %v9440_v50, %v12515_v48 }
 0x6b4   : > { %v9441_v59 = vpop.f32.mrb[110].mxu1  ;;  %9452 = vmatprep.subr.bf16.mxu1 %v3188_v56  ;;  %v10566_v62 = vpop.eup %10565  ;;  %v3169_v30 = vadd.f32 %v12515_v48, %v3168_v22  ;;  %v2973_v51 = vunpack.c.l.bf16 %v2962_v41  ;;  %v2974_v47 = vunpack.c.h.bf16 %v2962_v41 }
 0x6b5   : > { %v3180_v34 = vadd.f32 %v9441_v59, %v12515_v48  ;;  %v3171_v14 = vpop.f32.mrb[111].mxu1  ;;  %v2946_v29 = vpop.xlane.xlu1 %2945 }
 0x6b6   : > { %v3172_v49 = vadd.f32 %v12515_v48, %v3171_v14  ;;  %v10568_v16 = vpop.eup %10567  ;;  %v2944_v63 = vpop.xlane.xlu0 %2943  ;;  %10577 = vrcp.f32 %v2973_v51 }
 0x6b7   : > { %v3190_v45 = vpack.c.bf16 %v3180_v34, %v3177_v2  ;;  %9453 = vmatpush3.bf16.msra.mxu1 %v3188_v56  ;;  %v2963_v18 = vpack.c.bf16 %v2946_v29, %v2944_v63  ;;  %v2999_v19 = vpack.c.bf16 %v10568_v16, %v10566_v62  ;;  %10579 = vrcp.f32 %v2974_v47 }
 0x6b8   : > { %v3189_v35 = vpack.c.bf16 %v3172_v49, %v3169_v30  ;;  %v10570_v21 = vpop.eup %10569 }
 0x6b9   : > { %v2975_v50 = vunpack.c.l.bf16 %v2963_v18  ;;  %v2976_v31 = vunpack.c.h.bf16 %v2963_v18  ;;  %v2950_v5 = vpop.xlane.xlu1 %2949  ;;  %v3007_v22 = vmul.bf16 %v12466_v7, %v2999_v19  ;;  %v10572_v59 = vpop.eup %10571 }
 0x6ba   : > { %9454 = vmatprep.subr.bf16.mxu1 %v3189_v35  ;;  %v2948_v48 = vpop.xlane.xlu0 %2947  ;;  %v3000_v41 = vpack.c.bf16 %v10572_v59, %v10570_v21 }
 0x6bb   : > { %9455 = vmatpush3.bf16.msra.mxu1 %v3189_v35  ;;  %10581 = vrcp.f32 %v2975_v50  ;;  %9458 = vmatprep.mubr.bf16.mxu1 %v3007_v22  ;;  %v2964_v56 = vpack.c.bf16 %v2950_v5, %v2948_v48 }
 0x6bc   : > { %9456 = vmatprep.subr.bf16.mxu1 %v3190_v45  ;;  %10583 = vrcp.f32 %v2976_v31  ;;  %v10574_v2 = vpop.eup %10573  ;;  %v3008_v47 = vmul.bf16 %v12473_v15, %v3000_v41 }
 0x6bd   : > { %v2977_v34 = vunpack.c.l.bf16 %v2964_v56  ;;  %v2978_v14 = vunpack.c.h.bf16 %v2964_v56  ;;  %v2954_v62 = vpop.xlane.xlu1 %2953  ;;  %v10576_v30 = vpop.eup %10575 }
 0x6be   : > { %v2952_v51 = vpop.xlane.xlu0 %2951  ;;  %v3001_v49 = vpack.c.bf16 %v10576_v30, %v10574_v2 }
 0x6bf   : > { %9457 = vmatpush3.bf16.msra.mxu1 %v3190_v45  ;;  %10585 = vrcp.f32 %v2977_v34  ;;  %v2965_v7 = vpack.c.bf16 %v2954_v62, %v2952_v51 }
 0x6c0   : > { %9506 = vmatprep.subr.bf16.mxu1 %v12317_v4  ;;  %10587 = vrcp.f32 %v2978_v14  ;;  %v10578_v29 = vpop.eup %10577  ;;  %v3009_v18 = vmul.bf16 %v12480_v61, %v3001_v49 }
 0x6c1   : > { %v2979_v16 = vunpack.c.l.bf16 %v2965_v7  ;;  %v2980_v63 = vunpack.c.h.bf16 %v2965_v7  ;;  %v2958_v35 = vpop.xlane.xlu1 %2957  ;;  %v10580_v19 = vpop.eup %10579 }
 0x6c2   : > { %9459 = vmatmul.mubr.bf16.vlgmr.msra.gmra.mrb[80].mxu1 %v3008_v47  ;;  %v2956_v21 = vpop.xlane.xlu0 %2955  ;;  %v3002_v50 = vpack.c.bf16 %v10580_v19, %v10578_v29 }
 0x6c3   : > { %10589 = vrcp.f32 %v2979_v16  ;;  %9462 = vmatprep.mubr.bf16.mxu1 %v3009_v18  ;;  %v2966_v45 = vpack.c.bf16 %v2958_v35, %v2956_v21  ;;  %v14708_v21 = vld [vmem:[#allocation10_spill] sm:$0xff] }
 0x6c4   : > { %10591 = vrcp.f32 %v2980_v63  ;;  %v3010_v59 = vmul.bf16 %v12487_v36, %v3002_v50  ;;  %v10948_v50 = vld [vmem:[%s14547_s2 + $0x8] sm:$0xff] }
 0x6c5   : > { %v10582_v31 = vpop.eup %10581  ;;  %v2981_v5 = vunpack.c.l.bf16 %v2966_v45  ;;  %v2982_v22 = vunpack.c.h.bf16 %v2966_v45 }
 0x6c6   : > { %v10584_v15 = vpop.eup %10583 }
 0x6c7   : > { %10593 = vrcp.f32 %v2981_v5  ;;  %v3003_v48 = vpack.c.bf16 %v10584_v15, %v10582_v31  ;;  %v10950_v5 = vld [vmem:[%s14547_s2 + $0x18] sm:$0xff] }
 0x6c8   : > { %9507 = vmatpush3.bf16.xpose.msra.mxu1 %v12317_v4  ;;  %10595 = vrcp.f32 %v2982_v22 }
 0x6c9   : > { %9508 = vmatprep.subr.bf16.mxu1 %v12315_v52  ;;  %v10586_v61 = vpop.eup %10585  ;;  %v3011_v56 = vmul.bf16 %v12492_v6, %v3003_v48  ;;  %v10951_v48 = vld [vmem:[%s14547_s2 + $0x20] sm:$0xff] }
 0x6ca   : > { %9463 = vmatmul.mubr.bf16.gmra.mrb[84].mxu1 %v3010_v59  ;;  %v10588_v41 = vpop.eup %10587 }
 0x6cb   : > { %9466 = vmatprep.mubr.bf16.mxu1 %v3011_v56  ;;  %v3004_v2 = vpack.c.bf16 %v10588_v41, %v10586_v61 }
 0x6cd   : > { %v10590_v34 = vpop.eup %10589  ;;  %v3012_v62 = vmul.bf16 %v12497_v42, %v3004_v2  ;;  %v10952_v2 = vld [vmem:[%s14547_s2 + $0x28] sm:$0xff] }
 0x6ce   : > { %v10592_v14 = vpop.eup %10591 }
 0x6cf   : > { %v3005_v4 = vpack.c.bf16 %v10592_v14, %v10590_v34  ;;  %v10953_v14 = vld [vmem:[%s14547_s2 + $0x30] sm:$0xff] }
 0x6d0   : > { %9509 = vmatpush3.bf16.xpose.msra.mxu1 %v12315_v52  ;;  %v14706_v52 = vld [vmem:[#allocation4_spill] sm:$0xff] }
 0x6d1   : > { %9510 = vmatprep.subr.bf16.mxu1 %v12337_v53  ;;  %v10594_v36 = vpop.eup %10593  ;;  %v3013_v30 = vmul.bf16 %v12502_v24, %v3005_v4  ;;  %v10954_v4 = vld [vmem:[%s14547_s2 + $0x38] sm:$0xff] }
 0x6d2   : > { %9467 = vmatmul.mubr.bf16.gmra.mrb[88].mxu1 %v3012_v62  ;;  %v10596_v51 = vpop.eup %10595 }
 0x6d3   : > { %9470 = vmatprep.mubr.bf16.mxu1 %v3013_v30  ;;  %v3006_v7 = vpack.c.bf16 %v10596_v51, %v10594_v36 }
 0x6d5   : > { %v3014_v6 = vmul.bf16 %v12507_v60, %v3006_v7  ;;  %v10955_v7 = vld [vmem:[%s14547_s2 + $0x40] sm:$0xff] }
 0x6d8   : > { %9511 = vmatpush3.bf16.xpose.msra.mxu1 %v12337_v53 }
 0x6d9   : > { %9512 = vmatprep.subr.bf16.mxu1 %v12329_v0 }
 0x6da   : > { %9471 = vmatmul.mubr.bf16.gmra.mrb[92].mxu1 %v3014_v6 }
 0x6db   : > { %9522 = vmatprep.mubr.bf16.mxu1 %v14706_v52 }
 0x6e0   : > { %9513 = vmatpush3.bf16.xpose.msra.mxu1 %v12329_v0 }
 0x6e1   : > { %9514 = vmatprep.subr.bf16.mxu1 %v12362_v3 }
 0x6e8   : > { %9515 = vmatpush3.bf16.xpose.msra.mxu1 %v12362_v3 }
 0x6e9   : > { %9516 = vmatprep.subr.bf16.mxu1 %v12354_v54 }
 0x6ea   : > { %v12553_v42 = vpop.f32.mrb[144].mxu0 }
 0x6eb   : > { %v12555_v24 = vpop.f32.mrb[145].mxu0 }
 0x6ec   : > { %v12557_v53 = vpop.f32.mrb[146].mxu0 }
 0x6ed   : > { %v12559_v60 = vpop.f32.mrb[147].mxu0 }
 0x6f0   : > { %9517 = vmatpush3.bf16.xpose.msra.mxu1 %v12354_v54 }
 0x6f1   : > { %9518 = vmatprep.subr.bf16.mxu1 %v12384_v9 }
 0x6f2   : > { %v12563_v47 = vpop.f32.mrb[148].mxu0 }
 0x6f3   : > { %v12565_v0 = vpop.f32.mrb[149].mxu0 }
 0x6f4   : > { %v12567_v49 = vpop.f32.mrb[150].mxu0 }
 0x6f5   : > { %v12569_v3 = vpop.f32.mrb[151].mxu0 }
 0x6f8   : > { %9519 = vmatpush3.bf16.xpose.msra.mxu1 %v12384_v9 }
 0x6f9   : > { %9520 = vmatprep.subr.bf16.mxu1 %v12376_v20 }
 0x6fa   : > { %v12573_v29 = vpop.f32.mrb[152].mxu0 }
 0x6fb   : > { %v12575_v16 = vpop.f32.mrb[153].mxu0 }
 0x6fc   : > { %v12577_v63 = vpop.f32.mrb[154].mxu0 }
 0x6fd   : > { %v12579_v54 = vpop.f32.mrb[155].mxu0 }
 0x700   : > { %9521 = vmatpush3.bf16.xpose.msra.mxu1 %v12376_v20  ;;  %v14707_v20 = vld [vmem:[#allocation8_spill] sm:$0xff] }
 0x701   : > { %9570 = vmatprep.subr.bf16.mxu1 %v12411_v23 }
 0x702   : > { %v12583_v35 = vpop.f32.mrb[156].mxu0 }
 0x703   : > { %v12585_v18 = vpop.f32.mrb[157].mxu0 }
 0x704   : > { %v12587_v19 = vpop.f32.mrb[158].mxu0 }
 0x705   : > { %v12590_v9 = vpop.f32.mrb[159].mxu0 }
 0x707   : > { %9523 = vmatmul.mubr.bf16.vlgmr.msra.gmra.mrb[112].mxu1 %v11383_v25  ;;  %v14709_v25 = vld [vmem:[#allocation12_spill] sm:$0xff] }
 0x708   : > { %9526 = vmatprep.mubr.bf16.mxu1 %v11391_v37  ;;  %9571 = vmatpush3.bf16.msra.mxu1 %v12411_v23  ;;  %v14710_v37 = vld [vmem:[#allocation14_spill] sm:$0xff] }
 0x709   : > { %9572 = vmatprep.subr.bf16.mxu1 %v12403_v58 }
 0x70c   : > { %9573 = vmatpush3.bf16.msra.mxu1 %v12403_v58  ;;  %v14711_v58 = vld [vmem:[#allocation16_spill] sm:$0xff] }
 0x70d   : > { %9574 = vmatprep.subr.bf16.mxu1 %v12427_v17 }
 0x70f   : > { %9527 = vmatmul.mubr.bf16.gmra.mrb[116].mxu1 %v14707_v20 }
 0x710   : > { %9530 = vmatprep.mubr.bf16.mxu1 %v14708_v21  ;;  %9575 = vmatpush3.bf16.msra.mxu1 %v12427_v17  ;;  %v10947_v17 = vld [vmem:[%s14547_s2] sm:$0xff]  ;;  %v10956_v21 = vld [vmem:[%s14547_s2 + $0x48] sm:$0xff] }
 0x711   : > { %9576 = vmatprep.subr.bf16.mxu1 %v12425_v26 }
 0x714   : > { %9577 = vmatpush3.bf16.msra.mxu1 %v12425_v26 }
 0x715   : > { %9578 = vmatprep.subr.bf16.mxu1 %v12436_v40 }
 0x717   : > { %9531 = vmatmul.mubr.bf16.gmra.mrb[120].mxu1 %v14709_v25 }
 0x718   : > { %9534 = vmatprep.mubr.bf16.mxu1 %v14710_v37  ;;  %9579 = vmatpush3.bf16.msra.mxu1 %v12436_v40  ;;  %v10957_v37 = vld [vmem:[%s14547_s2 + $0x50] sm:$0xff] }
 0x719   : > { %9580 = vmatprep.subr.bf16.mxu1 %v12434_v33 }
 0x71c   : > { %9581 = vmatpush3.bf16.msra.mxu1 %v12434_v33 }
 0x71d   : > { %9582 = vmatprep.subr.bf16.mxu1 %v12446_v46 }
 0x71f   : > { %9535 = vmatmul.mubr.bf16.gmra.mrb[124].mxu1 %v14711_v58 }
 0x720   : > { %9583 = vmatpush3.bf16.msra.mxu1 %v12446_v46 }
 0x721   : > { %9584 = vmatprep.subr.bf16.mxu1 %v12444_v32 }
 0x724   : > { %9585 = vmatpush3.bf16.msra.mxu1 %v12444_v32  ;;  %v10949_v32 = vld [vmem:[%s14547_s2 + $0x10] sm:$0xff] }
 0x7da   : > { %v9524_v23 = vpop.f32.mrb[112].mxu1 }
 0x7db   : > { %v3514_v26 = vpop.f32.mrb[113].mxu1  ;;  %v12627_v46 = vadd.f32 %v10949_v32, %v9524_v23  ;;  %v10958_v23 = vld [vmem:[%s14547_s2 + $0x58] sm:$0xff] }
 0x7dc   : > { %v12616_v40 = vadd.f32 %v10947_v17, %v3514_v26  ;;  %v9525_v45 = vpop.f32.mrb[114].mxu1 }
 0x7dd   : > { %v3517_v33 = vpop.f32.mrb[115].mxu1  ;;  %v12633_v22 = vadd.f32 %v10950_v5, %v9525_v45 }
 0x7de   : > { %v12621_v31 = vadd.f32 %v10948_v50, %v3517_v33  ;;  %3577 = vmax.xlane.f32.xlu0 %v12616_v40  ;;  %v10959_v33 = vld [vmem:[%s14547_s2 + $0x60] sm:$0xff] }
 0x7e0   : > { %3579 = vmax.xlane.f32.xlu1 %v12621_v31 }
 0x7e2   : > { %v9528_v15 = vpop.f32.mrb[116].mxu1  ;;  %3581 = vmax.xlane.f32.xlu0 %v12627_v46 }
 0x7e3   : > { %v3530_v59 = vpop.f32.mrb[117].mxu1  ;;  %v12649_v62 = vadd.f32 %v10953_v14, %v9528_v15  ;;  %v10960_v15 = vld [vmem:[%s14547_s2 + $0x68] sm:$0xff] }
 0x7e4   : > { %v12639_v61 = vadd.f32 %v10951_v48, %v3530_v59  ;;  %v9529_v56 = vpop.f32.mrb[118].mxu1  ;;  %3583 = vmax.xlane.f32.xlu1 %v12633_v22  ;;  %v10961_v48 = vld [vmem:[%s14547_s2 + $0x70] sm:$0xff] }
 0x7e5   : > { %v3533_v41 = vpop.f32.mrb[119].mxu1  ;;  %v3542_v36 = vadd.f32 %v10954_v4, %v9529_v56 }
 0x7e6   : > { %v3534_v34 = vadd.f32 %v10952_v2, %v3533_v41  ;;  %3585 = vmax.xlane.f32.xlu0 %v12639_v61  ;;  %v10962_v41 = vld [vmem:[%s14547_s2 + $0x78] sm:$0xff] }
 0x7e8   : > { %3587 = vmax.xlane.f32.xlu1 %v3534_v34 }
 0x7ea   : > { %v9532_v30 = vpop.f32.mrb[120].mxu1  ;;  %3589 = vmax.xlane.f32.xlu0 %v12649_v62 }
 0x7eb   : > { %v3546_v51 = vpop.f32.mrb[121].mxu1  ;;  %v12667_v58 = vadd.f32 %v10957_v37, %v9532_v30 }
 0x7ec   : > { %v12658_v6 = vadd.f32 %v10955_v7, %v3546_v51  ;;  %v9533_v52 = vpop.f32.mrb[122].mxu1  ;;  %3591 = vmax.xlane.f32.xlu1 %v3542_v36 }
 0x7ed   : > { %v3549_v20 = vpop.f32.mrb[123].mxu1  ;;  %v12672_v26 = vadd.f32 %v10958_v23, %v9533_v52 }
 0x7ee   : > { %v3550_v25 = vadd.f32 %v10956_v21, %v3549_v20  ;;  %3593 = vmax.xlane.f32.xlu0 %v12658_v6 }
 0x7f0   : > { %3595 = vmax.xlane.f32.xlu1 %v3550_v25 }
 0x7f2   : > { %v9536_v17 = vpop.f32.mrb[124].mxu1  ;;  %3597 = vmax.xlane.f32.xlu0 %v12667_v58 }
 0x7f3   : > { %v3562_v45 = vpop.f32.mrb[125].mxu1  ;;  %v12690_v56 = vadd.f32 %v10961_v48, %v9536_v17 }
 0x7f4   : > { %v12678_v50 = vadd.f32 %v10959_v33, %v3562_v45  ;;  %v9537_v32 = vpop.f32.mrb[126].mxu1  ;;  %3599 = vmax.xlane.f32.xlu1 %v12672_v26 }
 0x7f5   : > { %v3565_v5 = vpop.f32.mrb[127].mxu1  ;;  %v12696_v2 = vadd.f32 %v10962_v41, %v9537_v32 }
 0x7f6   : > { %v12684_v59 = vadd.f32 %v10960_v15, %v3565_v5  ;;  %3601 = vmax.xlane.f32.xlu0 %v12678_v50 }
 0x7f8   : > { %3603 = vmax.xlane.f32.xlu1 %v12684_v59 }
 0x7fa   : > { %3605 = vmax.xlane.f32.xlu0 %v12690_v56 }
 0x7fc   : > { %3607 = vmax.xlane.f32.xlu1 %v12696_v2 }
 0x86b   : > { %v3578_v14 = vpop.xlane.xlu0 %3577 }
 0x86c   : > { %v3609_v30 = vsub.f32 %v12616_v40, %v3578_v14 }
 0x86d   : > { %v3580_v4 = vpop.xlane.xlu1 %3579 }
 0x86e   : > { %v3610_v51 = vsub.f32 %v12621_v31, %v3580_v4 }
 0x86f   : > { %v3582_v7 = vpop.xlane.xlu0 %3581 }
 0x870   : > { %v3625_v52 = vpack.c.bf16 %v3610_v51, %v3609_v30  ;;  %v3611_v37 = vsub.f32 %v12627_v46, %v3582_v7 }
 0x871   : > { %v3584_v20 = vpop.xlane.xlu1 %3583 }
 0x872   : > { %v3634_v21 = vmul.bf16 1069105081, %v3625_v52  ;;  %v3612_v23 = vsub.f32 %v12633_v22, %v3584_v20 }
 0x873   : > { %v3586_v17 = vpop.xlane.xlu0 %3585 }
 0x874   : > { %10597 = vpow.bf16 %v3634_v21  ;;  %v3626_v45 = vpack.c.bf16 %v3612_v23, %v3611_v37  ;;  %v3613_v5 = vsub.f32 %v12639_v61, %v3586_v17 }
 0x875   : > { %v3588_v33 = vpop.xlane.xlu1 %3587 }
 0x876   : > { %v3637_v32 = vmul.bf16 1069105081, %v3626_v45  ;;  %v3614_v15 = vsub.f32 %v3534_v34, %v3588_v33 }
 0x877   : > { %v3590_v48 = vpop.xlane.xlu0 %3589 }
 0x878   : > { %10599 = vpow.bf16 %v3637_v32  ;;  %v3627_v40 = vpack.c.bf16 %v3614_v15, %v3613_v5  ;;  %v3615_v14 = vsub.f32 %v12649_v62, %v3590_v48 }
 0x879   : > { %v3592_v31 = vpop.xlane.xlu1 %3591 }
 0x87a   : > { %v3640_v41 = vmul.bf16 1069105081, %v3627_v40  ;;  %v3616_v4 = vsub.f32 %v3542_v36, %v3592_v31 }
 0x87b   : > { %v3594_v30 = vpop.xlane.xlu0 %3593 }
 0x87c   : > { %10601 = vpow.bf16 %v3640_v41  ;;  %v3628_v46 = vpack.c.bf16 %v3616_v4, %v3615_v14  ;;  %v3617_v7 = vsub.f32 %v12658_v6, %v3594_v30 }
 0x87d   : > { %v3596_v22 = vpop.xlane.xlu1 %3595 }
 0x87e   : > { %v3643_v51 = vmul.bf16 1069105081, %v3628_v46  ;;  %v3618_v52 = vsub.f32 %v3550_v25, %v3596_v22 }
 0x87f   : > { %v12707_v20 = vpop.eup %10597  ;;  %v3598_v61 = vpop.xlane.xlu0 %3597 }
 0x880   : > { %10603 = vpow.bf16 %v3643_v51  ;;  %v3629_v34 = vpack.c.bf16 %v3618_v52, %v3617_v7  ;;  %v3658_v21 = vunpack.c.h.bf16 %v12707_v20  ;;  %v3657_v23 = vunpack.c.l.bf16 %v12707_v20 }
 0x881   : > { %v3600_v37 = vpop.xlane.xlu1 %3599  ;;  %v3619_v36 = vsub.f32 %v12667_v58, %v3598_v61 }
 0x882   : > { %v3646_v62 = vmul.bf16 1069105081, %v3629_v34  ;;  %v3620_v17 = vsub.f32 %v12672_v26, %v3600_v37  ;;  %3675 = vadd.xlane.f32.xlu1 %v3658_v21  ;;  %3673 = vadd.xlane.f32.xlu0 %v3657_v23 }
 0x883   : > { %v12713_v45 = vpop.eup %10599  ;;  %v3602_v6 = vpop.xlane.xlu0 %3601 }
 0x884   : > { %10605 = vpow.bf16 %v3646_v62  ;;  %v3630_v25 = vpack.c.bf16 %v3620_v17, %v3619_v36  ;;  %v3660_v33 = vunpack.c.h.bf16 %v12713_v45  ;;  %v3659_v5 = vunpack.c.l.bf16 %v12713_v45 }
 0x885   : > { %v3604_v32 = vpop.xlane.xlu1 %3603  ;;  %v3621_v48 = vsub.f32 %v12678_v50, %v3602_v6 }
 0x886   : > { %v3649_v15 = vmul.bf16 1069105081, %v3630_v25  ;;  %v3622_v40 = vsub.f32 %v12684_v59, %v3604_v32  ;;  %3679 = vadd.xlane.f32.xlu1 %v3660_v33  ;;  %3677 = vadd.xlane.f32.xlu0 %v3659_v5  ;;  %v4515_v33 = vld [vmem:[%s14553_s8 + $0x30] sm:$0xf] }
 0x887   : > { %v12719_v58 = vpop.eup %10601  ;;  %v3606_v26 = vpop.xlane.xlu0 %3605  ;;  %v4516_v32 = vld [vmem:[%s14553_s8 + $0x70] sm:$0xf] }
 0x888   : > { %10607 = vpow.bf16 %v3649_v15  ;;  %v3631_v31 = vpack.c.bf16 %v3622_v40, %v3621_v48  ;;  %v3662_v41 = vunpack.c.h.bf16 %v12719_v58  ;;  %v3661_v4 = vunpack.c.l.bf16 %v12719_v58 }
 0x889   : > { %v3608_v14 = vpop.xlane.xlu1 %3607  ;;  %v3623_v46 = vsub.f32 %v12690_v56, %v3606_v26  ;;  %v12751_v5 = vcombine.low %v4515_v33, %v4516_v32 }
 0x88a   : > { %v3652_v30 = vmul.bf16 1069105081, %v3631_v31  ;;  %v3624_v22 = vsub.f32 %v12696_v2, %v3608_v14  ;;  %3683 = vadd.xlane.f32.xlu1 %v3662_v41  ;;  %3681 = vadd.xlane.f32.xlu0 %v3661_v4 }
 0x88b   : > { %v12725_v50 = vpop.eup %10603  ;;  %9666 = vmatprep.subr.bf16.mxu1 %v12751_v5 }
 0x88c   : > { %10609 = vpow.bf16 %v3652_v30  ;;  %v3632_v59 = vpack.c.bf16 %v3624_v22, %v3623_v46  ;;  %v3664_v51 = vunpack.c.h.bf16 %v12725_v50  ;;  %v3663_v7 = vunpack.c.l.bf16 %v12725_v50 }
 0x88e   : > { %v3655_v52 = vmul.bf16 1069105081, %v3632_v59  ;;  %3687 = vadd.xlane.f32.xlu1 %v3664_v51  ;;  %3685 = vadd.xlane.f32.xlu0 %v3663_v7 }
 0x88f   : > { %v12729_v61 = vpop.eup %10605 }
 0x890   : > { %10611 = vpow.bf16 %v3655_v52  ;;  %v3666_v56 = vunpack.c.h.bf16 %v12729_v61  ;;  %v3665_v2 = vunpack.c.l.bf16 %v12729_v61 }
 0x892   : > { %3691 = vadd.xlane.f32.xlu1 %v3666_v56  ;;  %3689 = vadd.xlane.f32.xlu0 %v3665_v2 }
 0x893   : > { %v12733_v34 = vpop.eup %10607 }
 0x894   : > { %v3668_v21 = vunpack.c.h.bf16 %v12733_v34  ;;  %v3667_v37 = vunpack.c.l.bf16 %v12733_v34 }
 0x896   : > { %3695 = vadd.xlane.f32.xlu1 %v3668_v21  ;;  %3693 = vadd.xlane.f32.xlu0 %v3667_v37 }
 0x897   : > { %v12737_v23 = vpop.eup %10609 }
 0x898   : > { %v3670_v62 = vunpack.c.h.bf16 %v12737_v23  ;;  %v3669_v36 = vunpack.c.l.bf16 %v12737_v23 }
 0x89a   : > { %3699 = vadd.xlane.f32.xlu1 %v3670_v62  ;;  %3697 = vadd.xlane.f32.xlu0 %v3669_v36 }
 0x89b   : > { %v12741_v17 = vpop.eup %10611 }
 0x89c   : > { %v3672_v6 = vunpack.c.h.bf16 %v12741_v17  ;;  %v3671_v25 = vunpack.c.l.bf16 %v12741_v17 }
 0x89e   : > { %3703 = vadd.xlane.f32.xlu1 %v3672_v6  ;;  %3701 = vadd.xlane.f32.xlu0 %v3671_v25 }
 0x90f   : > { %v3676_v15 = vpop.xlane.xlu1 %3675  ;;  %v3674_v48 = vpop.xlane.xlu0 %3673 }
 0x910   : > { %v3705_v40 = vpack.c.bf16 %v3676_v15, %v3674_v48 }
 0x912   : > { %v3713_v26 = vunpack.c.l.bf16 %v3705_v40  ;;  %v3714_v31 = vunpack.c.h.bf16 %v3705_v40 }
 0x913   : > { %v3680_v41 = vpop.xlane.xlu1 %3679  ;;  %v3678_v14 = vpop.xlane.xlu0 %3677 }
 0x914   : > { %10613 = vrcp.f32 %v3713_v26  ;;  %v3706_v4 = vpack.c.bf16 %v3680_v41, %v3678_v14 }
 0x915   : > { %10615 = vrcp.f32 %v3714_v31 }
 0x916   : > { %v3715_v30 = vunpack.c.l.bf16 %v3706_v4  ;;  %v3716_v46 = vunpack.c.h.bf16 %v3706_v4 }
 0x917   : > { %v3684_v22 = vpop.xlane.xlu1 %3683  ;;  %v3682_v59 = vpop.xlane.xlu0 %3681 }
 0x918   : > { %10617 = vrcp.f32 %v3715_v30  ;;  %v3707_v51 = vpack.c.bf16 %v3684_v22, %v3682_v59  ;;  %v4517_v30 = vld [vmem:[%s14553_s8 + $0xb0] sm:$0xf] }
 0x919   : > { %10619 = vrcp.f32 %v3716_v46  ;;  %v4518_v46 = vld [vmem:[%s14553_s8 + $0xf0] sm:$0xf] }
 0x91a   : > { %v3717_v7 = vunpack.c.l.bf16 %v3707_v51  ;;  %v3718_v52 = vunpack.c.h.bf16 %v3707_v51 }
 0x91b   : > { %v3688_v56 = vpop.xlane.xlu1 %3687  ;;  %v3686_v2 = vpop.xlane.xlu0 %3685 }
 0x91c   : > { %10621 = vrcp.f32 %v3717_v7  ;;  %v3708_v21 = vpack.c.bf16 %v3688_v56, %v3686_v2  ;;  %v8364_v2 = vcombine.low %v4517_v30, %v4518_v46 }
 0x91d   : > { %10623 = vrcp.f32 %v3718_v52 }
 0x91e   : > { %v10614_v37 = vpop.eup %10613  ;;  %v3719_v62 = vunpack.c.l.bf16 %v3708_v21  ;;  %v3720_v36 = vunpack.c.h.bf16 %v3708_v21 }
 0x91f   : > { %v3692_v6 = vpop.xlane.xlu1 %3691  ;;  %v10616_v25 = vpop.eup %10615 }
 0x920   : > { %v3690_v33 = vpop.xlane.xlu0 %3689  ;;  %10625 = vrcp.f32 %v3719_v62  ;;  %v3745_v15 = vpack.c.bf16 %v10616_v25, %v10614_v37  ;;  %v4519_v62 = vld [vmem:[%s14553_s8 + $0x130] sm:$0xf] }
 0x921   : > { %v3709_v32 = vpack.c.bf16 %v3692_v6, %v3690_v33  ;;  %10627 = vrcp.f32 %v3720_v36  ;;  %v4520_v36 = vld [vmem:[%s14553_s8 + $0x170] sm:$0xf] }
 0x922   : > { %v10618_v48 = vpop.eup %10617  ;;  %v3753_v41 = vmul.bf16 %v12707_v20, %v3745_v15 }
 0x923   : > { %v3721_v40 = vunpack.c.l.bf16 %v3709_v32  ;;  %v3722_v26 = vunpack.c.h.bf16 %v3709_v32  ;;  %v3696_v31 = vpop.xlane.xlu1 %3695  ;;  %v10620_v14 = vpop.eup %10619 }
 0x924   : > { %v3694_v4 = vpop.xlane.xlu0 %3693  ;;  %9586 = vmatprep.mubr.bf16.mxu1 %v3753_v41  ;;  %v3746_v59 = vpack.c.bf16 %v10620_v14, %v10618_v48  ;;  %v4521_v41 = vld [vmem:[%s14553_s8 + $0x1b0] sm:$0xf] }
 0x925   : > { %10629 = vrcp.f32 %v3721_v40  ;;  %v3710_v22 = vpack.c.bf16 %v3696_v31, %v3694_v4  ;;  %v8365_v40 = vcombine.low %v4519_v62, %v4520_v36  ;;  %v4522_v14 = vld [vmem:[%s14553_s8 + $0x1f0] sm:$0xf] }
 0x926   : > { %10631 = vrcp.f32 %v3722_v26  ;;  %v10622_v51 = vpop.eup %10621  ;;  %v3754_v20 = vmul.bf16 %v12713_v45, %v3746_v59  ;;  %v8366_v59 = vcombine.low %v4521_v41, %v4522_v14  ;;  %v4526_v62 = vld [vmem:[%s14553_s8 + $0x2f0] sm:$0xf] }
 0x927   : > { %v3723_v7 = vunpack.c.l.bf16 %v3710_v22  ;;  %v3724_v52 = vunpack.c.h.bf16 %v3710_v22  ;;  %v3700_v56 = vpop.xlane.xlu1 %3699  ;;  %v10624_v21 = vpop.eup %10623  ;;  %v4530_v41 = vld [vmem:[%s14553_s8 + $0x3f0] sm:$0xf] }
 0x928   : > { %v3698_v37 = vpop.xlane.xlu0 %3697  ;;  %9587 = vmatmul.mubr.bf16.vlgmr.msra.gmra.mrb[80].mxu1 %v3754_v20  ;;  %v3747_v25 = vpack.c.bf16 %v10624_v21, %v10622_v51 }
 0x929   : > { %10633 = vrcp.f32 %v3723_v7  ;;  %v3711_v6 = vpack.c.bf16 %v3700_v56, %v3698_v37  ;;  %9667 = vmatpush3.bf16.msra.mxu1 %v12751_v5  ;;  %v4523_v7 = vld [vmem:[%s14553_s8 + $0x230] sm:$0xf] }
 0x92a   : > { %10635 = vrcp.f32 %v3724_v52  ;;  %v10626_v33 = vpop.eup %10625  ;;  %v3755_v48 = vmul.bf16 %v12719_v58, %v3747_v25  ;;  %9668 = vmatprep.subr.bf16.mxu1 %v8364_v2  ;;  %v4524_v52 = vld [vmem:[%s14553_s8 + $0x270] sm:$0xf] }
 0x92b   : > { %v3725_v45 = vunpack.c.l.bf16 %v3711_v6  ;;  %v3726_v32 = vunpack.c.h.bf16 %v3711_v6  ;;  %v3704_v15 = vpop.xlane.xlu1 %3703  ;;  %v10628_v26 = vpop.eup %10627  ;;  %v4525_v37 = vld [vmem:[%s14553_s8 + $0x2b0] sm:$0xf] }
 0x92c   : > { %v3702_v31 = vpop.xlane.xlu0 %3701  ;;  %9590 = vmatprep.mubr.bf16.mxu1 %v3755_v48  ;;  %v3748_v4 = vpack.c.bf16 %v10628_v26, %v10626_v33  ;;  %v8368_v33 = vcombine.low %v4525_v37, %v4526_v62  ;;  %v4701_v37 = vld [vmem:[%s14553_s8 + $0x294] sm:$0xf] }
 0x92d   : > { %10637 = vrcp.f32 %v3725_v45  ;;  %v3712_v5 = vpack.c.bf16 %v3704_v15, %v3702_v31  ;;  %9669 = vmatpush3.bf16.msra.mxu1 %v8364_v2  ;;  %v4527_v45 = vld [vmem:[%s14553_s8 + $0x330] sm:$0xf]  ;;  %v4702_v62 = vld [vmem:[%s14553_s8 + $0x2d4] sm:$0xf] }
 0x92e   : > { %10639 = vrcp.f32 %v3726_v32  ;;  %v3756_v22 = vmul.bf16 %v12725_v50, %v3748_v4  ;;  %9670 = vmatprep.subr.bf16.mxu1 %v8365_v40  ;;  %v8367_v50 = vcombine.low %v4523_v7, %v4524_v52  ;;  %v4528_v32 = vld [vmem:[%s14553_s8 + $0x370] sm:$0xf]  ;;  %v4697_v52 = vld [vmem:[%s14553_s8 + $0x194] sm:$0xf] }
 0x92f   : > { %v10630_v30 = vpop.eup %10629  ;;  %v3727_v58 = vunpack.c.l.bf16 %v3712_v5  ;;  %v3728_v46 = vunpack.c.h.bf16 %v3712_v5  ;;  %v8369_v26 = vcombine.low %v4527_v45, %v4528_v32  ;;  %v4529_v31 = vld [vmem:[%s14553_s8 + $0x3b0] sm:$0xf]  ;;  %v4705_v45 = vld [vmem:[%s14553_s8 + $0x394] sm:$0xf] }
 0x930   : > { %v10632_v51 = vpop.eup %10631  ;;  %9591 = vmatmul.mubr.bf16.gmra.mrb[84].mxu1 %v3756_v22  ;;  %v8370_v4 = vcombine.low %v4529_v31, %v4530_v41  ;;  %v4706_v32 = vld [vmem:[%s14553_s8 + $0x3d4] sm:$0xf] }
 0x931   : > { %10641 = vrcp.f32 %v3727_v58  ;;  %v3749_v56 = vpack.c.bf16 %v10632_v51, %v10630_v30  ;;  %9671 = vmatpush3.bf16.msra.mxu1 %v8365_v40  ;;  %v4692_v30 = vld [vmem:[%s14553_s8 + $0x54] sm:$0xf] }
 0x932   : > { %10643 = vrcp.f32 %v3728_v46  ;;  %9672 = vmatprep.subr.bf16.mxu1 %v8366_v59  ;;  %v4694_v46 = vld [vmem:[%s14553_s8 + $0xd4] sm:$0xf] }
 0x933   : > { %v10634_v20 = vpop.eup %10633  ;;  %v3757_v2 = vmul.bf16 %v12729_v61, %v3749_v56  ;;  %v4696_v51 = vld [vmem:[%s14553_s8 + $0x154] sm:$0xf] }
 0x934   : > { %v10636_v21 = vpop.eup %10635  ;;  %v4698_v56 = vld [vmem:[%s14553_s8 + $0x1d4] sm:$0xf] }
 0x935   : > { %9594 = vmatprep.mubr.bf16.mxu1 %v3757_v2  ;;  %v3750_v36 = vpack.c.bf16 %v10636_v21, %v10634_v20  ;;  %9673 = vmatpush3.bf16.msra.mxu1 %v8366_v59  ;;  %v4695_v59 = vld [vmem:[%s14553_s8 + $0x114] sm:$0xf]  ;;  %v8375_v20 = vcombine.low %v4697_v52, %v4698_v56 }
 0x936   : > { %9674 = vmatprep.subr.bf16.mxu1 %v8367_v50  ;;  %v8374_v7 = vcombine.low %v4695_v59, %v4696_v51  ;;  %v4699_v2 = vld [vmem:[%s14553_s8 + $0x214] sm:$0xf] }
 0x937   : > { %v10638_v6 = vpop.eup %10637  ;;  %v3758_v25 = vmul.bf16 %v12733_v34, %v3750_v36  ;;  %v8377_v36 = vcombine.low %v4701_v37, %v4702_v62  ;;  %v5150_v31 = vld [vmem:[%s14553_s8 + $0xb4] sm:$0xf] }
 0x938   : > { %v10640_v61 = vpop.eup %10639  ;;  %v5151_v41 = vld [vmem:[%s14553_s8 + $0xf4] sm:$0xf] }
 0x939   : > { %9595 = vmatmul.mubr.bf16.gmra.mrb[88].mxu1 %v3758_v25  ;;  %v3751_v15 = vpack.c.bf16 %v10640_v61, %v10638_v6  ;;  %v4703_v6 = vld [vmem:[%s14553_s8 + $0x314] sm:$0xf] }
 0x93a   : > { %9675 = vmatpush3.bf16.msra.mxu1 %v8367_v50  ;;  %v4700_v50 = vld [vmem:[%s14553_s8 + $0x254] sm:$0xf] }
 0x93b   : > { %v10642_v48 = vpop.eup %10641  ;;  %v3759_v40 = vmul.bf16 %v12737_v23, %v3751_v15  ;;  %9676 = vmatprep.subr.bf16.mxu1 %v8368_v33  ;;  %v4691_v23 = vld [vmem:[%s14553_s8 + $0x14] sm:$0xf]  ;;  %v8376_v21 = vcombine.low %v4699_v2, %v4700_v50  ;;  %v8379_v15 = vcombine.low %v4705_v45, %v4706_v32 }
 0x93c   : > { %v10644_v34 = vpop.eup %10643  ;;  %v8372_v58 = vcombine.low %v4691_v23, %v4692_v30  ;;  %v4704_v25 = vld [vmem:[%s14553_s8 + $0x354] sm:$0xf] }
 0x93d   : > { %9598 = vmatprep.mubr.bf16.mxu1 %v3759_v40  ;;  %v3752_v14 = vpack.c.bf16 %v10644_v34, %v10642_v48  ;;  %v8378_v61 = vcombine.low %v4703_v6, %v4704_v25  ;;  %v5148_v48 = vld [vmem:[%s14553_s8 + $0x34] sm:$0xf] }
 0x93e   : > { %9677 = vmatpush3.bf16.msra.mxu1 %v8368_v33  ;;  %v14712_v33 = vld [vmem:[#allocation3_spill] sm:$0xff]  ;;  %v5149_v40 = vld [vmem:[%s14553_s8 + $0x74] sm:$0xf] }
 0x93f   : > { %v3760_v5 = vmul.bf16 %v12741_v17, %v3752_v14  ;;  %9678 = vmatprep.subr.bf16.mxu1 %v8369_v26  ;;  %v4693_v17 = vld [vmem:[%s14553_s8 + $0x94] sm:$0xf]  ;;  %v8381_v34 = vcombine.low %v5148_v48, %v5149_v40  ;;  %v8382_v14 = vcombine.low %v5150_v31, %v5151_v41 }
 0x940   : > { %v8373_v22 = vcombine.low %v4693_v17, %v4694_v46  ;;  %v5154_v30 = vld [vmem:[%s14553_s8 + $0x1b4] sm:$0xf] }
 0x941   : > { %9599 = vmatmul.mubr.bf16.gmra.mrb[92].mxu1 %v3760_v5  ;;  %v5152_v5 = vld [vmem:[%s14553_s8 + $0x134] sm:$0xf] }
 0x942   : > { %9679 = vmatpush3.bf16.msra.mxu1 %v8369_v26  ;;  %9682 = vmatprep.mubr.bf16.mxu1 %v11283_v12  ;;  %v14713_v26 = vld [vmem:[#allocation2_spill] sm:$0xff]  ;;  %v5156_v46 = vld [vmem:[%s14553_s8 + $0x234] sm:$0xf] }
 0x943   : > { %9680 = vmatprep.subr.bf16.mxu1 %v8370_v4  ;;  %v5158_v51 = vld [vmem:[%s14553_s8 + $0x2b4] sm:$0xf] }
 0x944   : > { %v5160_v56 = vld [vmem:[%s14553_s8 + $0x334] sm:$0xf] }
 0x945   : > { %v5162_v50 = vld [vmem:[%s14553_s8 + $0x3b4] sm:$0xf] }
 0x946   : > { %9681 = vmatpush3.bf16.msra.mxu1 %v8370_v4  ;;  %v5153_v4 = vld [vmem:[%s14553_s8 + $0x174] sm:$0xf] }
 0x947   : > { %9698 = vmatprep.subr.bf16.mxu1 %v8372_v58  ;;  %v8383_v23 = vcombine.low %v5152_v5, %v5153_v4 }
 0x949   : > { %9683 = vmatmul.mubr.bf16.vlgmr.msra.gmra.mrb[128].mxu1 %v11281_v11 }
 0x94a   : > { %9686 = vmatprep.mubr.bf16.mxu1 %v11306_v28  ;;  %9699 = vmatpush3.bf16.msra.mxu1 %v8372_v58  ;;  %v5155_v58 = vld [vmem:[%s14553_s8 + $0x1f4] sm:$0xf] }
 0x94b   : > { %9700 = vmatprep.subr.bf16.mxu1 %v8373_v22  ;;  %v8384_v17 = vcombine.low %v5154_v30, %v5155_v58 }
 0x94e   : > { %9701 = vmatpush3.bf16.msra.mxu1 %v8373_v22  ;;  %v5157_v22 = vld [vmem:[%s14553_s8 + $0x274] sm:$0xf] }
 0x94f   : > { %9702 = vmatprep.subr.bf16.mxu1 %v8374_v7  ;;  %v8385_v59 = vcombine.low %v5156_v46, %v5157_v22 }
 0x951   : > { %9687 = vmatmul.mubr.bf16.gmra.mrb[132].mxu1 %v11304_v27 }
 0x952   : > { %9690 = vmatprep.mubr.bf16.mxu1 %v11328_v44  ;;  %9703 = vmatpush3.bf16.msra.mxu1 %v8374_v7  ;;  %v5159_v7 = vld [vmem:[%s14553_s8 + $0x2f4] sm:$0xf] }
 0x953   : > { %9704 = vmatprep.subr.bf16.mxu1 %v8375_v20  ;;  %v8386_v52 = vcombine.low %v5158_v51, %v5159_v7  ;;  %v8362_v7 = vld [vmem:[%s14554_s9 + $0xc] ss:$0 sm:$0xff] }
 0x956   : > { %9705 = vmatpush3.bf16.msra.mxu1 %v8375_v20  ;;  %v5161_v20 = vld [vmem:[%s14553_s8 + $0x374] sm:$0xf] }
 0x957   : > { %9706 = vmatprep.subr.bf16.mxu1 %v8376_v21  ;;  %v8387_v2 = vcombine.low %v5160_v56, %v5161_v20 }
 0x959   : > { %9691 = vmatmul.mubr.bf16.gmra.mrb[136].mxu1 %v11326_v43 }
 0x95a   : > { %9694 = vmatprep.mubr.bf16.mxu1 %v14712_v33  ;;  %9707 = vmatpush3.bf16.msra.mxu1 %v8376_v21  ;;  %v5163_v21 = vld [vmem:[%s14553_s8 + $0x3f4] sm:$0xf] }
 0x95b   : > { %9708 = vmatprep.subr.bf16.mxu1 %v8377_v36  ;;  %v8388_v37 = vcombine.low %v5162_v50, %v5163_v21 }
 0x95e   : > { %9709 = vmatpush3.bf16.msra.mxu1 %v8377_v36 }
 0x95f   : > { %9710 = vmatprep.subr.bf16.mxu1 %v8378_v61 }
 0x961   : > { %9695 = vmatmul.mubr.bf16.gmra.mrb[140].mxu1 %v14713_v26 }
 0x962   : > { %9711 = vmatpush3.bf16.msra.mxu1 %v8378_v61  ;;  %9714 = vmatprep.mubr.bf16.mxu1 %v11283_v12 }
 0x963   : > { %9712 = vmatprep.subr.bf16.mxu1 %v8379_v15 }
 0x966   : > { %9713 = vmatpush3.bf16.msra.mxu1 %v8379_v15 }
 0x967   : > { %9762 = vmatprep.subr.bf16.mxu1 %v8381_v34 }
 0x969   : > { %9715 = vmatmul.mubr.bf16.vlgmr.msra.gmra.mrb[144].mxu1 %v11281_v11 }
 0x96a   : > { %9718 = vmatprep.mubr.bf16.mxu1 %v11306_v28  ;;  %9763 = vmatpush3.bf16.msra.mxu1 %v8381_v34 }
 0x96b   : > { %9764 = vmatprep.subr.bf16.mxu1 %v8382_v14 }
 0x96e   : > { %9765 = vmatpush3.bf16.msra.mxu1 %v8382_v14 }
 0x96f   : > { %9766 = vmatprep.subr.bf16.mxu1 %v8383_v23 }
 0x971   : > { %9719 = vmatmul.mubr.bf16.gmra.mrb[148].mxu1 %v11304_v27 }
 0x972   : > { %9722 = vmatprep.mubr.bf16.mxu1 %v11328_v44  ;;  %9767 = vmatpush3.bf16.msra.mxu1 %v8383_v23 }
 0x973   : > { %9768 = vmatprep.subr.bf16.mxu1 %v8384_v17 }
 0x976   : > { %9769 = vmatpush3.bf16.msra.mxu1 %v8384_v17 }
 0x977   : > { %9770 = vmatprep.subr.bf16.mxu1 %v8385_v59 }
 0x979   : > { %9723 = vmatmul.mubr.bf16.gmra.mrb[152].mxu1 %v11326_v43 }
 0x97a   : > { %9726 = vmatprep.mubr.bf16.mxu1 %v14712_v33  ;;  %9771 = vmatpush3.bf16.msra.mxu1 %v8385_v59 }
 0x97b   : > { %9772 = vmatprep.subr.bf16.mxu1 %v8386_v52 }
 0x97e   : > { %9773 = vmatpush3.bf16.msra.mxu1 %v8386_v52 }
 0x97f   : > { %9774 = vmatprep.subr.bf16.mxu1 %v8387_v2 }
 0x981   : > { %9727 = vmatmul.mubr.bf16.gmra.mrb[156].mxu1 %v14713_v26 }
 0x982   : > { %9775 = vmatpush3.bf16.msra.mxu1 %v8387_v2  ;;  %9778 = vmatprep.mubr.bf16.mxu1 %v11283_v12 }
 0x983   : > { %9776 = vmatprep.subr.bf16.mxu1 %v8388_v37 }
 0x986   : > { %9777 = vmatpush3.bf16.msra.mxu1 %v8388_v37 }
 0x989   : > { %9779 = vmatmul.mubr.bf16.vlgmr.msra.gmra.mrb[160].mxu1 %v11281_v11 }
 0x98a   : > { %9782 = vmatprep.mubr.bf16.mxu1 %v11306_v28 }
 0x991   : > { %9783 = vmatmul.mubr.bf16.gmra.mrb[164].mxu1 %v11304_v27 }
 0x992   : > { %9786 = vmatprep.mubr.bf16.mxu1 %v11328_v44 }
 0x999   : > { %9787 = vmatmul.mubr.bf16.gmra.mrb[168].mxu1 %v11326_v43 }
 0x99a   : > { %9790 = vmatprep.mubr.bf16.mxu1 %v14712_v33 }
 0x9a1   : > { %9791 = vmatmul.mubr.bf16.gmra.mrb[172].mxu1 %v14713_v26 }
 0x9fb   : > { %v12925_v62 = vpop.f32.mrb[80].mxu1 }
 0x9fc   : > { %14714 = vst [vmem:[#allocation27_spill] sm:$0xff] %v12925_v62  ;;  %v12927_v36 = vpop.f32.mrb[81].mxu1 }
 0x9fd   : > { %14715 = vst [vmem:[#allocation28_spill] sm:$0xff] %v12927_v36  ;;  %v12929_v6 = vpop.f32.mrb[82].mxu1 }
 0x9fe   : > { %14716 = vst [vmem:[#allocation29_spill] sm:$0xff] %v12929_v6  ;;  %v12933_v61 = vpop.f32.mrb[83].mxu1 }
 0x9ff   : > { %14717 = vst [vmem:[#allocation30_spill] sm:$0xff] %v12933_v61  ;;  %v13195_v61 = vld [vmem:[%s14547_s2 + $0x70] sm:$0xff] }
 0xa03   : > { %v12937_v32 = vpop.f32.mrb[84].mxu1 }
 0xa04   : > { %14718 = vst [vmem:[#allocation31_spill] sm:$0xff] %v12937_v32  ;;  %v12939_v15 = vpop.f32.mrb[85].mxu1  ;;  %v13168_v32 = vld [vmem:[%s14547_s2 + $0x58] sm:$0xff] }
 0xa05   : > { %14719 = vst [vmem:[#allocation32_spill] sm:$0xff] %v12939_v15  ;;  %v12941_v48 = vpop.f32.mrb[86].mxu1 }
 0xa06   : > { %14720 = vst [vmem:[#allocation33_spill] sm:$0xff] %v12941_v48  ;;  %v12945_v34 = vpop.f32.mrb[87].mxu1 }
 0xa07   : > { %14721 = vst [vmem:[#allocation34_spill] sm:$0xff] %v12945_v34  ;;  %v13177_v34 = vld [vmem:[%s14547_s2 + $0x60] sm:$0xff] }
 0xa0c   : > { %v12949_v41 = vpop.f32.mrb[88].mxu1 }
 0xa0d   : > { %14722 = vst [vmem:[#allocation35_spill] sm:$0xff] %v12949_v41  ;;  %v12951_v14 = vpop.f32.mrb[89].mxu1 }
 0xa0e   : > { %14723 = vst [vmem:[#allocation36_spill] sm:$0xff] %v12951_v14  ;;  %v12953_v5 = vpop.f32.mrb[90].mxu1 }
 0xa0f   : > { %14724 = vst [vmem:[#allocation26_spill] sm:$0xff] %v12953_v5  ;;  %v12957_v23 = vpop.f32.mrb[91].mxu1 }
 0xa10   : > { %14725 = vst [vmem:[#allocation19_spill] sm:$0xff] %v12957_v23 }
 0xa14   : > { %v12961_v58 = vpop.f32.mrb[92].mxu1 }
 0xa15   : > { %14726 = vst [vmem:[#allocation18_spill] sm:$0xff] %v12961_v58  ;;  %v12963_v17 = vpop.f32.mrb[93].mxu1 }
 0xa16   : > { %14727 = vst [vmem:[#allocation21_spill] sm:$0xff] %v12963_v17  ;;  %v12965_v46 = vpop.f32.mrb[94].mxu1 }
 0xa17   : > { %14728 = vst [vmem:[#allocation20_spill] sm:$0xff] %v12965_v46  ;;  %v12969_v59 = vpop.f32.mrb[95].mxu1 }
 0xa18   : > { %14729 = vst [vmem:[#allocation23_spill] sm:$0xff] %v12969_v59 }
 0xa1c   : > { %v9684_v52 = vpop.f32.mrb[128].mxu1 }
 0xa1d   : > { %v4629_v56 = vadd.f32 %v9684_v52, %v8362_v7  ;;  %v4620_v20 = vpop.f32.mrb[129].mxu1 }
 0xa1e   : > { %v9685_v2 = vpop.f32.mrb[130].mxu1  ;;  %v4621_v37 = vadd.f32 %v8362_v7, %v4620_v20 }
 0xa1f   : > { %v4632_v50 = vadd.f32 %v9685_v2, %v8362_v7  ;;  %v4623_v21 = vpop.f32.mrb[131].mxu1 }
 0xa20   : > { %v4624_v4 = vadd.f32 %v8362_v7, %v4623_v21 }
 0xa21   : > { %v12976_v30 = vpack.c.bf16 %v4632_v50, %v4629_v56 }
 0xa22   : > { %v12978_v22 = vpack.c.bf16 %v4624_v4, %v4621_v37 }
 0xa23   : > { %14730 = vst [vmem:[#allocation22_spill] sm:$0xff] %v12976_v30 }
 0xa24   : > { %14731 = vst [vmem:[#allocation25_spill] sm:$0xff] %v12978_v22  ;;  %v9688_v40 = vpop.f32.mrb[132].mxu1 }
 0xa25   : > { %v4645_v31 = vadd.f32 %v9688_v40, %v8362_v7  ;;  %v4636_v25 = vpop.f32.mrb[133].mxu1 }
 0xa26   : > { %v4637_v51 = vadd.f32 %v8362_v7, %v4636_v25  ;;  %v9689_v45 = vpop.f32.mrb[134].mxu1 }
 0xa27   : > { %v4648_v58 = vadd.f32 %v9689_v45, %v8362_v7  ;;  %v4639_v46 = vpop.f32.mrb[135].mxu1 }
 0xa28   : > { %v4640_v17 = vadd.f32 %v8362_v7, %v4639_v46 }
 0xa29   : > { %v12980_v59 = vpack.c.bf16 %v4648_v58, %v4645_v31 }
 0xa2a   : > { %v12982_v52 = vpack.c.bf16 %v4640_v17, %v4637_v51 }
 0xa2b   : > { %14732 = vst [vmem:[#allocation24_spill] sm:$0xff] %v12980_v59 }
 0xa2c   : > { %14733 = vst [vmem:[#allocation6_spill] sm:$0xff] %v12982_v52  ;;  %v9692_v2 = vpop.f32.mrb[136].mxu1 }
 0xa2d   : > { %v4661_v41 = vadd.f32 %v9692_v2, %v8362_v7  ;;  %v4652_v20 = vpop.f32.mrb[137].mxu1 }
 0xa2e   : > { %v4653_v21 = vadd.f32 %v8362_v7, %v4652_v20  ;;  %v9693_v56 = vpop.f32.mrb[138].mxu1 }
 0xa2f   : > { %v4664_v50 = vadd.f32 %v9693_v56, %v8362_v7  ;;  %v4655_v4 = vpop.f32.mrb[139].mxu1 }
 0xa30   : > { %v4656_v37 = vadd.f32 %v8362_v7, %v4655_v4 }
 0xa31   : > { %v12984_v30 = vpack.c.bf16 %v4664_v50, %v4661_v41  ;;  %v8371_v41 = vld [vmem:[%s14554_s9 + $0x5] ss:$0 sm:$0xff] }
 0xa32   : > { %v12986_v40 = vpack.c.bf16 %v4656_v37, %v4653_v21 }
 0xa33   : > { %14734 = vst [vmem:[#allocation7_spill] sm:$0xff] %v12984_v30 }
 0xa34   : > { %14735 = vst [vmem:[#allocation9_spill] sm:$0xff] %v12986_v40  ;;  %v9696_v25 = vpop.f32.mrb[140].mxu1 }
 0xa35   : > { %v4677_v45 = vadd.f32 %v9696_v25, %v8362_v7  ;;  %v4668_v5 = vpop.f32.mrb[141].mxu1 }
 0xa36   : > { %v4669_v46 = vadd.f32 %v8362_v7, %v4668_v5  ;;  %v9697_v31 = vpop.f32.mrb[142].mxu1 }
 0xa37   : > { %v4680_v58 = vadd.f32 %v9697_v31, %v8362_v7  ;;  %v4671_v17 = vpop.f32.mrb[143].mxu1 }
 0xa38   : > { %v4672_v51 = vadd.f32 %v8362_v7, %v4671_v17 }
 0xa39   : > { %v12988_v59 = vpack.c.bf16 %v4680_v58, %v4677_v45 }
 0xa3a   : > { %v12990_v2 = vpack.c.bf16 %v4672_v51, %v4669_v46 }
 0xa3b   : > { %14736 = vst [vmem:[#allocation4_spill] sm:$0xff] %v12988_v59 }
 0xa3c   : > { %14737 = vst [vmem:[#allocation8_spill] sm:$0xff] %v12990_v2  ;;  %v9716_v20 = vpop.f32.mrb[144].mxu1 }
 0xa3d   : > { %v4796_v56 = vpop.f32.mrb[145].mxu1  ;;  %v4805_v50 = vadd.f32 %v9716_v20, %v8371_v41 }
 0xa3e   : > { %v9717_v21 = vpop.f32.mrb[146].mxu1  ;;  %v4797_v25 = vadd.f32 %v8371_v41, %v4796_v56 }
 0xa3f   : > { %v4808_v4 = vadd.f32 %v9717_v21, %v8371_v41  ;;  %v4799_v37 = vpop.f32.mrb[147].mxu1 }
 0xa40   : > { %v4800_v5 = vadd.f32 %v8371_v41, %v4799_v37 }
 0xa41   : > { %v4860_v30 = vpack.c.bf16 %v4808_v4, %v4805_v50 }
 0xa42   : > { %v4859_v31 = vpack.c.bf16 %v4800_v5, %v4797_v25 }
 0xa44   : > { %v9720_v40 = vpop.f32.mrb[148].mxu1  ;;  %9730 = vmatprep.subr.bf16.mxu0 %v4859_v31 }
 0xa45   : > { %v4812_v7 = vpop.f32.mrb[149].mxu1  ;;  %9731 = vmatpush3.bf16.xpose.msra.mxu0 %v4859_v31  ;;  %v4821_v46 = vadd.f32 %v9720_v40, %v8371_v41 }
 0xa46   : > { %v9721_v45 = vpop.f32.mrb[150].mxu1  ;;  %9732 = vmatprep.subr.bf16.mxu0 %v4860_v30  ;;  %v4813_v51 = vadd.f32 %v8371_v41, %v4812_v7 }
 0xa47   : > { %v4824_v58 = vadd.f32 %v9721_v45, %v8371_v41  ;;  %v4815_v17 = vpop.f32.mrb[151].mxu1 }
 0xa48   : > { %v4816_v59 = vadd.f32 %v8371_v41, %v4815_v17 }
 0xa49   : > { %v4862_v2 = vpack.c.bf16 %v4824_v58, %v4821_v46 }
 0xa4a   : > { %v4861_v52 = vpack.c.bf16 %v4816_v59, %v4813_v51 }
 0xa4c   : > { %v9724_v20 = vpop.f32.mrb[152].mxu1 }
 0xa4d   : > { %v4828_v21 = vpop.f32.mrb[153].mxu1  ;;  %9733 = vmatpush3.bf16.xpose.msra.mxu0 %v4860_v30  ;;  %v4837_v50 = vadd.f32 %v9724_v20, %v8371_v41 }
 0xa4e   : > { %v9725_v56 = vpop.f32.mrb[154].mxu1  ;;  %9734 = vmatprep.subr.bf16.mxu0 %v4861_v52  ;;  %v4829_v25 = vadd.f32 %v8371_v41, %v4828_v21  ;;  %v8380_v21 = vld [vmem:[%s14554_s9 + $0xd] ss:$0 sm:$0xff] }
 0xa4f   : > { %v4840_v4 = vadd.f32 %v9725_v56, %v8371_v41  ;;  %v4831_v37 = vpop.f32.mrb[155].mxu1 }
 0xa50   : > { %v4832_v5 = vadd.f32 %v8371_v41, %v4831_v37 }
 0xa51   : > { %v4864_v31 = vpack.c.bf16 %v4840_v4, %v4837_v50 }
 0xa52   : > { %v4863_v14 = vpack.c.bf16 %v4832_v5, %v4829_v25 }
 0xa54   : > { %v9728_v23 = vpop.f32.mrb[156].mxu1 }
 0xa55   : > { %v4844_v40 = vpop.f32.mrb[157].mxu1  ;;  %9735 = vmatpush3.bf16.xpose.msra.mxu0 %v4861_v52  ;;  %v4853_v7 = vadd.f32 %v9728_v23, %v8371_v41 }
 0xa56   : > { %v9729_v45 = vpop.f32.mrb[158].mxu1  ;;  %9736 = vmatprep.subr.bf16.mxu0 %v4862_v2  ;;  %v4845_v58 = vadd.f32 %v8371_v41, %v4844_v40 }
 0xa57   : > { %v4856_v46 = vadd.f32 %v9729_v45, %v8371_v41  ;;  %v4847_v59 = vpop.f32.mrb[159].mxu1 }
 0xa58   : > { %v4848_v17 = vadd.f32 %v8371_v41, %v4847_v59 }
 0xa59   : > { %v12995_v30 = vpack.c.bf16 %v4856_v46, %v4853_v7 }
 0xa5a   : > { %v4865_v51 = vpack.c.bf16 %v4848_v17, %v4845_v58 }
 0xa5c   : > { %v9780_v20 = vpop.f32.mrb[160].mxu1 }
 0xa5d   : > { %9737 = vmatpush3.bf16.xpose.msra.mxu0 %v4862_v2  ;;  %v5253_v56 = vpop.f32.mrb[161].mxu1  ;;  %v5262_v52 = vadd.f32 %v9780_v20, %v8380_v21 }
 0xa5e   : > { %9738 = vmatprep.subr.bf16.mxu0 %v4863_v14  ;;  %v9781_v50 = vpop.f32.mrb[162].mxu1  ;;  %v5254_v23 = vadd.f32 %v8380_v21, %v5253_v56 }
 0xa5f   : > { %v5265_v4 = vadd.f32 %v9781_v50, %v8380_v21  ;;  %v5256_v37 = vpop.f32.mrb[163].mxu1 }
 0xa60   : > { %v5257_v25 = vadd.f32 %v8380_v21, %v5256_v37 }
 0xa61   : > { %v5317_v5 = vpack.c.bf16 %v5265_v4, %v5262_v52 }
 0xa62   : > { %v5316_v40 = vpack.c.bf16 %v5257_v25, %v5254_v23 }
 0xa64   : > { %v9784_v41 = vpop.f32.mrb[164].mxu1  ;;  %9794 = vmatprep.subr.bf16.mxu1 %v5316_v40 }
 0xa65   : > { %9739 = vmatpush3.bf16.xpose.msra.mxu0 %v4863_v14  ;;  %v5269_v45 = vpop.f32.mrb[165].mxu1  ;;  %9795 = vmatpush3.bf16.msra.mxu1 %v5316_v40  ;;  %v5278_v46 = vadd.f32 %v9784_v41, %v8380_v21 }
 0xa66   : > { %9740 = vmatprep.subr.bf16.mxu0 %v4864_v31  ;;  %v9785_v7 = vpop.f32.mrb[166].mxu1  ;;  %9796 = vmatprep.subr.bf16.mxu1 %v5317_v5  ;;  %v5270_v58 = vadd.f32 %v8380_v21, %v5269_v45 }
 0xa67   : > { %v5281_v2 = vadd.f32 %v9785_v7, %v8380_v21  ;;  %v5272_v59 = vpop.f32.mrb[167].mxu1 }
 0xa68   : > { %v5273_v17 = vadd.f32 %v8380_v21, %v5272_v59 }
 0xa69   : > { %v5319_v20 = vpack.c.bf16 %v5281_v2, %v5278_v46  ;;  %9797 = vmatpush3.bf16.msra.mxu1 %v5317_v5 }
 0xa6a   : > { %v5318_v50 = vpack.c.bf16 %v5273_v17, %v5270_v58  ;;  %v5518_v58 = vld [vmem:[%s14553_s8 + $0x18] sm:$0xf] }
 0xa6b   : > { %v5519_v17 = vld [vmem:[%s14553_s8 + $0x58] sm:$0xf] }
 0xa6c   : > { %v9788_v56 = vpop.f32.mrb[168].mxu1  ;;  %9798 = vmatprep.subr.bf16.mxu1 %v5318_v50 }
 0xa6d   : > { %9741 = vmatpush3.bf16.xpose.msra.mxu0 %v4864_v31  ;;  %v5285_v52 = vpop.f32.mrb[169].mxu1  ;;  %9799 = vmatpush3.bf16.msra.mxu1 %v5318_v50  ;;  %v5294_v4 = vadd.f32 %v9788_v56, %v8380_v21 }
 0xa6e   : > { %9742 = vmatprep.subr.bf16.mxu0 %v4865_v51  ;;  %v9789_v14 = vpop.f32.mrb[170].mxu1  ;;  %9800 = vmatprep.subr.bf16.mxu1 %v5319_v20  ;;  %v5286_v25 = vadd.f32 %v8380_v21, %v5285_v52  ;;  %v8390_v52 = vcombine.low %v5518_v58, %v5519_v17  ;;  %v5531_v58 = vld [vmem:[%s14553_s8 + $0x358] sm:$0xf] }
 0xa6f   : > { %v5297_v37 = vadd.f32 %v9789_v14, %v8380_v21  ;;  %v5288_v23 = vpop.f32.mrb[171].mxu1  ;;  %v5520_v14 = vld [vmem:[%s14553_s8 + $0x98] sm:$0xf] }
 0xa70   : > { %v5289_v40 = vadd.f32 %v8380_v21, %v5288_v23 }
 0xa71   : > { %v5321_v41 = vpack.c.bf16 %v5297_v37, %v5294_v4  ;;  %9801 = vmatpush3.bf16.msra.mxu1 %v5319_v20  ;;  %v5521_v4 = vld [vmem:[%s14553_s8 + $0xd8] sm:$0xf] }
 0xa72   : > { %v5320_v45 = vpack.c.bf16 %v5289_v40, %v5286_v25  ;;  %v5522_v37 = vld [vmem:[%s14553_s8 + $0x118] sm:$0xf] }
 0xa73   : > { %v5524_v25 = vld [vmem:[%s14553_s8 + $0x198] sm:$0xf] }
 0xa74   : > { %v9792_v7 = vpop.f32.mrb[172].mxu1  ;;  %9802 = vmatprep.subr.bf16.mxu1 %v5320_v45  ;;  %v5525_v40 = vld [vmem:[%s14553_s8 + $0x1d8] sm:$0xf] }
 0xa75   : > { %9743 = vmatpush3.bf16.xpose.msra.mxu0 %v4865_v51  ;;  %v5301_v5 = vpop.f32.mrb[173].mxu1  ;;  %9803 = vmatpush3.bf16.msra.mxu1 %v5320_v45  ;;  %v5310_v46 = vadd.f32 %v9792_v7, %v8380_v21  ;;  %v5526_v45 = vld [vmem:[%s14553_s8 + $0x218] sm:$0xf] }
 0xa76   : > { %9744 = vmatprep.subr.bf16.mxu0 %v12995_v30  ;;  %v9793_v31 = vpop.f32.mrb[174].mxu1  ;;  %9804 = vmatprep.subr.bf16.mxu1 %v5321_v41  ;;  %v5302_v20 = vadd.f32 %v8380_v21, %v5301_v5  ;;  %v5527_v7 = vld [vmem:[%s14553_s8 + $0x258] sm:$0xf] }
 0xa77   : > { %v5313_v2 = vadd.f32 %v9793_v31, %v8380_v21  ;;  %v5304_v59 = vpop.f32.mrb[175].mxu1  ;;  %v8394_v5 = vcombine.low %v5526_v45, %v5527_v7  ;;  %v5528_v31 = vld [vmem:[%s14553_s8 + $0x298] sm:$0xf] }
 0xa78   : > { %v5305_v50 = vadd.f32 %v8380_v21, %v5304_v59  ;;  %v8391_v21 = vcombine.low %v5520_v14, %v5521_v4  ;;  %v5530_v59 = vld [vmem:[%s14553_s8 + $0x318] sm:$0xf]  ;;  %v13070_v14 = vld [vmem:[%s14547_s2] sm:$0xff] }
 0xa79   : > { %v5323_v51 = vpack.c.bf16 %v5313_v2, %v5310_v46  ;;  %9805 = vmatpush3.bf16.msra.mxu1 %v5321_v41  ;;  %v8393_v41 = vcombine.low %v5524_v25, %v5525_v40  ;;  %v5529_v46 = vld [vmem:[%s14553_s8 + $0x2d8] sm:$0xf]  ;;  %v8396_v17 = vcombine.low %v5530_v59, %v5531_v58  ;;  %14738 = vst [vmem:[#allocation10_spill] sm:$0xff] %v13070_v14  ;;  %v13087_v25 = vld [vmem:[%s14547_s2 + $0x10] sm:$0xff]  ;;  %v13114_v58 = vld [vmem:[%s14547_s2 + $0x28] sm:$0xff] }
 0xa7a   : > { %v5322_v56 = vpack.c.bf16 %v5305_v50, %v5302_v20  ;;  %v8395_v2 = vcombine.low %v5528_v31, %v5529_v46  ;;  %v5532_v20 = vld [vmem:[%s14553_s8 + $0x398] sm:$0xf]  ;;  %v13105_v31 = vld [vmem:[%s14547_s2 + $0x20] sm:$0xff] }
 0xa7b   : > { %v5533_v50 = vld [vmem:[%s14553_s8 + $0x3d8] sm:$0xf] }
 0xa7c   : > { %9806 = vmatprep.subr.bf16.mxu1 %v5322_v56 }
 0xa7d   : > { %9745 = vmatpush3.bf16.xpose.msra.mxu0 %v12995_v30  ;;  %9807 = vmatpush3.bf16.msra.mxu1 %v5322_v56  ;;  %v5523_v30 = vld [vmem:[%s14553_s8 + $0x158] sm:$0xf] }
 0xa7e   : > { %9808 = vmatprep.subr.bf16.mxu1 %v5323_v51  ;;  %9858 = vmatprep.subr.bf16.mxu0 %v8390_v52  ;;  %v8392_v23 = vcombine.low %v5522_v37, %v5523_v30  ;;  %v13078_v30 = vld [vmem:[%s14547_s2 + $0x8] sm:$0xff] }
 0xa81   : > { %9809 = vmatpush3.bf16.msra.mxu1 %v5323_v51  ;;  %v8397_v51 = vcombine.low %v5532_v20, %v5533_v50  ;;  %v13123_v20 = vld [vmem:[%s14547_s2 + $0x30] sm:$0xff] }
 0xa82   : > { %9826 = vmatprep.subr.bf16.mxu1 %v12978_v22  ;;  %v13159_v22 = vld [vmem:[%s14547_s2 + $0x50] sm:$0xff] }
 0xa84   : > { %9747 = vmatmul.mubr.bf16.vlgmr.msra.gmra.mrb[160].mxu0 %v14699_v1 }
 0xa85   : > { %9750 = vmatprep.mubr.bf16.mxu0 %v14700_v10  ;;  %9859 = vmatpush3.bf16.msra.mxu0 %v8390_v52 }
 0xa86   : > { %9860 = vmatprep.subr.bf16.mxu0 %v8391_v21 }
 0xa89   : > { %9861 = vmatpush3.bf16.msra.mxu0 %v8391_v21 }
 0xa8a   : > { %9862 = vmatprep.subr.bf16.mxu0 %v8392_v23 }
 0xa8c   : > { %9751 = vmatmul.mubr.bf16.gmra.mrb[164].mxu0 %v14701_v57 }
 0xa8d   : > { %9754 = vmatprep.mubr.bf16.mxu0 %v14702_v8  ;;  %9863 = vmatpush3.bf16.msra.mxu0 %v8392_v23 }
 0xa8e   : > { %9864 = vmatprep.subr.bf16.mxu0 %v8393_v41 }
 0xa91   : > { %9865 = vmatpush3.bf16.msra.mxu0 %v8393_v41  ;;  %v13096_v41 = vld [vmem:[%s14547_s2 + $0x18] sm:$0xff] }
 0xa92   : > { %9866 = vmatprep.subr.bf16.mxu0 %v8394_v5 }
 0xa94   : > { %9755 = vmatmul.mubr.bf16.gmra.mrb[168].mxu0 %v14703_v55 }
 0xa95   : > { %9758 = vmatprep.mubr.bf16.mxu0 %v14704_v13  ;;  %9867 = vmatpush3.bf16.msra.mxu0 %v8394_v5 }
 0xa96   : > { %9868 = vmatprep.subr.bf16.mxu0 %v8395_v2 }
 0xa99   : > { %9869 = vmatpush3.bf16.msra.mxu0 %v8395_v2 }
 0xa9a   : > { %9870 = vmatprep.subr.bf16.mxu0 %v8396_v17 }
 0xa9c   : > { %9759 = vmatmul.mubr.bf16.gmra.mrb[172].mxu0 %v14705_v39 }
 0xa9d   : > { %9871 = vmatpush3.bf16.msra.mxu0 %v8396_v17  ;;  %9874 = vmatprep.mubr.bf16.mxu0 %v11283_v12 }
 0xa9e   : > { %9872 = vmatprep.subr.bf16.mxu0 %v8397_v51 }
 0xaa1   : > { %9873 = vmatpush3.bf16.msra.mxu0 %v8397_v51  ;;  %v13132_v51 = vld [vmem:[%s14547_s2 + $0x38] sm:$0xff] }
 0xaa4   : > { %9875 = vmatmul.mubr.bf16.vlgmr.msra.gmra.mrb[176].mxu0 %v11281_v11 }
 0xaa5   : > { %9878 = vmatprep.mubr.bf16.mxu0 %v11306_v28 }
 0xaac   : > { %9879 = vmatmul.mubr.bf16.gmra.mrb[180].mxu0 %v11304_v27 }
 0xaad   : > { %9882 = vmatprep.mubr.bf16.mxu0 %v11328_v44 }
 0xab4   : > { %9883 = vmatmul.mubr.bf16.gmra.mrb[184].mxu0 %v11326_v43 }
 0xab5   : > { %9886 = vmatprep.mubr.bf16.mxu0 %v14712_v33 }
 0xabc   : > { %9887 = vmatmul.mubr.bf16.gmra.mrb[188].mxu0 %v14713_v26 }
 0xabd   : > { %9906 = vmatprep.mubr.bf16.mxu0 %v14689_v38 }
 0xb57   : > { %v9748_v56 = vpop.f32.mrb[160].mxu0 }
 0xb58   : > { %v4901_v52 = vpop.f32.mrb[161].mxu0  ;;  %v13090_v40 = vadd.f32 %v13087_v25, %v9748_v56 }
 0xb59   : > { %v13073_v4 = vadd.f32 %v13070_v14, %v4901_v52  ;;  %v9749_v21 = vpop.f32.mrb[162].mxu0 }
 0xb5a   : > { %v4904_v37 = vpop.f32.mrb[163].mxu0  ;;  %v13099_v45 = vadd.f32 %v13096_v41, %v9749_v21 }
 0xb5b   : > { %v13081_v23 = vadd.f32 %v13078_v30, %v4904_v37  ;;  %4964 = vmax.xlane.f32.xlu0 %v13073_v4  ;;  %v13141_v37 = vld [vmem:[%s14547_s2 + $0x40] sm:$0xff] }
 0xb5d   : > { %4966 = vmax.xlane.f32.xlu1 %v13081_v23 }
 0xb5f   : > { %v9752_v7 = vpop.f32.mrb[164].mxu0  ;;  %4968 = vmax.xlane.f32.xlu0 %v13090_v40 }
 0xb60   : > { %v4917_v5 = vpop.f32.mrb[165].mxu0  ;;  %v13126_v50 = vadd.f32 %v13123_v20, %v9752_v7 }
 0xb61   : > { %v13108_v46 = vadd.f32 %v13105_v31, %v4917_v5  ;;  %v9753_v2 = vpop.f32.mrb[166].mxu0  ;;  %4970 = vmax.xlane.f32.xlu1 %v13099_v45 }
 0xb62   : > { %v4920_v59 = vpop.f32.mrb[167].mxu0  ;;  %14739 = vst [vmem:[#allocation12_spill] sm:$0xff] %v13126_v50  ;;  %v13135_v56 = vadd.f32 %v13132_v51, %v9753_v2  ;;  %v13150_v2 = vld [vmem:[%s14547_s2 + $0x48] sm:$0xff] }
 0xb63   : > { %v13117_v17 = vadd.f32 %v13114_v58, %v4920_v59  ;;  %4972 = vmax.xlane.f32.xlu0 %v13108_v46 }
 0xb64   : > { %14740 = vst [vmem:[#allocation14_spill] sm:$0xff] %v13135_v56 }
 0xb65   : > { %4974 = vmax.xlane.f32.xlu1 %v13117_v17 }
 0xb67   : > { %v9756_v52 = vpop.f32.mrb[168].mxu0  ;;  %4976 = vmax.xlane.f32.xlu0 %v13126_v50 }
 0xb68   : > { %v4933_v21 = vpop.f32.mrb[169].mxu0 }
 0xb69   : > { %v13144_v7 = vadd.f32 %v13141_v37, %v4933_v21  ;;  %v9757_v5 = vpop.f32.mrb[170].mxu0  ;;  %4978 = vmax.xlane.f32.xlu1 %v13135_v56  ;;  %v13162_v21 = vadd.f32 %v13159_v22, %v9756_v52  ;;  %v13224_v56 = vadd.f32 %v13078_v30, %v12559_v60 }
 0xb6a   : > { %v4936_v59 = vpop.f32.mrb[171].mxu0 }
 0xb6b   : > { %14741 = vst [vmem:[#allocation16_spill] sm:$0xff] %v13144_v7  ;;  %v13153_v38 = vadd.f32 %v13150_v2, %v4936_v59  ;;  %4980 = vmax.xlane.f32.xlu0 %v13144_v7  ;;  %14743 = vst [vmem:[#allocation37_spill] sm:$0xff] %v13162_v21  ;;  %v13171_v59 = vadd.f32 %v13168_v32, %v9757_v5  ;;  %v13186_v5 = vld [vmem:[%s14547_s2 + $0x68] sm:$0xff] }
 0xb6d   : > { %14742 = vst [vmem:[#allocation3_spill] sm:$0xff] %v13153_v38  ;;  %4982 = vmax.xlane.f32.xlu1 %v13153_v38  ;;  %14744 = vst [vmem:[#allocation38_spill] sm:$0xff] %v13171_v59 }
 0xb6f   : > { %v9760_v48 = vpop.f32.mrb[172].mxu0  ;;  %4984 = vmax.xlane.f32.xlu0 %v13162_v21 }
 0xb70   : > { %v4949_v15 = vpop.f32.mrb[173].mxu0 }
 0xb71   : > { %v13180_v52 = vadd.f32 %v13177_v34, %v4949_v15  ;;  %v9761_v62 = vpop.f32.mrb[174].mxu0  ;;  %4986 = vmax.xlane.f32.xlu1 %v13171_v59  ;;  %v13198_v15 = vadd.f32 %v13195_v61, %v9760_v48  ;;  %v13204_v59 = vld [vmem:[%s14547_s2 + $0x78] sm:$0xff] }
 0xb72   : > { %v4952_v6 = vpop.f32.mrb[175].mxu0 }
 0xb73   : > { %14745 = vst [vmem:[#allocation39_spill] sm:$0xff] %v13180_v52  ;;  %v13189_v36 = vadd.f32 %v13186_v5, %v4952_v6  ;;  %4988 = vmax.xlane.f32.xlu0 %v13180_v52  ;;  %14747 = vst [vmem:[#allocation41_spill] sm:$0xff] %v13198_v15  ;;  %v13207_v6 = vadd.f32 %v13204_v59, %v9761_v62  ;;  %v13212_v52 = vld [vmem:[%s14554_s9 + $0x6] ss:$0 sm:$0xff] }
 0xb75   : > { %14746 = vst [vmem:[#allocation40_spill] sm:$0xff] %v13189_v36  ;;  %4990 = vmax.xlane.f32.xlu1 %v13189_v36  ;;  %14748 = vst [vmem:[#allocation42_spill] sm:$0xff] %v13207_v6  ;;  %v13217_v36 = vadd.f32 %v13070_v14, %v12555_v24  ;;  %v13231_v14 = vadd.f32 %v13087_v25, %v12553_v42 }
 0xb77   : > { %v9876_v21 = vpop.f32.mrb[176].mxu0  ;;  %4992 = vmax.xlane.f32.xlu0 %v13198_v15 }
 0xb78   : > { %v5623_v48 = vpop.f32.mrb[177].mxu0  ;;  %v5632_v7 = vadd.f32 %v9876_v21, %v13212_v52 }
 0xb79   : > { %v9877_v38 = vpop.f32.mrb[178].mxu0  ;;  %4994 = vmax.xlane.f32.xlu1 %v13207_v6  ;;  %v5624_v50 = vadd.f32 %v13212_v52, %v5623_v48  ;;  %v13265_v48 = vadd.f32 %v13141_v37, %v12575_v16  ;;  %v13279_v37 = vadd.f32 %v13159_v22, %v12573_v29 }
 0xb7a   : > { %v5635_v62 = vadd.f32 %v9877_v38, %v13212_v52  ;;  %v5626_v26 = vpop.f32.mrb[179].mxu0  ;;  %v13236_v38 = vadd.f32 %v13096_v41, %v12557_v53  ;;  %v13248_v41 = vadd.f32 %v13114_v58, %v12569_v3 }
 0xb7b   : > { %v5627_v15 = vadd.f32 %v13212_v52, %v5626_v26  ;;  %4331 = vmax.xlane.f32.xlu0 %v13217_v36  ;;  %v13241_v26 = vadd.f32 %v13105_v31, %v12565_v0  ;;  %v13255_v31 = vadd.f32 %v13123_v20, %v12563_v47 }
 0xb7c   : > { %v5687_v24 = vpack.c.bf16 %v5635_v62, %v5632_v7 }
 0xb7d   : > { %v5686_v6 = vpack.c.bf16 %v5627_v15, %v5624_v50  ;;  %4333 = vmax.xlane.f32.xlu1 %v13224_v56 }
 0xb7f   : > { %v9880_v60 = vpop.f32.mrb[180].mxu0  ;;  %9890 = vmatprep.subr.bf16.mxu0 %v5686_v6  ;;  %4335 = vmax.xlane.f32.xlu0 %v13231_v14 }
 0xb80   : > { %v5639_v30 = vpop.f32.mrb[181].mxu0  ;;  %9891 = vmatpush3.bf16.xpose.msra.mxu0 %v5686_v6  ;;  %v5648_v42 = vadd.f32 %v9880_v60, %v13212_v52  ;;  %v13260_v6 = vadd.f32 %v13132_v51, %v12567_v49  ;;  %v13272_v49 = vadd.f32 %v13150_v2, %v12579_v54 }
 0xb81   : > { %v9881_v7 = vpop.f32.mrb[182].mxu0  ;;  %9892 = vmatprep.subr.bf16.mxu0 %v5687_v24  ;;  %4337 = vmax.xlane.f32.xlu1 %v13236_v38  ;;  %v5640_v50 = vadd.f32 %v13212_v52, %v5639_v30 }
 0xb82   : > { %v5651_v25 = vadd.f32 %v9881_v7, %v13212_v52  ;;  %v5642_v53 = vpop.f32.mrb[183].mxu0  ;;  %v13284_v7 = vadd.f32 %v13168_v32, %v12577_v63  ;;  %v13296_v63 = vadd.f32 %v13186_v5, %v12590_v9  ;;  %v6268_v5 = vld [vmem:[%s14553_s8 + $0x11c] sm:$0xf] }
 0xb83   : > { %v5643_v21 = vadd.f32 %v13212_v52, %v5642_v53  ;;  %4339 = vmax.xlane.f32.xlu0 %v13241_v26 }
 0xb84   : > { %v5689_v0 = vpack.c.bf16 %v5651_v25, %v5648_v42  ;;  %v13289_v42 = vadd.f32 %v13177_v34, %v12585_v18  ;;  %v13303_v34 = vadd.f32 %v13195_v61, %v12583_v35  ;;  %v6264_v35 = vld [vmem:[%s14553_s8 + $0x1c] sm:$0xf] }
 0xb85   : > { %v5688_v15 = vpack.c.bf16 %v5643_v21, %v5640_v50  ;;  %4341 = vmax.xlane.f32.xlu1 %v13248_v41  ;;  %v6266_v61 = vld [vmem:[%s14553_s8 + $0x9c] sm:$0xf] }
 0xb87   : > { %v9884_v3 = vpop.f32.mrb[184].mxu0  ;;  %4343 = vmax.xlane.f32.xlu0 %v13255_v31 }
 0xb88   : > { %v5655_v58 = vpop.f32.mrb[185].mxu0  ;;  %9893 = vmatpush3.bf16.xpose.msra.mxu0 %v5687_v24  ;;  %v5664_v47 = vadd.f32 %v9884_v3, %v13212_v52 }
 0xb89   : > { %v9885_v62 = vpop.f32.mrb[186].mxu0  ;;  %9894 = vmatprep.subr.bf16.mxu0 %v5688_v15  ;;  %4345 = vmax.xlane.f32.xlu1 %v13260_v6  ;;  %v5656_v51 = vadd.f32 %v13212_v52, %v5655_v58  ;;  %v6270_v58 = vld [vmem:[%s14553_s8 + $0x19c] sm:$0xf] }
 0xb8a   : > { %v5667_v20 = vadd.f32 %v9885_v62, %v13212_v52  ;;  %v5658_v60 = vpop.f32.mrb[187].mxu0  ;;  %v6271_v62 = vld [vmem:[%s14553_s8 + $0x1dc] sm:$0xf] }
 0xb8b   : > { %v5659_v24 = vadd.f32 %v13212_v52, %v5658_v60  ;;  %4347 = vmax.xlane.f32.xlu0 %v13265_v48  ;;  %v6273_v60 = vld [vmem:[%s14553_s8 + $0x25c] sm:$0xf] }
 0xb8c   : > { %v5691_v16 = vpack.c.bf16 %v5667_v20, %v5664_v47  ;;  %v8411_v47 = vcombine.low %v6270_v58, %v6271_v62  ;;  %v6272_v20 = vld [vmem:[%s14553_s8 + $0x21c] sm:$0xf] }
 0xb8d   : > { %v5690_v30 = vpack.c.bf16 %v5659_v24, %v5656_v51  ;;  %4349 = vmax.xlane.f32.xlu1 %v13272_v49  ;;  %v8412_v51 = vcombine.low %v6272_v20, %v6273_v60  ;;  %v6274_v24 = vld [vmem:[%s14553_s8 + $0x29c] sm:$0xf] }
 0xb8e   : > { %v6730_v58 = vld [vmem:[%s14553_s8 + $0x27c] sm:$0xf] }
 0xb8f   : > { %v9888_v54 = vpop.f32.mrb[188].mxu0  ;;  %4351 = vmax.xlane.f32.xlu0 %v13279_v37  ;;  %v6731_v60 = vld [vmem:[%s14553_s8 + $0x2bc] sm:$0xf] }
 0xb90   : > { %v5671_v2 = vpop.f32.mrb[189].mxu0  ;;  %9895 = vmatpush3.bf16.xpose.msra.mxu0 %v5688_v15  ;;  %v5680_v29 = vadd.f32 %v9888_v54, %v13212_v52  ;;  %v13308_v15 = vadd.f32 %v13204_v59, %v12587_v19  ;;  %v6265_v19 = vld [vmem:[%s14553_s8 + $0x5c] sm:$0xf] }
 0xb91   : > { %v9889_v25 = vpop.f32.mrb[190].mxu0  ;;  %9896 = vmatprep.subr.bf16.mxu0 %v5689_v0  ;;  %4353 = vmax.xlane.f32.xlu1 %v13284_v7  ;;  %v5672_v32 = vadd.f32 %v13212_v52, %v5671_v2  ;;  %v8408_v9 = vcombine.low %v6264_v35, %v6265_v19  ;;  %v6267_v59 = vld [vmem:[%s14553_s8 + $0xdc] sm:$0xf] }
 0xb92   : > { %v5683_v22 = vadd.f32 %v9889_v25, %v13212_v52  ;;  %v5674_v53 = vpop.f32.mrb[191].mxu0  ;;  %v6276_v54 = vld [vmem:[%s14553_s8 + $0x31c] sm:$0xf] }
 0xb93   : > { %v5675_v50 = vadd.f32 %v13212_v52, %v5674_v53  ;;  %4355 = vmax.xlane.f32.xlu0 %v13289_v42  ;;  %v8409_v52 = vcombine.low %v6266_v61, %v6267_v59  ;;  %v6277_v2 = vld [vmem:[%s14553_s8 + $0x35c] sm:$0xf] }
 0xb94   : > { %v5693_v18 = vpack.c.bf16 %v5683_v22, %v5680_v29  ;;  %v8414_v25 = vcombine.low %v6276_v54, %v6277_v2  ;;  %v6278_v29 = vld [vmem:[%s14553_s8 + $0x39c] sm:$0xf] }
 0xb95   : > { %v5692_v21 = vpack.c.bf16 %v5675_v50, %v5672_v32  ;;  %4357 = vmax.xlane.f32.xlu1 %v13296_v63  ;;  %v6279_v22 = vld [vmem:[%s14553_s8 + $0x3dc] sm:$0xf] }
 0xb96   : > { %v8415_v53 = vcombine.low %v6278_v29, %v6279_v22  ;;  %v6721_v32 = vld [vmem:[%s14553_s8 + $0x3c] sm:$0xf] }
 0xb97   : > { %4359 = vmax.xlane.f32.xlu0 %v13303_v34  ;;  %v6722_v50 = vld [vmem:[%s14553_s8 + $0x7c] sm:$0xf] }
 0xb98   : > { %9897 = vmatpush3.bf16.xpose.msra.mxu0 %v5689_v0  ;;  %v6269_v0 = vld [vmem:[%s14553_s8 + $0x15c] sm:$0xf] }
 0xb99   : > { %9898 = vmatprep.subr.bf16.mxu0 %v5690_v30  ;;  %4361 = vmax.xlane.f32.xlu1 %v13308_v15  ;;  %v8410_v3 = vcombine.low %v6268_v5, %v6269_v0  ;;  %v6724_v35 = vld [vmem:[%s14553_s8 + $0xfc] sm:$0xf] }
 0xb9a   : > { %v6726_v61 = vld [vmem:[%s14553_s8 + $0x17c] sm:$0xf] }
 0xb9b   : > { %v6728_v5 = vld [vmem:[%s14553_s8 + $0x1fc] sm:$0xf] }
 0xb9c   : > { %v6733_v29 = vld [vmem:[%s14553_s8 + $0x33c] sm:$0xf] }
 0xb9d   : > { %v6734_v22 = vld [vmem:[%s14553_s8 + $0x37c] sm:$0xf] }
 0xba0   : > { %9899 = vmatpush3.bf16.xpose.msra.mxu0 %v5690_v30 }
 0xba1   : > { %9900 = vmatprep.subr.bf16.mxu0 %v5691_v16 }
 0xba8   : > { %9901 = vmatpush3.bf16.xpose.msra.mxu0 %v5691_v16  ;;  %v6275_v16 = vld [vmem:[%s14553_s8 + $0x2dc] sm:$0xf] }
 0xba9   : > { %9902 = vmatprep.subr.bf16.mxu0 %v5692_v21  ;;  %v8413_v30 = vcombine.low %v6274_v24, %v6275_v16 }
 0xbb0   : > { %9903 = vmatpush3.bf16.xpose.msra.mxu0 %v5692_v21  ;;  %v6723_v21 = vld [vmem:[%s14553_s8 + $0xbc] sm:$0xf] }
 0xbb1   : > { %9904 = vmatprep.subr.bf16.mxu0 %v5693_v18  ;;  %v8418_v19 = vcombine.low %v6723_v21, %v6724_v35  ;;  %v6735_v35 = vld [vmem:[%s14553_s8 + $0x3bc] sm:$0xf] }
 0xbb8   : > { %9905 = vmatpush3.bf16.xpose.msra.mxu0 %v5693_v18  ;;  %v8417_v18 = vcombine.low %v6721_v32, %v6722_v50 }
 0xbb9   : > { %9986 = vmatprep.subr.bf16.mxu0 %v8408_v9 }
 0xbbf   : > { %9907 = vmatmul.mubr.bf16.vlgmr.msra.gmra.mrb[192].mxu0 %v14699_v1 }
 0xbc0   : > { %9910 = vmatprep.mubr.bf16.mxu0 %v14700_v10  ;;  %9987 = vmatpush3.bf16.msra.mxu0 %v8408_v9  ;;  %v6725_v9 = vld [vmem:[%s14553_s8 + $0x13c] sm:$0xf] }
 0xbc1   : > { %9988 = vmatprep.subr.bf16.mxu0 %v8409_v52  ;;  %v8419_v59 = vcombine.low %v6725_v9, %v6726_v61 }
 0xbc4   : > { %9989 = vmatpush3.bf16.msra.mxu0 %v8409_v52  ;;  %v6727_v52 = vld [vmem:[%s14553_s8 + $0x1bc] sm:$0xf] }
 0xbc5   : > { %9990 = vmatprep.subr.bf16.mxu0 %v8410_v3  ;;  %v8420_v0 = vcombine.low %v6727_v52, %v6728_v5 }
 0xbc7   : > { %9911 = vmatmul.mubr.bf16.gmra.mrb[196].mxu0 %v14701_v57 }
 0xbc8   : > { %9914 = vmatprep.mubr.bf16.mxu0 %v14702_v8  ;;  %9991 = vmatpush3.bf16.msra.mxu0 %v8410_v3  ;;  %v6729_v3 = vld [vmem:[%s14553_s8 + $0x23c] sm:$0xf] }
 0xbc9   : > { %9992 = vmatprep.subr.bf16.mxu0 %v8411_v47 }
 0xbcc   : > { %9993 = vmatpush3.bf16.msra.mxu0 %v8411_v47  ;;  %v8421_v47 = vcombine.low %v6729_v3, %v6730_v58  ;;  %v14749_v3 = vld [vmem:[#allocation12_spill] sm:$0xff] }
 0xbcd   : > { %9994 = vmatprep.subr.bf16.mxu0 %v8412_v51 }
 0xbcf   : > { %9915 = vmatmul.mubr.bf16.gmra.mrb[200].mxu0 %v14703_v55 }
 0xbd0   : > { %9918 = vmatprep.mubr.bf16.mxu0 %v14704_v13  ;;  %9995 = vmatpush3.bf16.msra.mxu0 %v8412_v51  ;;  %v6732_v51 = vld [vmem:[%s14553_s8 + $0x2fc] sm:$0xf] }
 0xbd1   : > { %9996 = vmatprep.subr.bf16.mxu0 %v8413_v30  ;;  %v8422_v2 = vcombine.low %v6731_v60, %v6732_v51  ;;  %v10421_v60 = vld [vmem:[%s14556_s11] sm:$0xff]  }
 0xbd4   : > { %9997 = vmatpush3.bf16.msra.mxu0 %v8413_v30 }
 0xbd5   : > { %9998 = vmatprep.subr.bf16.mxu0 %v8414_v25 }
 0xbd7   : > { %9919 = vmatmul.mubr.bf16.gmra.mrb[204].mxu0 %v14705_v39 }
 0xbd8   : > { %9999 = vmatpush3.bf16.msra.mxu0 %v8414_v25  ;;  %10002 = vmatprep.mubr.bf16.mxu0 %v11283_v12 }
 0xbd9   : > { %10000 = vmatprep.subr.bf16.mxu0 %v8415_v53 }
 0xbdc   : > { %10001 = vmatpush3.bf16.msra.mxu0 %v8415_v53 }
 0xbdd   : > { %10050 = vmatprep.subr.bf16.mxu0 %v8417_v18 }
 0xbdf   : > { %10003 = vmatmul.mubr.bf16.vlgmr.msra.gmra.mrb[208].mxu0 %v11281_v11 }
 0xbe0   : > { %10006 = vmatprep.mubr.bf16.mxu0 %v11306_v28  ;;  %10051 = vmatpush3.bf16.msra.mxu0 %v8417_v18  ;;  %v8423_v18 = vcombine.low %v6733_v29, %v6734_v22 }
 0xbe1   : > { %10052 = vmatprep.subr.bf16.mxu0 %v8418_v19 }
 0xbe4   : > { %10053 = vmatpush3.bf16.msra.mxu0 %v8418_v19 }
 0xbe5   : > { %10054 = vmatprep.subr.bf16.mxu0 %v8419_v59 }
 0xbe7   : > { %10007 = vmatmul.mubr.bf16.gmra.mrb[212].mxu0 %v11304_v27 }
 0xbe8   : > { %10010 = vmatprep.mubr.bf16.mxu0 %v11328_v44  ;;  %10055 = vmatpush3.bf16.msra.mxu0 %v8419_v59  ;;  %v4965_v62 = vpop.xlane.xlu0 %4964 }
 0xbe9   : > { %10056 = vmatprep.subr.bf16.mxu0 %v8420_v0  ;;  %v4996_v24 = vsub.f32 %v13073_v4, %v4965_v62  ;;  %v14750_v62 = vld [vmem:[#allocation14_spill] sm:$0xff] }
 0xbea   : > { %v4967_v20 = vpop.xlane.xlu1 %4966 }
 0xbeb   : > { %v4997_v16 = vsub.f32 %v13081_v23, %v4967_v20  ;;  %v14751_v20 = vld [vmem:[#allocation2_spill] sm:$0xff] }
 0xbec   : > { %10057 = vmatpush3.bf16.msra.mxu0 %v8420_v0  ;;  %v4969_v30 = vpop.xlane.xlu0 %4968 }
 0xbed   : > { %v5012_v54 = vpack.c.bf16 %v4997_v16, %v4996_v24  ;;  %10058 = vmatprep.subr.bf16.mxu0 %v8421_v47  ;;  %v4998_v32 = vsub.f32 %v13090_v40, %v4969_v30  ;;  %v6736_v40 = vld [vmem:[%s14553_s8 + $0x3fc] sm:$0xf]  ;;  %v14752_v16 = vld [vmem:[#allocation16_spill] sm:$0xff] }
 0xbee   : > { %v4971_v25 = vpop.xlane.xlu1 %4970  ;;  %v8424_v52 = vcombine.low %v6735_v35, %v6736_v40  ;;  %v14755_v35 = vld [vmem:[#allocation38_spill] sm:$0xff] }
 0xbef   : > { %v5021_v53 = vmul.bf16 1069105081, %v5012_v54  ;;  %v4999_v4 = vsub.f32 %v13099_v45, %v4971_v25  ;;  %10011 = vmatmul.mubr.bf16.gmra.mrb[216].mxu0 %v11326_v43  ;;  %v14753_v54 = vld [vmem:[#allocation3_spill] sm:$0xff] }
 0xbf0   : > { %10014 = vmatprep.mubr.bf16.mxu0 %v14712_v33  ;;  %10059 = vmatpush3.bf16.msra.mxu0 %v8421_v47  ;;  %v4973_v23 = vpop.xlane.xlu0 %4972 }
 0xbf1   : > { %10645 = vpow.bf16 %v5021_v53  ;;  %v5013_v50 = vpack.c.bf16 %v4999_v4, %v4998_v32  ;;  %10060 = vmatprep.subr.bf16.mxu0 %v8422_v2  ;;  %v5000_v19 = vsub.f32 %v13108_v46, %v4973_v23  ;;  %v10422_v23 = vld [vmem:[%s14556_s11 + $0x8] sm:$0xff]  }
 0xbf2   : > { %v4975_v21 = vpop.xlane.xlu1 %4974 }
 0xbf3   : > { %v5024_v45 = vmul.bf16 1069105081, %v5013_v50  ;;  %v5001_v9 = vsub.f32 %v13117_v17, %v4975_v21 }
 0xbf4   : > { %10061 = vmatpush3.bf16.msra.mxu0 %v8422_v2  ;;  %v4977_v61 = vpop.xlane.xlu0 %4976 }
 0xbf5   : > { %10647 = vpow.bf16 %v5024_v45  ;;  %v5014_v59 = vpack.c.bf16 %v5001_v9, %v5000_v19  ;;  %10062 = vmatprep.subr.bf16.mxu0 %v8423_v18  ;;  %v5002_v58 = vsub.f32 %v14749_v3, %v4977_v61  ;;  %v14756_v3 = vld [vmem:[#allocation39_spill] sm:$0xff] }
 0xbf6   : > { %v4979_v5 = vpop.xlane.xlu1 %4978 }
 0xbf7   : > { %v5027_v0 = vmul.bf16 1069105081, %v5014_v59  ;;  %v5003_v47 = vsub.f32 %v14750_v62, %v4979_v5  ;;  %10015 = vmatmul.mubr.bf16.gmra.mrb[220].mxu0 %v14751_v20  ;;  %v10423_v5 = vld [vmem:[%s14556_s11 + $0x10] sm:$0xff]  }
 0xbf8   : > { %10063 = vmatpush3.bf16.msra.mxu0 %v8423_v18  ;;  %10066 = vmatprep.mubr.bf16.mxu0 %v11283_v12  ;;  %v4981_v46 = vpop.xlane.xlu0 %4980  ;;  %v14754_v18 = vld [vmem:[#allocation37_spill] sm:$0xff]  ;;  %v14757_v62 = vld [vmem:[#allocation40_spill] sm:$0xff] }
 0xbf9   : > { %10649 = vpow.bf16 %v5027_v0  ;;  %v5015_v17 = vpack.c.bf16 %v5003_v47, %v5002_v58  ;;  %10064 = vmatprep.subr.bf16.mxu0 %v8424_v52  ;;  %v5004_v30 = vsub.f32 %v14752_v16, %v4981_v46 }
 0xbfa   : > { %v4983_v51 = vpop.xlane.xlu1 %4982 }
 0xbfb   : > { %v5030_v24 = vmul.bf16 1069105081, %v5015_v17  ;;  %v5005_v2 = vsub.f32 %v14753_v54, %v4983_v51 }
 0xbfc   : > { %v13437_v25 = vpop.eup %10645  ;;  %10065 = vmatpush3.bf16.msra.mxu0 %v8424_v52  ;;  %v4985_v29 = vpop.xlane.xlu0 %4984 }
 0xbfd   : > { %10651 = vpow.bf16 %v5030_v24  ;;  %v5016_v22 = vpack.c.bf16 %v5005_v2, %v5004_v30  ;;  %10114 = vmatprep.subr.bf16.mxu0 %v10421_v60  ;;  %v5045_v53 = vunpack.c.h.bf16 %v13437_v25  ;;  %v5044_v4 = vunpack.c.l.bf16 %v13437_v25  ;;  %v10424_v30 = vld [vmem:[%s14556_s11 + $0x18] sm:$0xff]  }
 0xbfe   : > { %v4987_v32 = vpop.xlane.xlu1 %4986  ;;  %v5006_v21 = vsub.f32 %v14754_v18, %v4985_v29  ;;  %v14758_v2 = vld [vmem:[#allocation41_spill] sm:$0xff] }
 0xbff   : > { %v5033_v50 = vmul.bf16 1069105081, %v5016_v22  ;;  %v5007_v40 = vsub.f32 %v14755_v35, %v4987_v32  ;;  %10067 = vmatmul.mubr.bf16.vlgmr.msra.gmra.mrb[224].mxu0 %v11281_v11  ;;  %5062 = vadd.xlane.f32.xlu1 %v5045_v53  ;;  %v14759_v22 = vld [vmem:[#allocation42_spill] sm:$0xff] }
 0xc00   : > { %v13447_v45 = vpop.eup %10647  ;;  %5060 = vadd.xlane.f32.xlu0 %v5044_v4  ;;  %10070 = vmatprep.mubr.bf16.mxu0 %v11306_v28  ;;  %v4989_v19 = vpop.xlane.xlu0 %4988  ;;  %v10425_v35 = vld [vmem:[%s14556_s11 + $0x20] sm:$0xff]  }
 0xc01   : > { %10653 = vpow.bf16 %v5033_v50  ;;  %v5017_v9 = vpack.c.bf16 %v5007_v40, %v5006_v21  ;;  %10115 = vmatpush3.bf16.msra.mxu0 %v10421_v60  ;;  %v5047_v61 = vunpack.c.h.bf16 %v13447_v45  ;;  %v5046_v52 = vunpack.c.l.bf16 %v13447_v45 }
 0xc02   : > { %v4991_v59 = vpop.xlane.xlu1 %4990  ;;  %10116 = vmatprep.subr.bf16.mxu0 %v10422_v23  ;;  %v5008_v58 = vsub.f32 %v14756_v3, %v4989_v19 }
 0xc03   : > { %v5036_v0 = vmul.bf16 1069105081, %v5017_v9  ;;  %v5009_v47 = vsub.f32 %v14757_v62, %v4991_v59  ;;  %5066 = vadd.xlane.f32.xlu1 %v5047_v61 }
 0xc04   : > { %v13457_v46 = vpop.eup %10649  ;;  %5064 = vadd.xlane.f32.xlu0 %v5046_v52  ;;  %v4993_v17 = vpop.xlane.xlu0 %4992 }
 0xc05   : > { %10655 = vpow.bf16 %v5036_v0  ;;  %v5018_v60 = vpack.c.bf16 %v5009_v47, %v5008_v58  ;;  %10117 = vmatpush3.bf16.msra.mxu0 %v10422_v23  ;;  %v5049_v51 = vunpack.c.h.bf16 %v13457_v46  ;;  %v5048_v16 = vunpack.c.l.bf16 %v13457_v46 }
 0xc06   : > { %v4995_v24 = vpop.xlane.xlu1 %4994  ;;  %10118 = vmatprep.subr.bf16.mxu0 %v10423_v5  ;;  %v5010_v29 = vsub.f32 %v14758_v2, %v4993_v17 }
 0xc07   : > { %v5039_v54 = vmul.bf16 1069105081, %v5018_v60  ;;  %v5011_v53 = vsub.f32 %v14759_v22, %v4995_v24  ;;  %10071 = vmatmul.mubr.bf16.gmra.mrb[228].mxu0 %v11304_v27  ;;  %5070 = vadd.xlane.f32.xlu1 %v5049_v51 }
 0xc08   : > { %v13467_v32 = vpop.eup %10651  ;;  %5068 = vadd.xlane.f32.xlu0 %v5048_v16  ;;  %10074 = vmatprep.mubr.bf16.mxu0 %v11328_v44  ;;  %v4332_v4 = vpop.xlane.xlu0 %4331 }
 0xc09   : > { %10657 = vpow.bf16 %v5039_v54  ;;  %v5019_v23 = vpack.c.bf16 %v5011_v53, %v5010_v29  ;;  %10119 = vmatpush3.bf16.msra.mxu0 %v10423_v5  ;;  %v5051_v50 = vunpack.c.h.bf16 %v13467_v32  ;;  %v5050_v21 = vunpack.c.l.bf16 %v13467_v32 }
 0xc0a   : > { %v4334_v18 = vpop.xlane.xlu1 %4333  ;;  %10120 = vmatprep.subr.bf16.mxu0 %v10424_v30  ;;  %v4363_v19 = vsub.f32 %v13217_v36, %v4332_v4  ;;  %v10426_v36 = vld [vmem:[%s14556_s11 + $0x28] sm:$0xff]  }
 0xc0b   : > { %v5042_v40 = vmul.bf16 1069105081, %v5019_v23  ;;  %v4364_v9 = vsub.f32 %v13224_v56, %v4334_v18  ;;  %5074 = vadd.xlane.f32.xlu1 %v5051_v50 }
 0xc0c   : > { %v13477_v61 = vpop.eup %10653  ;;  %5072 = vadd.xlane.f32.xlu0 %v5050_v21  ;;  %v4336_v59 = vpop.xlane.xlu0 %4335 }
 0xc0d   : > { %10659 = vpow.bf16 %v5042_v40  ;;  %v4379_v52 = vpack.c.bf16 %v4364_v9, %v4363_v19  ;;  %10121 = vmatpush3.bf16.msra.mxu0 %v10424_v30  ;;  %v5053_v5 = vunpack.c.h.bf16 %v13477_v61  ;;  %v5052_v3 = vunpack.c.l.bf16 %v13477_v61  ;;  %v14761_v40 = vld [vmem:[#allocation28_spill] sm:$0xff] }
 0xc0e   : > { %v4338_v0 = vpop.xlane.xlu1 %4337  ;;  %10122 = vmatprep.subr.bf16.mxu0 %v10425_v35  ;;  %v4365_v56 = vsub.f32 %v13231_v14, %v4336_v59 }
 0xc0f   : > { %v4388_v58 = vmul.bf16 1069105081, %v4379_v52  ;;  %v4366_v62 = vsub.f32 %v13236_v38, %v4338_v0  ;;  %10075 = vmatmul.mubr.bf16.gmra.mrb[232].mxu0 %v11326_v43  ;;  %5078 = vadd.xlane.f32.xlu1 %v5053_v5  ;;  %v10427_v38 = vld [vmem:[%s14556_s11 + $0x30] sm:$0xff]  }
 0xc10   : > { %v13487_v47 = vpop.eup %10655  ;;  %5076 = vadd.xlane.f32.xlu0 %v5052_v3  ;;  %10078 = vmatprep.mubr.bf16.mxu0 %v14712_v33  ;;  %v4340_v17 = vpop.xlane.xlu0 %4339 }
 0xc11   : > { %10661 = vpow.bf16 %v4388_v58  ;;  %v4380_v60 = vpack.c.bf16 %v4366_v62, %v4365_v56  ;;  %10123 = vmatpush3.bf16.msra.mxu0 %v10425_v35  ;;  %v5055_v51 = vunpack.c.h.bf16 %v13487_v47  ;;  %v5054_v14 = vunpack.c.l.bf16 %v13487_v47  ;;  %v14760_v35 = vld [vmem:[#allocation30_spill] sm:$0xff] }
 0xc12   : > { %v4342_v24 = vpop.xlane.xlu1 %4341  ;;  %10124 = vmatprep.subr.bf16.mxu0 %v10426_v36  ;;  %v4367_v30 = vsub.f32 %v13241_v26, %v4340_v17  ;;  %v10428_v26 = vld [vmem:[%s14556_s11 + $0x38] sm:$0xff]   ;;  %v14762_v19 = vpack.c.bf16 %v14760_v35, %v14761_v40 }
 0xc13   : > { %v4391_v16 = vmul.bf16 1069105081, %v4380_v60  ;;  %v4368_v54 = vsub.f32 %v13248_v41, %v4342_v24  ;;  %5082 = vadd.xlane.f32.xlu1 %v5055_v51 }
 0xc14   : > { %v13497_v2 = vpop.eup %10657  ;;  %5080 = vadd.xlane.f32.xlu0 %v5054_v14  ;;  %v4344_v29 = vpop.xlane.xlu0 %4343 }
 0xc15   : > { %10663 = vpow.bf16 %v4391_v16  ;;  %v4381_v22 = vpack.c.bf16 %v4368_v54, %v4367_v30  ;;  %10125 = vmatpush3.bf16.msra.mxu0 %v10426_v36  ;;  %v5057_v53 = vunpack.c.h.bf16 %v13497_v2  ;;  %v5056_v23 = vunpack.c.l.bf16 %v13497_v2  ;;  %v14763_v16 = vld [vmem:[#allocation29_spill] sm:$0xff]  ;;  %v14764_v30 = vld [vmem:[#allocation27_spill] sm:$0xff] }
 0xc16   : > { %v4346_v4 = vpop.xlane.xlu1 %4345  ;;  %10126 = vmatprep.subr.bf16.mxu0 %v10427_v38  ;;  %v4369_v41 = vsub.f32 %v13255_v31, %v4344_v29  ;;  %v14765_v54 = vpack.c.bf16 %v14763_v16, %v14764_v30  ;;  %v10434_v30 = vld [vmem:[%s14555_s10 + $0x28] sm:$0xff]  }
 0xc17   : > { %v4394_v50 = vmul.bf16 1069105081, %v4381_v22  ;;  %v4370_v18 = vsub.f32 %v13260_v6, %v4346_v4  ;;  %10079 = vmatmul.mubr.bf16.gmra.mrb[236].mxu0 %v14751_v20  ;;  %5086 = vadd.xlane.f32.xlu1 %v5057_v53  ;;  %v10429_v6 = vld [vmem:[%s14555_s10] sm:$0xff]   ;;  %v14767_v4 = vld [vmem:[#allocation32_spill] sm:$0xff] }
 0xc18   : > { %v13507_v21 = vpop.eup %10659  ;;  %5084 = vadd.xlane.f32.xlu0 %v5056_v23  ;;  %10130 = vmatprep.mubr.bf16.mxu0 %v14762_v19  ;;  %v4348_v9 = vpop.xlane.xlu0 %4347  ;;  %v14766_v53 = vld [vmem:[#allocation34_spill] sm:$0xff] }
 0xc19   : > { %10665 = vpow.bf16 %v4394_v50  ;;  %v4382_v59 = vpack.c.bf16 %v4370_v18, %v4369_v41  ;;  %10127 = vmatpush3.bf16.msra.mxu0 %v10427_v38  ;;  %v5059_v52 = vunpack.c.h.bf16 %v13507_v21  ;;  %v5058_v31 = vunpack.c.l.bf16 %v13507_v21  ;;  %v10431_v50 = vld [vmem:[%s14555_s10 + $0x10] sm:$0xff]  }
 0xc1a   : > { %v4350_v5 = vpop.xlane.xlu1 %4349  ;;  %10128 = vmatprep.subr.bf16.mxu0 %v10428_v26  ;;  %v4371_v3 = vsub.f32 %v13265_v48, %v4348_v9  ;;  %v10430_v48 = vld [vmem:[%s14555_s10 + $0x8] sm:$0xff]   ;;  %v14768_v23 = vpack.c.bf16 %v14766_v53, %v14767_v4 }
 0xc1b   : > { %v4397_v0 = vmul.bf16 1069105081, %v4382_v59  ;;  %v4372_v36 = vsub.f32 %v13272_v49, %v4350_v5  ;;  %5090 = vadd.xlane.f32.xlu1 %v5059_v52  ;;  %v14778_v4 = vld [vmem:[#allocation23_spill] sm:$0xff] }
 0xc1c   : > { %v13519_v58 = vpop.eup %10661  ;;  %5088 = vadd.xlane.f32.xlu0 %v5058_v31  ;;  %v4352_v56 = vpop.xlane.xlu0 %4351 }
 0xc1d   : > { %10667 = vpow.bf16 %v4397_v0  ;;  %v4383_v62 = vpack.c.bf16 %v4372_v36, %v4371_v3  ;;  %10129 = vmatpush3.bf16.msra.mxu0 %v10428_v26  ;;  %v4412_v17 = vunpack.c.h.bf16 %v13519_v58  ;;  %v4411_v51 = vunpack.c.l.bf16 %v13519_v58  ;;  %v14769_v3 = vld [vmem:[#allocation33_spill] sm:$0xff]  ;;  %v14770_v36 = vld [vmem:[#allocation31_spill] sm:$0xff] }
 0xc1e   : > { %v4354_v60 = vpop.xlane.xlu1 %4353  ;;  %10146 = vmatprep.subr.bf16.mxu0 %v10429_v6  ;;  %v4373_v49 = vsub.f32 %v13279_v37, %v4352_v56  ;;  %v14771_v56 = vpack.c.bf16 %v14769_v3, %v14770_v36 }
 0xc1f   : > { %v4400_v24 = vmul.bf16 1069105081, %v4383_v62  ;;  %v4374_v14 = vsub.f32 %v13284_v7, %v4354_v60  ;;  %4429 = vadd.xlane.f32.xlu1 %v4412_v17  ;;  %v14772_v17 = vld [vmem:[#allocation19_spill] sm:$0xff]  ;;  %v14773_v60 = vld [vmem:[#allocation36_spill] sm:$0xff] }
 0xc20   : > { %v13528_v38 = vpop.eup %10663  ;;  %10131 = vmatmul.mubr.bf16.vlgmr.msra.gmra.mrb[240].mxu0 %v14765_v54  ;;  %4427 = vadd.xlane.f32.xlu0 %v4411_v51  ;;  %v4356_v29 = vpop.xlane.xlu0 %4355  ;;  %v14774_v51 = vpack.c.bf16 %v14772_v17, %v14773_v60 }
 0xc21   : > { %10669 = vpow.bf16 %v4400_v24  ;;  %v4384_v22 = vpack.c.bf16 %v4374_v14, %v4373_v49  ;;  %10134 = vmatprep.mubr.bf16.mxu0 %v14768_v23  ;;  %10147 = vmatpush3.bf16.msra.mxu0 %v10429_v6  ;;  %v4414_v37 = vunpack.c.h.bf16 %v13528_v38  ;;  %v4413_v7 = vunpack.c.l.bf16 %v13528_v38  ;;  %v14779_v23 = vld [vmem:[#allocation21_spill] sm:$0xff] }
 0xc22   : > { %v4358_v26 = vpop.xlane.xlu1 %4357  ;;  %10148 = vmatprep.subr.bf16.mxu0 %v10430_v48  ;;  %v4375_v18 = vsub.f32 %v13289_v42, %v4356_v29  ;;  %v10432_v42 = vld [vmem:[%s14555_s10 + $0x18] sm:$0xff]   ;;  %v14775_v29 = vld [vmem:[#allocation26_spill] sm:$0xff] }
 0xc23   : > { %v4403_v41 = vmul.bf16 1069105081, %v4384_v22  ;;  %v4376_v35 = vsub.f32 %v13296_v63, %v4358_v26  ;;  %4433 = vadd.xlane.f32.xlu1 %v4414_v37  ;;  %v14776_v22 = vld [vmem:[#allocation35_spill] sm:$0xff]  ;;  %v14780_v37 = vpack.c.bf16 %v14778_v4, %v14779_v23 }
 0xc24   : > { %v13543_v40 = vpop.eup %10665  ;;  %4431 = vadd.xlane.f32.xlu0 %v4413_v7  ;;  %v4360_v19 = vpop.xlane.xlu0 %4359  ;;  %v14777_v53 = vpack.c.bf16 %v14775_v29, %v14776_v22  ;;  %v10979_v4 = vld [vmem:[%s14547_s2 + $0x8] sm:$0xff] }
 0xc25   : > { %10671 = vpow.bf16 %v4403_v41  ;;  %v4385_v9 = vpack.c.bf16 %v4376_v35, %v4375_v18  ;;  %10149 = vmatpush3.bf16.msra.mxu0 %v10430_v48  ;;  %v4416_v59 = vunpack.c.h.bf16 %v13543_v40  ;;  %v4415_v5 = vunpack.c.l.bf16 %v13543_v40 }
 0xc26   : > { %v4362_v52 = vpop.xlane.xlu1 %4361  ;;  %10150 = vmatprep.subr.bf16.mxu0 %v10431_v50  ;;  %v4377_v63 = vsub.f32 %v13303_v34, %v4360_v19  ;;  %v10436_v19 = vld [vmem:[%s14555_s10 + $0x38] sm:$0xff]  }
 0xc27   : > { %v4406_v31 = vmul.bf16 1069105081, %v4385_v9  ;;  %v4378_v6 = vsub.f32 %v13308_v15, %v4362_v52  ;;  %4437 = vadd.xlane.f32.xlu1 %v4416_v59  ;;  %v10433_v15 = vld [vmem:[%s14555_s10 + $0x20] sm:$0xff]   ;;  %v14781_v59 = vld [vmem:[#allocation20_spill] sm:$0xff] }
 0xc28   : > { %v13552_v0 = vpop.eup %10667  ;;  %10135 = vmatmul.mubr.bf16.gmra.mrb[244].mxu0 %v14771_v56  ;;  %4435 = vadd.xlane.f32.xlu0 %v4415_v5  ;;  %v14782_v52 = vld [vmem:[#allocation18_spill] sm:$0xff] }
 0xc29   : > { %10673 = vpow.bf16 %v4406_v31  ;;  %v4386_v62 = vpack.c.bf16 %v4378_v6, %v4377_v63  ;;  %10138 = vmatprep.mubr.bf16.mxu0 %v14774_v51  ;;  %10151 = vmatpush3.bf16.msra.mxu0 %v10431_v50  ;;  %v4418_v48 = vunpack.c.h.bf16 %v13552_v0  ;;  %v4417_v34 = vunpack.c.l.bf16 %v13552_v0  ;;  %v10435_v50 = vld [vmem:[%s14555_s10 + $0x30] sm:$0xff]  }
 0xc2a   : > { %10152 = vmatprep.subr.bf16.mxu0 %v10432_v42  ;;  %v14783_v5 = vpack.c.bf16 %v14781_v59, %v14782_v52 }
 0xc2b   : > { %v4409_v24 = vmul.bf16 1069105081, %v4386_v62  ;;  %4441 = vadd.xlane.f32.xlu1 %v4418_v48 }
 0xc2c   : > { %v13565_v49 = vpop.eup %10669  ;;  %4439 = vadd.xlane.f32.xlu0 %v4417_v34 }
 0xc2d   : > { %10675 = vpow.bf16 %v4409_v24  ;;  %10153 = vmatpush3.bf16.msra.mxu0 %v10432_v42  ;;  %v4420_v14 = vunpack.c.h.bf16 %v13565_v49  ;;  %v4419_v16 = vunpack.c.l.bf16 %v13565_v49  ;;  %v14784_v24 = vld [vmem:[#allocation10_spill] sm:$0xff] }
 0xc2e   : > { %10154 = vmatprep.subr.bf16.mxu0 %v10433_v15 }
 0xc2f   : > { %4445 = vadd.xlane.f32.xlu1 %v4420_v14 }
 0xc30   : > { %v13572_v54 = vpop.eup %10671  ;;  %10139 = vmatmul.mubr.bf16.gmra.mrb[248].mxu0 %v14777_v53  ;;  %4443 = vadd.xlane.f32.xlu0 %v4419_v16 }
 0xc31   : > { %10142 = vmatprep.mubr.bf16.mxu0 %v14780_v37  ;;  %10155 = vmatpush3.bf16.msra.mxu0 %v10433_v15  ;;  %v4422_v26 = vunpack.c.h.bf16 %v13572_v54  ;;  %v4421_v7 = vunpack.c.l.bf16 %v13572_v54  ;;  %v10980_v37 = vld [vmem:[%s14547_s2 + $0x10] sm:$0xff] }
 0xc32   : > { %10156 = vmatprep.subr.bf16.mxu0 %v10434_v30 }
 0xc33   : > { %4449 = vadd.xlane.f32.xlu1 %v4422_v26 }
 0xc34   : > { %v13585_v41 = vpop.eup %10673  ;;  %4447 = vadd.xlane.f32.xlu0 %v4421_v7 }
 0xc35   : > { %10157 = vmatpush3.bf16.msra.mxu0 %v10434_v30  ;;  %v4424_v18 = vunpack.c.h.bf16 %v13585_v41  ;;  %v4423_v35 = vunpack.c.l.bf16 %v13585_v41 }
 0xc36   : > { %10158 = vmatprep.subr.bf16.mxu0 %v10435_v50 }
 0xc37   : > { %4453 = vadd.xlane.f32.xlu1 %v4424_v18 }
 0xc38   : > { %v13592_v9 = vpop.eup %10675  ;;  %4451 = vadd.xlane.f32.xlu0 %v4423_v35  ;;  %10143 = vmatmul.mubr.bf16.gmra.mrb[252].mxu0 %v14783_v5 }
 0xc39   : > { %10159 = vmatpush3.bf16.msra.mxu0 %v10435_v50  ;;  %10162 = vmatprep.mubr.bf16.mxu0 %v11283_v12  ;;  %v4426_v42 = vunpack.c.h.bf16 %v13592_v9  ;;  %v4425_v31 = vunpack.c.l.bf16 %v13592_v9 }
 0xc3a   : > { %10160 = vmatprep.subr.bf16.mxu0 %v10436_v19 }
 0xc3b   : > { %4457 = vadd.xlane.f32.xlu1 %v4426_v42 }
 0xc3c   : > { %4455 = vadd.xlane.f32.xlu0 %v4425_v31 }
 0xc3d   : > { %10161 = vmatpush3.bf16.msra.mxu0 %v10436_v19  ;;  %v10981_v19 = vld [vmem:[%s14547_s2 + $0x18] sm:$0xff] }
 0xc40   : > { %10163 = vmatmul.mubr.bf16.vlgmr.msra.gmra.mrb[240].mxu0 %v11281_v11 }
 0xc41   : > { %10166 = vmatprep.mubr.bf16.mxu0 %v11306_v28 }
 0xc48   : > { %10167 = vmatmul.mubr.bf16.gmra.mrb[244].mxu0 %v11304_v27 }
 0xc49   : > { %10170 = vmatprep.mubr.bf16.mxu0 %v11328_v44 }
 0xc50   : > { %10171 = vmatmul.mubr.bf16.gmra.mrb[248].mxu0 %v11326_v43 }
 0xc51   : > { %10174 = vmatprep.mubr.bf16.mxu0 %v14712_v33 }
 0xc58   : > { %10175 = vmatmul.mubr.bf16.gmra.mrb[252].mxu0 %v14751_v20 }
 0xc8c   : > { %v5063_v63 = vpop.xlane.xlu1 %5062 }
 0xc8d   : > { %v5061_v6 = vpop.xlane.xlu0 %5060 }
 0xc8e   : > { %v5092_v3 = vpack.c.bf16 %v5063_v63, %v5061_v6 }
 0xc90   : > { %v5100_v36 = vunpack.c.l.bf16 %v5092_v3  ;;  %v5101_v56 = vunpack.c.h.bf16 %v5092_v3  ;;  %v5067_v62 = vpop.xlane.xlu1 %5066  ;;  %v10982_v3 = vld [vmem:[%s14547_s2 + $0x20] sm:$0xff] }
 0xc91   : > { %v5065_v17 = vpop.xlane.xlu0 %5064 }
 0xc92   : > { %10677 = vrcp.f32 %v5100_v36  ;;  %v5093_v60 = vpack.c.bf16 %v5067_v62, %v5065_v17  ;;  %v9908_v51 = vpop.f32.mrb[192].mxu0 }
 0xc93   : > { %10679 = vrcp.f32 %v5101_v56  ;;  %v5728_v48 = vpop.f32.mrb[193].mxu0  ;;  %v13619_v26 = vadd.f32 %v10980_v37, %v9908_v51 }
 0xc94   : > { %v5102_v34 = vunpack.c.l.bf16 %v5093_v60  ;;  %v5103_v15 = vunpack.c.h.bf16 %v5093_v60  ;;  %v13608_v14 = vadd.f32 %v14784_v24, %v5728_v48  ;;  %v9909_v16 = vpop.f32.mrb[194].mxu0  ;;  %v5071_v30 = vpop.xlane.xlu1 %5070 }
 0xc95   : > { %v5069_v29 = vpop.xlane.xlu0 %5068  ;;  %v5731_v22 = vpop.f32.mrb[195].mxu0  ;;  %v13625_v59 = vadd.f32 %v10981_v19, %v9909_v16 }
 0xc96   : > { %10681 = vrcp.f32 %v5102_v34  ;;  %v5094_v53 = vpack.c.bf16 %v5071_v30, %v5069_v29  ;;  %v13613_v23 = vadd.f32 %v10979_v4, %v5731_v22  ;;  %5791 = vmax.xlane.f32.xlu0 %v13608_v14  ;;  %v10983_v34 = vld [vmem:[%s14547_s2 + $0x28] sm:$0xff]  ;;  %v10984_v30 = vld [vmem:[%s14547_s2 + $0x30] sm:$0xff] }
 0xc97   : > { %10683 = vrcp.f32 %v5103_v15 }
 0xc98   : > { %v5104_v7 = vunpack.c.l.bf16 %v5094_v53  ;;  %v5105_v50 = vunpack.c.h.bf16 %v5094_v53  ;;  %v5075_v18 = vpop.xlane.xlu1 %5074  ;;  %5793 = vmax.xlane.f32.xlu1 %v13613_v23 }
 0xc99   : > { %v5073_v35 = vpop.xlane.xlu0 %5072 }
 0xc9a   : > { %10685 = vrcp.f32 %v5104_v7  ;;  %v5095_v52 = vpack.c.bf16 %v5075_v18, %v5073_v35  ;;  %v9912_v5 = vpop.f32.mrb[196].mxu0  ;;  %5795 = vmax.xlane.f32.xlu0 %v13619_v26  ;;  %v10985_v18 = vld [vmem:[%s14547_s2 + $0x38] sm:$0xff] }
 0xc9b   : > { %10687 = vrcp.f32 %v5105_v50  ;;  %v5744_v42 = vpop.f32.mrb[197].mxu0  ;;  %v13643_v29 = vadd.f32 %v10984_v30, %v9912_v5 }
 0xc9c   : > { %v10678_v31 = vpop.eup %10677  ;;  %v5106_v63 = vunpack.c.l.bf16 %v5095_v52  ;;  %v5107_v6 = vunpack.c.h.bf16 %v5095_v52  ;;  %v13631_v36 = vadd.f32 %v10982_v3, %v5744_v42  ;;  %v9913_v56 = vpop.f32.mrb[198].mxu0  ;;  %5797 = vmax.xlane.f32.xlu1 %v13625_v59 }
 0xc9d   : > { %v5079_v62 = vpop.xlane.xlu1 %5078  ;;  %v10680_v17 = vpop.eup %10679  ;;  %v13650_v35 = vadd.f32 %v10985_v18, %v9913_v56 }
 0xc9e   : > { %v5077_v60 = vpop.xlane.xlu0 %5076  ;;  %v5747_v51 = vpop.f32.mrb[199].mxu0  ;;  %10689 = vrcp.f32 %v5106_v63  ;;  %5799 = vmax.xlane.f32.xlu0 %v13631_v36  ;;  %v5132_v24 = vpack.c.bf16 %v10680_v17, %v10678_v31 }
 0xc9f   : > { %v5096_v48 = vpack.c.bf16 %v5079_v62, %v5077_v60  ;;  %v13637_v15 = vadd.f32 %v10983_v34, %v5747_v51  ;;  %10691 = vrcp.f32 %v5107_v6  ;;  %v10986_v6 = vld [vmem:[%s14547_s2 + $0x40] sm:$0xff] }
 0xca0   : > { %v10682_v16 = vpop.eup %10681  ;;  %v5140_v37 = vmul.bf16 %v13437_v25, %v5132_v24  ;;  %v10987_v24 = vld [vmem:[%s14547_s2 + $0x48] sm:$0xff] }
 0xca1   : > { %v5108_v22 = vunpack.c.l.bf16 %v5096_v48  ;;  %v5109_v53 = vunpack.c.h.bf16 %v5096_v48  ;;  %v5083_v4 = vpop.xlane.xlu1 %5082  ;;  %5801 = vmax.xlane.f32.xlu1 %v13637_v15  ;;  %v10684_v7 = vpop.eup %10683 }
 0xca2   : > { %v5081_v50 = vpop.xlane.xlu0 %5080  ;;  %9810 = vmatprep.mubr.bf16.mxu1 %v5140_v37  ;;  %v9916_v52 = vpop.f32.mrb[200].mxu0  ;;  %5803 = vmax.xlane.f32.xlu0 %v13643_v29  ;;  %v5133_v5 = vpack.c.bf16 %v10684_v7, %v10682_v16 }
 0xca3   : > { %10693 = vrcp.f32 %v5108_v22  ;;  %v5097_v19 = vpack.c.bf16 %v5083_v4, %v5081_v50  ;;  %v5760_v42 = vpop.f32.mrb[201].mxu0  ;;  %v14785_v22 = vld [vmem:[#allocation25_spill] sm:$0xff]  ;;  %v14786_v50 = vld [vmem:[#allocation22_spill] sm:$0xff] }
 0xca4   : > { %10695 = vrcp.f32 %v5109_v53  ;;  %v10686_v31 = vpop.eup %10685  ;;  %v13656_v3 = vadd.f32 %v10986_v6, %v5760_v42  ;;  %v9917_v56 = vpop.f32.mrb[202].mxu0  ;;  %v5141_v17 = vmul.bf16 %v13447_v45, %v5133_v5  ;;  %v10988_v45 = vld [vmem:[%s14547_s2 + $0x50] sm:$0xff] }
 0xca5   : > { %v5110_v63 = vunpack.c.l.bf16 %v5097_v19  ;;  %v5111_v25 = vunpack.c.h.bf16 %v5097_v19  ;;  %v5087_v62 = vpop.xlane.xlu1 %5086  ;;  %5805 = vmax.xlane.f32.xlu1 %v13650_v35  ;;  %v10688_v60 = vpop.eup %10687  ;;  %v13670_v4 = vadd.f32 %v10988_v45, %v9916_v52 }
 0xca6   : > { %v5085_v51 = vpop.xlane.xlu0 %5084  ;;  %v5763_v48 = vpop.f32.mrb[203].mxu0  ;;  %9811 = vmatmul.mubr.bf16.vlgmr.msra.gmra.mrb[176].mxu1 %v5141_v17  ;;  %5807 = vmax.xlane.f32.xlu0 %v13656_v3  ;;  %v5134_v30 = vpack.c.bf16 %v10688_v60, %v10686_v31  ;;  %v10989_v31 = vld [vmem:[%s14547_s2 + $0x58] sm:$0xff] }
 0xca7   : > { %10697 = vrcp.f32 %v5110_v63  ;;  %v5098_v34 = vpack.c.bf16 %v5087_v62, %v5085_v51  ;;  %v13663_v16 = vadd.f32 %v10987_v24, %v5763_v48  ;;  %9827 = vmatpush3.bf16.msra.mxu1 %v14785_v22  ;;  %v13678_v63 = vadd.f32 %v10989_v31, %v9917_v56  ;;  %v14787_v51 = vld [vmem:[#allocation6_spill] sm:$0xff] }
 0xca8   : > { %10699 = vrcp.f32 %v5111_v25  ;;  %v10690_v53 = vpop.eup %10689  ;;  %9828 = vmatprep.subr.bf16.mxu1 %v14786_v50  ;;  %v5142_v19 = vmul.bf16 %v13457_v46, %v5134_v30  ;;  %v10990_v56 = vld [vmem:[%s14547_s2 + $0x60] sm:$0xff] }
 0xca9   : > { %v5112_v37 = vunpack.c.l.bf16 %v5098_v34  ;;  %v5113_v7 = vunpack.c.h.bf16 %v5098_v34  ;;  %v5091_v18 = vpop.xlane.xlu1 %5090  ;;  %5809 = vmax.xlane.f32.xlu1 %v13663_v16  ;;  %v10692_v5 = vpop.eup %10691 }
 0xcaa   : > { %v5089_v42 = vpop.xlane.xlu0 %5088  ;;  %9814 = vmatprep.mubr.bf16.mxu1 %v5142_v19  ;;  %v9920_v25 = vpop.f32.mrb[204].mxu0  ;;  %5811 = vmax.xlane.f32.xlu0 %v13670_v4  ;;  %v5135_v6 = vpack.c.bf16 %v10692_v5, %v10690_v53 }
 0xcab   : > { %10701 = vrcp.f32 %v5112_v37  ;;  %v5099_v52 = vpack.c.bf16 %v5091_v18, %v5089_v42  ;;  %9829 = vmatpush3.bf16.msra.mxu1 %v14786_v50  ;;  %v5776_v62 = vpop.f32.mrb[205].mxu0 }
 0xcac   : > { %10703 = vrcp.f32 %v5113_v7  ;;  %9830 = vmatprep.subr.bf16.mxu1 %v14787_v51  ;;  %v13686_v48 = vadd.f32 %v10990_v56, %v5776_v62  ;;  %v9921_v34 = vpop.f32.mrb[206].mxu0  ;;  %v5143_v30 = vmul.bf16 %v13467_v32, %v5135_v6  ;;  %v10991_v7 = vld [vmem:[%s14547_s2 + $0x68] sm:$0xff]  ;;  %v10992_v32 = vld [vmem:[%s14547_s2 + $0x70] sm:$0xff] }
 0xcad   : > { %v10694_v46 = vpop.eup %10693  ;;  %v5114_v17 = vunpack.c.l.bf16 %v5099_v52  ;;  %v5115_v60 = vunpack.c.h.bf16 %v5099_v52  ;;  %v4430_v24 = vpop.xlane.xlu1 %4429  ;;  %5813 = vmax.xlane.f32.xlu1 %v13678_v63  ;;  %v13700_v5 = vadd.f32 %v10992_v32, %v9920_v25  ;;  %v14788_v52 = vld [vmem:[#allocation24_spill] sm:$0xff] }
 0xcae   : > { %v10696_v22 = vpop.eup %10695  ;;  %v4428_v53 = vpop.xlane.xlu0 %4427  ;;  %9815 = vmatmul.mubr.bf16.gmra.mrb[180].mxu1 %v5143_v30  ;;  %5815 = vmax.xlane.f32.xlu0 %v13686_v48 }
 0xcaf   : > { %v5779_v45 = vpop.f32.mrb[207].mxu0  ;;  %10705 = vrcp.f32 %v5114_v17  ;;  %v4459_v37 = vpack.c.bf16 %v4430_v24, %v4428_v53  ;;  %v5136_v18 = vpack.c.bf16 %v10696_v22, %v10694_v46  ;;  %9831 = vmatpush3.bf16.msra.mxu1 %v14787_v51  ;;  %v13713_v24 = vld [vmem:[%s14554_s9 + $0x7] ss:$0 sm:$0xff] }
 0xcb0   : > { %v13693_v50 = vadd.f32 %v10991_v7, %v5779_v45  ;;  %10707 = vrcp.f32 %v5115_v60  ;;  %9832 = vmatprep.subr.bf16.mxu1 %v14788_v52  ;;  %v10993_v60 = vld [vmem:[%s14547_s2 + $0x78] sm:$0xff] }
 0xcb1   : > { %v10698_v19 = vpop.eup %10697  ;;  %v4467_v42 = vunpack.c.l.bf16 %v4459_v37  ;;  %v4468_v31 = vunpack.c.h.bf16 %v4459_v37  ;;  %v4434_v6 = vpop.xlane.xlu1 %4433  ;;  %v5144_v62 = vmul.bf16 %v13477_v61, %v5136_v18  ;;  %v13708_v51 = vadd.f32 %v10993_v60, %v9921_v34  ;;  %v14789_v45 = vld [vmem:[#allocation9_spill] sm:$0xff] }
 0xcb2   : > { %5817 = vmax.xlane.f32.xlu1 %v13693_v50  ;;  %v10700_v46 = vpop.eup %10699  ;;  %v4432_v17 = vpop.xlane.xlu0 %4431  ;;  %5819 = vmax.xlane.f32.xlu0 %v13700_v5 }
 0xcb3   : > { %10709 = vrcp.f32 %v4467_v42  ;;  %9818 = vmatprep.mubr.bf16.mxu1 %v5144_v62  ;;  %v4460_v25 = vpack.c.bf16 %v4434_v6, %v4432_v17  ;;  %v10004_v56 = vpop.f32.mrb[208].mxu0  ;;  %v5137_v61 = vpack.c.bf16 %v10700_v46, %v10698_v19  ;;  %9833 = vmatpush3.bf16.msra.mxu1 %v14788_v52 }
 0xcb4   : > { %10711 = vrcp.f32 %v4468_v31  ;;  %v6369_v30 = vpop.f32.mrb[209].mxu0  ;;  %9834 = vmatprep.subr.bf16.mxu1 %v14789_v45  ;;  %v6378_v42 = vadd.f32 %v10004_v56, %v13713_v24 }
 0xcb5   : > { %v10702_v22 = vpop.eup %10701  ;;  %v4469_v53 = vunpack.c.l.bf16 %v4460_v25  ;;  %v4470_v34 = vunpack.c.h.bf16 %v4460_v25  ;;  %v10005_v37 = vpop.f32.mrb[210].mxu0  ;;  %v5145_v18 = vmul.bf16 %v13487_v47, %v5137_v61  ;;  %v6370_v19 = vadd.f32 %v13713_v24, %v6369_v30  ;;  %v14790_v61 = vld [vmem:[#allocation7_spill] sm:$0xff] }
 0xcb6   : > { %v4438_v7 = vpop.xlane.xlu1 %4437  ;;  %5821 = vmax.xlane.f32.xlu1 %v13708_v51  ;;  %v10704_v32 = vpop.eup %10703  ;;  %v6381_v31 = vadd.f32 %v10005_v37, %v13713_v24 }
 0xcb7   : > { %v4436_v52 = vpop.xlane.xlu0 %4435  ;;  %v6372_v6 = vpop.f32.mrb[211].mxu0  ;;  %10713 = vrcp.f32 %v4469_v53  ;;  %9819 = vmatmul.mubr.bf16.gmra.mrb[184].mxu1 %v5145_v18  ;;  %v5138_v17 = vpack.c.bf16 %v10704_v32, %v10702_v22 }
 0xcb8   : > { %v4461_v62 = vpack.c.bf16 %v4438_v7, %v4436_v52  ;;  %v6373_v46 = vadd.f32 %v13713_v24, %v6372_v6  ;;  %10715 = vrcp.f32 %v4470_v34  ;;  %v13724_v60 = vpack.c.bf16 %v6381_v31, %v6378_v42  ;;  %9835 = vmatpush3.bf16.msra.mxu1 %v14789_v45  ;;  %v14791_v6 = vld [vmem:[#allocation8_spill] sm:$0xff] }
 0xcb9   : > { %v10706_v47 = vpop.eup %10705  ;;  %9836 = vmatprep.subr.bf16.mxu1 %v14790_v61  ;;  %v5146_v53 = vmul.bf16 %v13497_v2, %v5138_v17  ;;  %v5976_v17 = vld [vmem:[%s14553_s8 + $0x78] sm:$0xf] }
 0xcba   : > { %v4471_v25 = vunpack.c.l.bf16 %v4461_v62  ;;  %v4472_v56 = vunpack.c.h.bf16 %v4461_v62  ;;  %v13728_v30 = vpack.c.bf16 %v6373_v46, %v6370_v19  ;;  %v4442_v37 = vpop.xlane.xlu1 %4441  ;;  %v10708_v18 = vpop.eup %10707  ;;  %v5975_v46 = vld [vmem:[%s14553_s8 + $0x38] sm:$0xf] }
 0xcbb   : > { %v4440_v7 = vpop.xlane.xlu0 %4439  ;;  %9822 = vmatprep.mubr.bf16.mxu1 %v5146_v53  ;;  %v10008_v34 = vpop.f32.mrb[212].mxu0  ;;  %v5139_v32 = vpack.c.bf16 %v10708_v18, %v10706_v47 }
 0xcbc   : > { %10717 = vrcp.f32 %v4471_v25  ;;  %v4462_v22 = vpack.c.bf16 %v4442_v37, %v4440_v7  ;;  %9837 = vmatpush3.bf16.msra.mxu1 %v14790_v61  ;;  %v6385_v45 = vpop.f32.mrb[213].mxu0  ;;  %v6394_v25 = vadd.f32 %v10008_v34, %v13713_v24 }
 0xcbd   : > { %10719 = vrcp.f32 %v4472_v56  ;;  %v10710_v42 = vpop.eup %10709  ;;  %9838 = vmatprep.subr.bf16.mxu1 %v14791_v6  ;;  %v10009_v19 = vpop.f32.mrb[214].mxu0  ;;  %v5147_v2 = vmul.bf16 %v13507_v21, %v5139_v32  ;;  %v6386_v56 = vadd.f32 %v13713_v24, %v6385_v45  ;;  %v8399_v32 = vcombine.low %v5975_v46, %v5976_v17  ;;  %v14792_v45 = vld [vmem:[#allocation4_spill] sm:$0xff] }
 0xcbe   : > { %v4473_v31 = vunpack.c.l.bf16 %v4462_v22  ;;  %v4474_v52 = vunpack.c.h.bf16 %v4462_v22  ;;  %v4446_v62 = vpop.xlane.xlu1 %4445  ;;  %v10712_v47 = vpop.eup %10711  ;;  %v6397_v61 = vadd.f32 %v10009_v19, %v13713_v24 }
 0xcbf   : > { %v4444_v37 = vpop.xlane.xlu0 %4443  ;;  %v6388_v53 = vpop.f32.mrb[215].mxu0  ;;  %9823 = vmatmul.mubr.bf16.gmra.mrb[188].mxu1 %v5147_v2  ;;  %v4499_v7 = vpack.c.bf16 %v10712_v47, %v10710_v42  ;;  %v5977_v42 = vld [vmem:[%s14553_s8 + $0xb8] sm:$0xf] }
 0xcc0   : > { %10721 = vrcp.f32 %v4473_v31  ;;  %v4463_v21 = vpack.c.bf16 %v4446_v62, %v4444_v37  ;;  %v6389_v18 = vadd.f32 %v13713_v24, %v6388_v53  ;;  %v13744_v22 = vpack.c.bf16 %v6397_v61, %v6394_v25  ;;  %9839 = vmatpush3.bf16.msra.mxu1 %v14791_v6 }
 0xcc1   : > { %10723 = vrcp.f32 %v4474_v52  ;;  %v10714_v39 = vpop.eup %10713  ;;  %9840 = vmatprep.subr.bf16.mxu1 %v14792_v45  ;;  %v4507_v31 = vmul.bf16 %v13519_v58, %v4499_v7  ;;  %v5978_v52 = vld [vmem:[%s14553_s8 + $0xf8] sm:$0xf] }
 0xcc2   : > { %v4475_v34 = vunpack.c.l.bf16 %v4463_v21  ;;  %v4476_v13 = vunpack.c.h.bf16 %v4463_v21  ;;  %v13748_v19 = vpack.c.bf16 %v6389_v18, %v6386_v56  ;;  %v4450_v55 = vpop.xlane.xlu1 %4449  ;;  %v10716_v62 = vpop.eup %10715  ;;  %v8400_v21 = vcombine.low %v5977_v42, %v5978_v52  ;;  %v5979_v18 = vld [vmem:[%s14553_s8 + $0x138] sm:$0xf] }
 0xcc3   : > { %v4448_v2 = vpop.xlane.xlu0 %4447  ;;  %9842 = vmatprep.mubr.bf16.mxu1 %v4507_v31  ;;  %v10012_v46 = vpop.f32.mrb[216].mxu0  ;;  %v4500_v17 = vpack.c.bf16 %v10716_v62, %v10714_v39 }
 0xcc4   : > { %10725 = vrcp.f32 %v4475_v34  ;;  %v4464_v6 = vpack.c.bf16 %v4450_v55, %v4448_v2  ;;  %9841 = vmatpush3.bf16.msra.mxu1 %v14792_v45  ;;  %v6401_v47 = vpop.f32.mrb[217].mxu0  ;;  %v5980_v55 = vld [vmem:[%s14553_s8 + $0x178] sm:$0xf]  ;;  %v6410_v39 = vadd.f32 %v10012_v46, %v13713_v24 }
 0xcc5   : > { %10727 = vrcp.f32 %v4476_v13  ;;  %v10013_v61 = vpop.f32.mrb[218].mxu0  ;;  %v4508_v53 = vmul.bf16 %v13528_v38, %v4500_v17  ;;  %9922 = vmatprep.subr.bf16.mxu1 %v8399_v32  ;;  %v6402_v7 = vadd.f32 %v13713_v24, %v6401_v47  ;;  %v8401_v52 = vcombine.low %v5979_v18, %v5980_v55 }
 0xcc6   : > { %v10718_v58 = vpop.eup %10717  ;;  %v4477_v25 = vunpack.c.l.bf16 %v4464_v6  ;;  %v4478_v56 = vunpack.c.h.bf16 %v4464_v6  ;;  %v4454_v37 = vpop.xlane.xlu1 %4453  ;;  %v6413_v34 = vadd.f32 %v10013_v61, %v13713_v24 }
 0xcc7   : > { %v10720_v13 = vpop.eup %10719  ;;  %v4452_v45 = vpop.xlane.xlu0 %4451  ;;  %9843 = vmatmul.mubr.bf16.vlgmr.msra.gmra.mrb[176].mxu1 %v4508_v53 }
 0xcc8   : > { %v6404_v31 = vpop.f32.mrb[219].mxu0  ;;  %10729 = vrcp.f32 %v4477_v25  ;;  %v4465_v38 = vpack.c.bf16 %v4454_v37, %v4452_v45  ;;  %v4501_v2 = vpack.c.bf16 %v10720_v13, %v10718_v58  ;;  %v13769_v42 = vpack.c.bf16 %v6413_v34, %v6410_v39  ;;  %9923 = vmatpush3.bf16.msra.mxu1 %v8399_v32  ;;  %v5981_v58 = vld [vmem:[%s14553_s8 + $0x1b8] sm:$0xf] }
 0xcc9   : > { %v6405_v62 = vadd.f32 %v13713_v24, %v6404_v31  ;;  %10731 = vrcp.f32 %v4478_v56  ;;  %9924 = vmatprep.subr.bf16.mxu1 %v8400_v21  ;;  %v5982_v32 = vld [vmem:[%s14553_s8 + $0x1f8] sm:$0xf] }
 0xcca   : > { %v10722_v6 = vpop.eup %10721  ;;  %v4479_v17 = vunpack.c.l.bf16 %v4465_v38  ;;  %v4480_v46 = vunpack.c.h.bf16 %v4465_v38  ;;  %v4458_v47 = vpop.xlane.xlu1 %4457  ;;  %v4509_v61 = vmul.bf16 %v13543_v40, %v4501_v2  ;;  %v8402_v45 = vcombine.low %v5981_v58, %v5982_v32 }
 0xccb   : > { %v13771_v8 = vpack.c.bf16 %v6405_v62, %v6402_v7  ;;  %v10724_v25 = vpop.eup %10723  ;;  %v4456_v37 = vpop.xlane.xlu0 %4455 }
 0xccc   : > { %10733 = vrcp.f32 %v4479_v17  ;;  %v4466_v56 = vpack.c.bf16 %v4458_v47, %v4456_v37  ;;  %9846 = vmatprep.mubr.bf16.mxu1 %v4509_v61  ;;  %v10016_v53 = vpop.f32.mrb[220].mxu0  ;;  %v4502_v18 = vpack.c.bf16 %v10724_v25, %v10722_v6  ;;  %9925 = vmatpush3.bf16.msra.mxu1 %v8400_v21  ;;  %v5983_v6 = vld [vmem:[%s14553_s8 + $0x238] sm:$0xf] }
 0xccd   : > { %10735 = vrcp.f32 %v4480_v46  ;;  %v6417_v55 = vpop.f32.mrb[221].mxu0  ;;  %9926 = vmatprep.subr.bf16.mxu1 %v8401_v52  ;;  %v6426_v38 = vadd.f32 %v10016_v53, %v13713_v24  ;;  %v5984_v21 = vld [vmem:[%s14553_s8 + $0x278] sm:$0xf] }
 0xcce   : > { %v10726_v40 = vpop.eup %10725  ;;  %v4481_v13 = vunpack.c.l.bf16 %v4466_v56  ;;  %v4482_v39 = vunpack.c.h.bf16 %v4466_v56  ;;  %v4510_v7 = vmul.bf16 %v13552_v0, %v4502_v18  ;;  %v10017_v34 = vpop.f32.mrb[222].mxu0  ;;  %v6418_v0 = vadd.f32 %v13713_v24, %v6417_v55  ;;  %v5985_v56 = vld [vmem:[%s14553_s8 + $0x2b8] sm:$0xf] }
 0xccf   : > { %v10728_v31 = vpop.eup %10727  ;;  %v6429_v62 = vadd.f32 %v10017_v34, %v13713_v24  ;;  %v6420_v2 = vpop.f32.mrb[223].mxu0  ;;  %v8403_v58 = vcombine.low %v5983_v6, %v5984_v21 }
 0xcd0   : > { %10737 = vrcp.f32 %v4481_v13  ;;  %9847 = vmatmul.mubr.bf16.gmra.mrb[180].mxu1 %v4510_v7  ;;  %v6421_v17 = vadd.f32 %v13713_v24, %v6420_v2  ;;  %v4503_v46 = vpack.c.bf16 %v10728_v31, %v10726_v40  ;;  %v5986_v24 = vld [vmem:[%s14553_s8 + $0x2f8] sm:$0xf] }
 0xcd1   : > { %10739 = vrcp.f32 %v4482_v39  ;;  %v13791_v47 = vpack.c.bf16 %v6429_v62, %v6426_v38  ;;  %9927 = vmatpush3.bf16.msra.mxu1 %v8401_v52  ;;  %v13805_v52 = vld [vmem:[%s14554_s9 + $0xf] ss:$0 sm:$0xff]  ;;  %v8404_v39 = vcombine.low %v5985_v56, %v5986_v24  ;;  %v5987_v62 = vld [vmem:[%s14553_s8 + $0x338] sm:$0xf] }
 0xcd2   : > { %v10730_v61 = vpop.eup %10729  ;;  %v13793_v25 = vpack.c.bf16 %v6421_v17, %v6418_v0  ;;  %v4511_v37 = vmul.bf16 %v13565_v49, %v4503_v46  ;;  %9928 = vmatprep.subr.bf16.mxu1 %v8402_v45  ;;  %v10068_v53 = vpop.f32.mrb[224].mxu0  ;;  %v5990_v56 = vld [vmem:[%s14553_s8 + $0x3f8] sm:$0xf] }
 0xcd3   : > { %v10732_v32 = vpop.eup %10731  ;;  %v6826_v49 = vpop.f32.mrb[225].mxu0  ;;  %v6835_v34 = vadd.f32 %v10068_v53, %v13805_v52 }
 0xcd4   : > { %9850 = vmatprep.mubr.bf16.mxu1 %v4511_v37  ;;  %v4504_v18 = vpack.c.bf16 %v10732_v32, %v10730_v61  ;;  %v10069_v13 = vpop.f32.mrb[226].mxu0  ;;  %v6827_v2 = vadd.f32 %v13805_v52, %v6826_v49  ;;  %v5989_v32 = vld [vmem:[%s14553_s8 + $0x3b8] sm:$0xf] }
 0xcd5   : > { %9929 = vmatpush3.bf16.msra.mxu1 %v8402_v45  ;;  %v6838_v31 = vadd.f32 %v10069_v13, %v13805_v52  ;;  %v6829_v38 = vpop.f32.mrb[227].mxu0  ;;  %v5988_v45 = vld [vmem:[%s14553_s8 + $0x378] sm:$0xf]  ;;  %v8406_v49 = vcombine.low %v5989_v32, %v5990_v56 }
 0xcd6   : > { %v10734_v55 = vpop.eup %10733  ;;  %v4512_v40 = vmul.bf16 %v13572_v54, %v4504_v18  ;;  %9930 = vmatprep.subr.bf16.mxu1 %v8403_v58  ;;  %v6830_v54 = vadd.f32 %v13805_v52, %v6829_v38  ;;  %v8405_v61 = vcombine.low %v5987_v62, %v5988_v45 }
 0xcd7   : > { %v10736_v7 = vpop.eup %10735  ;;  %v13818_v21 = vpack.c.bf16 %v6838_v31, %v6835_v34 }
 0xcd8   : > { %9851 = vmatmul.mubr.bf16.gmra.mrb[184].mxu1 %v4512_v40  ;;  %v4505_v6 = vpack.c.bf16 %v10736_v7, %v10734_v55  ;;  %v13820_v17 = vpack.c.bf16 %v6830_v54, %v6827_v2 }
 0xcd9   : > { %9931 = vmatpush3.bf16.msra.mxu1 %v8403_v58 }
 0xcda   : > { %v10738_v0 = vpop.eup %10737  ;;  %v4513_v46 = vmul.bf16 %v13585_v41, %v4505_v6  ;;  %9932 = vmatprep.subr.bf16.mxu1 %v8404_v39  ;;  %v10072_v24 = vpop.f32.mrb[228].mxu0 }
 0xcdb   : > { %v10740_v37 = vpop.eup %10739  ;;  %v6842_v58 = vpop.f32.mrb[229].mxu0  ;;  %v6851_v55 = vadd.f32 %v10072_v24, %v13805_v52 }
 0xcdc   : > { %9854 = vmatprep.mubr.bf16.mxu1 %v4513_v46  ;;  %v4506_v53 = vpack.c.bf16 %v10740_v37, %v10738_v0  ;;  %v10073_v41 = vpop.f32.mrb[230].mxu0  ;;  %v6843_v7 = vadd.f32 %v13805_v52, %v6842_v58 }
 0xcdd   : > { %9933 = vmatpush3.bf16.msra.mxu1 %v8404_v39  ;;  %v6854_v40 = vadd.f32 %v10073_v41, %v13805_v52  ;;  %v6845_v13 = vpop.f32.mrb[231].mxu0 }
 0xcde   : > { %v4514_v18 = vmul.bf16 %v13592_v9, %v4506_v53  ;;  %9934 = vmatprep.subr.bf16.mxu1 %v8405_v61  ;;  %v6846_v34 = vadd.f32 %v13805_v52, %v6845_v13 }
 0xcdf   : > { %v13834_v31 = vpack.c.bf16 %v6854_v40, %v6851_v55 }
 0xce0   : > { %9855 = vmatmul.mubr.bf16.gmra.mrb[188].mxu1 %v4514_v18  ;;  %v13837_v39 = vpack.c.bf16 %v6846_v34, %v6843_v7 }
 0xce1   : > { %9935 = vmatpush3.bf16.msra.mxu1 %v8405_v61  ;;  %9938 = vmatprep.mubr.bf16.mxu1 %v11283_v12 }
 0xce2   : > { %9936 = vmatprep.subr.bf16.mxu1 %v8406_v49  ;;  %v10076_v9 = vpop.f32.mrb[232].mxu0 }
 0xce3   : > { %v6858_v38 = vpop.f32.mrb[233].mxu0  ;;  %v6867_v45 = vadd.f32 %v10076_v9, %v13805_v52 }
 0xce4   : > { %v10077_v62 = vpop.f32.mrb[234].mxu0  ;;  %v6859_v6 = vadd.f32 %v13805_v52, %v6858_v38 }
 0xce5   : > { %9937 = vmatpush3.bf16.msra.mxu1 %v8406_v49  ;;  %v6870_v2 = vadd.f32 %v10077_v62, %v13805_v52  ;;  %v6861_v54 = vpop.f32.mrb[235].mxu0 }
 0xce6   : > { %v6862_v0 = vadd.f32 %v13805_v52, %v6861_v54 }
 0xce7   : > { %v13844_v46 = vpack.c.bf16 %v6870_v2, %v6867_v45 }
 0xce8   : > { %9939 = vmatmul.mubr.bf16.vlgmr.msra.gmra.mrb[192].mxu1 %v11281_v11  ;;  %v13847_v12 = vpack.c.bf16 %v6862_v0, %v6859_v6 }
 0xce9   : > { %9942 = vmatprep.mubr.bf16.mxu1 %v11306_v28 }
 0xcea   : > { %v10080_v61 = vpop.f32.mrb[236].mxu0 }
 0xceb   : > { %v6874_v37 = vpop.f32.mrb[237].mxu0  ;;  %v6883_v56 = vadd.f32 %v10080_v61, %v13805_v52 }
 0xcec   : > { %v10081_v32 = vpop.f32.mrb[238].mxu0  ;;  %v6875_v58 = vadd.f32 %v13805_v52, %v6874_v37 }
 0xced   : > { %v6886_v24 = vadd.f32 %v10081_v32, %v13805_v52  ;;  %v6877_v53 = vpop.f32.mrb[239].mxu0 }
 0xcee   : > { %v6878_v11 = vadd.f32 %v13805_v52, %v6877_v53 }
 0xcef   : > { %v13854_v18 = vpack.c.bf16 %v6886_v24, %v6883_v56 }
 0xcf0   : > { %9943 = vmatmul.mubr.bf16.gmra.mrb[196].mxu1 %v11304_v27  ;;  %v13857_v28 = vpack.c.bf16 %v6878_v11, %v6875_v58 }
 0xcf1   : > { %9946 = vmatprep.mubr.bf16.mxu1 %v11328_v44 }
 0xcf8   : > { %9947 = vmatmul.mubr.bf16.gmra.mrb[200].mxu1 %v11326_v43 }
 0xcf9   : > { %9950 = vmatprep.mubr.bf16.mxu1 %v14712_v33 }
 0xd00   : > { %9951 = vmatmul.mubr.bf16.gmra.mrb[204].mxu1 %v14751_v20 }
 0xd23   : > { %v5792_v41 = vpop.xlane.xlu0 %5791 }
 0xd24   : > { %v5823_v55 = vsub.f32 %v13608_v14, %v5792_v41 }
 0xd25   : > { %v5794_v49 = vpop.xlane.xlu1 %5793 }
 0xd26   : > { %v5824_v27 = vsub.f32 %v13613_v23, %v5794_v49 }
 0xd27   : > { %v5796_v40 = vpop.xlane.xlu0 %5795 }
 0xd28   : > { %v5839_v52 = vpack.c.bf16 %v5824_v27, %v5823_v55  ;;  %v5825_v44 = vsub.f32 %v13619_v26, %v5796_v40 }
 0xd29   : > { %v5798_v13 = vpop.xlane.xlu1 %5797 }
 0xd2a   : > { %v5848_v7 = vmul.bf16 1069105081, %v5839_v52  ;;  %v5826_v34 = vsub.f32 %v13625_v59, %v5798_v13 }
 0xd2b   : > { %v5800_v9 = vpop.xlane.xlu0 %5799 }
 0xd2c   : > { %10741 = vpow.bf16 %v5848_v7  ;;  %v5840_v43 = vpack.c.bf16 %v5826_v34, %v5825_v44  ;;  %v5827_v20 = vsub.f32 %v13631_v36, %v5800_v9 }
 0xd2e   : > { %v5802_v33 = vpop.xlane.xlu1 %5801  ;;  %v5851_v38 = vmul.bf16 1069105081, %v5840_v43 }
 0xd2f   : > { %v5828_v62 = vsub.f32 %v13637_v15, %v5802_v33  ;;  %v5804_v14 = vpop.xlane.xlu0 %5803 }
 0xd30   : > { %10743 = vpow.bf16 %v5851_v38  ;;  %v5829_v54 = vsub.f32 %v13643_v29, %v5804_v14 }
 0xd31   : > { %v5841_v23 = vpack.c.bf16 %v5828_v62, %v5827_v20 }
 0xd32   : > { %v5806_v45 = vpop.xlane.xlu1 %5805 }
 0xd33   : > { %v5854_v2 = vmul.bf16 1069105081, %v5841_v23  ;;  %v5830_v26 = vsub.f32 %v13650_v35, %v5806_v45  ;;  %v5808_v6 = vpop.xlane.xlu0 %5807 }
 0xd34   : > { %v5831_v37 = vsub.f32 %v13656_v3, %v5808_v6 }
 0xd35   : > { %10745 = vpow.bf16 %v5854_v2  ;;  %v5842_v59 = vpack.c.bf16 %v5830_v26, %v5829_v54 }
 0xd36   : > { %v5810_v0 = vpop.xlane.xlu1 %5809 }
 0xd37   : > { %v5857_v61 = vmul.bf16 1069105081, %v5842_v59  ;;  %v5832_v36 = vsub.f32 %v13663_v16, %v5810_v0  ;;  %v13872_v32 = vpop.eup %10741  ;;  %v5812_v15 = vpop.xlane.xlu0 %5811 }
 0xd38   : > { %v5872_v24 = vunpack.c.h.bf16 %v13872_v32  ;;  %v5871_v29 = vunpack.c.l.bf16 %v13872_v32  ;;  %v5833_v58 = vsub.f32 %v13670_v4, %v5812_v15  ;;  %v13913_v15 = vld [vmem:[%s14554_s9 + $0xe] ss:$0 sm:$0xff] }
 0xd39   : > { %10747 = vpow.bf16 %v5857_v61  ;;  %v5843_v56 = vpack.c.bf16 %v5832_v36, %v5831_v37 }
 0xd3a   : > { %v5814_v53 = vpop.xlane.xlu1 %5813  ;;  %5889 = vadd.xlane.f32.xlu1 %v5872_v24  ;;  %5887 = vadd.xlane.f32.xlu0 %v5871_v29 }
 0xd3b   : > { %v5860_v35 = vmul.bf16 1069105081, %v5843_v56  ;;  %v5834_v11 = vsub.f32 %v13678_v63, %v5814_v53  ;;  %v13878_v41 = vpop.eup %10743  ;;  %v5816_v3 = vpop.xlane.xlu0 %5815 }
 0xd3c   : > { %v5874_v49 = vunpack.c.h.bf16 %v13878_v41  ;;  %v5873_v27 = vunpack.c.l.bf16 %v13878_v41  ;;  %v5835_v52 = vsub.f32 %v13686_v48, %v5816_v3 }
 0xd3d   : > { %10749 = vpow.bf16 %v5860_v35  ;;  %v5844_v16 = vpack.c.bf16 %v5834_v11, %v5833_v58 }
 0xd3e   : > { %5893 = vadd.xlane.f32.xlu1 %v5874_v49  ;;  %5891 = vadd.xlane.f32.xlu0 %v5873_v27 }
 0xd3f   : > { %v5818_v55 = vpop.xlane.xlu1 %5817  ;;  %v5863_v40 = vmul.bf16 1069105081, %v5844_v16  ;;  %v5820_v63 = vpop.xlane.xlu0 %5819 }
 0xd40   : > { %v5836_v13 = vsub.f32 %v13693_v50, %v5818_v55  ;;  %v13884_v4 = vpop.eup %10745  ;;  %v5837_v33 = vsub.f32 %v13700_v5, %v5820_v63 }
 0xd41   : > { %10751 = vpow.bf16 %v5863_v40  ;;  %v5876_v44 = vunpack.c.h.bf16 %v13884_v4  ;;  %v5875_v9 = vunpack.c.l.bf16 %v13884_v4 }
 0xd42   : > { %v5845_v7 = vpack.c.bf16 %v5836_v13, %v5835_v52 }
 0xd43   : > { %v5822_v34 = vpop.xlane.xlu1 %5821  ;;  %5897 = vadd.xlane.f32.xlu1 %v5876_v44  ;;  %5895 = vadd.xlane.f32.xlu0 %v5875_v9 }
 0xd44   : > { %v5866_v43 = vmul.bf16 1069105081, %v5845_v7  ;;  %v5838_v38 = vsub.f32 %v13708_v51, %v5822_v34  ;;  %v13890_v48 = vpop.eup %10747 }
 0xd45   : > { %v5878_v20 = vunpack.c.h.bf16 %v13890_v48  ;;  %v5877_v62 = vunpack.c.l.bf16 %v13890_v48 }
 0xd46   : > { %10753 = vpow.bf16 %v5866_v43  ;;  %v5846_v50 = vpack.c.bf16 %v5838_v38, %v5837_v33 }
 0xd47   : > { %5901 = vadd.xlane.f32.xlu1 %v5878_v20  ;;  %5899 = vadd.xlane.f32.xlu0 %v5877_v62 }
 0xd48   : > { %v5869_v14 = vmul.bf16 1069105081, %v5846_v50  ;;  %v13894_v23 = vpop.eup %10749 }
 0xd49   : > { %v5880_v5 = vunpack.c.h.bf16 %v13894_v23  ;;  %v5879_v51 = vunpack.c.l.bf16 %v13894_v23 }
 0xd4a   : > { %10755 = vpow.bf16 %v5869_v14 }
 0xd4b   : > { %5905 = vadd.xlane.f32.xlu1 %v5880_v5  ;;  %5903 = vadd.xlane.f32.xlu0 %v5879_v51 }
 0xd4c   : > { %v13898_v45 = vpop.eup %10751 }
 0xd4d   : > { %v5882_v2 = vunpack.c.h.bf16 %v13898_v45  ;;  %v5881_v54 = vunpack.c.l.bf16 %v13898_v45 }
 0xd4f   : > { %5909 = vadd.xlane.f32.xlu1 %v5882_v2  ;;  %5907 = vadd.xlane.f32.xlu0 %v5881_v54 }
 0xd51   : > { %v13902_v26 = vpop.eup %10753 }
 0xd52   : > { %v5884_v6 = vunpack.c.h.bf16 %v13902_v26  ;;  %v5883_v59 = vunpack.c.l.bf16 %v13902_v26 }
 0xd54   : > { %5913 = vadd.xlane.f32.xlu1 %v5884_v6  ;;  %5911 = vadd.xlane.f32.xlu0 %v5883_v59 }
 0xd55   : > { %v13906_v0 = vpop.eup %10755 }
 0xd56   : > { %v5886_v61 = vunpack.c.h.bf16 %v13906_v0  ;;  %v5885_v37 = vunpack.c.l.bf16 %v13906_v0 }
 0xd58   : > { %5917 = vadd.xlane.f32.xlu1 %v5886_v61  ;;  %5915 = vadd.xlane.f32.xlu0 %v5885_v37 }
 0xdbb   : > { %v9940_v36 = vpop.f32.mrb[192].mxu1 }
 0xdbc   : > { %v6080_v56 = vpop.f32.mrb[193].mxu1  ;;  %v6089_v53 = vadd.f32 %v9940_v36, %v13913_v15 }
 0xdbd   : > { %v9941_v24 = vpop.f32.mrb[194].mxu1  ;;  %v6081_v58 = vadd.f32 %v13913_v15, %v6080_v56 }
 0xdbe   : > { %v6092_v29 = vadd.f32 %v9941_v24, %v13913_v15  ;;  %v6083_v35 = vpop.f32.mrb[195].mxu1 }
 0xdbf   : > { %v6084_v11 = vadd.f32 %v13913_v15, %v6083_v35 }
 0xdc0   : > { %v6144_v3 = vpack.c.bf16 %v6092_v29, %v6089_v53 }
 0xdc1   : > { %v6143_v16 = vpack.c.bf16 %v6084_v11, %v6081_v58 }
 0xdc3   : > { %v9944_v49 = vpop.f32.mrb[196].mxu1  ;;  %9954 = vmatprep.subr.bf16.mxu1 %v6143_v16 }
 0xdc4   : > { %v6096_v55 = vpop.f32.mrb[197].mxu1  ;;  %9955 = vmatpush3.bf16.msra.mxu1 %v6143_v16  ;;  %v6105_v40 = vadd.f32 %v9944_v49, %v13913_v15 }
 0xdc5   : > { %v9945_v27 = vpop.f32.mrb[198].mxu1  ;;  %9956 = vmatprep.subr.bf16.mxu1 %v6144_v3  ;;  %v6097_v63 = vadd.f32 %v13913_v15, %v6096_v55 }
 0xdc6   : > { %v6108_v52 = vadd.f32 %v9945_v27, %v13913_v15  ;;  %v6099_v13 = vpop.f32.mrb[199].mxu1 }
 0xdc7   : > { %v6100_v7 = vadd.f32 %v13913_v15, %v6099_v13  ;;  %v5890_v9 = vpop.xlane.xlu1 %5889  ;;  %v5888_v43 = vpop.xlane.xlu0 %5887 }
 0xdc8   : > { %v6146_v44 = vpack.c.bf16 %v6108_v52, %v6105_v40  ;;  %9957 = vmatpush3.bf16.msra.mxu1 %v6144_v3  ;;  %v5919_v33 = vpack.c.bf16 %v5890_v9, %v5888_v43 }
 0xdc9   : > { %v6145_v34 = vpack.c.bf16 %v6100_v7, %v6097_v63 }
 0xdca   : > { %v5927_v20 = vunpack.c.l.bf16 %v5919_v33  ;;  %v5928_v62 = vunpack.c.h.bf16 %v5919_v33 }
 0xdcb   : > { %v9948_v38 = vpop.f32.mrb[200].mxu1  ;;  %9958 = vmatprep.subr.bf16.mxu1 %v6145_v34  ;;  %v5894_v5 = vpop.xlane.xlu1 %5893 }
 0xdcc   : > { %v6112_v50 = vpop.f32.mrb[201].mxu1  ;;  %9959 = vmatpush3.bf16.msra.mxu1 %v6145_v34  ;;  %v6121_v51 = vadd.f32 %v9948_v38, %v13913_v15  ;;  %v5892_v6 = vpop.xlane.xlu0 %5891  ;;  %10757 = vrcp.f32 %v5927_v20 }
 0xdcd   : > { %v9949_v14 = vpop.f32.mrb[202].mxu1  ;;  %9960 = vmatprep.subr.bf16.mxu1 %v6146_v44  ;;  %v6113_v59 = vadd.f32 %v13913_v15, %v6112_v50  ;;  %v5920_v37 = vpack.c.bf16 %v5894_v5, %v5892_v6  ;;  %10759 = vrcp.f32 %v5928_v62 }
 0xdce   : > { %v6124_v2 = vadd.f32 %v9949_v14, %v13913_v15  ;;  %v6115_v54 = vpop.f32.mrb[203].mxu1 }
 0xdcf   : > { %v6116_v61 = vadd.f32 %v13913_v15, %v6115_v54  ;;  %v5929_v24 = vunpack.c.l.bf16 %v5920_v37  ;;  %v5930_v53 = vunpack.c.h.bf16 %v5920_v37 }
 0xdd0   : > { %v6148_v36 = vpack.c.bf16 %v6124_v2, %v6121_v51  ;;  %9961 = vmatpush3.bf16.msra.mxu1 %v6146_v44  ;;  %v5898_v29 = vpop.xlane.xlu1 %5897  ;;  %v5896_v35 = vpop.xlane.xlu0 %5895 }
 0xdd1   : > { %v6147_v56 = vpack.c.bf16 %v6116_v61, %v6113_v59  ;;  %10761 = vrcp.f32 %v5929_v24  ;;  %v5921_v58 = vpack.c.bf16 %v5898_v29, %v5896_v35 }
 0xdd2   : > { %10763 = vrcp.f32 %v5930_v53 }
 0xdd3   : > { %v9952_v11 = vpop.f32.mrb[204].mxu1  ;;  %9962 = vmatprep.subr.bf16.mxu1 %v6147_v56  ;;  %v5931_v16 = vunpack.c.l.bf16 %v5921_v58  ;;  %v5932_v49 = vunpack.c.h.bf16 %v5921_v58 }
 0xdd4   : > { %v6128_v3 = vpop.f32.mrb[205].mxu1  ;;  %9963 = vmatpush3.bf16.msra.mxu1 %v6147_v56  ;;  %v5902_v27 = vpop.xlane.xlu1 %5901  ;;  %v6137_v40 = vadd.f32 %v9952_v11, %v13913_v15 }
 0xdd5   : > { %v9953_v55 = vpop.f32.mrb[206].mxu1  ;;  %9964 = vmatprep.subr.bf16.mxu1 %v6148_v36  ;;  %v5900_v63 = vpop.xlane.xlu0 %5899  ;;  %10765 = vrcp.f32 %v5931_v16  ;;  %v6129_v7 = vadd.f32 %v13913_v15, %v6128_v3 }
 0xdd6   : > { %v6140_v52 = vadd.f32 %v9953_v55, %v13913_v15  ;;  %v6131_v13 = vpop.f32.mrb[207].mxu1  ;;  %v5922_v34 = vpack.c.bf16 %v5902_v27, %v5900_v63  ;;  %10767 = vrcp.f32 %v5932_v49  ;;  %v10758_v43 = vpop.eup %10757 }
 0xdd7   : > { %v6132_v44 = vadd.f32 %v13913_v15, %v6131_v13  ;;  %v10760_v62 = vpop.eup %10759 }
 0xdd8   : > { %v6150_v9 = vpack.c.bf16 %v6140_v52, %v6137_v40  ;;  %9965 = vmatpush3.bf16.msra.mxu1 %v6148_v36  ;;  %v5933_v38 = vunpack.c.l.bf16 %v5922_v34  ;;  %v5934_v50 = vunpack.c.h.bf16 %v5922_v34  ;;  %v5906_v20 = vpop.xlane.xlu1 %5905  ;;  %v5959_v51 = vpack.c.bf16 %v10760_v62, %v10758_v43 }
 0xdd9   : > { %v6149_v33 = vpack.c.bf16 %v6132_v44, %v6129_v7  ;;  %v5904_v14 = vpop.xlane.xlu0 %5903 }
 0xdda   : > { %10769 = vrcp.f32 %v5933_v38  ;;  %v5923_v5 = vpack.c.bf16 %v5906_v20, %v5904_v14  ;;  %v5967_v59 = vmul.bf16 %v13872_v32, %v5959_v51 }
 0xddb   : > { %9966 = vmatprep.subr.bf16.mxu1 %v6149_v33  ;;  %10771 = vrcp.f32 %v5934_v50  ;;  %v10762_v2 = vpop.eup %10761 }
 0xddc   : > { %9967 = vmatpush3.bf16.msra.mxu1 %v6149_v33  ;;  %v5935_v54 = vunpack.c.l.bf16 %v5923_v5  ;;  %v5936_v15 = vunpack.c.h.bf16 %v5923_v5  ;;  %v5910_v6 = vpop.xlane.xlu1 %5909  ;;  %v10764_v61 = vpop.eup %10763  ;;  %9970 = vmatprep.mubr.bf16.mxu1 %v5967_v59 }
 0xddd   : > { %9968 = vmatprep.subr.bf16.mxu1 %v6150_v9  ;;  %v5908_v37 = vpop.xlane.xlu0 %5907  ;;  %v5960_v56 = vpack.c.bf16 %v10764_v61, %v10762_v2  ;;  %v10999_v61 = vld [vmem:[%s14547_s2 + $0x28] sm:$0xff] }
 0xdde   : > { %10773 = vrcp.f32 %v5935_v54  ;;  %v5924_v36 = vpack.c.bf16 %v5910_v6, %v5908_v37 }
 0xddf   : > { %10775 = vrcp.f32 %v5936_v15  ;;  %v10766_v24 = vpop.eup %10765  ;;  %v5968_v58 = vmul.bf16 %v13878_v41, %v5960_v56 }
 0xde0   : > { %9969 = vmatpush3.bf16.msra.mxu1 %v6150_v9  ;;  %v5937_v53 = vunpack.c.l.bf16 %v5924_v36  ;;  %v5938_v29 = vunpack.c.h.bf16 %v5924_v36  ;;  %v10768_v11 = vpop.eup %10767  ;;  %v11000_v36 = vld [vmem:[%s14547_s2 + $0x30] sm:$0xff] }
 0xde1   : > { %10018 = vmatprep.subr.bf16.mxu1 %v13728_v30  ;;  %v5914_v35 = vpop.xlane.xlu1 %5913  ;;  %v5912_v3 = vpop.xlane.xlu0 %5911  ;;  %v5961_v16 = vpack.c.bf16 %v10768_v11, %v10766_v24  ;;  %v11001_v24 = vld [vmem:[%s14547_s2 + $0x38] sm:$0xff] }
 0xde2   : > { %10777 = vrcp.f32 %v5937_v53  ;;  %v5925_v32 = vpack.c.bf16 %v5914_v35, %v5912_v3 }
 0xde3   : > { %9971 = vmatmul.mubr.bf16.vlgmr.msra.gmra.mrb[176].mxu1 %v5968_v58  ;;  %10779 = vrcp.f32 %v5938_v29  ;;  %v5969_v52 = vmul.bf16 %v13884_v4, %v5961_v16  ;;  %v11002_v58 = vld [vmem:[%s14547_s2 + $0x40] sm:$0xff]  ;;  %v11003_v16 = vld [vmem:[%s14547_s2 + $0x48] sm:$0xff] }
 0xde4   : > { %v10770_v49 = vpop.eup %10769  ;;  %v5939_v55 = vunpack.c.l.bf16 %v5925_v32  ;;  %v5940_v27 = vunpack.c.h.bf16 %v5925_v32 }
 0xde5   : > { %v5918_v40 = vpop.xlane.xlu1 %5917  ;;  %v10772_v13 = vpop.eup %10771  ;;  %9974 = vmatprep.mubr.bf16.mxu1 %v5969_v52 }
 0xde6   : > { %v5916_v63 = vpop.xlane.xlu0 %5915  ;;  %10781 = vrcp.f32 %v5939_v55  ;;  %v5962_v44 = vpack.c.bf16 %v10772_v13, %v10770_v49  ;;  %v11004_v55 = vld [vmem:[%s14547_s2 + $0x50] sm:$0xff] }
 0xde7   : > { %v5926_v7 = vpack.c.bf16 %v5918_v40, %v5916_v63  ;;  %10783 = vrcp.f32 %v5940_v27  ;;  %v11005_v40 = vld [vmem:[%s14547_s2 + $0x58] sm:$0xff] }
 0xde8   : > { %v10774_v41 = vpop.eup %10773  ;;  %v5970_v43 = vmul.bf16 %v13890_v48, %v5962_v44 }
 0xde9   : > { %v5941_v34 = vunpack.c.l.bf16 %v5926_v7  ;;  %v5942_v9 = vunpack.c.h.bf16 %v5926_v7  ;;  %10019 = vmatpush3.bf16.xpose.msra.mxu1 %v13728_v30  ;;  %v10776_v33 = vpop.eup %10775  ;;  %v11006_v7 = vld [vmem:[%s14547_s2 + $0x60] sm:$0xff] }
 0xdea   : > { %10020 = vmatprep.subr.bf16.mxu1 %v13724_v60  ;;  %v5963_v4 = vpack.c.bf16 %v10776_v33, %v10774_v41  ;;  %v11008_v33 = vld [vmem:[%s14547_s2 + $0x70] sm:$0xff] }
 0xdeb   : > { %10785 = vrcp.f32 %v5941_v34  ;;  %9975 = vmatmul.mubr.bf16.gmra.mrb[180].mxu1 %v5970_v43 }
 0xdec   : > { %10787 = vrcp.f32 %v5942_v9  ;;  %v10778_v38 = vpop.eup %10777  ;;  %v5971_v50 = vmul.bf16 %v13894_v23, %v5963_v4  ;;  %v11007_v9 = vld [vmem:[%s14547_s2 + $0x68] sm:$0xff] }
 0xded   : > { %v10780_v20 = vpop.eup %10779 }
 0xdee   : > { %9978 = vmatprep.mubr.bf16.mxu1 %v5971_v50  ;;  %v5964_v62 = vpack.c.bf16 %v10780_v20, %v10778_v38  ;;  %v11009_v38 = vld [vmem:[%s14547_s2 + $0x78] sm:$0xff] }
 0xdf0   : > { %v10782_v14 = vpop.eup %10781  ;;  %v5972_v30 = vmul.bf16 %v13898_v45, %v5964_v62 }
 0xdf1   : > { %10021 = vmatpush3.bf16.xpose.msra.mxu1 %v13724_v60  ;;  %v10784_v5 = vpop.eup %10783  ;;  %v14793_v60 = vld [vmem:[#allocation5_spill] sm:$0xff] }
 0xdf2   : > { %10022 = vmatprep.subr.bf16.mxu1 %v13748_v19  ;;  %v5965_v48 = vpack.c.bf16 %v10784_v5, %v10782_v14 }
 0xdf3   : > { %9979 = vmatmul.mubr.bf16.gmra.mrb[184].mxu1 %v5972_v30 }
 0xdf4   : > { %v5973_v2 = vmul.bf16 %v13902_v26, %v5965_v48  ;;  %v10998_v26 = vld [vmem:[%s14547_s2 + $0x20] sm:$0xff] }
 0xdf5   : > { %v10786_v51 = vpop.eup %10785 }
 0xdf6   : > { %v10788_v54 = vpop.eup %10787  ;;  %9982 = vmatprep.mubr.bf16.mxu1 %v5973_v2 }
 0xdf7   : > { %v5966_v15 = vpack.c.bf16 %v10788_v54, %v10786_v51 }
 0xdf9   : > { %10023 = vmatpush3.bf16.xpose.msra.mxu1 %v13748_v19  ;;  %v5974_v23 = vmul.bf16 %v13906_v0, %v5966_v15 }
 0xdfa   : > { %10024 = vmatprep.subr.bf16.mxu1 %v13744_v22 }
 0xdfb   : > { %9983 = vmatmul.mubr.bf16.gmra.mrb[188].mxu1 %v5974_v23 }
 0xdfc   : > { %10034 = vmatprep.mubr.bf16.mxu1 %v14793_v60 }
 0xe01   : > { %10025 = vmatpush3.bf16.xpose.msra.mxu1 %v13744_v22 }
 0xe02   : > { %10026 = vmatprep.subr.bf16.mxu1 %v13771_v8 }
 0xe09   : > { %10027 = vmatpush3.bf16.xpose.msra.mxu1 %v13771_v8  ;;  %v14794_v8 = vld [vmem:[#allocation11_spill] sm:$0xff] }
 0xe0a   : > { %10028 = vmatprep.subr.bf16.mxu1 %v13769_v42 }
 0xe11   : > { %10029 = vmatpush3.bf16.xpose.msra.mxu1 %v13769_v42  ;;  %v10994_v42 = vld [vmem:[%s14547_s2] sm:$0xff] }
 0xe12   : > { %10030 = vmatprep.subr.bf16.mxu1 %v13793_v25 }
 0xe19   : > { %10031 = vmatpush3.bf16.xpose.msra.mxu1 %v13793_v25 }
 0xe1a   : > { %10032 = vmatprep.subr.bf16.mxu1 %v13791_v47 }
 0xe21   : > { %10033 = vmatpush3.bf16.xpose.msra.mxu1 %v13791_v47 }
 0xe22   : > { %10082 = vmatprep.subr.bf16.mxu1 %v13820_v17 }
 0xe28   : > { %10035 = vmatmul.mubr.bf16.vlgmr.msra.gmra.mrb[208].mxu1 %v14699_v1  ;;  %v14795_v1 = vld [vmem:[#allocation13_spill] sm:$0xff] }
 0xe29   : > { %10038 = vmatprep.mubr.bf16.mxu1 %v14700_v10  ;;  %10083 = vmatpush3.bf16.msra.mxu1 %v13820_v17  ;;  %v14796_v10 = vld [vmem:[#allocation15_spill] sm:$0xff] }
 0xe2a   : > { %10084 = vmatprep.subr.bf16.mxu1 %v13818_v21  ;;  %v10995_v17 = vld [vmem:[%s14547_s2 + $0x8] sm:$0xff] }
 0xe2d   : > { %10085 = vmatpush3.bf16.msra.mxu1 %v13818_v21 }
 0xe2e   : > { %10086 = vmatprep.subr.bf16.mxu1 %v13837_v39 }
 0xe30   : > { %10039 = vmatmul.mubr.bf16.gmra.mrb[212].mxu1 %v14701_v57  ;;  %v14797_v57 = vld [vmem:[#allocation17_spill] sm:$0xff] }
 0xe31   : > { %10042 = vmatprep.mubr.bf16.mxu1 %v14794_v8  ;;  %10087 = vmatpush3.bf16.msra.mxu1 %v13837_v39  ;;  %v10996_v39 = vld [vmem:[%s14547_s2 + $0x10] sm:$0xff] }
 0xe32   : > { %10088 = vmatprep.subr.bf16.mxu1 %v13834_v31 }
 0xe35   : > { %10089 = vmatpush3.bf16.msra.mxu1 %v13834_v31 }
 0xe36   : > { %10090 = vmatprep.subr.bf16.mxu1 %v13847_v12 }
 0xe38   : > { %10043 = vmatmul.mubr.bf16.gmra.mrb[216].mxu1 %v14795_v1 }
 0xe39   : > { %10046 = vmatprep.mubr.bf16.mxu1 %v14796_v10  ;;  %10091 = vmatpush3.bf16.msra.mxu1 %v13847_v12  ;;  %v10997_v12 = vld [vmem:[%s14547_s2 + $0x18] sm:$0xff] }
 0xe3a   : > { %10092 = vmatprep.subr.bf16.mxu1 %v13844_v46 }
 0xe3d   : > { %10093 = vmatpush3.bf16.msra.mxu1 %v13844_v46 }
 0xe3e   : > { %10094 = vmatprep.subr.bf16.mxu1 %v13857_v28 }
 0xe40   : > { %10047 = vmatmul.mubr.bf16.gmra.mrb[220].mxu1 %v14797_v57 }
 0xe41   : > { %10095 = vmatpush3.bf16.msra.mxu1 %v13857_v28 }
 0xe42   : > { %10096 = vmatprep.subr.bf16.mxu1 %v13854_v18 }
 0xe45   : > { %10097 = vmatpush3.bf16.msra.mxu1 %v13854_v18 }
 0xefb   : > { %v10036_v22 = vpop.f32.mrb[208].mxu1 }
 0xefc   : > { %v6474_v19 = vpop.f32.mrb[209].mxu1  ;;  %v13993_v46 = vadd.f32 %v10996_v39, %v10036_v22 }
 0xefd   : > { %v13982_v47 = vadd.f32 %v10994_v42, %v6474_v19  ;;  %v10037_v25 = vpop.f32.mrb[210].mxu1 }
 0xefe   : > { %v6477_v21 = vpop.f32.mrb[211].mxu1  ;;  %v13999_v18 = vadd.f32 %v10997_v12, %v10037_v25 }
 0xeff   : > { %v13987_v31 = vadd.f32 %v10995_v17, %v6477_v21  ;;  %6537 = vmax.xlane.f32.xlu0 %v13982_v47 }
 0xf01   : > { %6539 = vmax.xlane.f32.xlu1 %v13987_v31 }
 0xf03   : > { %v10040_v28 = vpop.f32.mrb[212].mxu1  ;;  %6541 = vmax.xlane.f32.xlu0 %v13993_v46 }
 0xf04   : > { %v6490_v45 = vpop.f32.mrb[213].mxu1  ;;  %v14015_v56 = vadd.f32 %v11000_v36, %v10040_v28 }
 0xf05   : > { %v14005_v0 = vadd.f32 %v10998_v26, %v6490_v45  ;;  %v10041_v6 = vpop.f32.mrb[214].mxu1  ;;  %6543 = vmax.xlane.f32.xlu1 %v13999_v18 }
 0xf06   : > { %v6493_v59 = vpop.f32.mrb[215].mxu1  ;;  %v6502_v53 = vadd.f32 %v11001_v24, %v10041_v6 }
 0xf07   : > { %v6494_v37 = vadd.f32 %v10999_v61, %v6493_v59  ;;  %6545 = vmax.xlane.f32.xlu0 %v14005_v0 }
 0xf09   : > { %6547 = vmax.xlane.f32.xlu1 %v6494_v37 }
 0xf0b   : > { %v10044_v29 = vpop.f32.mrb[216].mxu1  ;;  %6549 = vmax.xlane.f32.xlu0 %v14015_v56 }
 0xf0c   : > { %v6506_v35 = vpop.f32.mrb[217].mxu1  ;;  %v14033_v27 = vadd.f32 %v11004_v55, %v10044_v29 }
 0xf0d   : > { %v14024_v11 = vadd.f32 %v11002_v58, %v6506_v35  ;;  %v10045_v3 = vpop.f32.mrb[218].mxu1  ;;  %6551 = vmax.xlane.f32.xlu1 %v6502_v53 }
 0xf0e   : > { %v6509_v32 = vpop.f32.mrb[219].mxu1  ;;  %v14038_v52 = vadd.f32 %v11005_v40, %v10045_v3 }
 0xf0f   : > { %v6510_v49 = vadd.f32 %v11003_v16, %v6509_v32  ;;  %6553 = vmax.xlane.f32.xlu0 %v14024_v11 }
 0xf11   : > { %6555 = vmax.xlane.f32.xlu1 %v6510_v49 }
 0xf13   : > { %v10048_v13 = vpop.f32.mrb[220].mxu1  ;;  %6557 = vmax.xlane.f32.xlu0 %v14033_v27 }
 0xf14   : > { %v6522_v63 = vpop.f32.mrb[221].mxu1  ;;  %v14056_v4 = vadd.f32 %v11008_v33, %v10048_v13 }
 0xf15   : > { %v14044_v44 = vadd.f32 %v11006_v7, %v6522_v63  ;;  %v10049_v41 = vpop.f32.mrb[222].mxu1  ;;  %6559 = vmax.xlane.f32.xlu1 %v14038_v52 }
 0xf16   : > { %v6525_v34 = vpop.f32.mrb[223].mxu1  ;;  %v14062_v50 = vadd.f32 %v11009_v38, %v10049_v41 }
 0xf17   : > { %v14050_v43 = vadd.f32 %v11007_v9, %v6525_v34  ;;  %6561 = vmax.xlane.f32.xlu0 %v14044_v44 }
 0xf19   : > { %6563 = vmax.xlane.f32.xlu1 %v14050_v43 }
 0xf1b   : > { %6565 = vmax.xlane.f32.xlu0 %v14056_v4 }
 0xf1d   : > { %6567 = vmax.xlane.f32.xlu1 %v14062_v50 }
 0xf8c   : > { %v6538_v20 = vpop.xlane.xlu0 %6537 }
 0xf8d   : > { %v6569_v14 = vsub.f32 %v13982_v47, %v6538_v20 }
 0xf8e   : > { %v6540_v62 = vpop.xlane.xlu1 %6539 }
 0xf8f   : > { %v6570_v30 = vsub.f32 %v13987_v31, %v6540_v62 }
 0xf90   : > { %v6542_v5 = vpop.xlane.xlu0 %6541 }
 0xf91   : > { %v6585_v48 = vpack.c.bf16 %v6570_v30, %v6569_v14  ;;  %v6571_v54 = vsub.f32 %v13993_v46, %v6542_v5 }
 0xf92   : > { %v6544_v51 = vpop.xlane.xlu1 %6543 }
 0xf93   : > { %v6594_v2 = vmul.bf16 1069105081, %v6585_v48  ;;  %v6572_v15 = vsub.f32 %v13999_v18, %v6544_v51 }
 0xf94   : > { %v6546_v23 = vpop.xlane.xlu0 %6545 }
 0xf95   : > { %10789 = vpow.bf16 %v6594_v2  ;;  %v6586_v60 = vpack.c.bf16 %v6572_v15, %v6571_v54  ;;  %v6573_v10 = vsub.f32 %v14005_v0, %v6546_v23  ;;  %v10437_v54 = vld [vmem:[%s14557_s12] sm:$0xff]   ;;  %v10438_v15 = vld [vmem:[%s14557_s12 + $0x8] sm:$0xff]   ;;  %v10439_v23 = vld [vmem:[%s14557_s12 + $0x10] sm:$0xff]  }
 0xf96   : > { %v6548_v8 = vpop.xlane.xlu1 %6547  ;;  %10178 = vmatprep.subr.bf16.mxu0 %v10437_v54 }
 0xf97   : > { %v6597_v1 = vmul.bf16 1069105081, %v6586_v60  ;;  %v6574_v57 = vsub.f32 %v6494_v37, %v6548_v8  ;;  %10179 = vmatpush3.bf16.msra.mxu0 %v10437_v54  ;;  %v10440_v60 = vld [vmem:[%s14557_s12 + $0x18] sm:$0xff]   ;;  %v10441_v8 = vld [vmem:[%s14557_s12 + $0x20] sm:$0xff]  }
 0xf98   : > { %v6550_v22 = vpop.xlane.xlu0 %6549  ;;  %10180 = vmatprep.subr.bf16.mxu0 %v10438_v15 }
 0xf99   : > { %10791 = vpow.bf16 %v6597_v1  ;;  %v6587_v19 = vpack.c.bf16 %v6574_v57, %v6573_v10  ;;  %v6575_v25 = vsub.f32 %v14015_v56, %v6550_v22  ;;  %v10442_v1 = vld [vmem:[%s14557_s12 + $0x28] sm:$0xff]   ;;  %v10443_v10 = vld [vmem:[%s14557_s12 + $0x30] sm:$0xff]  }
 0xf9a   : > { %v6552_v42 = vpop.xlane.xlu1 %6551 }
 0xf9b   : > { %v6600_v47 = vmul.bf16 1069105081, %v6587_v19  ;;  %v6576_v21 = vsub.f32 %v6502_v53, %v6552_v42  ;;  %10181 = vmatpush3.bf16.msra.mxu0 %v10438_v15 }
 0xf9c   : > { %v6554_v17 = vpop.xlane.xlu0 %6553  ;;  %10182 = vmatprep.subr.bf16.mxu0 %v10439_v23 }
 0xf9d   : > { %10793 = vpow.bf16 %v6600_v47  ;;  %v6588_v31 = vpack.c.bf16 %v6576_v21, %v6575_v25  ;;  %v6577_v12 = vsub.f32 %v14024_v11, %v6554_v17 }
 0xf9e   : > { %v6556_v39 = vpop.xlane.xlu1 %6555 }
 0xf9f   : > { %v6603_v46 = vmul.bf16 1069105081, %v6588_v31  ;;  %v6578_v18 = vsub.f32 %v6510_v49, %v6556_v39  ;;  %10183 = vmatpush3.bf16.msra.mxu0 %v10439_v23 }
 0xfa0   : > { %v14073_v28 = vpop.eup %10789  ;;  %v6558_v45 = vpop.xlane.xlu0 %6557  ;;  %10184 = vmatprep.subr.bf16.mxu0 %v10440_v60 }
 0xfa1   : > { %10795 = vpow.bf16 %v6603_v46  ;;  %v6589_v26 = vpack.c.bf16 %v6578_v18, %v6577_v12  ;;  %v6618_v0 = vunpack.c.h.bf16 %v14073_v28  ;;  %v6617_v59 = vunpack.c.l.bf16 %v14073_v28 }
 0xfa2   : > { %v6560_v6 = vpop.xlane.xlu1 %6559  ;;  %v6579_v37 = vsub.f32 %v14033_v27, %v6558_v45 }
 0xfa3   : > { %v6606_v61 = vmul.bf16 1069105081, %v6589_v26  ;;  %v6580_v36 = vsub.f32 %v14038_v52, %v6560_v6  ;;  %6635 = vadd.xlane.f32.xlu1 %v6618_v0  ;;  %6633 = vadd.xlane.f32.xlu0 %v6617_v59 }
 0xfa4   : > { %v14079_v56 = vpop.eup %10791  ;;  %v6562_v24 = vpop.xlane.xlu0 %6561  ;;  %10185 = vmatpush3.bf16.msra.mxu0 %v10440_v60 }
 0xfa5   : > { %10797 = vpow.bf16 %v6606_v61  ;;  %v6590_v53 = vpack.c.bf16 %v6580_v36, %v6579_v37  ;;  %v6620_v29 = vunpack.c.h.bf16 %v14079_v56  ;;  %v6619_v58 = vunpack.c.l.bf16 %v14079_v56  ;;  %10186 = vmatprep.subr.bf16.mxu0 %v10441_v8 }
 0xfa6   : > { %v6564_v35 = vpop.xlane.xlu1 %6563  ;;  %v6581_v3 = vsub.f32 %v14044_v44, %v6562_v24 }
 0xfa7   : > { %v6609_v11 = vmul.bf16 1069105081, %v6590_v53  ;;  %v6582_v32 = vsub.f32 %v14050_v43, %v6564_v35  ;;  %6639 = vadd.xlane.f32.xlu1 %v6620_v29  ;;  %6637 = vadd.xlane.f32.xlu0 %v6619_v58 }
 0xfa8   : > { %v14085_v16 = vpop.eup %10793  ;;  %v6566_v49 = vpop.xlane.xlu0 %6565  ;;  %10187 = vmatpush3.bf16.msra.mxu0 %v10441_v8 }
 0xfa9   : > { %10799 = vpow.bf16 %v6609_v11  ;;  %v6591_v55 = vpack.c.bf16 %v6582_v32, %v6581_v3  ;;  %v6622_v27 = vunpack.c.h.bf16 %v14085_v16  ;;  %v6621_v52 = vunpack.c.l.bf16 %v14085_v16  ;;  %10188 = vmatprep.subr.bf16.mxu0 %v10442_v1 }
 0xfaa   : > { %v6568_v40 = vpop.xlane.xlu1 %6567  ;;  %v6583_v63 = vsub.f32 %v14056_v4, %v6566_v49 }
 0xfab   : > { %v6612_v13 = vmul.bf16 1069105081, %v6591_v55  ;;  %v6584_v7 = vsub.f32 %v14062_v50, %v6568_v40  ;;  %6643 = vadd.xlane.f32.xlu1 %v6622_v27  ;;  %6641 = vadd.xlane.f32.xlu0 %v6621_v52 }
 0xfac   : > { %v14091_v44 = vpop.eup %10795  ;;  %10189 = vmatpush3.bf16.msra.mxu0 %v10442_v1 }
 0xfad   : > { %10801 = vpow.bf16 %v6612_v13  ;;  %v6592_v41 = vpack.c.bf16 %v6584_v7, %v6583_v63  ;;  %v6624_v34 = vunpack.c.h.bf16 %v14091_v44  ;;  %v6623_v9 = vunpack.c.l.bf16 %v14091_v44  ;;  %10190 = vmatprep.subr.bf16.mxu0 %v10443_v10 }
 0xfaf   : > { %v6615_v43 = vmul.bf16 1069105081, %v6592_v41  ;;  %6647 = vadd.xlane.f32.xlu1 %v6624_v34  ;;  %6645 = vadd.xlane.f32.xlu0 %v6623_v9 }
 0xfb0   : > { %v14095_v33 = vpop.eup %10797  ;;  %10191 = vmatpush3.bf16.msra.mxu0 %v10443_v10 }
 0xfb1   : > { %10803 = vpow.bf16 %v6615_v43  ;;  %v6626_v4 = vunpack.c.h.bf16 %v14095_v33  ;;  %v6625_v38 = vunpack.c.l.bf16 %v14095_v33 }
 0xfb3   : > { %6651 = vadd.xlane.f32.xlu1 %v6626_v4  ;;  %6649 = vadd.xlane.f32.xlu0 %v6625_v38 }
 0xfb4   : > { %v14099_v50 = vpop.eup %10799 }
 0xfb5   : > { %v6628_v20 = vunpack.c.h.bf16 %v14099_v50  ;;  %v6627_v62 = vunpack.c.l.bf16 %v14099_v50 }
 0xfb7   : > { %6655 = vadd.xlane.f32.xlu1 %v6628_v20  ;;  %6653 = vadd.xlane.f32.xlu0 %v6627_v62 }
 0xfb8   : > { %v14103_v14 = vpop.eup %10801 }
 0xfb9   : > { %v6630_v30 = vunpack.c.h.bf16 %v14103_v14  ;;  %v6629_v5 = vunpack.c.l.bf16 %v14103_v14 }
 0xfbb   : > { %6659 = vadd.xlane.f32.xlu1 %v6630_v30  ;;  %6657 = vadd.xlane.f32.xlu0 %v6629_v5 }
 0xfbc   : > { %v14107_v48 = vpop.eup %10803 }
 0xfbd   : > { %v6632_v51 = vunpack.c.h.bf16 %v14107_v48  ;;  %v6631_v2 = vunpack.c.l.bf16 %v14107_v48 }
 0xfbf   : > { %6663 = vadd.xlane.f32.xlu1 %v6632_v51  ;;  %6661 = vadd.xlane.f32.xlu0 %v6631_v2 }
0x1030   : > { %v6636_v57 = vpop.xlane.xlu1 %6635  ;;  %v6634_v22 = vpop.xlane.xlu0 %6633 }
0x1031   : > { %v6665_v19 = vpack.c.bf16 %v6636_v57, %v6634_v22 }
0x1033   : > { %v6673_v42 = vunpack.c.l.bf16 %v6665_v19  ;;  %v6674_v47 = vunpack.c.h.bf16 %v6665_v19 }
0x1034   : > { %v6640_v25 = vpop.xlane.xlu1 %6639  ;;  %v6638_v21 = vpop.xlane.xlu0 %6637 }
0x1035   : > { %10805 = vrcp.f32 %v6673_v42  ;;  %v6666_v17 = vpack.c.bf16 %v6640_v25, %v6638_v21 }
0x1036   : > { %10807 = vrcp.f32 %v6674_v47 }
0x1037   : > { %v6675_v31 = vunpack.c.l.bf16 %v6666_v17  ;;  %v6676_v39 = vunpack.c.h.bf16 %v6666_v17 }
0x1038   : > { %v6644_v46 = vpop.xlane.xlu1 %6643  ;;  %v6642_v12 = vpop.xlane.xlu0 %6641 }
0x1039   : > { %10809 = vrcp.f32 %v6675_v31  ;;  %v6667_v18 = vpack.c.bf16 %v6644_v46, %v6642_v12 }
0x103a   : > { %10811 = vrcp.f32 %v6676_v39 }
0x103b   : > { %v6677_v45 = vunpack.c.l.bf16 %v6667_v18  ;;  %v6678_v26 = vunpack.c.h.bf16 %v6667_v18  ;;  %v10448_v18 = vld [vmem:[%s14559_s14 + $0x18] sm:$0xff]  }
0x103c   : > { %v6648_v0 = vpop.xlane.xlu1 %6647  ;;  %v6646_v6 = vpop.xlane.xlu0 %6645 }
0x103d   : > { %10813 = vrcp.f32 %v6677_v45  ;;  %v6668_v59 = vpack.c.bf16 %v6648_v0, %v6646_v6  ;;  %v10449_v45 = vld [vmem:[%s14559_s14 + $0x20] sm:$0xff]  }
0x103e   : > { %10815 = vrcp.f32 %v6678_v26  ;;  %v10450_v26 = vld [vmem:[%s14559_s14 + $0x28] sm:$0xff]  }
0x103f   : > { %v10806_v61 = vpop.eup %10805  ;;  %v6679_v37 = vunpack.c.l.bf16 %v6668_v59  ;;  %v6680_v36 = vunpack.c.h.bf16 %v6668_v59 }
0x1040   : > { %v6652_v24 = vpop.xlane.xlu1 %6651  ;;  %v10808_v53 = vpop.eup %10807 }
0x1041   : > { %v6650_v29 = vpop.xlane.xlu0 %6649  ;;  %10817 = vrcp.f32 %v6679_v37  ;;  %v6705_v58 = vpack.c.bf16 %v10808_v53, %v10806_v61 }
0x1042   : > { %v6669_v35 = vpack.c.bf16 %v6652_v24, %v6650_v29  ;;  %10819 = vrcp.f32 %v6680_v36 }
0x1043   : > { %v10810_v11 = vpop.eup %10809  ;;  %v6713_v55 = vmul.bf16 %v14073_v28, %v6705_v58 }
0x1044   : > { %v6681_v3 = vunpack.c.l.bf16 %v6669_v35  ;;  %v6682_v32 = vunpack.c.h.bf16 %v6669_v35  ;;  %v6656_v49 = vpop.xlane.xlu1 %6655  ;;  %v10812_v27 = vpop.eup %10811 }
0x1045   : > { %v6654_v40 = vpop.xlane.xlu0 %6653  ;;  %10098 = vmatprep.mubr.bf16.mxu1 %v6713_v55  ;;  %v6706_v13 = vpack.c.bf16 %v10812_v27, %v10810_v11 }
0x1046   : > { %10821 = vrcp.f32 %v6681_v3  ;;  %v6670_v52 = vpack.c.bf16 %v6656_v49, %v6654_v40 }
0x1047   : > { %10823 = vrcp.f32 %v6682_v32  ;;  %v10814_v63 = vpop.eup %10813  ;;  %v6714_v9 = vmul.bf16 %v14079_v56, %v6706_v13 }
0x1048   : > { %v6683_v7 = vunpack.c.l.bf16 %v6670_v52  ;;  %v6684_v41 = vunpack.c.h.bf16 %v6670_v52  ;;  %v6660_v34 = vpop.xlane.xlu1 %6659  ;;  %v10816_v43 = vpop.eup %10815 }
0x1049   : > { %v6658_v4 = vpop.xlane.xlu0 %6657  ;;  %10099 = vmatmul.mubr.bf16.vlgmr.msra.gmra.mrb[176].mxu1 %v6714_v9  ;;  %v6707_v20 = vpack.c.bf16 %v10816_v43, %v10814_v63  ;;  %v10451_v9 = vld [vmem:[%s14559_s14 + $0x30] sm:$0xff]   ;;  %v10452_v43 = vld [vmem:[%s14559_s14 + $0x38] sm:$0xff]  }
0x104a   : > { %10825 = vrcp.f32 %v6683_v7  ;;  %v6671_v38 = vpack.c.bf16 %v6660_v34, %v6658_v4 }
0x104b   : > { %10827 = vrcp.f32 %v6684_v41  ;;  %v10818_v28 = vpop.eup %10817  ;;  %v6715_v51 = vmul.bf16 %v14085_v16, %v6707_v20 }
0x104c   : > { %v6685_v62 = vunpack.c.l.bf16 %v6671_v38  ;;  %v6686_v30 = vunpack.c.h.bf16 %v6671_v38  ;;  %v6664_v5 = vpop.xlane.xlu1 %6663  ;;  %v10820_v2 = vpop.eup %10819  ;;  %v8449_v38 = vld [vmem:[%s14558_s13] ss:$0 sm:$0xff] }
0x104d   : > { %v6662_v54 = vpop.xlane.xlu0 %6661  ;;  %10102 = vmatprep.mubr.bf16.mxu1 %v6715_v51  ;;  %v6708_v23 = vpack.c.bf16 %v10820_v2, %v10818_v28 }
0x104e   : > { %10829 = vrcp.f32 %v6685_v62  ;;  %v6672_v15 = vpack.c.bf16 %v6664_v5, %v6662_v54 }
0x104f   : > { %10831 = vrcp.f32 %v6686_v30  ;;  %v6716_v1 = vmul.bf16 %v14091_v44, %v6708_v23 }
0x1050   : > { %v10822_v56 = vpop.eup %10821  ;;  %v6687_v60 = vunpack.c.l.bf16 %v6672_v15  ;;  %v6688_v8 = vunpack.c.h.bf16 %v6672_v15 }
0x1051   : > { %v10824_v10 = vpop.eup %10823  ;;  %10103 = vmatmul.mubr.bf16.gmra.mrb[180].mxu1 %v6716_v1 }
0x1052   : > { %10833 = vrcp.f32 %v6687_v60  ;;  %v6709_v57 = vpack.c.bf16 %v10824_v10, %v10822_v56 }
0x1053   : > { %10835 = vrcp.f32 %v6688_v8 }
0x1054   : > { %v10826_v22 = vpop.eup %10825  ;;  %v6717_v16 = vmul.bf16 %v14095_v33, %v6709_v57  ;;  %v10444_v33 = vld [vmem:[%s14557_s12 + $0x38] sm:$0xff]  }
0x1055   : > { %v10828_v19 = vpop.eup %10827  ;;  %10192 = vmatprep.subr.bf16.mxu0 %v10444_v33 }
0x1056   : > { %10106 = vmatprep.mubr.bf16.mxu1 %v6717_v16  ;;  %v6710_v42 = vpack.c.bf16 %v10828_v19, %v10826_v22  ;;  %10193 = vmatpush3.bf16.msra.mxu0 %v10444_v33 }
0x1058   : > { %v10830_v47 = vpop.eup %10829  ;;  %v6718_v25 = vmul.bf16 %v14099_v50, %v6710_v42  ;;  %v10445_v50 = vld [vmem:[%s14559_s14] sm:$0xff]  }
0x1059   : > { %v10832_v21 = vpop.eup %10831  ;;  %10210 = vmatprep.subr.bf16.mxu1 %v10445_v50 }
0x105a   : > { %10107 = vmatmul.mubr.bf16.gmra.mrb[184].mxu1 %v6718_v25  ;;  %v6711_v17 = vpack.c.bf16 %v10832_v21, %v10830_v47 }
0x105b   : > { %10211 = vmatpush3.bf16.msra.mxu1 %v10445_v50 }
0x105c   : > { %v10834_v31 = vpop.eup %10833  ;;  %v6719_v44 = vmul.bf16 %v14103_v14, %v6711_v17  ;;  %v10446_v14 = vld [vmem:[%s14559_s14 + $0x8] sm:$0xff]  }
0x105d   : > { %v10836_v39 = vpop.eup %10835  ;;  %10212 = vmatprep.subr.bf16.mxu1 %v10446_v14 }
0x105e   : > { %10110 = vmatprep.mubr.bf16.mxu1 %v6719_v44  ;;  %v6712_v46 = vpack.c.bf16 %v10836_v39, %v10834_v31 }
0x105f   : > { %10213 = vmatpush3.bf16.msra.mxu1 %v10446_v14 }
0x1060   : > { %v6720_v12 = vmul.bf16 %v14107_v48, %v6712_v46  ;;  %v10447_v48 = vld [vmem:[%s14559_s14 + $0x10] sm:$0xff]  }
0x1061   : > { %10214 = vmatprep.subr.bf16.mxu1 %v10447_v48 }
0x1062   : > { %10111 = vmatmul.mubr.bf16.gmra.mrb[188].mxu1 %v6720_v12 }
0x1063   : > { %10215 = vmatpush3.bf16.msra.mxu1 %v10447_v48 }
0x1064   : > { %10216 = vmatprep.subr.bf16.mxu1 %v10448_v18 }
0x1067   : > { %10217 = vmatpush3.bf16.msra.mxu1 %v10448_v18 }
0x1068   : > { %10218 = vmatprep.subr.bf16.mxu1 %v10449_v45 }
0x106b   : > { %10219 = vmatpush3.bf16.msra.mxu1 %v10449_v45 }
0x106c   : > { %10220 = vmatprep.subr.bf16.mxu1 %v10450_v26 }
0x106f   : > { %10221 = vmatpush3.bf16.msra.mxu1 %v10450_v26 }
0x1070   : > { %10222 = vmatprep.subr.bf16.mxu1 %v10451_v9 }
0x1073   : > { %10223 = vmatpush3.bf16.msra.mxu1 %v10451_v9 }
0x1074   : > { %10224 = vmatprep.subr.bf16.mxu1 %v10452_v43 }
0x1077   : > { %10225 = vmatpush3.bf16.msra.mxu1 %v10452_v43 }
0x111c   : > { %v10100_v0 = vpop.f32.mrb[176].mxu1 }
0x111d   : > { %v6931_v6 = vpop.f32.mrb[177].mxu1 }
0x111e   : > { %v10101_v59 = vpop.f32.mrb[178].mxu1 }
0x111f   : > { %v7011_v61 = vpack.c.bf16 %v10101_v59, %v10100_v0  ;;  %v6934_v37 = vpop.f32.mrb[179].mxu1 }
0x1120   : > { %v7010_v36 = vpack.c.bf16 %v6934_v37, %v6931_v6 }
0x1122   : > { %10194 = vmatprep.mubr.bf16.mxu0 %v7010_v36  ;;  %v14178_v36 = vld [vmem:[%s14548_s3] ss:$0 sm:$0xff] }
0x1123   : > { %10195 = vmatmul.mubr.bf16.vlgmr.msra.gmra.mrb[240].mxu0 %v7011_v61  ;;  %v14173_v61 = vld [vmem:[%s14560_s15] ss:$0 sm:$0xff] }
0x1124   : > { %v10104_v24 = vpop.f32.mrb[180].mxu1 }
0x1125   : > { %v6947_v53 = vpop.f32.mrb[181].mxu1 }
0x1126   : > { %v10105_v29 = vpop.f32.mrb[182].mxu1 }
0x1127   : > { %v7013_v35 = vpack.c.bf16 %v10105_v29, %v10104_v24  ;;  %v6950_v58 = vpop.f32.mrb[183].mxu1 }
0x1128   : > { %v7012_v11 = vpack.c.bf16 %v6950_v58, %v6947_v53 }
0x112a   : > { %10198 = vmatprep.mubr.bf16.mxu0 %v7012_v11 }
0x112b   : > { %10199 = vmatmul.mubr.bf16.gmra.mrb[244].mxu0 %v7013_v35 }
0x112d   : > { %v10108_v3 = vpop.f32.mrb[184].mxu1 }
0x112e   : > { %v6963_v32 = vpop.f32.mrb[185].mxu1 }
0x112f   : > { %v10109_v49 = vpop.f32.mrb[186].mxu1 }
0x1130   : > { %v7015_v55 = vpack.c.bf16 %v10109_v49, %v10108_v3  ;;  %v6966_v27 = vpop.f32.mrb[187].mxu1  ;;  %v14191_v3 = vld [vmem:[%s14548_s3 + $0x1] ss:$0 sm:$0xff] }
0x1131   : > { %v7014_v40 = vpack.c.bf16 %v6966_v27, %v6963_v32 }
0x1133   : > { %10202 = vmatprep.mubr.bf16.mxu0 %v7014_v40 }
0x1134   : > { %10203 = vmatmul.mubr.bf16.gmra.mrb[248].mxu0 %v7015_v55 }
0x1135   : > { %v10112_v52 = vpop.f32.mrb[188].mxu1 }
0x1136   : > { %v6979_v13 = vpop.f32.mrb[189].mxu1 }
0x1137   : > { %v10113_v63 = vpop.f32.mrb[190].mxu1 }
0x1138   : > { %v7017_v7 = vpack.c.bf16 %v10113_v63, %v10112_v52  ;;  %v6982_v41 = vpop.f32.mrb[191].mxu1 }
0x1139   : > { %v7016_v34 = vpack.c.bf16 %v6982_v41, %v6979_v13 }
0x113b   : > { %10206 = vmatprep.mubr.bf16.mxu0 %v7016_v34 }
0x113c   : > { %10207 = vmatmul.mubr.bf16.gmra.mrb[252].mxu0 %v7017_v7 }
0x11f6   : > { %v10196_v4 = vpop.f32.mrb[240].mxu0 }
0x11f7   : > { %v7438_v20 = vpop.f32.mrb[241].mxu0  ;;  %v7526_v62 = vadd.f32 %v10196_v4, %v8449_v38 }
0x11f8   : > { %v10197_v28 = vpop.f32.mrb[242].mxu0  ;;  %v7524_v51 = vadd.f32 %v8449_v38, %v7438_v20 }
0x11f9   : > { %v7527_v30 = vadd.f32 %v10197_v28, %v8449_v38  ;;  %v7441_v5 = vpop.f32.mrb[243].mxu0 }
0x11fa   : > { %v7525_v2 = vadd.f32 %v8449_v38, %v7441_v5 }
0x11fb   : > { %v7541_v54 = vpack.c.bf16 %v7527_v30, %v7526_v62 }
0x11fc   : > { %v7540_v15 = vpack.c.bf16 %v7525_v2, %v7524_v51 }
0x11fe   : > { %v10200_v23 = vpop.f32.mrb[244].mxu0  ;;  %10226 = vmatprep.mubr.bf16.mxu1 %v7540_v15 }
0x11ff   : > { %v7454_v56 = vpop.f32.mrb[245].mxu0  ;;  %10227 = vmatmul.mubr.bf16.vlgmr.msra.gmra.mrb[224].mxu1 %v7541_v54  ;;  %v7530_v8 = vadd.f32 %v10200_v23, %v8449_v38 }
0x1200   : > { %v10201_v60 = vpop.f32.mrb[246].mxu0  ;;  %v7528_v57 = vadd.f32 %v8449_v38, %v7454_v56 }
0x1201   : > { %v7531_v1 = vadd.f32 %v10201_v60, %v8449_v38  ;;  %v7457_v10 = vpop.f32.mrb[247].mxu0 }
0x1202   : > { %v7529_v22 = vadd.f32 %v8449_v38, %v7457_v10 }
0x1203   : > { %v7543_v16 = vpack.c.bf16 %v7531_v1, %v7530_v8 }
0x1204   : > { %v7542_v19 = vpack.c.bf16 %v7529_v22, %v7528_v57 }
0x1206   : > { %10230 = vmatprep.mubr.bf16.mxu1 %v7542_v19 }
0x1207   : > { %v10204_v42 = vpop.f32.mrb[248].mxu0  ;;  %10231 = vmatmul.mubr.bf16.gmra.mrb[228].mxu1 %v7543_v16 }
0x1208   : > { %v7470_v47 = vpop.f32.mrb[249].mxu0  ;;  %v7534_v21 = vadd.f32 %v10204_v42, %v8449_v38 }
0x1209   : > { %v10205_v25 = vpop.f32.mrb[250].mxu0  ;;  %v7532_v44 = vadd.f32 %v8449_v38, %v7470_v47 }
0x120a   : > { %v7535_v17 = vadd.f32 %v10205_v25, %v8449_v38  ;;  %v7473_v31 = vpop.f32.mrb[251].mxu0 }
0x120b   : > { %v7533_v39 = vadd.f32 %v8449_v38, %v7473_v31 }
0x120c   : > { %v7545_v46 = vpack.c.bf16 %v7535_v17, %v7534_v21 }
0x120d   : > { %v7544_v12 = vpack.c.bf16 %v7533_v39, %v7532_v44 }
0x120f   : > { %v10208_v33 = vpop.f32.mrb[252].mxu0  ;;  %10234 = vmatprep.mubr.bf16.mxu1 %v7544_v12 }
0x1210   : > { %v7486_v50 = vpop.f32.mrb[253].mxu0  ;;  %10235 = vmatmul.mubr.bf16.gmra.mrb[232].mxu1 %v7545_v46  ;;  %v7538_v48 = vadd.f32 %v10208_v33, %v8449_v38 }
0x1211   : > { %v10209_v14 = vpop.f32.mrb[254].mxu0  ;;  %v7536_v26 = vadd.f32 %v8449_v38, %v7486_v50 }
0x1212   : > { %v7539_v18 = vadd.f32 %v10209_v14, %v8449_v38  ;;  %v7489_v45 = vpop.f32.mrb[255].mxu0 }
0x1213   : > { %v7537_v0 = vadd.f32 %v8449_v38, %v7489_v45 }
0x1214   : > { %v7547_v6 = vpack.c.bf16 %v7539_v18, %v7538_v48 }
0x1215   : > { %v7546_v59 = vpack.c.bf16 %v7537_v0, %v7536_v26 }
0x1217   : > { %10238 = vmatprep.mubr.bf16.mxu1 %v7546_v59 }
0x1218   : > { %10239 = vmatmul.mubr.bf16.gmra.mrb[236].mxu1 %v7547_v6 }
0x12d2   : > { %v10228_v37 = vpop.f32.mrb[224].mxu1 }
0x12d3   : > { %v14181_v24 = vadd.f32 %v10228_v37, %v14173_v61  ;;  %v7653_v53 = vpop.f32.mrb[225].mxu1 }
0x12d4   : > { %v10229_v29 = vpop.f32.mrb[226].mxu1  ;;  %v14196_v49 = vadd.f32 %v14173_v61, %v7653_v53 }
0x12d5   : > { %v14184_v35 = vadd.f32 %v10229_v29, %v14173_v61  ;;  %v7656_v58 = vpop.f32.mrb[227].mxu1  ;;  %v7727_v11 = vadd.f32 %v14178_v36, %v14181_v24  ;;  %v7779_v55 = vadd.f32 %v14191_v3, %v14181_v24 }
0x12d6   : > { %v14201_v40 = vadd.f32 %v14173_v61, %v7656_v58  ;;  %v7725_v41 = vadd.f32 %v14178_v36, %v14196_v49  ;;  %v7777_v43 = vadd.f32 %v14191_v3, %v14196_v49 }
0x12d7   : > { %7745 = vmax.xlane.f32.xlu0 %v7727_v11  ;;  %v7728_v32 = vadd.f32 %v14178_v36, %v14184_v35  ;;  %v7780_v13 = vadd.f32 %v14191_v3, %v14184_v35  ;;  %v14305_v11 = vld [vmem:[%s14548_s3 + $0x4] ss:$0 sm:$0xff] }
0x12d8   : > { %v7726_v34 = vadd.f32 %v14178_v36, %v14201_v40  ;;  %v7778_v28 = vadd.f32 %v14191_v3, %v14201_v40 }
0x12d9   : > { %7747 = vmax.xlane.f32.xlu1 %v7728_v32  ;;  %v14310_v32 = vld [vmem:[%s14548_s3 + $0x2] ss:$0 sm:$0xff] }
0x12da   : > { %v10232_v27 = vpop.f32.mrb[228].mxu1 }
0x12db   : > { %7797 = vmax.xlane.f32.xlu0 %v7779_v55  ;;  %v7669_v52 = vpop.f32.mrb[229].mxu1  ;;  %v14210_v9 = vadd.f32 %v10232_v27, %v14173_v61 }
0x12dc   : > { %v10233_v63 = vpop.f32.mrb[230].mxu1  ;;  %v14224_v2 = vadd.f32 %v14173_v61, %v7669_v52 }
0x12dd   : > { %7799 = vmax.xlane.f32.xlu1 %v7780_v13  ;;  %v7672_v7 = vpop.f32.mrb[231].mxu1  ;;  %v14215_v38 = vadd.f32 %v10233_v63, %v14173_v61  ;;  %v7731_v5 = vadd.f32 %v14178_v36, %v14210_v9  ;;  %v7783_v54 = vadd.f32 %v14191_v3, %v14210_v9  ;;  %v7831_v13 = vadd.f32 %v14310_v32, %v14181_v24 }
0x12de   : > { %v14229_v23 = vadd.f32 %v14173_v61, %v7672_v7  ;;  %v7729_v10 = vadd.f32 %v14178_v36, %v14224_v2  ;;  %v7781_v16 = vadd.f32 %v14191_v3, %v14224_v2 }
0x12df   : > { %7741 = vmax.xlane.f32.xlu0 %v7725_v41  ;;  %v7732_v51 = vadd.f32 %v14178_v36, %v14215_v38  ;;  %v7784_v60 = vadd.f32 %v14191_v3, %v14215_v38 }
0x12e0   : > { %v7730_v57 = vadd.f32 %v14178_v36, %v14229_v23  ;;  %v7782_v42 = vadd.f32 %v14191_v3, %v14229_v23 }
0x12e1   : > { %7743 = vmax.xlane.f32.xlu1 %v7726_v34 }
0x12e3   : > { %v10236_v4 = vpop.f32.mrb[232].mxu1  ;;  %7793 = vmax.xlane.f32.xlu0 %v7777_v43  ;;  %v7832_v43 = vadd.f32 %v14310_v32, %v14184_v35 }
0x12e4   : > { %v7685_v20 = vpop.f32.mrb[233].mxu1  ;;  %v14238_v22 = vadd.f32 %v10236_v4, %v14173_v61 }
0x12e5   : > { %v10237_v62 = vpop.f32.mrb[234].mxu1  ;;  %7795 = vmax.xlane.f32.xlu1 %v7778_v28  ;;  %v14252_v21 = vadd.f32 %v14173_v61, %v7685_v20 }
0x12e6   : > { %v7688_v30 = vpop.f32.mrb[235].mxu1  ;;  %v14243_v19 = vadd.f32 %v10237_v62, %v14173_v61  ;;  %v7735_v47 = vadd.f32 %v14178_v36, %v14238_v22  ;;  %v7787_v17 = vadd.f32 %v14191_v3, %v14238_v22 }
0x12e7   : > { %7753 = vmax.xlane.f32.xlu0 %v7731_v5  ;;  %v14257_v31 = vadd.f32 %v14173_v61, %v7688_v30  ;;  %v7733_v39 = vadd.f32 %v14178_v36, %v14252_v21  ;;  %v7785_v33 = vadd.f32 %v14191_v3, %v14252_v21 }
0x12e8   : > { %v7736_v25 = vadd.f32 %v14178_v36, %v14243_v19  ;;  %v7788_v44 = vadd.f32 %v14191_v3, %v14243_v19 }
0x12e9   : > { %7755 = vmax.xlane.f32.xlu1 %v7732_v51  ;;  %v7734_v46 = vadd.f32 %v14178_v36, %v14257_v31  ;;  %v7786_v14 = vadd.f32 %v14191_v3, %v14257_v31 }
0x12eb   : > { %v10240_v15 = vpop.f32.mrb[236].mxu1  ;;  %7805 = vmax.xlane.f32.xlu0 %v7783_v54 }
0x12ec   : > { %v7701_v56 = vpop.f32.mrb[237].mxu1  ;;  %v14266_v12 = vadd.f32 %v10240_v15, %v14173_v61  ;;  %v7829_v15 = vadd.f32 %v14310_v32, %v14196_v49 }
0x12ed   : > { %v10241_v8 = vpop.f32.mrb[238].mxu1  ;;  %7807 = vmax.xlane.f32.xlu1 %v7784_v60  ;;  %v14276_v48 = vadd.f32 %v14173_v61, %v7701_v56 }
0x12ee   : > { %v7704_v1 = vpop.f32.mrb[239].mxu1  ;;  %v14271_v50 = vadd.f32 %v10241_v8, %v14173_v61  ;;  %v7739_v18 = vadd.f32 %v14178_v36, %v14266_v12  ;;  %v7791_v37 = vadd.f32 %v14191_v3, %v14266_v12 }
0x12ef   : > { %7749 = vmax.xlane.f32.xlu0 %v7729_v10  ;;  %v14281_v45 = vadd.f32 %v14173_v61, %v7704_v1  ;;  %v7737_v0 = vadd.f32 %v14178_v36, %v14276_v48  ;;  %v7789_v59 = vadd.f32 %v14191_v3, %v14276_v48  ;;  %v7830_v10 = vadd.f32 %v14310_v32, %v14201_v40 }
0x12f0   : > { %v7740_v26 = vadd.f32 %v14178_v36, %v14271_v50  ;;  %v7792_v53 = vadd.f32 %v14191_v3, %v14271_v50 }
0x12f1   : > { %7751 = vmax.xlane.f32.xlu1 %v7730_v57  ;;  %v7738_v6 = vadd.f32 %v14178_v36, %v14281_v45  ;;  %v7790_v61 = vadd.f32 %v14191_v3, %v14281_v45  ;;  %v14300_v36 = vld [vmem:[%s14548_s3 + $0x3] ss:$0 sm:$0xff] }
0x12f3   : > { %7801 = vmax.xlane.f32.xlu0 %v7781_v16 }
0x12f5   : > { %7803 = vmax.xlane.f32.xlu1 %v7782_v42 }
0x12f7   : > { %7761 = vmax.xlane.f32.xlu0 %v7735_v47 }
0x12f9   : > { %7763 = vmax.xlane.f32.xlu1 %v7736_v25 }
0x12fb   : > { %7813 = vmax.xlane.f32.xlu0 %v7787_v17 }
0x12fd   : > { %7815 = vmax.xlane.f32.xlu1 %v7788_v44 }
0x12ff   : > { %7757 = vmax.xlane.f32.xlu0 %v7733_v39 }
0x1301   : > { %7759 = vmax.xlane.f32.xlu1 %v7734_v46  ;;  %v7835_v46 = vadd.f32 %v14310_v32, %v14210_v9 }
0x1303   : > { %7809 = vmax.xlane.f32.xlu0 %v7785_v33 }
0x1305   : > { %7811 = vmax.xlane.f32.xlu1 %v7786_v14 }
0x1307   : > { %7769 = vmax.xlane.f32.xlu0 %v7739_v18 }
0x1309   : > { %7771 = vmax.xlane.f32.xlu1 %v7740_v26 }
0x130b   : > { %7765 = vmax.xlane.f32.xlu0 %v7737_v0 }
0x130d   : > { %7767 = vmax.xlane.f32.xlu1 %v7738_v6 }
0x130f   : > { %7817 = vmax.xlane.f32.xlu0 %v7789_v59 }
0x1311   : > { %7819 = vmax.xlane.f32.xlu1 %v7790_v61  ;;  %v7836_v61 = vadd.f32 %v14310_v32, %v14215_v38 }
0x1313   : > { %7821 = vmax.xlane.f32.xlu0 %v7791_v37 }
0x1315   : > { %7823 = vmax.xlane.f32.xlu1 %v7792_v53 }
0x1364   : > { %v7746_v29 = vpop.xlane.xlu0 %7745 }
0x1365   : > { %v7851_v3 = vmul.f32 %v14300_v36, %v7746_v29 }
0x1366   : > { %v7748_v58 = vpop.xlane.xlu1 %7747 }
0x1367   : > { %v7852_v63 = vmul.f32 %v14300_v36, %v7748_v58 }
0x1368   : > { %v7798_v55 = vpop.xlane.xlu0 %7797 }
0x1369   : > { %v7871_v27 = vmul.f32 %v14305_v11, %v7798_v55 }
0x136a   : > { %v7800_v52 = vpop.xlane.xlu1 %7799 }
0x136b   : > { %v7887_v7 = vadd.f32 %v7871_v27, %v7851_v3  ;;  %v7872_v41 = vmul.f32 %v14305_v11, %v7800_v52 }
0x136c   : > { %v7742_v34 = vpop.xlane.xlu0 %7741 }
0x136d   : > { %v7903_v4 = vsub.f32 %v7831_v13, %v7887_v7  ;;  %v7888_v20 = vadd.f32 %v7872_v41, %v7852_v63  ;;  %v7849_v54 = vmul.f32 %v14300_v36, %v7742_v34  ;;  %v7833_v63 = vadd.f32 %v14310_v32, %v14224_v2 }
0x136e   : > { %v7744_v28 = vpop.xlane.xlu1 %7743  ;;  %v7834_v2 = vadd.f32 %v14310_v32, %v14229_v23 }
0x136f   : > { %v7921_v62 = vmul.f32 1.442695, %v7903_v4  ;;  %v7904_v30 = vsub.f32 %v7832_v43, %v7888_v20  ;;  %v7850_v60 = vmul.f32 %v14300_v36, %v7744_v28 }
0x1370   : > { %v7794_v5 = vpop.xlane.xlu0 %7793 }
0x1371   : > { %10837 = vpow2.f32 %v7921_v62  ;;  %v7923_v51 = vmul.f32 1.442695, %v7904_v30  ;;  %v7869_v24 = vmul.f32 %v14305_v11, %v7794_v5 }
0x1372   : > { %v7796_v56 = vpop.xlane.xlu1 %7795 }
0x1373   : > { %10839 = vpow2.f32 %v7923_v51  ;;  %v7885_v35 = vadd.f32 %v7869_v24, %v7849_v54  ;;  %v7870_v8 = vmul.f32 %v14305_v11, %v7796_v56 }
0x1374   : > { %v7754_v1 = vpop.xlane.xlu0 %7753 }
0x1375   : > { %v7901_v57 = vsub.f32 %v7829_v15, %v7885_v35  ;;  %v7886_v16 = vadd.f32 %v7870_v8, %v7850_v60  ;;  %v7855_v49 = vmul.f32 %v14300_v36, %v7754_v1 }
0x1376   : > { %v7756_v42 = vpop.xlane.xlu1 %7755 }
0x1377   : > { %v7917_v47 = vmul.f32 1.442695, %v7901_v57  ;;  %v7902_v25 = vsub.f32 %v7830_v10, %v7886_v16  ;;  %v7856_v40 = vmul.f32 %v14300_v36, %v7756_v42  ;;  %v7839_v10 = vadd.f32 %v14310_v32, %v14238_v22 }
0x1378   : > { %v7806_v17 = vpop.xlane.xlu0 %7805  ;;  %v7840_v22 = vadd.f32 %v14310_v32, %v14243_v19 }
0x1379   : > { %10841 = vpow2.f32 %v7917_v47  ;;  %v7919_v44 = vmul.f32 1.442695, %v7902_v25  ;;  %v7875_v39 = vmul.f32 %v14305_v11, %v7806_v17 }
0x137a   : > { %v7808_v33 = vpop.xlane.xlu1 %7807 }
0x137b   : > { %v14332_v14 = vpop.eup %10837  ;;  %10843 = vpow2.f32 %v7919_v44  ;;  %v7891_v18 = vadd.f32 %v7875_v39, %v7855_v49  ;;  %v7876_v26 = vmul.f32 %v14305_v11, %v7808_v33 }
0x137c   : > { %v7750_v0 = vpop.xlane.xlu0 %7749  ;;  %v7951_v6 = vmul.f32 %v14332_v14, %v14300_v36  ;;  %v7999_v27 = vmul.f32 %v14332_v14, %v14305_v11 }
0x137d   : > { %v14338_v59 = vpop.eup %10839  ;;  %v7907_v37 = vsub.f32 %v7835_v46, %v7891_v18  ;;  %v7892_v9 = vadd.f32 %v7876_v26, %v7856_v40  ;;  %v7853_v13 = vmul.f32 %v14300_v36, %v7750_v0 }
0x137e   : > { %v7752_v53 = vpop.xlane.xlu1 %7751  ;;  %7969 = vadd.xlane.f32.xlu0 %v7951_v6  ;;  %v7952_v29 = vmul.f32 %v14338_v59, %v14300_v36  ;;  %v8000_v41 = vmul.f32 %v14338_v59, %v14305_v11 }
0x137f   : > { %v7929_v58 = vmul.f32 1.442695, %v7907_v37  ;;  %v7908_v55 = vsub.f32 %v7836_v61, %v7892_v9  ;;  %v7854_v43 = vmul.f32 %v14300_v36, %v7752_v53  ;;  %v7837_v53 = vadd.f32 %v14310_v32, %v14252_v21 }
0x1380   : > { %v7802_v3 = vpop.xlane.xlu0 %7801  ;;  %7971 = vadd.xlane.f32.xlu1 %v7952_v29  ;;  %v7838_v21 = vadd.f32 %v14310_v32, %v14257_v31 }
0x1381   : > { %10845 = vpow2.f32 %v7929_v58  ;;  %v7931_v52 = vmul.f32 1.442695, %v7908_v55  ;;  %v7873_v38 = vmul.f32 %v14305_v11, %v7802_v3 }
0x1382   : > { %v7804_v7 = vpop.xlane.xlu1 %7803  ;;  %8017 = vadd.xlane.f32.xlu0 %v7999_v27 }
0x1383   : > { %v14352_v34 = vpop.eup %10841  ;;  %10847 = vpow2.f32 %v7931_v52  ;;  %v7889_v4 = vadd.f32 %v7873_v38, %v7853_v13  ;;  %v7874_v20 = vmul.f32 %v14305_v11, %v7804_v7 }
0x1384   : > { %v7762_v28 = vpop.xlane.xlu0 %7761  ;;  %8019 = vadd.xlane.f32.xlu1 %v8000_v41  ;;  %v7949_v62 = vmul.f32 %v14352_v34, %v14300_v36  ;;  %v7997_v35 = vmul.f32 %v14352_v34, %v14305_v11 }
0x1385   : > { %v14358_v30 = vpop.eup %10843  ;;  %v7905_v5 = vsub.f32 %v7833_v63, %v7889_v4  ;;  %v7890_v51 = vadd.f32 %v7874_v20, %v7854_v43  ;;  %v7859_v1 = vmul.f32 %v14300_v36, %v7762_v28 }
0x1386   : > { %v7764_v54 = vpop.xlane.xlu1 %7763  ;;  %7965 = vadd.xlane.f32.xlu0 %v7949_v62  ;;  %v7950_v24 = vmul.f32 %v14358_v30, %v14300_v36  ;;  %v7998_v16 = vmul.f32 %v14358_v30, %v14305_v11 }
0x1387   : > { %v7925_v15 = vmul.f32 1.442695, %v7905_v5  ;;  %v7906_v56 = vsub.f32 %v7834_v2, %v7890_v51  ;;  %v7860_v47 = vmul.f32 %v14300_v36, %v7764_v54 }
0x1388   : > { %v7814_v60 = vpop.xlane.xlu0 %7813  ;;  %7967 = vadd.xlane.f32.xlu1 %v7950_v24 }
0x1389   : > { %10849 = vpow2.f32 %v7925_v15  ;;  %v7927_v8 = vmul.f32 1.442695, %v7906_v56  ;;  %v7879_v23 = vmul.f32 %v14305_v11, %v7814_v60 }
0x138a   : > { %v7816_v57 = vpop.xlane.xlu1 %7815  ;;  %8013 = vadd.xlane.f32.xlu0 %v7997_v35 }
0x138b   : > { %v14372_v42 = vpop.eup %10845  ;;  %10851 = vpow2.f32 %v7927_v8  ;;  %v7895_v25 = vadd.f32 %v7879_v23, %v7859_v1  ;;  %v7880_v17 = vmul.f32 %v14305_v11, %v7816_v57 }
0x138c   : > { %v7758_v44 = vpop.xlane.xlu0 %7757  ;;  %8015 = vadd.xlane.f32.xlu1 %v7998_v16  ;;  %v7955_v49 = vmul.f32 %v14372_v42, %v14300_v36  ;;  %v8003_v61 = vmul.f32 %v14372_v42, %v14305_v11  ;;  %v7841_v16 = vadd.f32 %v14310_v32, %v14276_v48 }
0x138d   : > { %v14378_v39 = vpop.eup %10847  ;;  %v7911_v46 = vsub.f32 %v7839_v10, %v7895_v25  ;;  %v7896_v33 = vadd.f32 %v7880_v17, %v7860_v47  ;;  %v7857_v9 = vmul.f32 %v14300_v36, %v7758_v44 }
0x138e   : > { %v7760_v40 = vpop.xlane.xlu1 %7759  ;;  %7977 = vadd.xlane.f32.xlu0 %v7955_v49  ;;  %v7956_v18 = vmul.f32 %v14378_v39, %v14300_v36  ;;  %v8004_v58 = vmul.f32 %v14378_v39, %v14305_v11 }
0x138f   : > { %v7937_v26 = vmul.f32 1.442695, %v7911_v46  ;;  %v7912_v0 = vsub.f32 %v7840_v22, %v7896_v33  ;;  %v7858_v3 = vmul.f32 %v14300_v36, %v7760_v40  ;;  %v7843_v22 = vadd.f32 %v14310_v32, %v14266_v12 }
0x1390   : > { %v7810_v6 = vpop.xlane.xlu0 %7809  ;;  %7979 = vadd.xlane.f32.xlu1 %v7956_v18  ;;  %v7842_v18 = vadd.f32 %v14310_v32, %v14281_v45 }
0x1391   : > { %10853 = vpow2.f32 %v7937_v26  ;;  %v7939_v37 = vmul.f32 1.442695, %v7912_v0  ;;  %v7877_v19 = vmul.f32 %v14305_v11, %v7810_v6 }
0x1392   : > { %v7812_v29 = vpop.xlane.xlu1 %7811  ;;  %8025 = vadd.xlane.f32.xlu0 %v8003_v61 }
0x1393   : > { %v14392_v55 = vpop.eup %10849  ;;  %10855 = vpow2.f32 %v7939_v37  ;;  %v7893_v27 = vadd.f32 %v7877_v19, %v7857_v9  ;;  %v7878_v52 = vmul.f32 %v14305_v11, %v7812_v29  ;;  %v7844_v37 = vadd.f32 %v14310_v32, %v14271_v50 }
0x1394   : > { %v7770_v13 = vpop.xlane.xlu0 %7769  ;;  %8027 = vadd.xlane.f32.xlu1 %v8004_v58  ;;  %v7953_v38 = vmul.f32 %v14392_v55, %v14300_v36  ;;  %v8001_v2 = vmul.f32 %v14392_v55, %v14305_v11 }
0x1395   : > { %v14398_v63 = vpop.eup %10851  ;;  %v7909_v7 = vsub.f32 %v7837_v53, %v7893_v27  ;;  %v7894_v41 = vadd.f32 %v7878_v52, %v7858_v3  ;;  %v7863_v17 = vmul.f32 %v14300_v36, %v7770_v13 }
0x1396   : > { %v7772_v43 = vpop.xlane.xlu1 %7771  ;;  %7973 = vadd.xlane.f32.xlu0 %v7953_v38  ;;  %v7954_v4 = vmul.f32 %v14398_v63, %v14300_v36  ;;  %v8002_v31 = vmul.f32 %v14398_v63, %v14305_v11 }
0x1397   : > { %v7933_v20 = vmul.f32 1.442695, %v7909_v7  ;;  %v7910_v28 = vsub.f32 %v7838_v21, %v7894_v41  ;;  %v7864_v26 = vmul.f32 %v14300_v36, %v7772_v43 }
0x1398   : > { %7975 = vadd.xlane.f32.xlu1 %v7954_v4  ;;  %v7766_v62 = vpop.xlane.xlu0 %7765 }
0x1399   : > { %10857 = vpow2.f32 %v7933_v20  ;;  %v7935_v5 = vmul.f32 1.442695, %v7910_v28  ;;  %v7861_v60 = vmul.f32 %v14300_v36, %v7766_v62 }
0x139a   : > { %v7768_v51 = vpop.xlane.xlu1 %7767  ;;  %8021 = vadd.xlane.f32.xlu0 %v8001_v2 }
0x139b   : > { %v14408_v54 = vpop.eup %10853  ;;  %10859 = vpow2.f32 %v7935_v5  ;;  %v7862_v23 = vmul.f32 %v14300_v36, %v7768_v51 }
0x139c   : > { %8023 = vadd.xlane.f32.xlu1 %v8002_v31  ;;  %v7818_v24 = vpop.xlane.xlu0 %7817  ;;  %v7959_v15 = vmul.f32 %v14408_v54, %v14300_v36  ;;  %v8007_v25 = vmul.f32 %v14408_v54, %v14305_v11 }
0x139d   : > { %v14412_v56 = vpop.eup %10855  ;;  %v7881_v35 = vmul.f32 %v14305_v11, %v7818_v24 }
0x139e   : > { %v7820_v8 = vpop.xlane.xlu1 %7819  ;;  %7985 = vadd.xlane.f32.xlu0 %v7959_v15  ;;  %v7960_v1 = vmul.f32 %v14412_v56, %v14300_v36  ;;  %v8008_v40 = vmul.f32 %v14412_v56, %v14305_v11 }
0x139f   : > { %v7897_v10 = vadd.f32 %v7881_v35, %v7861_v60  ;;  %v7882_v57 = vmul.f32 %v14305_v11, %v7820_v8 }
0x13a0   : > { %7987 = vadd.xlane.f32.xlu1 %v7960_v1  ;;  %v7822_v47 = vpop.xlane.xlu0 %7821 }
0x13a1   : > { %v7898_v44 = vadd.f32 %v7882_v57, %v7862_v23  ;;  %v7883_v49 = vmul.f32 %v14305_v11, %v7822_v47  ;;  %v7913_v46 = vsub.f32 %v7841_v16, %v7897_v10 }
0x13a2   : > { %v7824_v33 = vpop.xlane.xlu1 %7823  ;;  %8033 = vadd.xlane.f32.xlu0 %v8007_v25 }
0x13a3   : > { %v14430_v48 = vpop.eup %10857  ;;  %v7899_v0 = vadd.f32 %v7883_v49, %v7863_v17  ;;  %v7884_v6 = vmul.f32 %v14305_v11, %v7824_v33  ;;  %v7914_v9 = vsub.f32 %v7842_v18, %v7898_v44  ;;  %v7941_v29 = vmul.f32 1.442695, %v7913_v46 }
0x13a4   : > { %8035 = vadd.xlane.f32.xlu1 %v8008_v40  ;;  %v7957_v12 = vmul.f32 %v14430_v48, %v14300_v36  ;;  %v8005_v27 = vmul.f32 %v14430_v48, %v14305_v11 }
0x13a5   : > { %v14438_v61 = vpop.eup %10859  ;;  %v7915_v19 = vsub.f32 %v7843_v22, %v7899_v0  ;;  %v7900_v53 = vadd.f32 %v7884_v6, %v7864_v26  ;;  %v7943_v52 = vmul.f32 1.442695, %v7914_v9 }
0x13a6   : > { %7981 = vadd.xlane.f32.xlu0 %v7957_v12  ;;  %v7958_v45 = vmul.f32 %v14438_v61, %v14300_v36  ;;  %v8006_v50 = vmul.f32 %v14438_v61, %v14305_v11 }
0x13a7   : > { %v7945_v58 = vmul.f32 1.442695, %v7915_v19  ;;  %v7916_v3 = vsub.f32 %v7844_v37, %v7900_v53 }
0x13a8   : > { %7983 = vadd.xlane.f32.xlu1 %v7958_v45 }
0x13a9   : > { %10861 = vpow2.f32 %v7945_v58  ;;  %v7947_v13 = vmul.f32 1.442695, %v7916_v3 }
0x13aa   : > { %10863 = vpow2.f32 %v7941_v29  ;;  %8029 = vadd.xlane.f32.xlu0 %v8005_v27 }
0x13ab   : > { %10865 = vpow2.f32 %v7947_v13 }
0x13ac   : > { %8031 = vadd.xlane.f32.xlu1 %v8006_v50  ;;  %10867 = vpow2.f32 %v7943_v52 }
0x13b3   : > { %v14448_v32 = vpop.eup %10861 }
0x13b4   : > { %v14450_v38 = vpop.eup %10863  ;;  %v7963_v21 = vmul.f32 %v14448_v32, %v14300_v36  ;;  %v8011_v2 = vmul.f32 %v14448_v32, %v14305_v11 }
0x13b5   : > { %v14454_v7 = vpop.eup %10865  ;;  %v7961_v4 = vmul.f32 %v14450_v38, %v14300_v36  ;;  %v8009_v28 = vmul.f32 %v14450_v38, %v14305_v11 }
0x13b6   : > { %7993 = vadd.xlane.f32.xlu0 %v7963_v21  ;;  %v7964_v41 = vmul.f32 %v14454_v7, %v14300_v36  ;;  %v14458_v43 = vpop.eup %10867  ;;  %v8012_v5 = vmul.f32 %v14454_v7, %v14305_v11 }
0x13b7   : > { %v7962_v20 = vmul.f32 %v14458_v43, %v14300_v36  ;;  %v8010_v62 = vmul.f32 %v14458_v43, %v14305_v11 }
0x13b8   : > { %7995 = vadd.xlane.f32.xlu1 %v7964_v41 }
0x13ba   : > { %7989 = vadd.xlane.f32.xlu0 %v7961_v4 }
0x13bc   : > { %7991 = vadd.xlane.f32.xlu1 %v7962_v20 }
0x13be   : > { %8037 = vadd.xlane.f32.xlu0 %v8009_v28 }
0x13c0   : > { %8039 = vadd.xlane.f32.xlu1 %v8010_v62 }
0x13c2   : > { %8041 = vadd.xlane.f32.xlu0 %v8011_v2 }
0x13c4   : > { %8043 = vadd.xlane.f32.xlu1 %v8012_v5 }
0x140b   : > { %v7970_v51 = vpop.xlane.xlu0 %7969 }
0x140c   : > { %10869 = vrcp.f32 %v7970_v51 }
0x140d   : > { %v7972_v31 = vpop.xlane.xlu1 %7971 }
0x140e   : > { %10871 = vrcp.f32 %v7972_v31 }
0x140f   : > { %v8018_v24 = vpop.xlane.xlu0 %8017 }
0x1410   : > { %10873 = vrcp.f32 %v8018_v24 }
0x1411   : > { %v8020_v15 = vpop.xlane.xlu1 %8019 }
0x1412   : > { %10875 = vrcp.f32 %v8020_v15 }
0x1413   : > { %v7966_v60 = vpop.xlane.xlu0 %7965 }
0x1414   : > { %10877 = vrcp.f32 %v7966_v60 }
0x1415   : > { %v7968_v35 = vpop.xlane.xlu1 %7967 }
0x1416   : > { %10879 = vrcp.f32 %v7968_v35  ;;  %v10870_v1 = vpop.eup %10869 }
0x1417   : > { %v8014_v8 = vpop.xlane.xlu0 %8013  ;;  %v8063_v16 = vmul.f32 %v10870_v1, %v14300_v36 }
0x1418   : > { %10881 = vrcp.f32 %v8014_v8  ;;  %v10872_v23 = vpop.eup %10871 }
0x1419   : > { %v8016_v10 = vpop.xlane.xlu1 %8015  ;;  %v8064_v44 = vmul.f32 %v10872_v23, %v14300_v36 }
0x141a   : > { %v10874_v57 = vpop.eup %10873  ;;  %10883 = vrcp.f32 %v8016_v10 }
0x141b   : > { %v8095_v47 = vmul.f32 %v10874_v57, %v14305_v11  ;;  %v7978_v25 = vpop.xlane.xlu0 %7977 }
0x141c   : > { %v10876_v17 = vpop.eup %10875  ;;  %10885 = vrcp.f32 %v7978_v25 }
0x141d   : > { %v8111_v49 = vadd.f32 %v8095_v47, %v8063_v16  ;;  %v8096_v22 = vmul.f32 %v10876_v17, %v14305_v11  ;;  %v7980_v46 = vpop.xlane.xlu1 %7979 }
0x141e   : > { %10887 = vrcp.f32 %v7980_v46  ;;  %v10878_v26 = vpop.eup %10877 }
0x141f   : > { %v8127_v33 = vmul.f32 %v14332_v14, %v8111_v49  ;;  %v8112_v40 = vadd.f32 %v8096_v22, %v8064_v44  ;;  %v8026_v18 = vpop.xlane.xlu0 %8025  ;;  %v8061_v9 = vmul.f32 %v10878_v26, %v14300_v36 }
0x1420   : > { %10889 = vrcp.f32 %v8026_v18  ;;  %v10880_v0 = vpop.eup %10879 }
0x1421   : > { %8143 = vst [vmem:[%s14480_s24 + $0x10] sm:$0xff] %v8127_v33  ;;  %v8128_v6 = vmul.f32 %v14338_v59, %v8112_v40  ;;  %v8028_v12 = vpop.xlane.xlu1 %8027  ;;  %v8062_v29 = vmul.f32 %v10880_v0, %v14300_v36 }
0x1422   : > { %v10882_v37 = vpop.eup %10881  ;;  %10891 = vrcp.f32 %v8028_v12 }
0x1423   : > { %8144 = vst [vmem:[%s14480_s24 + $0x18] sm:$0xff] %v8128_v6  ;;  %v8093_v19 = vmul.f32 %v10882_v37, %v14305_v11  ;;  %v7974_v53 = vpop.xlane.xlu0 %7973 }
0x1424   : > { %v10884_v14 = vpop.eup %10883  ;;  %10893 = vrcp.f32 %v7974_v53 }
0x1425   : > { %v8109_v45 = vadd.f32 %v8093_v19, %v8061_v9  ;;  %v8094_v58 = vmul.f32 %v10884_v14, %v14305_v11  ;;  %v7976_v3 = vpop.xlane.xlu1 %7975 }
0x1426   : > { %10895 = vrcp.f32 %v7976_v3  ;;  %v10886_v13 = vpop.eup %10885 }
0x1427   : > { %v8125_v59 = vmul.f32 %v14352_v34, %v8109_v45  ;;  %v8110_v27 = vadd.f32 %v8094_v58, %v8062_v29  ;;  %v8022_v52 = vpop.xlane.xlu0 %8021  ;;  %v8067_v20 = vmul.f32 %v10886_v13, %v14300_v36 }
0x1428   : > { %10897 = vrcp.f32 %v8022_v52  ;;  %v10888_v50 = vpop.eup %10887 }
0x1429   : > { %8141 = vst [vmem:[%s14480_s24] sm:$0xff] %v8125_v59  ;;  %v8126_v21 = vmul.f32 %v14358_v30, %v8110_v27  ;;  %v8024_v41 = vpop.xlane.xlu1 %8023  ;;  %v8068_v2 = vmul.f32 %v10888_v50, %v14300_v36 }
0x142a   : > { %v10890_v4 = vpop.eup %10889  ;;  %10899 = vrcp.f32 %v8024_v41 }
0x142b   : > { %8142 = vst [vmem:[%s14480_s24 + $0x8] sm:$0xff] %v8126_v21  ;;  %v8099_v28 = vmul.f32 %v10890_v4, %v14305_v11  ;;  %v7986_v62 = vpop.xlane.xlu0 %7985 }
0x142c   : > { %v10892_v34 = vpop.eup %10891  ;;  %10901 = vrcp.f32 %v7986_v62 }
0x142d   : > { %v8115_v5 = vadd.f32 %v8099_v28, %v8067_v20  ;;  %v8100_v51 = vmul.f32 %v10892_v34, %v14305_v11  ;;  %v7988_v31 = vpop.xlane.xlu1 %7987 }
0x142e   : > { %10903 = vrcp.f32 %v7988_v31  ;;  %v10894_v60 = vpop.eup %10893 }
0x142f   : > { %v8131_v30 = vmul.f32 %v14372_v42, %v8115_v5  ;;  %v8116_v24 = vadd.f32 %v8100_v51, %v8068_v2  ;;  %v8034_v15 = vpop.xlane.xlu0 %8033  ;;  %v8065_v10 = vmul.f32 %v10894_v60, %v14300_v36 }
0x1430   : > { %10905 = vrcp.f32 %v8034_v15  ;;  %v10896_v35 = vpop.eup %10895 }
0x1431   : > { %8147 = vst [vmem:[%s14480_s24 + $0x30] sm:$0xff] %v8131_v30  ;;  %v8132_v8 = vmul.f32 %v14378_v39, %v8116_v24  ;;  %v8036_v1 = vpop.xlane.xlu1 %8035  ;;  %v8066_v47 = vmul.f32 %v10896_v35, %v14300_v36 }
0x1432   : > { %v10898_v23 = vpop.eup %10897  ;;  %10907 = vrcp.f32 %v8036_v1 }
0x1433   : > { %8148 = vst [vmem:[%s14480_s24 + $0x38] sm:$0xff] %v8132_v8  ;;  %v8097_v57 = vmul.f32 %v10898_v23, %v14305_v11  ;;  %v7982_v16 = vpop.xlane.xlu0 %7981 }
0x1434   : > { %v10900_v42 = vpop.eup %10899  ;;  %10909 = vrcp.f32 %v7982_v16 }
0x1435   : > { %v8113_v25 = vadd.f32 %v8097_v57, %v8065_v10  ;;  %v8098_v17 = vmul.f32 %v10900_v42, %v14305_v11  ;;  %v7984_v44 = vpop.xlane.xlu1 %7983 }
0x1436   : > { %10911 = vrcp.f32 %v7984_v44  ;;  %v10902_v46 = vpop.eup %10901 }
0x1437   : > { %v8129_v39 = vmul.f32 %v14392_v55, %v8113_v25  ;;  %v8114_v49 = vadd.f32 %v8098_v17, %v8066_v47  ;;  %v8030_v22 = vpop.xlane.xlu0 %8029  ;;  %v8071_v0 = vmul.f32 %v10902_v46, %v14300_v36 }
0x1438   : > { %10913 = vrcp.f32 %v8030_v22  ;;  %v10904_v33 = vpop.eup %10903 }
0x1439   : > { %8145 = vst [vmem:[%s14480_s24 + $0x20] sm:$0xff] %v8129_v39  ;;  %v8130_v40 = vmul.f32 %v14398_v63, %v8114_v49  ;;  %v8032_v18 = vpop.xlane.xlu1 %8031  ;;  %v8072_v12 = vmul.f32 %v10904_v33, %v14300_v36 }
0x143a   : > { %v10906_v26 = vpop.eup %10905  ;;  %10915 = vrcp.f32 %v8032_v18 }
0x143b   : > { %8146 = vst [vmem:[%s14480_s24 + $0x28] sm:$0xff] %v8130_v40  ;;  %v8103_v6 = vmul.f32 %v10906_v26, %v14305_v11 }
0x143c   : > { %v10908_v55 = vpop.eup %10907 }
0x143d   : > { %v8119_v37 = vadd.f32 %v8103_v6, %v8071_v0  ;;  %v8104_v9 = vmul.f32 %v10908_v55, %v14305_v11 }
0x143e   : > { %v10910_v14 = vpop.eup %10909 }
0x143f   : > { %v8135_v19 = vmul.f32 %v14408_v54, %v8119_v37  ;;  %v8120_v53 = vadd.f32 %v8104_v9, %v8072_v12  ;;  %v8069_v58 = vmul.f32 %v10910_v14, %v14300_v36 }
0x1440   : > { %v10912_v63 = vpop.eup %10911 }
0x1441   : > { %8151 = vst [vmem:[%s14480_s24 + $0x50] sm:$0xff] %v8135_v19  ;;  %v8136_v29 = vmul.f32 %v14412_v56, %v8120_v53  ;;  %v8070_v52 = vmul.f32 %v10912_v63, %v14300_v36 }
0x1442   : > { %v10914_v45 = vpop.eup %10913 }
0x1443   : > { %8152 = vst [vmem:[%s14480_s24 + $0x58] sm:$0xff] %v8136_v29  ;;  %v8101_v3 = vmul.f32 %v10914_v45, %v14305_v11  ;;  %v7994_v59 = vpop.xlane.xlu0 %7993 }
0x1444   : > { %v10916_v27 = vpop.eup %10915 }
0x1445   : > { %v8117_v13 = vadd.f32 %v8101_v3, %v8069_v58  ;;  %v8102_v54 = vmul.f32 %v10916_v27, %v14305_v11  ;;  %v7996_v50 = vpop.xlane.xlu1 %7995 }
0x1447   : > { %v8133_v21 = vmul.f32 %v14430_v48, %v8117_v13  ;;  %v8118_v41 = vadd.f32 %v8102_v54, %v8070_v52  ;;  %v7990_v4 = vpop.xlane.xlu0 %7989 }
0x1448   : > { %10917 = vrcp.f32 %v7990_v4 }
0x1449   : > { %8149 = vst [vmem:[%s14480_s24 + $0x40] sm:$0xff] %v8133_v21  ;;  %v8134_v56 = vmul.f32 %v14438_v61, %v8118_v41  ;;  %v7992_v20 = vpop.xlane.xlu1 %7991 }
0x144a   : > { %10919 = vrcp.f32 %v7992_v20 }
0x144b   : > { %8150 = vst [vmem:[%s14480_s24 + $0x48] sm:$0xff] %v8134_v56  ;;  %v8038_v28 = vpop.xlane.xlu0 %8037 }
0x144c   : > { %10921 = vrcp.f32 %v8038_v28 }
0x144d   : > { %10923 = vrcp.f32 %v7994_v59  ;;  %v8040_v62 = vpop.xlane.xlu1 %8039 }
0x144e   : > { %10925 = vrcp.f32 %v8040_v62 }
0x144f   : > { %10927 = vrcp.f32 %v7996_v50  ;;  %v8042_v34 = vpop.xlane.xlu0 %8041 }
0x1450   : > { %10929 = vrcp.f32 %v8042_v34 }
0x1451   : > { %v8044_v2 = vpop.xlane.xlu1 %8043 }
0x1452   : > { %10931 = vrcp.f32 %v8044_v2  ;;  %v10918_v48 = vpop.eup %10917 }
0x1453   : > { %v8073_v61 = vmul.f32 %v10918_v48, %v14300_v36 }
0x1454   : > { %v10920_v5 = vpop.eup %10919 }
0x1455   : > { %v8074_v60 = vmul.f32 %v10920_v5, %v14300_v36 }
0x1456   : > { %v10922_v51 = vpop.eup %10921 }
0x1457   : > { %v10924_v31 = vpop.eup %10923  ;;  %v8105_v30 = vmul.f32 %v10922_v51, %v14305_v11 }
0x1458   : > { %v10926_v24 = vpop.eup %10925  ;;  %v8075_v23 = vmul.f32 %v10924_v31, %v14300_v36 }
0x1459   : > { %v10928_v15 = vpop.eup %10927  ;;  %v8121_v35 = vadd.f32 %v8105_v30, %v8073_v61  ;;  %v8106_v8 = vmul.f32 %v10926_v24, %v14305_v11 }
0x145a   : > { %v10930_v1 = vpop.eup %10929  ;;  %v8076_v47 = vmul.f32 %v10928_v15, %v14300_v36 }
0x145b   : > { %v8137_v10 = vmul.f32 %v14450_v38, %v8121_v35  ;;  %v8122_v57 = vadd.f32 %v8106_v8, %v8074_v60  ;;  %v8107_v16 = vmul.f32 %v10930_v1, %v14305_v11 }
0x145c   : > { %v10932_v42 = vpop.eup %10931 }
0x145d   : > { %8153 = vst [vmem:[%s14480_s24 + $0x60] sm:$0xff] %v8137_v10  ;;  %v8138_v25 = vmul.f32 %v14458_v43, %v8122_v57  ;;  %v8123_v17 = vadd.f32 %v8107_v16, %v8075_v23  ;;  %v8108_v44 = vmul.f32 %v10932_v42, %v14305_v11 }
0x145f   : > { %8154 = vst [vmem:[%s14480_s24 + $0x68] sm:$0xff] %v8138_v25  ;;  %v8139_v39 = vmul.f32 %v14448_v32, %v8123_v17  ;;  %v8124_v49 = vadd.f32 %v8108_v44, %v8076_v47 }
0x1461   : > { %8155 = vst [vmem:[%s14480_s24 + $0x70] sm:$0xff] %v8139_v39  ;;  %v8140_v22 = vmul.f32 %v14454_v7, %v8124_v49 }
0x1463   : > { %8156 = vst [vmem:[%s14480_s24 + $0x78] sm:$0xff] %v8140_v22 }
0x1464 PF: > { %s26_s21 = sadd.s32 1, %s11016_s21  }
0x1465   : > { %p23_p4 = scmp.ge.s32.totalorder %s26_s21, 6  }
0x1467   :  { %25 = sbr.rel (!%p23_p4) target bundleno = 2 (0x2), region = 117 }

</bundles_post_ra>
